<compile_context>
chip_gen: v7x
topology: tpu7x:2x2x1
jax: 0.10.0
libtpu: 0.0.40
codegen_flags: <defaults>
</compile_context>

<pallas_src>
import numpy as np
import jax
import jax.numpy as jnp
from jax import lax
from jax.experimental import pallas as pl
from jax.experimental.pallas import tpu as pltpu

BN_EPS = 1e-5
LRELU_SLOPE = 0.01  # nn.LeakyReLU default


def _full_spec(shape):
    shape = tuple(shape)
    return pl.BlockSpec(shape, lambda i: (0,) * len(shape))


# ----------------------------------------------------------------------------
# The single fused encoder kernel
# ----------------------------------------------------------------------------
def encoder_kernel(*refs):
    # refs = [x, (S, M, G, Gb, gamma, beta) x 4 layers, W_heads, b_heads, eps,
    #         z_out, mu_out, logvar_out]
    x_ref = refs[0]
    conv_refs = refs[1:25]
    w_heads_ref, b_heads_ref, eps_ref = refs[25], refs[26], refs[27]
    z_ref, mu_ref, lv_ref = refs[28], refs[29], refs[30]

    act = x_ref[...]  # layer-1 input: (N*H, W*Cin), f32
    for layer in range(4):
        s_ref, m_ref, g_ref, gb_ref, gamma_ref, beta_ref = conv_refs[6 * layer:6 * layer + 6]
        n_taps = s_ref.shape[0]
        rows_out = s_ref.shape[1]
        cols_out = m_ref.shape[2]
        cout = gamma_ref.shape[1]

        # conv3x3 / stride 2 / pad 1 as a sum of tap matmuls (all on the MXU).
        acc = jnp.zeros((rows_out, cols_out), jnp.float32)
        for t in range(n_taps):
            sel = jnp.dot(s_ref[t], act, preferred_element_type=jnp.float32)
            acc = acc + jnp.dot(sel, m_ref[t], preferred_element_type=jnp.float32)

        # BatchNorm (training mode: biased batch statistics) fused with LeakyReLU.
        # Per-channel pooling / broadcast go through the MXU via the 0/1 matrices G / Gb.
        inv_cnt = 1.0 / float(rows_out * (cols_out // cout))
        ones_row = jnp.ones((1, rows_out), jnp.float32)
        g_mat = g_ref[...]
        gb_mat = gb_ref[...]
        col_sum = jnp.dot(ones_row, acc, preferred_element_type=jnp.float32)
        mean_c = jnp.dot(col_sum, g_mat, preferred_element_type=jnp.float32) * inv_cnt
        centered = acc - jnp.dot(mean_c, gb_mat, preferred_element_type=jnp.float32)
        sq_sum = jnp.dot(ones_row, centered * centered, preferred_element_type=jnp.float32)
        var_c = jnp.dot(sq_sum, g_mat, preferred_element_type=jnp.float32) * inv_cnt
        scale_c = gamma_ref[...] * lax.rsqrt(var_c + BN_EPS)
        scale_cols = jnp.dot(scale_c, gb_mat, preferred_element_type=jnp.float32)
        shift_cols = jnp.dot(beta_ref[...], gb_mat, preferred_element_type=jnp.float32)
        y = centered * scale_cols + shift_cols
        act = jnp.where(y > 0, y, LRELU_SLOPE * y)

    # act is now (N, F) already in NCHW-flatten order -> fused fc_mu/fc_logvar + reparam.
    heads = jnp.dot(act, w_heads_ref[...], preferred_element_type=jnp.float32) + b_heads_ref[...]
    z_dim = eps_ref.shape[1]
    mu = heads[:, :z_dim]
    lv = heads[:, z_dim:]
    std = jnp.exp(0.5 * lv)
    z_ref[...] = mu + std * eps_ref[...]
    mu_ref[...] = mu
    lv_ref[...] = lv


# ----------------------------------------------------------------------------
# One-time parameter preprocessing (hoisted out of the forward pass)
# ----------------------------------------------------------------------------
def _conv_layer_operands(w_oihw, n_batch, h_in, w_in):
    """Operands for a stride-2/pad-1 3x3 conv with output layout [N*Ho, Wo*Cout]."""
    cout, cin = w_oihw.shape[0], w_oihw.shape[1]
    h_out, w_out = h_in // 2, w_in // 2
    S = np.zeros((3, n_batch * h_out, n_batch * h_in), np.float32)
    M = np.zeros((3, w_in * cin, w_out * cout), np.float32)
    for di in range(3):
        for n in range(n_batch):
            for ho in range(h_out):
                h = 2 * ho + di - 1
                if 0 <= h < h_in:
                    S[di, n * h_out + ho, n * h_in + h] = 1.0
        for wo in range(w_out):
            for dj in range(3):
                wc = 2 * wo + dj - 1
                if 0 <= wc < w_in:
                    M[di, wc * cin:(wc + 1) * cin, wo * cout:(wo + 1) * cout] = \
                        w_oihw[:, :, di, dj].T
    G = np.tile(np.eye(cout, dtype=np.float32), (w_out, 1))  # (Wo*Cout, Cout) channel pooling
    return S, M, G, np.ascontiguousarray(G.T)


def _final_conv_layer_operands(w_oihw, n_batch, h_in, w_in):
    """Last conv: output written directly in NCHW-flatten order -> layout [N, Cout*Ho*Wo]."""
    cout, cin = w_oihw.shape[0], w_oihw.shape[1]
    h_out, w_out = h_in // 2, w_in // 2
    n_feat = cout * h_out * w_out
    S = np.zeros((3 * h_out, n_batch, n_batch * h_in), np.float32)
    M = np.zeros((3 * h_out, w_in * cin, n_feat), np.float32)
    for ho in range(h_out):
        for di in range(3):
            t = ho * 3 + di
            h = 2 * ho + di - 1
            if 0 <= h < h_in:
                for n in range(n_batch):
                    S[t, n, n * h_in + h] = 1.0
            for wo in range(w_out):
                for dj in range(3):
                    wc = 2 * wo + dj - 1
                    if 0 <= wc < w_in:
                        for co in range(cout):
                            f = co * (h_out * w_out) + ho * w_out + wo
                            M[t, wc * cin:(wc + 1) * cin, f] = w_oihw[co, :, di, dj]
    G = np.zeros((n_feat, cout), np.float32)
    for f in range(n_feat):
        G[f, f // (h_out * w_out)] = 1.0
    return S, M, G, np.ascontiguousarray(G.T)


def prepare_params(params, batch, spatial):
    """Precompute every kernel operand once (weight re-layout hoisted out of the forward)."""
    conv_ops = []
    h = w = spatial
    for i in range(4):
        w_conv, _bias, gamma, beta = params[f"conv{i+1}"]
        w_np = np.asarray(w_conv, np.float32)
        build = _final_conv_layer_operands if i == 3 else _conv_layer_operands
        S, M, G, Gb = build(w_np, batch, h, w)
        # NOTE: the conv bias `_bias` is analytically cancelled by the BatchNorm mean
        # subtraction that immediately follows, so it is not shipped to the kernel.
        conv_ops += [jnp.asarray(S), jnp.asarray(M), jnp.asarray(G), jnp.asarray(Gb),
                     jnp.asarray(gamma, jnp.float32).reshape(1, -1),
                     jnp.asarray(beta, jnp.float32).reshape(1, -1)]
        h, w = h // 2, w // 2
    w_mu, b_mu = params["fc_mu"]
    w_lv, b_lv = params["fc_logvar"]
    # fc_mu / fc_logvar fused into a single (F, 2Z) matmul; columns [0:Z]=mu, [Z:2Z]=logvar.
    w_heads = jnp.concatenate([jnp.asarray(w_mu).T, jnp.asarray(w_lv).T], axis=1)
    b_heads = jnp.concatenate([jnp.asarray(b_mu), jnp.asarray(b_lv)]).reshape(1, -1)
    return {"conv": conv_ops, "w_heads": w_heads, "b_heads": b_heads}


# ----------------------------------------------------------------------------
# Forward pass
# ----------------------------------------------------------------------------
def _encoder_pallas(x_nchw, prep, eps):
    n, c, h, w = x_nchw.shape
    # NCHW -> [N*H, W*C] rows=(n,h), cols=(w,ci): the only XLA glue in the forward pass.
    x_rows = jnp.transpose(x_nchw, (0, 2, 3, 1)).reshape(n * h, w * c)
    inputs = [x_rows] + list(prep["conv"]) + [prep["w_heads"], prep["b_heads"], eps]
    z_dim = eps.shape[1]
    out_sds = jax.ShapeDtypeStruct((n, z_dim), jnp.float32)
    return pl.pallas_call(
        encoder_kernel,
        out_shape=(out_sds, out_sds, out_sds),
        grid=(1,),
        in_specs=[_full_spec(a.shape) for a in inputs],
        out_specs=tuple(_full_spec((n, z_dim)) for _ in range(3)),
        compiler_params=pltpu.CompilerParams(
            dimension_semantics=("arbitrary",),
            vmem_limit_bytes=32 * 1024 * 1024,  # ~4 MB of operands; safe on v5e/v6e/v7x
        ),
    )(*inputs)


_encoder_pallas_jit = jax.jit(_encoder_pallas)


def encoder_forward(x_nchw, prep, eps, num_features):
    z, mu, logvar = _encoder_pallas_jit(x_nchw, prep, eps)
    shape_before_flattening = (num_features, x_nchw.shape[2] // 16, x_nchw.shape[3] // 16)
    return z, mu, logvar, shape_before_flattening


# ----------------------------------------------------------------------------
# Parameter construction (deterministic, PyTorch shape conventions)
# ----------------------------------------------------------------------------
def init_params(key, in_channels, num_features, z_dim):
    params = {}
    cins = [in_channels, num_features, num_features, num_features]
    for i in range(4):
        key, k1, k2, k3, k4 = jax.random.split(key, 5)
        cin = cins[i]
        fan_in = cin * 9
        w = jax.random.normal(k1, (num_features, cin, 3, 3), jnp.float32) / jnp.sqrt(fan_in)
        b = 0.1 * jax.random.normal(k2, (num_features,), jnp.float32)
        gamma = 1.0 + 0.1 * jax.random.normal(k3, (num_features,), jnp.float32)
        beta = 0.1 * jax.random.normal(k4, (num_features,), jnp.float32)
        params[f"conv{i+1}"] = (w, b, gamma, beta)
    F = num_features * 2 * 2
    key, k1, k2, k3, k4 = jax.random.split(key, 5)
    params["fc_mu"] = (jax.random.normal(k1, (z_dim, F), jnp.float32) / jnp.sqrt(F),
                       0.1 * jax.random.normal(k2, (z_dim,), jnp.float32))
    params["fc_logvar"] = (jax.random.normal(k3, (z_dim, F), jnp.float32) / jnp.sqrt(F),
                           0.1 * jax.random.normal(k4, (z_dim,), jnp.float32))
    return params


# ----------------------------------------------------------------------------
# Pure-JAX (XLA) reference for validation
# ----------------------------------------------------------------------------
def encoder_reference(x_nchw, params, eps):
    x = x_nchw
    for i in range(4):
        w, b, gamma, beta = params[f"conv{i+1}"]
        y = lax.conv_general_dilated(
            x, w, window_strides=(2, 2), padding=((1, 1), (1, 1)),
            dimension_numbers=("NCHW", "OIHW", "NCHW"),
            precision=lax.Precision.HIGHEST)
        y = y + b.reshape(1, -1, 1, 1)
        mean = jnp.mean(y, axis=(0, 2, 3), keepdims=True)
        var = jnp.mean(jnp.square(y - mean), axis=(0, 2, 3), keepdims=True)
        y = gamma.reshape(1, -1, 1, 1) * (y - mean) * lax.rsqrt(var + BN_EPS) \
            + beta.reshape(1, -1, 1, 1)
        x = jnp.where(y > 0, y, LRELU_SLOPE * y)
    flat = x.reshape(x.shape[0], -1)
    w_mu, b_mu = params["fc_mu"]
    w_lv, b_lv = params["fc_logvar"]
    mu = jnp.dot(flat, w_mu.T, precision=lax.Precision.HIGHEST) + b_mu
    lv = jnp.dot(flat, w_lv.T, precision=lax.Precision.HIGHEST) + b_lv
    z = mu + jnp.exp(0.5 * lv) * eps
    return z, mu, lv


if __name__ == "__main__":
    in_channels, num_features, z_dim = 3, 32, 16
    batch, spatial = 2, 32  # 32 -> 16 -> 8 -> 4 -> 2, so fc input is num_features*2*2

    key = jax.random.PRNGKey(0)
    key, kx, keps, kp = jax.random.split(key, 4)
    x = jax.random.normal(kx, (batch, in_channels, spatial, spatial), jnp.float32)
    params = init_params(kp, in_channels, num_features, z_dim)
    # TODO(synk): torch.randn_like in _reparameterize is nondeterministic in PyTorch; here eps is
    # drawn deterministically with jax.random outside the kernel and consumed inside it.
    eps = jax.random.normal(keps, (batch, z_dim), jnp.float32)

    prep = prepare_params(params, batch, spatial)

    z, mu, logvar, shape_before = encoder_forward(x, prep, eps, num_features)
    jax.block_until_ready((z, mu, logvar))

    assert z.shape == (batch, z_dim)
    assert mu.shape == (batch, z_dim)
    assert logvar.shape == (batch, z_dim)
    assert shape_before == (num_features, 2, 2)
    assert bool(jnp.all(jnp.isfinite(z)))

    # Cross-check the fused kernel against a pure-JAX/XLA reference (loose tolerance because the
    # kernel's MXU matmul rounding differs from the HIGHEST-precision reference path).
    z_r, mu_r, lv_r = encoder_reference(x, params, eps)
    np.testing.assert_allclose(np.asarray(mu), np.asarray(mu_r), rtol=1e-1, atol=1e-1)
    np.testing.assert_allclose(np.asarray(logvar), np.asarray(lv_r), rtol=1e-1, atol=1e-1)
    np.testing.assert_allclose(np.asarray(z), np.asarray(z_r), rtol=1e-1, atol=1e-1)

    print("KERNEL_OK")
</pallas_src>

<mosaic_0001>
module attributes {stable_mosaic.version = 11 : i64} {
  func.func @encoder_kernel(%arg0: i32, %arg1: memref<64x96xf32, #tpu.memory_space<vmem>>, %arg2: memref<3x32x64xf32, #tpu.memory_space<vmem>>, %arg3: memref<3x96x512xf32, #tpu.memory_space<vmem>>, %arg4: memref<512x32xf32, #tpu.memory_space<vmem>>, %arg5: memref<32x512xf32, #tpu.memory_space<vmem>>, %arg6: memref<1x32xf32, #tpu.memory_space<vmem>>, %arg7: memref<1x32xf32, #tpu.memory_space<vmem>>, %arg8: memref<3x16x32xf32, #tpu.memory_space<vmem>>, %arg9: memref<3x512x256xf32, #tpu.memory_space<vmem>>, %arg10: memref<256x32xf32, #tpu.memory_space<vmem>>, %arg11: memref<32x256xf32, #tpu.memory_space<vmem>>, %arg12: memref<1x32xf32, #tpu.memory_space<vmem>>, %arg13: memref<1x32xf32, #tpu.memory_space<vmem>>, %arg14: memref<3x8x16xf32, #tpu.memory_space<vmem>>, %arg15: memref<3x256x128xf32, #tpu.memory_space<vmem>>, %arg16: memref<128x32xf32, #tpu.memory_space<vmem>>, %arg17: memref<32x128xf32, #tpu.memory_space<vmem>>, %arg18: memref<1x32xf32, #tpu.memory_space<vmem>>, %arg19: memref<1x32xf32, #tpu.memory_space<vmem>>, %arg20: memref<6x2x8xf32, #tpu.memory_space<vmem>>, %arg21: memref<6x128x128xf32, #tpu.memory_space<vmem>>, %arg22: memref<128x32xf32, #tpu.memory_space<vmem>>, %arg23: memref<32x128xf32, #tpu.memory_space<vmem>>, %arg24: memref<1x32xf32, #tpu.memory_space<vmem>>, %arg25: memref<1x32xf32, #tpu.memory_space<vmem>>, %arg26: memref<128x32xf32, #tpu.memory_space<vmem>>, %arg27: memref<1x32xf32, #tpu.memory_space<vmem>>, %arg28: memref<2x16xf32, #tpu.memory_space<vmem>>, %arg29: memref<2x16xf32, #tpu.memory_space<vmem>>, %arg30: memref<2x16xf32, #tpu.memory_space<vmem>>, %arg31: memref<2x16xf32, #tpu.memory_space<vmem>>) attributes {dimension_semantics = [#tpu.dimension_semantics<arbitrary>], iteration_bounds = array<i64: 1>, scalar_prefetch = 0 : i64, scratch_operands = 0 : i64, tpu.core_type = #tpu.core_type<tc>, window_params = [{pipeline_mode = #tpu.pipeline_mode<synchronous>, transform_indices = @transform_0, window_bounds = array<i64: 64, 96>}, {pipeline_mode = #tpu.pipeline_mode<synchronous>, transform_indices = @transform_1, window_bounds = array<i64: 3, 32, 64>}, {pipeline_mode = #tpu.pipeline_mode<synchronous>, transform_indices = @transform_2, window_bounds = array<i64: 3, 96, 512>}, {pipeline_mode = #tpu.pipeline_mode<synchronous>, transform_indices = @transform_3, window_bounds = array<i64: 512, 32>}, {pipeline_mode = #tpu.pipeline_mode<synchronous>, transform_indices = @transform_4, window_bounds = array<i64: 32, 512>}, {pipeline_mode = #tpu.pipeline_mode<synchronous>, transform_indices = @transform_5, window_bounds = array<i64: 1, 32>}, {pipeline_mode = #tpu.pipeline_mode<synchronous>, transform_indices = @transform_6, window_bounds = array<i64: 1, 32>}, {pipeline_mode = #tpu.pipeline_mode<synchronous>, transform_indices = @transform_7, window_bounds = array<i64: 3, 16, 32>}, {pipeline_mode = #tpu.pipeline_mode<synchronous>, transform_indices = @transform_8, window_bounds = array<i64: 3, 512, 256>}, {pipeline_mode = #tpu.pipeline_mode<synchronous>, transform_indices = @transform_9, window_bounds = array<i64: 256, 32>}, {pipeline_mode = #tpu.pipeline_mode<synchronous>, transform_indices = @transform_10, window_bounds = array<i64: 32, 256>}, {pipeline_mode = #tpu.pipeline_mode<synchronous>, transform_indices = @transform_11, window_bounds = array<i64: 1, 32>}, {pipeline_mode = #tpu.pipeline_mode<synchronous>, transform_indices = @transform_12, window_bounds = array<i64: 1, 32>}, {pipeline_mode = #tpu.pipeline_mode<synchronous>, transform_indices = @transform_13, window_bounds = array<i64: 3, 8, 16>}, {pipeline_mode = #tpu.pipeline_mode<synchronous>, transform_indices = @transform_14, window_bounds = array<i64: 3, 256, 128>}, {pipeline_mode = #tpu.pipeline_mode<synchronous>, transform_indices = @transform_15, window_bounds = array<i64: 128, 32>}, {pipeline_mode = #tpu.pipeline_mode<synchronous>, transform_indices = @transform_16, window_bounds = array<i64: 32, 128>}, {pipeline_mode = #tpu.pipeline_mode<synchronous>, transform_indices = @transform_17, window_bounds = array<i64: 1, 32>}, {pipeline_mode = #tpu.pipeline_mode<synchronous>, transform_indices = @transform_18, window_bounds = array<i64: 1, 32>}, {pipeline_mode = #tpu.pipeline_mode<synchronous>, transform_indices = @transform_19, window_bounds = array<i64: 6, 2, 8>}, {pipeline_mode = #tpu.pipeline_mode<synchronous>, transform_indices = @transform_20, window_bounds = array<i64: 6, 128, 128>}, {pipeline_mode = #tpu.pipeline_mode<synchronous>, transform_indices = @transform_21, window_bounds = array<i64: 128, 32>}, {pipeline_mode = #tpu.pipeline_mode<synchronous>, transform_indices = @transform_22, window_bounds = array<i64: 32, 128>}, {pipeline_mode = #tpu.pipeline_mode<synchronous>, transform_indices = @transform_23, window_bounds = array<i64: 1, 32>}, {pipeline_mode = #tpu.pipeline_mode<synchronous>, transform_indices = @transform_24, window_bounds = array<i64: 1, 32>}, {pipeline_mode = #tpu.pipeline_mode<synchronous>, transform_indices = @transform_25, window_bounds = array<i64: 128, 32>}, {pipeline_mode = #tpu.pipeline_mode<synchronous>, transform_indices = @transform_26, window_bounds = array<i64: 1, 32>}, {pipeline_mode = #tpu.pipeline_mode<synchronous>, transform_indices = @transform_27, window_bounds = array<i64: 2, 16>}, {pipeline_mode = #tpu.pipeline_mode<synchronous>, transform_indices = @transform_28, window_bounds = array<i64: 2, 16>}, {pipeline_mode = #tpu.pipeline_mode<synchronous>, transform_indices = @transform_29, window_bounds = array<i64: 2, 16>}, {pipeline_mode = #tpu.pipeline_mode<synchronous>, transform_indices = @transform_30, window_bounds = array<i64: 2, 16>}]} {
    %c0 = arith.constant 0 : index
    %c0_0 = arith.constant 0 : index
    %0 = vector.load %arg1[%c0, %c0_0] : memref<64x96xf32, #tpu.memory_space<vmem>>, vector<64x96xf32>
    %cst = arith.constant 0.000000e+00 : f32
    %1 = vector.broadcast %cst : f32 to vector<32x512xf32>
    %c0_1 = arith.constant 0 : index
    %c0_2 = arith.constant 0 : index
    %c0_3 = arith.constant 0 : index
    %2 = vector.load %arg2[%c0_1, %c0_2, %c0_3] : memref<3x32x64xf32, #tpu.memory_space<vmem>>, vector<1x32x64xf32>
    %3 = vector.shape_cast %2 : vector<1x32x64xf32> to vector<32x64xf32>
    %cst_4 = arith.constant dense<0.000000e+00> : vector<32x96xf32>
    %4 = tpu.matmul %3, %0, %cst_4 {dimension_numbers = #tpu.dot_dimension_numbers<[1], [0], [0], [1], [0, 0, 1, 1], [], []>} : vector<32x64xf32>, vector<64x96xf32>, vector<32x96xf32> -> vector<32x96xf32>
    %c0_5 = arith.constant 0 : index
    %c0_6 = arith.constant 0 : index
    %c0_7 = arith.constant 0 : index
    %5 = vector.load %arg3[%c0_5, %c0_6, %c0_7] : memref<3x96x512xf32, #tpu.memory_space<vmem>>, vector<1x96x512xf32>
    %6 = vector.shape_cast %5 : vector<1x96x512xf32> to vector<96x512xf32>
    %cst_8 = arith.constant dense<0.000000e+00> : vector<32x512xf32>
    %7 = tpu.matmul %4, %6, %cst_8 {dimension_numbers = #tpu.dot_dimension_numbers<[1], [0], [0], [1], [0, 0, 1, 1], [], []>} : vector<32x96xf32>, vector<96x512xf32>, vector<32x512xf32> -> vector<32x512xf32>
    %8 = arith.addf %1, %7 : vector<32x512xf32>
    %c1 = arith.constant 1 : index
    %c0_9 = arith.constant 0 : index
    %c0_10 = arith.constant 0 : index
    %9 = vector.load %arg2[%c1, %c0_9, %c0_10] : memref<3x32x64xf32, #tpu.memory_space<vmem>>, vector<1x32x64xf32>
    %10 = vector.shape_cast %9 : vector<1x32x64xf32> to vector<32x64xf32>
    %cst_11 = arith.constant dense<0.000000e+00> : vector<32x96xf32>
    %11 = tpu.matmul %10, %0, %cst_11 {dimension_numbers = #tpu.dot_dimension_numbers<[1], [0], [0], [1], [0, 0, 1, 1], [], []>} : vector<32x64xf32>, vector<64x96xf32>, vector<32x96xf32> -> vector<32x96xf32>
    %c1_12 = arith.constant 1 : index
    %c0_13 = arith.constant 0 : index
    %c0_14 = arith.constant 0 : index
    %12 = vector.load %arg3[%c1_12, %c0_13, %c0_14] : memref<3x96x512xf32, #tpu.memory_space<vmem>>, vector<1x96x512xf32>
    %13 = vector.shape_cast %12 : vector<1x96x512xf32> to vector<96x512xf32>
    %cst_15 = arith.constant dense<0.000000e+00> : vector<32x512xf32>
    %14 = tpu.matmul %11, %13, %cst_15 {dimension_numbers = #tpu.dot_dimension_numbers<[1], [0], [0], [1], [0, 0, 1, 1], [], []>} : vector<32x96xf32>, vector<96x512xf32>, vector<32x512xf32> -> vector<32x512xf32>
    %15 = arith.addf %8, %14 : vector<32x512xf32>
    %c2 = arith.constant 2 : index
    %c0_16 = arith.constant 0 : index
    %c0_17 = arith.constant 0 : index
    %16 = vector.load %arg2[%c2, %c0_16, %c0_17] : memref<3x32x64xf32, #tpu.memory_space<vmem>>, vector<1x32x64xf32>
    %17 = vector.shape_cast %16 : vector<1x32x64xf32> to vector<32x64xf32>
    %cst_18 = arith.constant dense<0.000000e+00> : vector<32x96xf32>
    %18 = tpu.matmul %17, %0, %cst_18 {dimension_numbers = #tpu.dot_dimension_numbers<[1], [0], [0], [1], [0, 0, 1, 1], [], []>} : vector<32x64xf32>, vector<64x96xf32>, vector<32x96xf32> -> vector<32x96xf32>
    %c2_19 = arith.constant 2 : index
    %c0_20 = arith.constant 0 : index
    %c0_21 = arith.constant 0 : index
    %19 = vector.load %arg3[%c2_19, %c0_20, %c0_21] : memref<3x96x512xf32, #tpu.memory_space<vmem>>, vector<1x96x512xf32>
    %20 = vector.shape_cast %19 : vector<1x96x512xf32> to vector<96x512xf32>
    %cst_22 = arith.constant dense<0.000000e+00> : vector<32x512xf32>
    %21 = tpu.matmul %18, %20, %cst_22 {dimension_numbers = #tpu.dot_dimension_numbers<[1], [0], [0], [1], [0, 0, 1, 1], [], []>} : vector<32x96xf32>, vector<96x512xf32>, vector<32x512xf32> -> vector<32x512xf32>
    %22 = arith.addf %15, %21 : vector<32x512xf32>
    %cst_23 = arith.constant 1.000000e+00 : f32
    %23 = vector.broadcast %cst_23 : f32 to vector<1x32xf32>
    %c0_24 = arith.constant 0 : index
    %c0_25 = arith.constant 0 : index
    %24 = vector.load %arg4[%c0_24, %c0_25] : memref<512x32xf32, #tpu.memory_space<vmem>>, vector<512x32xf32>
    %c0_26 = arith.constant 0 : index
    %c0_27 = arith.constant 0 : index
    %25 = vector.load %arg5[%c0_26, %c0_27] : memref<32x512xf32, #tpu.memory_space<vmem>>, vector<32x512xf32>
    %cst_28 = arith.constant dense<0.000000e+00> : vector<1x512xf32>
    %26 = tpu.matmul %23, %22, %cst_28 {dimension_numbers = #tpu.dot_dimension_numbers<[1], [0], [0], [1], [0, 0, 1, 1], [], []>} : vector<1x32xf32>, vector<32x512xf32>, vector<1x512xf32> -> vector<1x512xf32>
    %cst_29 = arith.constant dense<0.000000e+00> : vector<1x32xf32>
    %27 = tpu.matmul %26, %24, %cst_29 {dimension_numbers = #tpu.dot_dimension_numbers<[1], [0], [0], [1], [0, 0, 1, 1], [], []>} : vector<1x512xf32>, vector<512x32xf32>, vector<1x32xf32> -> vector<1x32xf32>
    %cst_30 = arith.constant 0.001953125 : f32
    %28 = vector.broadcast %cst_30 : f32 to vector<1x32xf32>
    %29 = arith.mulf %27, %28 : vector<1x32xf32>
    %cst_31 = arith.constant dense<0.000000e+00> : vector<1x512xf32>
    %30 = tpu.matmul %29, %25, %cst_31 {dimension_numbers = #tpu.dot_dimension_numbers<[1], [0], [0], [1], [0, 0, 1, 1], [], []>} : vector<1x32xf32>, vector<32x512xf32>, vector<1x512xf32> -> vector<1x512xf32>
    %31 = vector.broadcast %30 : vector<1x512xf32> to vector<32x512xf32>
    %32 = arith.subf %22, %31 : vector<32x512xf32>
    %33 = arith.mulf %32, %32 : vector<32x512xf32>
    %cst_32 = arith.constant dense<0.000000e+00> : vector<1x512xf32>
    %34 = tpu.matmul %23, %33, %cst_32 {dimension_numbers = #tpu.dot_dimension_numbers<[1], [0], [0], [1], [0, 0, 1, 1], [], []>} : vector<1x32xf32>, vector<32x512xf32>, vector<1x512xf32> -> vector<1x512xf32>
    %cst_33 = arith.constant dense<0.000000e+00> : vector<1x32xf32>
    %35 = tpu.matmul %34, %24, %cst_33 {dimension_numbers = #tpu.dot_dimension_numbers<[1], [0], [0], [1], [0, 0, 1, 1], [], []>} : vector<1x512xf32>, vector<512x32xf32>, vector<1x32xf32> -> vector<1x32xf32>
    %cst_34 = arith.constant 0.001953125 : f32
    %36 = vector.broadcast %cst_34 : f32 to vector<1x32xf32>
    %37 = arith.mulf %35, %36 : vector<1x32xf32>
    %c0_35 = arith.constant 0 : index
    %c0_36 = arith.constant 0 : index
    %38 = vector.load %arg6[%c0_35, %c0_36] : memref<1x32xf32, #tpu.memory_space<vmem>>, vector<1x32xf32>
    %cst_37 = arith.constant 9.99999974E-6 : f32
    %39 = vector.broadcast %cst_37 : f32 to vector<1x32xf32>
    %40 = arith.addf %37, %39 : vector<1x32xf32>
    %41 = math.rsqrt %40 : vector<1x32xf32>
    %42 = arith.mulf %38, %41 : vector<1x32xf32>
    %cst_38 = arith.constant dense<0.000000e+00> : vector<1x512xf32>
    %43 = tpu.matmul %42, %25, %cst_38 {dimension_numbers = #tpu.dot_dimension_numbers<[1], [0], [0], [1], [0, 0, 1, 1], [], []>} : vector<1x32xf32>, vector<32x512xf32>, vector<1x512xf32> -> vector<1x512xf32>
    %c0_39 = arith.constant 0 : index
    %c0_40 = arith.constant 0 : index
    %44 = vector.load %arg7[%c0_39, %c0_40] : memref<1x32xf32, #tpu.memory_space<vmem>>, vector<1x32xf32>
    %cst_41 = arith.constant dense<0.000000e+00> : vector<1x512xf32>
    %45 = tpu.matmul %44, %25, %cst_41 {dimension_numbers = #tpu.dot_dimension_numbers<[1], [0], [0], [1], [0, 0, 1, 1], [], []>} : vector<1x32xf32>, vector<32x512xf32>, vector<1x512xf32> -> vector<1x512xf32>
    %46 = vector.broadcast %43 : vector<1x512xf32> to vector<32x512xf32>
    %47 = arith.mulf %32, %46 : vector<32x512xf32>
    %48 = vector.broadcast %45 : vector<1x512xf32> to vector<32x512xf32>
    %49 = arith.addf %47, %48 : vector<32x512xf32>
    %cst_42 = arith.constant 0.000000e+00 : f32
    %50 = vector.broadcast %cst_42 : f32 to vector<32x512xf32>
    %51 = arith.cmpf ogt, %49, %50 : vector<32x512xf32>
    %cst_43 = arith.constant 0.00999999977 : f32
    %52 = vector.broadcast %cst_43 : f32 to vector<32x512xf32>
    %53 = arith.mulf %52, %49 : vector<32x512xf32>
    %54 = arith.select %51, %49, %53 : vector<32x512xi1>, vector<32x512xf32>
    %cst_44 = arith.constant 0.000000e+00 : f32
    %55 = vector.broadcast %cst_44 : f32 to vector<16x256xf32>
    %c0_45 = arith.constant 0 : index
    %c0_46 = arith.constant 0 : index
    %c0_47 = arith.constant 0 : index
    %56 = vector.load %arg8[%c0_45, %c0_46, %c0_47] : memref<3x16x32xf32, #tpu.memory_space<vmem>>, vector<1x16x32xf32>
    %57 = vector.shape_cast %56 : vector<1x16x32xf32> to vector<16x32xf32>
    %cst_48 = arith.constant dense<0.000000e+00> : vector<16x512xf32>
    %58 = tpu.matmul %57, %54, %cst_48 {dimension_numbers = #tpu.dot_dimension_numbers<[1], [0], [0], [1], [0, 0, 1, 1], [], []>} : vector<16x32xf32>, vector<32x512xf32>, vector<16x512xf32> -> vector<16x512xf32>
    %c0_49 = arith.constant 0 : index
    %c0_50 = arith.constant 0 : index
    %c0_51 = arith.constant 0 : index
    %59 = vector.load %arg9[%c0_49, %c0_50, %c0_51] : memref<3x512x256xf32, #tpu.memory_space<vmem>>, vector<1x512x256xf32>
    %60 = vector.shape_cast %59 : vector<1x512x256xf32> to vector<512x256xf32>
    %cst_52 = arith.constant dense<0.000000e+00> : vector<16x256xf32>
    %61 = tpu.matmul %58, %60, %cst_52 {dimension_numbers = #tpu.dot_dimension_numbers<[1], [0], [0], [1], [0, 0, 1, 1], [], []>} : vector<16x512xf32>, vector<512x256xf32>, vector<16x256xf32> -> vector<16x256xf32>
    %62 = arith.addf %55, %61 : vector<16x256xf32>
    %c1_53 = arith.constant 1 : index
    %c0_54 = arith.constant 0 : index
    %c0_55 = arith.constant 0 : index
    %63 = vector.load %arg8[%c1_53, %c0_54, %c0_55] : memref<3x16x32xf32, #tpu.memory_space<vmem>>, vector<1x16x32xf32>
    %64 = vector.shape_cast %63 : vector<1x16x32xf32> to vector<16x32xf32>
    %cst_56 = arith.constant dense<0.000000e+00> : vector<16x512xf32>
    %65 = tpu.matmul %64, %54, %cst_56 {dimension_numbers = #tpu.dot_dimension_numbers<[1], [0], [0], [1], [0, 0, 1, 1], [], []>} : vector<16x32xf32>, vector<32x512xf32>, vector<16x512xf32> -> vector<16x512xf32>
    %c1_57 = arith.constant 1 : index
    %c0_58 = arith.constant 0 : index
    %c0_59 = arith.constant 0 : index
    %66 = vector.load %arg9[%c1_57, %c0_58, %c0_59] : memref<3x512x256xf32, #tpu.memory_space<vmem>>, vector<1x512x256xf32>
    %67 = vector.shape_cast %66 : vector<1x512x256xf32> to vector<512x256xf32>
    %cst_60 = arith.constant dense<0.000000e+00> : vector<16x256xf32>
    %68 = tpu.matmul %65, %67, %cst_60 {dimension_numbers = #tpu.dot_dimension_numbers<[1], [0], [0], [1], [0, 0, 1, 1], [], []>} : vector<16x512xf32>, vector<512x256xf32>, vector<16x256xf32> -> vector<16x256xf32>
    %69 = arith.addf %62, %68 : vector<16x256xf32>
    %c2_61 = arith.constant 2 : index
    %c0_62 = arith.constant 0 : index
    %c0_63 = arith.constant 0 : index
    %70 = vector.load %arg8[%c2_61, %c0_62, %c0_63] : memref<3x16x32xf32, #tpu.memory_space<vmem>>, vector<1x16x32xf32>
    %71 = vector.shape_cast %70 : vector<1x16x32xf32> to vector<16x32xf32>
    %cst_64 = arith.constant dense<0.000000e+00> : vector<16x512xf32>
    %72 = tpu.matmul %71, %54, %cst_64 {dimension_numbers = #tpu.dot_dimension_numbers<[1], [0], [0], [1], [0, 0, 1, 1], [], []>} : vector<16x32xf32>, vector<32x512xf32>, vector<16x512xf32> -> vector<16x512xf32>
    %c2_65 = arith.constant 2 : index
    %c0_66 = arith.constant 0 : index
    %c0_67 = arith.constant 0 : index
    %73 = vector.load %arg9[%c2_65, %c0_66, %c0_67] : memref<3x512x256xf32, #tpu.memory_space<vmem>>, vector<1x512x256xf32>
    %74 = vector.shape_cast %73 : vector<1x512x256xf32> to vector<512x256xf32>
    %cst_68 = arith.constant dense<0.000000e+00> : vector<16x256xf32>
    %75 = tpu.matmul %72, %74, %cst_68 {dimension_numbers = #tpu.dot_dimension_numbers<[1], [0], [0], [1], [0, 0, 1, 1], [], []>} : vector<16x512xf32>, vector<512x256xf32>, vector<16x256xf32> -> vector<16x256xf32>
    %76 = arith.addf %69, %75 : vector<16x256xf32>
    %cst_69 = arith.constant 1.000000e+00 : f32
    %77 = vector.broadcast %cst_69 : f32 to vector<1x16xf32>
    %c0_70 = arith.constant 0 : index
    %c0_71 = arith.constant 0 : index
    %78 = vector.load %arg10[%c0_70, %c0_71] : memref<256x32xf32, #tpu.memory_space<vmem>>, vector<256x32xf32>
    %c0_72 = arith.constant 0 : index
    %c0_73 = arith.constant 0 : index
    %79 = vector.load %arg11[%c0_72, %c0_73] : memref<32x256xf32, #tpu.memory_space<vmem>>, vector<32x256xf32>
    %cst_74 = arith.constant dense<0.000000e+00> : vector<1x256xf32>
    %80 = tpu.matmul %77, %76, %cst_74 {dimension_numbers = #tpu.dot_dimension_numbers<[1], [0], [0], [1], [0, 0, 1, 1], [], []>} : vector<1x16xf32>, vector<16x256xf32>, vector<1x256xf32> -> vector<1x256xf32>
    %cst_75 = arith.constant dense<0.000000e+00> : vector<1x32xf32>
    %81 = tpu.matmul %80, %78, %cst_75 {dimension_numbers = #tpu.dot_dimension_numbers<[1], [0], [0], [1], [0, 0, 1, 1], [], []>} : vector<1x256xf32>, vector<256x32xf32>, vector<1x32xf32> -> vector<1x32xf32>
    %cst_76 = arith.constant 7.812500e-03 : f32
    %82 = vector.broadcast %cst_76 : f32 to vector<1x32xf32>
    %83 = arith.mulf %81, %82 : vector<1x32xf32>
    %cst_77 = arith.constant dense<0.000000e+00> : vector<1x256xf32>
    %84 = tpu.matmul %83, %79, %cst_77 {dimension_numbers = #tpu.dot_dimension_numbers<[1], [0], [0], [1], [0, 0, 1, 1], [], []>} : vector<1x32xf32>, vector<32x256xf32>, vector<1x256xf32> -> vector<1x256xf32>
    %85 = vector.broadcast %84 : vector<1x256xf32> to vector<16x256xf32>
    %86 = arith.subf %76, %85 : vector<16x256xf32>
    %87 = arith.mulf %86, %86 : vector<16x256xf32>
    %cst_78 = arith.constant dense<0.000000e+00> : vector<1x256xf32>
    %88 = tpu.matmul %77, %87, %cst_78 {dimension_numbers = #tpu.dot_dimension_numbers<[1], [0], [0], [1], [0, 0, 1, 1], [], []>} : vector<1x16xf32>, vector<16x256xf32>, vector<1x256xf32> -> vector<1x256xf32>
    %cst_79 = arith.constant dense<0.000000e+00> : vector<1x32xf32>
    %89 = tpu.matmul %88, %78, %cst_79 {dimension_numbers = #tpu.dot_dimension_numbers<[1], [0], [0], [1], [0, 0, 1, 1], [], []>} : vector<1x256xf32>, vector<256x32xf32>, vector<1x32xf32> -> vector<1x32xf32>
    %cst_80 = arith.constant 7.812500e-03 : f32
    %90 = vector.broadcast %cst_80 : f32 to vector<1x32xf32>
    %91 = arith.mulf %89, %90 : vector<1x32xf32>
    %c0_81 = arith.constant 0 : index
    %c0_82 = arith.constant 0 : index
    %92 = vector.load %arg12[%c0_81, %c0_82] : memref<1x32xf32, #tpu.memory_space<vmem>>, vector<1x32xf32>
    %cst_83 = arith.constant 9.99999974E-6 : f32
    %93 = vector.broadcast %cst_83 : f32 to vector<1x32xf32>
    %94 = arith.addf %91, %93 : vector<1x32xf32>
    %95 = math.rsqrt %94 : vector<1x32xf32>
    %96 = arith.mulf %92, %95 : vector<1x32xf32>
    %cst_84 = arith.constant dense<0.000000e+00> : vector<1x256xf32>
    %97 = tpu.matmul %96, %79, %cst_84 {dimension_numbers = #tpu.dot_dimension_numbers<[1], [0], [0], [1], [0, 0, 1, 1], [], []>} : vector<1x32xf32>, vector<32x256xf32>, vector<1x256xf32> -> vector<1x256xf32>
    %c0_85 = arith.constant 0 : index
    %c0_86 = arith.constant 0 : index
    %98 = vector.load %arg13[%c0_85, %c0_86] : memref<1x32xf32, #tpu.memory_space<vmem>>, vector<1x32xf32>
    %cst_87 = arith.constant dense<0.000000e+00> : vector<1x256xf32>
    %99 = tpu.matmul %98, %79, %cst_87 {dimension_numbers = #tpu.dot_dimension_numbers<[1], [0], [0], [1], [0, 0, 1, 1], [], []>} : vector<1x32xf32>, vector<32x256xf32>, vector<1x256xf32> -> vector<1x256xf32>
    %100 = vector.broadcast %97 : vector<1x256xf32> to vector<16x256xf32>
    %101 = arith.mulf %86, %100 : vector<16x256xf32>
    %102 = vector.broadcast %99 : vector<1x256xf32> to vector<16x256xf32>
    %103 = arith.addf %101, %102 : vector<16x256xf32>
    %cst_88 = arith.constant 0.000000e+00 : f32
    %104 = vector.broadcast %cst_88 : f32 to vector<16x256xf32>
    %105 = arith.cmpf ogt, %103, %104 : vector<16x256xf32>
    %cst_89 = arith.constant 0.00999999977 : f32
    %106 = vector.broadcast %cst_89 : f32 to vector<16x256xf32>
    %107 = arith.mulf %106, %103 : vector<16x256xf32>
    %108 = arith.select %105, %103, %107 : vector<16x256xi1>, vector<16x256xf32>
    %cst_90 = arith.constant 0.000000e+00 : f32
    %109 = vector.broadcast %cst_90 : f32 to vector<8x128xf32>
    %c0_91 = arith.constant 0 : index
    %c0_92 = arith.constant 0 : index
    %c0_93 = arith.constant 0 : index
    %110 = vector.load %arg14[%c0_91, %c0_92, %c0_93] : memref<3x8x16xf32, #tpu.memory_space<vmem>>, vector<1x8x16xf32>
    %111 = vector.shape_cast %110 : vector<1x8x16xf32> to vector<8x16xf32>
    %cst_94 = arith.constant dense<0.000000e+00> : vector<8x256xf32>
    %112 = tpu.matmul %111, %108, %cst_94 {dimension_numbers = #tpu.dot_dimension_numbers<[1], [0], [0], [1], [0, 0, 1, 1], [], []>} : vector<8x16xf32>, vector<16x256xf32>, vector<8x256xf32> -> vector<8x256xf32>
    %c0_95 = arith.constant 0 : index
    %c0_96 = arith.constant 0 : index
    %c0_97 = arith.constant 0 : index
    %113 = vector.load %arg15[%c0_95, %c0_96, %c0_97] : memref<3x256x128xf32, #tpu.memory_space<vmem>>, vector<1x256x128xf32>
    %114 = vector.shape_cast %113 : vector<1x256x128xf32> to vector<256x128xf32>
    %cst_98 = arith.constant dense<0.000000e+00> : vector<8x128xf32>
    %115 = tpu.matmul %112, %114, %cst_98 {dimension_numbers = #tpu.dot_dimension_numbers<[1], [0], [0], [1], [0, 0, 1, 1], [], []>} : vector<8x256xf32>, vector<256x128xf32>, vector<8x128xf32> -> vector<8x128xf32>
    %116 = arith.addf %109, %115 : vector<8x128xf32>
    %c1_99 = arith.constant 1 : index
    %c0_100 = arith.constant 0 : index
    %c0_101 = arith.constant 0 : index
    %117 = vector.load %arg14[%c1_99, %c0_100, %c0_101] : memref<3x8x16xf32, #tpu.memory_space<vmem>>, vector<1x8x16xf32>
    %118 = vector.shape_cast %117 : vector<1x8x16xf32> to vector<8x16xf32>
    %cst_102 = arith.constant dense<0.000000e+00> : vector<8x256xf32>
    %119 = tpu.matmul %118, %108, %cst_102 {dimension_numbers = #tpu.dot_dimension_numbers<[1], [0], [0], [1], [0, 0, 1, 1], [], []>} : vector<8x16xf32>, vector<16x256xf32>, vector<8x256xf32> -> vector<8x256xf32>
    %c1_103 = arith.constant 1 : index
    %c0_104 = arith.constant 0 : index
    %c0_105 = arith.constant 0 : index
    %120 = vector.load %arg15[%c1_103, %c0_104, %c0_105] : memref<3x256x128xf32, #tpu.memory_space<vmem>>, vector<1x256x128xf32>
    %121 = vector.shape_cast %120 : vector<1x256x128xf32> to vector<256x128xf32>
    %cst_106 = arith.constant dense<0.000000e+00> : vector<8x128xf32>
    %122 = tpu.matmul %119, %121, %cst_106 {dimension_numbers = #tpu.dot_dimension_numbers<[1], [0], [0], [1], [0, 0, 1, 1], [], []>} : vector<8x256xf32>, vector<256x128xf32>, vector<8x128xf32> -> vector<8x128xf32>
    %123 = arith.addf %116, %122 : vector<8x128xf32>
    %c2_107 = arith.constant 2 : index
    %c0_108 = arith.constant 0 : index
    %c0_109 = arith.constant 0 : index
    %124 = vector.load %arg14[%c2_107, %c0_108, %c0_109] : memref<3x8x16xf32, #tpu.memory_space<vmem>>, vector<1x8x16xf32>
    %125 = vector.shape_cast %124 : vector<1x8x16xf32> to vector<8x16xf32>
    %cst_110 = arith.constant dense<0.000000e+00> : vector<8x256xf32>
    %126 = tpu.matmul %125, %108, %cst_110 {dimension_numbers = #tpu.dot_dimension_numbers<[1], [0], [0], [1], [0, 0, 1, 1], [], []>} : vector<8x16xf32>, vector<16x256xf32>, vector<8x256xf32> -> vector<8x256xf32>
    %c2_111 = arith.constant 2 : index
    %c0_112 = arith.constant 0 : index
    %c0_113 = arith.constant 0 : index
    %127 = vector.load %arg15[%c2_111, %c0_112, %c0_113] : memref<3x256x128xf32, #tpu.memory_space<vmem>>, vector<1x256x128xf32>
    %128 = vector.shape_cast %127 : vector<1x256x128xf32> to vector<256x128xf32>
    %cst_114 = arith.constant dense<0.000000e+00> : vector<8x128xf32>
    %129 = tpu.matmul %126, %128, %cst_114 {dimension_numbers = #tpu.dot_dimension_numbers<[1], [0], [0], [1], [0, 0, 1, 1], [], []>} : vector<8x256xf32>, vector<256x128xf32>, vector<8x128xf32> -> vector<8x128xf32>
    %130 = arith.addf %123, %129 : vector<8x128xf32>
    %cst_115 = arith.constant 1.000000e+00 : f32
    %131 = vector.broadcast %cst_115 : f32 to vector<1x8xf32>
    %c0_116 = arith.constant 0 : index
    %c0_117 = arith.constant 0 : index
    %132 = vector.load %arg16[%c0_116, %c0_117] : memref<128x32xf32, #tpu.memory_space<vmem>>, vector<128x32xf32>
    %c0_118 = arith.constant 0 : index
    %c0_119 = arith.constant 0 : index
    %133 = vector.load %arg17[%c0_118, %c0_119] : memref<32x128xf32, #tpu.memory_space<vmem>>, vector<32x128xf32>
    %cst_120 = arith.constant dense<0.000000e+00> : vector<1x128xf32>
    %134 = tpu.matmul %131, %130, %cst_120 {dimension_numbers = #tpu.dot_dimension_numbers<[1], [0], [0], [1], [0, 0, 1, 1], [], []>} : vector<1x8xf32>, vector<8x128xf32>, vector<1x128xf32> -> vector<1x128xf32>
    %cst_121 = arith.constant dense<0.000000e+00> : vector<1x32xf32>
    %135 = tpu.matmul %134, %132, %cst_121 {dimension_numbers = #tpu.dot_dimension_numbers<[1], [0], [0], [1], [0, 0, 1, 1], [], []>} : vector<1x128xf32>, vector<128x32xf32>, vector<1x32xf32> -> vector<1x32xf32>
    %cst_122 = arith.constant 3.125000e-02 : f32
    %136 = vector.broadcast %cst_122 : f32 to vector<1x32xf32>
    %137 = arith.mulf %135, %136 : vector<1x32xf32>
    %cst_123 = arith.constant dense<0.000000e+00> : vector<1x128xf32>
    %138 = tpu.matmul %137, %133, %cst_123 {dimension_numbers = #tpu.dot_dimension_numbers<[1], [0], [0], [1], [0, 0, 1, 1], [], []>} : vector<1x32xf32>, vector<32x128xf32>, vector<1x128xf32> -> vector<1x128xf32>
    %139 = vector.broadcast %138 : vector<1x128xf32> to vector<8x128xf32>
    %140 = arith.subf %130, %139 : vector<8x128xf32>
    %141 = arith.mulf %140, %140 : vector<8x128xf32>
    %cst_124 = arith.constant dense<0.000000e+00> : vector<1x128xf32>
    %142 = tpu.matmul %131, %141, %cst_124 {dimension_numbers = #tpu.dot_dimension_numbers<[1], [0], [0], [1], [0, 0, 1, 1], [], []>} : vector<1x8xf32>, vector<8x128xf32>, vector<1x128xf32> -> vector<1x128xf32>
    %cst_125 = arith.constant dense<0.000000e+00> : vector<1x32xf32>
    %143 = tpu.matmul %142, %132, %cst_125 {dimension_numbers = #tpu.dot_dimension_numbers<[1], [0], [0], [1], [0, 0, 1, 1], [], []>} : vector<1x128xf32>, vector<128x32xf32>, vector<1x32xf32> -> vector<1x32xf32>
    %cst_126 = arith.constant 3.125000e-02 : f32
    %144 = vector.broadcast %cst_126 : f32 to vector<1x32xf32>
    %145 = arith.mulf %143, %144 : vector<1x32xf32>
    %c0_127 = arith.constant 0 : index
    %c0_128 = arith.constant 0 : index
    %146 = vector.load %arg18[%c0_127, %c0_128] : memref<1x32xf32, #tpu.memory_space<vmem>>, vector<1x32xf32>
    %cst_129 = arith.constant 9.99999974E-6 : f32
    %147 = vector.broadcast %cst_129 : f32 to vector<1x32xf32>
    %148 = arith.addf %145, %147 : vector<1x32xf32>
    %149 = math.rsqrt %148 : vector<1x32xf32>
    %150 = arith.mulf %146, %149 : vector<1x32xf32>
    %cst_130 = arith.constant dense<0.000000e+00> : vector<1x128xf32>
    %151 = tpu.matmul %150, %133, %cst_130 {dimension_numbers = #tpu.dot_dimension_numbers<[1], [0], [0], [1], [0, 0, 1, 1], [], []>} : vector<1x32xf32>, vector<32x128xf32>, vector<1x128xf32> -> vector<1x128xf32>
    %c0_131 = arith.constant 0 : index
    %c0_132 = arith.constant 0 : index
    %152 = vector.load %arg19[%c0_131, %c0_132] : memref<1x32xf32, #tpu.memory_space<vmem>>, vector<1x32xf32>
    %cst_133 = arith.constant dense<0.000000e+00> : vector<1x128xf32>
    %153 = tpu.matmul %152, %133, %cst_133 {dimension_numbers = #tpu.dot_dimension_numbers<[1], [0], [0], [1], [0, 0, 1, 1], [], []>} : vector<1x32xf32>, vector<32x128xf32>, vector<1x128xf32> -> vector<1x128xf32>
    %154 = vector.broadcast %151 : vector<1x128xf32> to vector<8x128xf32>
    %155 = arith.mulf %140, %154 : vector<8x128xf32>
    %156 = vector.broadcast %153 : vector<1x128xf32> to vector<8x128xf32>
    %157 = arith.addf %155, %156 : vector<8x128xf32>
    %cst_134 = arith.constant 0.000000e+00 : f32
    %158 = vector.broadcast %cst_134 : f32 to vector<8x128xf32>
    %159 = arith.cmpf ogt, %157, %158 : vector<8x128xf32>
    %cst_135 = arith.constant 0.00999999977 : f32
    %160 = vector.broadcast %cst_135 : f32 to vector<8x128xf32>
    %161 = arith.mulf %160, %157 : vector<8x128xf32>
    %162 = arith.select %159, %157, %161 : vector<8x128xi1>, vector<8x128xf32>
    %cst_136 = arith.constant 0.000000e+00 : f32
    %163 = vector.broadcast %cst_136 : f32 to vector<2x128xf32>
    %c0_137 = arith.constant 0 : index
    %c0_138 = arith.constant 0 : index
    %c0_139 = arith.constant 0 : index
    %164 = vector.load %arg20[%c0_137, %c0_138, %c0_139] : memref<6x2x8xf32, #tpu.memory_space<vmem>>, vector<1x2x8xf32>
    %165 = vector.shape_cast %164 : vector<1x2x8xf32> to vector<2x8xf32>
    %cst_140 = arith.constant dense<0.000000e+00> : vector<2x128xf32>
    %166 = tpu.matmul %165, %162, %cst_140 {dimension_numbers = #tpu.dot_dimension_numbers<[1], [0], [0], [1], [0, 0, 1, 1], [], []>} : vector<2x8xf32>, vector<8x128xf32>, vector<2x128xf32> -> vector<2x128xf32>
    %c0_141 = arith.constant 0 : index
    %c0_142 = arith.constant 0 : index
    %c0_143 = arith.constant 0 : index
    %167 = vector.load %arg21[%c0_141, %c0_142, %c0_143] : memref<6x128x128xf32, #tpu.memory_space<vmem>>, vector<1x128x128xf32>
    %168 = vector.shape_cast %167 : vector<1x128x128xf32> to vector<128x128xf32>
    %cst_144 = arith.constant dense<0.000000e+00> : vector<2x128xf32>
    %169 = tpu.matmul %166, %168, %cst_144 {dimension_numbers = #tpu.dot_dimension_numbers<[1], [0], [0], [1], [0, 0, 1, 1], [], []>} : vector<2x128xf32>, vector<128x128xf32>, vector<2x128xf32> -> vector<2x128xf32>
    %170 = arith.addf %163, %169 : vector<2x128xf32>
    %c1_145 = arith.constant 1 : index
    %c0_146 = arith.constant 0 : index
    %c0_147 = arith.constant 0 : index
    %171 = vector.load %arg20[%c1_145, %c0_146, %c0_147] : memref<6x2x8xf32, #tpu.memory_space<vmem>>, vector<1x2x8xf32>
    %172 = vector.shape_cast %171 : vector<1x2x8xf32> to vector<2x8xf32>
    %cst_148 = arith.constant dense<0.000000e+00> : vector<2x128xf32>
    %173 = tpu.matmul %172, %162, %cst_148 {dimension_numbers = #tpu.dot_dimension_numbers<[1], [0], [0], [1], [0, 0, 1, 1], [], []>} : vector<2x8xf32>, vector<8x128xf32>, vector<2x128xf32> -> vector<2x128xf32>
    %c1_149 = arith.constant 1 : index
    %c0_150 = arith.constant 0 : index
    %c0_151 = arith.constant 0 : index
    %174 = vector.load %arg21[%c1_149, %c0_150, %c0_151] : memref<6x128x128xf32, #tpu.memory_space<vmem>>, vector<1x128x128xf32>
    %175 = vector.shape_cast %174 : vector<1x128x128xf32> to vector<128x128xf32>
    %cst_152 = arith.constant dense<0.000000e+00> : vector<2x128xf32>
    %176 = tpu.matmul %173, %175, %cst_152 {dimension_numbers = #tpu.dot_dimension_numbers<[1], [0], [0], [1], [0, 0, 1, 1], [], []>} : vector<2x128xf32>, vector<128x128xf32>, vector<2x128xf32> -> vector<2x128xf32>
    %177 = arith.addf %170, %176 : vector<2x128xf32>
    %c2_153 = arith.constant 2 : index
    %c0_154 = arith.constant 0 : index
    %c0_155 = arith.constant 0 : index
    %178 = vector.load %arg20[%c2_153, %c0_154, %c0_155] : memref<6x2x8xf32, #tpu.memory_space<vmem>>, vector<1x2x8xf32>
    %179 = vector.shape_cast %178 : vector<1x2x8xf32> to vector<2x8xf32>
    %cst_156 = arith.constant dense<0.000000e+00> : vector<2x128xf32>
    %180 = tpu.matmul %179, %162, %cst_156 {dimension_numbers = #tpu.dot_dimension_numbers<[1], [0], [0], [1], [0, 0, 1, 1], [], []>} : vector<2x8xf32>, vector<8x128xf32>, vector<2x128xf32> -> vector<2x128xf32>
    %c2_157 = arith.constant 2 : index
    %c0_158 = arith.constant 0 : index
    %c0_159 = arith.constant 0 : index
    %181 = vector.load %arg21[%c2_157, %c0_158, %c0_159] : memref<6x128x128xf32, #tpu.memory_space<vmem>>, vector<1x128x128xf32>
    %182 = vector.shape_cast %181 : vector<1x128x128xf32> to vector<128x128xf32>
    %cst_160 = arith.constant dense<0.000000e+00> : vector<2x128xf32>
    %183 = tpu.matmul %180, %182, %cst_160 {dimension_numbers = #tpu.dot_dimension_numbers<[1], [0], [0], [1], [0, 0, 1, 1], [], []>} : vector<2x128xf32>, vector<128x128xf32>, vector<2x128xf32> -> vector<2x128xf32>
    %184 = arith.addf %177, %183 : vector<2x128xf32>
    %c3 = arith.constant 3 : index
    %c0_161 = arith.constant 0 : index
    %c0_162 = arith.constant 0 : index
    %185 = vector.load %arg20[%c3, %c0_161, %c0_162] : memref<6x2x8xf32, #tpu.memory_space<vmem>>, vector<1x2x8xf32>
    %186 = vector.shape_cast %185 : vector<1x2x8xf32> to vector<2x8xf32>
    %cst_163 = arith.constant dense<0.000000e+00> : vector<2x128xf32>
    %187 = tpu.matmul %186, %162, %cst_163 {dimension_numbers = #tpu.dot_dimension_numbers<[1], [0], [0], [1], [0, 0, 1, 1], [], []>} : vector<2x8xf32>, vector<8x128xf32>, vector<2x128xf32> -> vector<2x128xf32>
    %c3_164 = arith.constant 3 : index
    %c0_165 = arith.constant 0 : index
    %c0_166 = arith.constant 0 : index
    %188 = vector.load %arg21[%c3_164, %c0_165, %c0_166] : memref<6x128x128xf32, #tpu.memory_space<vmem>>, vector<1x128x128xf32>
    %189 = vector.shape_cast %188 : vector<1x128x128xf32> to vector<128x128xf32>
    %cst_167 = arith.constant dense<0.000000e+00> : vector<2x128xf32>
    %190 = tpu.matmul %187, %189, %cst_167 {dimension_numbers = #tpu.dot_dimension_numbers<[1], [0], [0], [1], [0, 0, 1, 1], [], []>} : vector<2x128xf32>, vector<128x128xf32>, vector<2x128xf32> -> vector<2x128xf32>
    %191 = arith.addf %184, %190 : vector<2x128xf32>
    %c4 = arith.constant 4 : index
    %c0_168 = arith.constant 0 : index
    %c0_169 = arith.constant 0 : index
    %192 = vector.load %arg20[%c4, %c0_168, %c0_169] : memref<6x2x8xf32, #tpu.memory_space<vmem>>, vector<1x2x8xf32>
    %193 = vector.shape_cast %192 : vector<1x2x8xf32> to vector<2x8xf32>
    %cst_170 = arith.constant dense<0.000000e+00> : vector<2x128xf32>
    %194 = tpu.matmul %193, %162, %cst_170 {dimension_numbers = #tpu.dot_dimension_numbers<[1], [0], [0], [1], [0, 0, 1, 1], [], []>} : vector<2x8xf32>, vector<8x128xf32>, vector<2x128xf32> -> vector<2x128xf32>
    %c4_171 = arith.constant 4 : index
    %c0_172 = arith.constant 0 : index
    %c0_173 = arith.constant 0 : index
    %195 = vector.load %arg21[%c4_171, %c0_172, %c0_173] : memref<6x128x128xf32, #tpu.memory_space<vmem>>, vector<1x128x128xf32>
    %196 = vector.shape_cast %195 : vector<1x128x128xf32> to vector<128x128xf32>
    %cst_174 = arith.constant dense<0.000000e+00> : vector<2x128xf32>
    %197 = tpu.matmul %194, %196, %cst_174 {dimension_numbers = #tpu.dot_dimension_numbers<[1], [0], [0], [1], [0, 0, 1, 1], [], []>} : vector<2x128xf32>, vector<128x128xf32>, vector<2x128xf32> -> vector<2x128xf32>
    %198 = arith.addf %191, %197 : vector<2x128xf32>
    %c5 = arith.constant 5 : index
    %c0_175 = arith.constant 0 : index
    %c0_176 = arith.constant 0 : index
    %199 = vector.load %arg20[%c5, %c0_175, %c0_176] : memref<6x2x8xf32, #tpu.memory_space<vmem>>, vector<1x2x8xf32>
    %200 = vector.shape_cast %199 : vector<1x2x8xf32> to vector<2x8xf32>
    %cst_177 = arith.constant dense<0.000000e+00> : vector<2x128xf32>
    %201 = tpu.matmul %200, %162, %cst_177 {dimension_numbers = #tpu.dot_dimension_numbers<[1], [0], [0], [1], [0, 0, 1, 1], [], []>} : vector<2x8xf32>, vector<8x128xf32>, vector<2x128xf32> -> vector<2x128xf32>
    %c5_178 = arith.constant 5 : index
    %c0_179 = arith.constant 0 : index
    %c0_180 = arith.constant 0 : index
    %202 = vector.load %arg21[%c5_178, %c0_179, %c0_180] : memref<6x128x128xf32, #tpu.memory_space<vmem>>, vector<1x128x128xf32>
    %203 = vector.shape_cast %202 : vector<1x128x128xf32> to vector<128x128xf32>
    %cst_181 = arith.constant dense<0.000000e+00> : vector<2x128xf32>
    %204 = tpu.matmul %201, %203, %cst_181 {dimension_numbers = #tpu.dot_dimension_numbers<[1], [0], [0], [1], [0, 0, 1, 1], [], []>} : vector<2x128xf32>, vector<128x128xf32>, vector<2x128xf32> -> vector<2x128xf32>
    %205 = arith.addf %198, %204 : vector<2x128xf32>
    %cst_182 = arith.constant 1.000000e+00 : f32
    %206 = vector.broadcast %cst_182 : f32 to vector<1x2xf32>
    %c0_183 = arith.constant 0 : index
    %c0_184 = arith.constant 0 : index
    %207 = vector.load %arg22[%c0_183, %c0_184] : memref<128x32xf32, #tpu.memory_space<vmem>>, vector<128x32xf32>
    %c0_185 = arith.constant 0 : index
    %c0_186 = arith.constant 0 : index
    %208 = vector.load %arg23[%c0_185, %c0_186] : memref<32x128xf32, #tpu.memory_space<vmem>>, vector<32x128xf32>
    %cst_187 = arith.constant dense<0.000000e+00> : vector<1x128xf32>
    %209 = tpu.matmul %206, %205, %cst_187 {dimension_numbers = #tpu.dot_dimension_numbers<[1], [0], [0], [1], [0, 0, 1, 1], [], []>} : vector<1x2xf32>, vector<2x128xf32>, vector<1x128xf32> -> vector<1x128xf32>
    %cst_188 = arith.constant dense<0.000000e+00> : vector<1x32xf32>
    %210 = tpu.matmul %209, %207, %cst_188 {dimension_numbers = #tpu.dot_dimension_numbers<[1], [0], [0], [1], [0, 0, 1, 1], [], []>} : vector<1x128xf32>, vector<128x32xf32>, vector<1x32xf32> -> vector<1x32xf32>
    %cst_189 = arith.constant 1.250000e-01 : f32
    %211 = vector.broadcast %cst_189 : f32 to vector<1x32xf32>
    %212 = arith.mulf %210, %211 : vector<1x32xf32>
    %cst_190 = arith.constant dense<0.000000e+00> : vector<1x128xf32>
    %213 = tpu.matmul %212, %208, %cst_190 {dimension_numbers = #tpu.dot_dimension_numbers<[1], [0], [0], [1], [0, 0, 1, 1], [], []>} : vector<1x32xf32>, vector<32x128xf32>, vector<1x128xf32> -> vector<1x128xf32>
    %214 = vector.broadcast %213 : vector<1x128xf32> to vector<2x128xf32>
    %215 = arith.subf %205, %214 : vector<2x128xf32>
    %216 = arith.mulf %215, %215 : vector<2x128xf32>
    %cst_191 = arith.constant dense<0.000000e+00> : vector<1x128xf32>
    %217 = tpu.matmul %206, %216, %cst_191 {dimension_numbers = #tpu.dot_dimension_numbers<[1], [0], [0], [1], [0, 0, 1, 1], [], []>} : vector<1x2xf32>, vector<2x128xf32>, vector<1x128xf32> -> vector<1x128xf32>
    %cst_192 = arith.constant dense<0.000000e+00> : vector<1x32xf32>
    %218 = tpu.matmul %217, %207, %cst_192 {dimension_numbers = #tpu.dot_dimension_numbers<[1], [0], [0], [1], [0, 0, 1, 1], [], []>} : vector<1x128xf32>, vector<128x32xf32>, vector<1x32xf32> -> vector<1x32xf32>
    %cst_193 = arith.constant 1.250000e-01 : f32
    %219 = vector.broadcast %cst_193 : f32 to vector<1x32xf32>
    %220 = arith.mulf %218, %219 : vector<1x32xf32>
    %c0_194 = arith.constant 0 : index
    %c0_195 = arith.constant 0 : index
    %221 = vector.load %arg24[%c0_194, %c0_195] : memref<1x32xf32, #tpu.memory_space<vmem>>, vector<1x32xf32>
    %cst_196 = arith.constant 9.99999974E-6 : f32
    %222 = vector.broadcast %cst_196 : f32 to vector<1x32xf32>
    %223 = arith.addf %220, %222 : vector<1x32xf32>
    %224 = math.rsqrt %223 : vector<1x32xf32>
    %225 = arith.mulf %221, %224 : vector<1x32xf32>
    %cst_197 = arith.constant dense<0.000000e+00> : vector<1x128xf32>
    %226 = tpu.matmul %225, %208, %cst_197 {dimension_numbers = #tpu.dot_dimension_numbers<[1], [0], [0], [1], [0, 0, 1, 1], [], []>} : vector<1x32xf32>, vector<32x128xf32>, vector<1x128xf32> -> vector<1x128xf32>
    %c0_198 = arith.constant 0 : index
    %c0_199 = arith.constant 0 : index
    %227 = vector.load %arg25[%c0_198, %c0_199] : memref<1x32xf32, #tpu.memory_space<vmem>>, vector<1x32xf32>
    %cst_200 = arith.constant dense<0.000000e+00> : vector<1x128xf32>
    %228 = tpu.matmul %227, %208, %cst_200 {dimension_numbers = #tpu.dot_dimension_numbers<[1], [0], [0], [1], [0, 0, 1, 1], [], []>} : vector<1x32xf32>, vector<32x128xf32>, vector<1x128xf32> -> vector<1x128xf32>
    %229 = vector.broadcast %226 : vector<1x128xf32> to vector<2x128xf32>
    %230 = arith.mulf %215, %229 : vector<2x128xf32>
    %231 = vector.broadcast %228 : vector<1x128xf32> to vector<2x128xf32>
    %232 = arith.addf %230, %231 : vector<2x128xf32>
    %cst_201 = arith.constant 0.000000e+00 : f32
    %233 = vector.broadcast %cst_201 : f32 to vector<2x128xf32>
    %234 = arith.cmpf ogt, %232, %233 : vector<2x128xf32>
    %cst_202 = arith.constant 0.00999999977 : f32
    %235 = vector.broadcast %cst_202 : f32 to vector<2x128xf32>
    %236 = arith.mulf %235, %232 : vector<2x128xf32>
    %237 = arith.select %234, %232, %236 : vector<2x128xi1>, vector<2x128xf32>
    %c0_203 = arith.constant 0 : index
    %c0_204 = arith.constant 0 : index
    %238 = vector.load %arg26[%c0_203, %c0_204] : memref<128x32xf32, #tpu.memory_space<vmem>>, vector<128x32xf32>
    %cst_205 = arith.constant dense<0.000000e+00> : vector<2x32xf32>
    %239 = tpu.matmul %237, %238, %cst_205 {dimension_numbers = #tpu.dot_dimension_numbers<[1], [0], [0], [1], [0, 0, 1, 1], [], []>} : vector<2x128xf32>, vector<128x32xf32>, vector<2x32xf32> -> vector<2x32xf32>
    %c0_206 = arith.constant 0 : index
    %c0_207 = arith.constant 0 : index
    %240 = vector.load %arg27[%c0_206, %c0_207] : memref<1x32xf32, #tpu.memory_space<vmem>>, vector<1x32xf32>
    %241 = vector.broadcast %240 : vector<1x32xf32> to vector<2x32xf32>
    %242 = arith.addf %239, %241 : vector<2x32xf32>
    %243 = vector.extract_strided_slice %242 {offsets = [0, 0], sizes = [2, 16], strides = [1, 1]} : vector<2x32xf32> to vector<2x16xf32>
    %244 = vector.extract_strided_slice %242 {offsets = [0, 16], sizes = [2, 16], strides = [1, 1]} : vector<2x32xf32> to vector<2x16xf32>
    %cst_208 = arith.constant 5.000000e-01 : f32
    %245 = vector.broadcast %cst_208 : f32 to vector<2x16xf32>
    %246 = arith.mulf %245, %244 : vector<2x16xf32>
    %247 = math.exp %246 : vector<2x16xf32>
    %c0_209 = arith.constant 0 : index
    %c0_210 = arith.constant 0 : index
    %248 = vector.load %arg28[%c0_209, %c0_210] : memref<2x16xf32, #tpu.memory_space<vmem>>, vector<2x16xf32>
    %249 = arith.mulf %247, %248 : vector<2x16xf32>
    %250 = arith.addf %243, %249 : vector<2x16xf32>
    %c0_211 = arith.constant 0 : index
    %c0_212 = arith.constant 0 : index
    %251 = vector.load %arg29[%c0_211, %c0_212] : memref<2x16xf32, #tpu.memory_space<vmem>>, vector<2x16xf32>
    tpu.vector_store %arg29[%c0_211, %c0_212], %250 {strides = array<i32>} : memref<2x16xf32, #tpu.memory_space<vmem>>, vector<2x16xf32>,
    %c0_213 = arith.constant 0 : index
    %c0_214 = arith.constant 0 : index
    %252 = vector.load %arg30[%c0_213, %c0_214] : memref<2x16xf32, #tpu.memory_space<vmem>>, vector<2x16xf32>
    tpu.vector_store %arg30[%c0_213, %c0_214], %243 {strides = array<i32>} : memref<2x16xf32, #tpu.memory_space<vmem>>, vector<2x16xf32>,
    %c0_215 = arith.constant 0 : index
    %c0_216 = arith.constant 0 : index
    %253 = vector.load %arg31[%c0_215, %c0_216] : memref<2x16xf32, #tpu.memory_space<vmem>>, vector<2x16xf32>
    tpu.vector_store %arg31[%c0_215, %c0_216], %244 {strides = array<i32>} : memref<2x16xf32, #tpu.memory_space<vmem>>, vector<2x16xf32>,
    return
  }
  func.func @transform_0(%arg0: i32) -> (i32, i32) {
    %c0_i32 = arith.constant 0 : i32
    %c0_i32_0 = arith.constant 0 : i32
    %c0_i32_1 = arith.constant 0 : i32
    return %c0_i32, %c0_i32_0 : i32, i32
  }
  func.func @transform_1(%arg0: i32) -> (i32, i32, i32) {
    %c0_i32 = arith.constant 0 : i32
    %c0_i32_0 = arith.constant 0 : i32
    %c0_i32_1 = arith.constant 0 : i32
    %c0_i32_2 = arith.constant 0 : i32
    return %c0_i32, %c0_i32_0, %c0_i32_1 : i32, i32, i32
  }
  func.func @transform_2(%arg0: i32) -> (i32, i32, i32) {
    %c0_i32 = arith.constant 0 : i32
    %c0_i32_0 = arith.constant 0 : i32
    %c0_i32_1 = arith.constant 0 : i32
    %c0_i32_2 = arith.constant 0 : i32
    return %c0_i32, %c0_i32_0, %c0_i32_1 : i32, i32, i32
  }
  func.func @transform_3(%arg0: i32) -> (i32, i32) {
    %c0_i32 = arith.constant 0 : i32
    %c0_i32_0 = arith.constant 0 : i32
    %c0_i32_1 = arith.constant 0 : i32
    return %c0_i32, %c0_i32_0 : i32, i32
  }
  func.func @transform_4(%arg0: i32) -> (i32, i32) {
    %c0_i32 = arith.constant 0 : i32
    %c0_i32_0 = arith.constant 0 : i32
    %c0_i32_1 = arith.constant 0 : i32
    return %c0_i32, %c0_i32_0 : i32, i32
  }
  func.func @transform_5(%arg0: i32) -> (i32, i32) {
    %c0_i32 = arith.constant 0 : i32
    %c0_i32_0 = arith.constant 0 : i32
    %c0_i32_1 = arith.constant 0 : i32
    return %c0_i32, %c0_i32_0 : i32, i32
  }
  func.func @transform_6(%arg0: i32) -> (i32, i32) {
    %c0_i32 = arith.constant 0 : i32
    %c0_i32_0 = arith.constant 0 : i32
    %c0_i32_1 = arith.constant 0 : i32
    return %c0_i32, %c0_i32_0 : i32, i32
  }
  func.func @transform_7(%arg0: i32) -> (i32, i32, i32) {
    %c0_i32 = arith.constant 0 : i32
    %c0_i32_0 = arith.constant 0 : i32
    %c0_i32_1 = arith.constant 0 : i32
    %c0_i32_2 = arith.constant 0 : i32
    return %c0_i32, %c0_i32_0, %c0_i32_1 : i32, i32, i32
  }
  func.func @transform_8(%arg0: i32) -> (i32, i32, i32) {
    %c0_i32 = arith.constant 0 : i32
    %c0_i32_0 = arith.constant 0 : i32
    %c0_i32_1 = arith.constant 0 : i32
    %c0_i32_2 = arith.constant 0 : i32
    return %c0_i32, %c0_i32_0, %c0_i32_1 : i32, i32, i32
  }
  func.func @transform_9(%arg0: i32) -> (i32, i32) {
    %c0_i32 = arith.constant 0 : i32
    %c0_i32_0 = arith.constant 0 : i32
    %c0_i32_1 = arith.constant 0 : i32
    return %c0_i32, %c0_i32_0 : i32, i32
  }
  func.func @transform_10(%arg0: i32) -> (i32, i32) {
    %c0_i32 = arith.constant 0 : i32
    %c0_i32_0 = arith.constant 0 : i32
    %c0_i32_1 = arith.constant 0 : i32
    return %c0_i32, %c0_i32_0 : i32, i32
  }
  func.func @transform_11(%arg0: i32) -> (i32, i32) {
    %c0_i32 = arith.constant 0 : i32
    %c0_i32_0 = arith.constant 0 : i32
    %c0_i32_1 = arith.constant 0 : i32
    return %c0_i32, %c0_i32_0 : i32, i32
  }
  func.func @transform_12(%arg0: i32) -> (i32, i32) {
    %c0_i32 = arith.constant 0 : i32
    %c0_i32_0 = arith.constant 0 : i32
    %c0_i32_1 = arith.constant 0 : i32
    return %c0_i32, %c0_i32_0 : i32, i32
  }
  func.func @transform_13(%arg0: i32) -> (i32, i32, i32) {
    %c0_i32 = arith.constant 0 : i32
    %c0_i32_0 = arith.constant 0 : i32
    %c0_i32_1 = arith.constant 0 : i32
    %c0_i32_2 = arith.constant 0 : i32
    return %c0_i32, %c0_i32_0, %c0_i32_1 : i32, i32, i32
  }
  func.func @transform_14(%arg0: i32) -> (i32, i32, i32) {
    %c0_i32 = arith.constant 0 : i32
    %c0_i32_0 = arith.constant 0 : i32
    %c0_i32_1 = arith.constant 0 : i32
    %c0_i32_2 = arith.constant 0 : i32
    return %c0_i32, %c0_i32_0, %c0_i32_1 : i32, i32, i32
  }
  func.func @transform_15(%arg0: i32) -> (i32, i32) {
    %c0_i32 = arith.constant 0 : i32
    %c0_i32_0 = arith.constant 0 : i32
    %c0_i32_1 = arith.constant 0 : i32
    return %c0_i32, %c0_i32_0 : i32, i32
  }
  func.func @transform_16(%arg0: i32) -> (i32, i32) {
    %c0_i32 = arith.constant 0 : i32
    %c0_i32_0 = arith.constant 0 : i32
    %c0_i32_1 = arith.constant 0 : i32
    return %c0_i32, %c0_i32_0 : i32, i32
  }
  func.func @transform_17(%arg0: i32) -> (i32, i32) {
    %c0_i32 = arith.constant 0 : i32
    %c0_i32_0 = arith.constant 0 : i32
    %c0_i32_1 = arith.constant 0 : i32
    return %c0_i32, %c0_i32_0 : i32, i32
  }
  func.func @transform_18(%arg0: i32) -> (i32, i32) {
    %c0_i32 = arith.constant 0 : i32
    %c0_i32_0 = arith.constant 0 : i32
    %c0_i32_1 = arith.constant 0 : i32
    return %c0_i32, %c0_i32_0 : i32, i32
  }
  func.func @transform_19(%arg0: i32) -> (i32, i32, i32) {
    %c0_i32 = arith.constant 0 : i32
    %c0_i32_0 = arith.constant 0 : i32
    %c0_i32_1 = arith.constant 0 : i32
    %c0_i32_2 = arith.constant 0 : i32
    return %c0_i32, %c0_i32_0, %c0_i32_1 : i32, i32, i32
  }
  func.func @transform_20(%arg0: i32) -> (i32, i32, i32) {
    %c0_i32 = arith.constant 0 : i32
    %c0_i32_0 = arith.constant 0 : i32
    %c0_i32_1 = arith.constant 0 : i32
    %c0_i32_2 = arith.constant 0 : i32
    return %c0_i32, %c0_i32_0, %c0_i32_1 : i32, i32, i32
  }
  func.func @transform_21(%arg0: i32) -> (i32, i32) {
    %c0_i32 = arith.constant 0 : i32
    %c0_i32_0 = arith.constant 0 : i32
    %c0_i32_1 = arith.constant 0 : i32
    return %c0_i32, %c0_i32_0 : i32, i32
  }
  func.func @transform_22(%arg0: i32) -> (i32, i32) {
    %c0_i32 = arith.constant 0 : i32
    %c0_i32_0 = arith.constant 0 : i32
    %c0_i32_1 = arith.constant 0 : i32
    return %c0_i32, %c0_i32_0 : i32, i32
  }
  func.func @transform_23(%arg0: i32) -> (i32, i32) {
    %c0_i32 = arith.constant 0 : i32
    %c0_i32_0 = arith.constant 0 : i32
    %c0_i32_1 = arith.constant 0 : i32
    return %c0_i32, %c0_i32_0 : i32, i32
  }
  func.func @transform_24(%arg0: i32) -> (i32, i32) {
    %c0_i32 = arith.constant 0 : i32
    %c0_i32_0 = arith.constant 0 : i32
    %c0_i32_1 = arith.constant 0 : i32
    return %c0_i32, %c0_i32_0 : i32, i32
  }
  func.func @transform_25(%arg0: i32) -> (i32, i32) {
    %c0_i32 = arith.constant 0 : i32
    %c0_i32_0 = arith.constant 0 : i32
    %c0_i32_1 = arith.constant 0 : i32
    return %c0_i32, %c0_i32_0 : i32, i32
  }
  func.func @transform_26(%arg0: i32) -> (i32, i32) {
    %c0_i32 = arith.constant 0 : i32
    %c0_i32_0 = arith.constant 0 : i32
    %c0_i32_1 = arith.constant 0 : i32
    return %c0_i32, %c0_i32_0 : i32, i32
  }
  func.func @transform_27(%arg0: i32) -> (i32, i32) {
    %c0_i32 = arith.constant 0 : i32
    %c0_i32_0 = arith.constant 0 : i32
    %c0_i32_1 = arith.constant 0 : i32
    return %c0_i32, %c0_i32_0 : i32, i32
  }
  func.func @transform_28(%arg0: i32) -> (i32, i32) {
    %c0_i32 = arith.constant 0 : i32
    %c0_i32_0 = arith.constant 0 : i32
    %c0_i32_1 = arith.constant 0 : i32
    return %c0_i32, %c0_i32_0 : i32, i32
  }
  func.func @transform_29(%arg0: i32) -> (i32, i32) {
    %c0_i32 = arith.constant 0 : i32
    %c0_i32_0 = arith.constant 0 : i32
    %c0_i32_1 = arith.constant 0 : i32
    return %c0_i32, %c0_i32_0 : i32, i32
  }
  func.func @transform_30(%arg0: i32) -> (i32, i32) {
    %c0_i32 = arith.constant 0 : i32
    %c0_i32_0 = arith.constant 0 : i32
    %c0_i32_1 = arith.constant 0 : i32
    return %c0_i32, %c0_i32_0 : i32, i32
  }
}

</mosaic_0001>

<bundles_post_ra>
// kernel: _encoder_pallas.1
= control target key start
LH: loop header
LB: loop body
LE: loop exit
PB: predicated region body
PF: predicated region fallthrough
CT: control target
= control target key end

     0   :  { %s10806_s6 = smov 1   ;;  %s10807_s10 = smov 2   ;;  %s12473_s0 = inlined_call_operand.smem [shape: u32[31], index: -1, kind: input, shape index: {}] }
   0x1   :  { %s10880_s5 = sld [smem:[%s12473_s0]]   ;;  %s10808_s14 = smov 3  }
   0x2   :  { %s10885_s9 = sld [smem:[%s12473_s0 + %s10806_s6]]   ;;  %s10809_s18 = smov 4  }
   0x3   :  { %s10890_s13 = sld [smem:[%s12473_s0 + %s10807_s10]]   ;;  %s10810_s22 = smov 5  }
   0x4   :  { %s10895_s17 = sld [smem:[%s12473_s0 + %s10808_s14]]   ;;  %s10811_s26 = smov 6  }
   0x5   :  { %s10900_s21 = sld [smem:[%s12473_s0 + %s10809_s18]]   ;;  %s10812_s30 = smov 7  }
   0x6   :  { %s10905_s25 = sld [smem:[%s12473_s0 + %s10810_s22]]   ;;  %s10813_s4 = smov 8  }
   0x7   :  { %12505 = sst [smem:[#allocation52_spill]] %s10880_s5  ;;  %s10814_s10 = smov 9  }
   0x8   :  { %s10910_s29 = sld [smem:[%s12473_s0 + %s10811_s26]]   ;;  %s10815_s15 = smov 10  }
   0x9   :  { %12506 = sst [smem:[#allocation53_spill]] %s10890_s13  ;;  %s10816_s20 = smov 11  }
   0xa   :  { %12507 = sst [smem:[#allocation54_spill]] %s10895_s17  ;;  %s10817_s26 = smov 12  }
   0xb   :  { %s10915_s3 = sld [smem:[%s12473_s0 + %s10812_s30]]   ;;  %s10818_s1 = smov 13  }
   0xc   :  { %s10920_s8 = sld [smem:[%s12473_s0 + %s10813_s4]]   ;;  %s10819_s7 = smov 14  }
   0xd   :  { %s10925_s14 = sld [smem:[%s12473_s0 + %s10814_s10]]   ;;  %s10821_s22 = smov 16  }
   0xe   :  { %s10930_s19 = sld [smem:[%s12473_s0 + %s10815_s15]]   ;;  %s10820_s15 = smov 15  }
   0xf   :  { %s10935_s24 = sld [smem:[%s12473_s0 + %s10816_s20]]   ;;  %s10822_s28 = smov 17  }
  0x10   :  { %s10940_s30 = sld [smem:[%s12473_s0 + %s10817_s26]]  }
  0x11   :  { %s10945_s6 = sld [smem:[%s12473_s0 + %s10818_s1]]  }
  0x12   :  { %s10950_s12 = sld [smem:[%s12473_s0 + %s10819_s7]]   ;;  %s10823_s7 = smov 18  }
  0x13   :  { %12508 = sst [smem:[#allocation55_spill]] %s10925_s14 }
  0x14   :  { %s10955_s20 = sld [smem:[%s12473_s0 + %s10820_s15]]   ;;  %s10824_s15 = smov 19  }
  0x15   :  { %s10960_s27 = sld [smem:[%s12473_s0 + %s10821_s22]]   ;;  %s10825_s22 = smov 20  }
  0x16   :  { %12509 = sst [smem:[#allocation56_spill]] %s10940_s30 }
  0x17   :  { %s10965_s4 = sld [smem:[%s12473_s0 + %s10822_s28]]   ;;  %s10826_s28 = smov 21  }
  0x18   :  { %12510 = sst [smem:[#allocation57_spill]] %s10950_s12 }
  0x19   :  { %s10970_s14 = sld [smem:[%s12473_s0 + %s10823_s7]]   ;;  %s10827_s7 = smov 22  }
  0x1a   :  { %12511 = sst [smem:[#allocation58_spill]] %s10955_s20 }
  0x1b   :  { %s10975_s20 = sld [smem:[%s12473_s0 + %s10824_s15]]   ;;  %s10828_s15 = smov 23  }
  0x1c   :  { %s10980_s17 = sld [smem:[%s12473_s0 + %s10825_s22]]   ;;  %s10829_s22 = smov 24  }
  0x1d   :  { %12512 = sst [smem:[#allocation59_spill]] %s10965_s4 }
  0x1e   :  { %s10985_s13 = sld [smem:[%s12473_s0 + %s10826_s28]]   ;;  %s10830_s28 = smov 25  }
  0x1f   :  { %s10990_s5 = sld [smem:[%s12473_s0 + %s10827_s7]]   ;;  %s10831_s7 = smov 26  }
  0x20   :  { %s11000_s4 = sld [smem:[%s12473_s0 + %s10829_s22]]   ;;  %s10833_s22 = smov 28  }
  0x21   :  { %12513 = sst [smem:[#allocation60_spill]] %s10975_s20 }
  0x22   :  { %s10995_s20 = sld [smem:[%s12473_s0 + %s10828_s15]]   ;;  %s10832_s15 = smov 27  }
  0x23   :  { %s11015_s12 = sld [smem:[%s12473_s0 + %s10832_s15]]  }
  0x24   :  { %12514 = sst [smem:[#allocation61_spill]] %s10985_s13 }
  0x25   :  { %12515 = sst [smem:[#allocation62_spill]] %s10990_s5 }
  0x26   :  { %12516 = sst [smem:[#allocation63_spill]] %s11000_s4 }
  0x27   :  { %s11005_s13 = sld [smem:[%s12473_s0 + %s10830_s28]]   ;;  %s10834_s28 = smov 29  }
  0x28   :  { %s11010_s5 = sld [smem:[%s12473_s0 + %s10831_s7]]   ;;  %s10835_s7 = smov 30  }
  0x29   :  { %s11020_s4 = sld [smem:[%s12473_s0 + %s10833_s22]]  }
  0x2a   :  { %s11030_s30 = sld [smem:[%s12473_s0 + %s10835_s7]]  }
  0x2d   :  { %12517 = sst [smem:[#allocation64_spill]] %s11005_s13 }
  0x2e   :  { %s11025_s13 = sld [smem:[%s12473_s0 + %s10834_s28]]  }
  0x2f   :  { %67 = vsyncpa [#allocation3], 0 }
  0x30   :  { %68 = vsyncpa [#allocation6], 0 }
  0x31   :  { %69 = vsyncpa [#allocation9], 0 }
  0x32   :  { %70 = vsyncpa [#allocation12], 0 }
  0x33   :  { %71 = vsyncpa [#allocation15], 0 }
  0x34   :  { %72 = vsyncpa [#allocation18], 0 }
  0x35   :  { %73 = vsyncpa [#allocation21], 0 }
  0x36   :  { %74 = vsyncpa [#allocation24], 0 }
  0x37   :  { %75 = vsyncpa [#allocation27], 0 }
  0x38   :  { %76 = vsyncpa [#allocation30], 0 }
  0x39   :  { %77 = vsyncpa [#allocation33], 0 }
  0x3a   :  { %78 = vsyncpa [#allocation4], 0 }
  0x3b   :  { %79 = vsyncpa [#allocation37], 0  ;;  %s10836_s15 = smov [#allocation5]   ;;  %s10252_s0 = scalar_lea.hbm %s10900_s21, 2048 }
  0x3c   :  { %s103_s16 = sshll.u32 %s10836_s15, 4  ;;  %p10253_p0 = scmp.ne.s32.totalorder %s10900_s21, %s10252_s0  ;;  %s104_s16 = int_to_ptr.vmem [resolvable:$true] %s103_s16 }
  0x3d   :  { %p10256_p1 = scmp.lt.u32.totalorder %s10252_s0, %s10900_s21 }
  0x3f   :  { %p10258_p2 = pnand %p10256_p1, %p10253_p0 }
  0x41   :  { %10261 = shalt.err (!%p10258_p2)
}
  0x42   :  { %s10262_s18 = scalar_lea.vmem %s104_s16, 2048  ;;  %p10267_p4 = scmp.lt.s32.totalorder %s104_s16, %s104_s16 }
  0x43   :  { %p10263_p3 = scmp.ne.s32.totalorder %s104_s16, %s10262_s18  ;;  %p10268_p5 = scmp.lt.s32.totalorder %s10262_s18, %s10262_s18 }
  0x45   :  { %p10269_p6 = por %p10268_p5, %p10267_p4 }
  0x47   :  { %p10270_p7 = pnand %p10269_p6, %p10263_p3 }
  0x49   :  { %10273 = shalt.err (!%p10270_p7)
}
  0x4a   :  { %s10837_s22 = smov 512   ;;  %s10838_s23 = smov 32  }
  0x4b   :  { %109 = dma.hbm_to_vmem [thread:$0]  %s10900_s21, 2048, %s104_s16, [#allocation6], %s10837_s22, %s10837_s22, %s10838_s23  }
  0x4c   :  { %s10839_s26 = smov [#allocation8]   ;;  %s10840_s1 = smov [#allocation11]  }
  0x4d   :  { %s126_s28 = sshll.u32 %s10839_s26, 4  ;;  %s147_s2 = sshll.u32 %s10840_s1, 4  ;;  %s127_s28 = int_to_ptr.vmem [resolvable:$true] %s126_s28  ;;  %s148_s2 = int_to_ptr.vmem [resolvable:$true] %s147_s2 }
  0x4e   :  { %s10274_s7 = scalar_lea.hbm %s10910_s29, 16 }
  0x4f   :  { %p10275_p8 = scmp.ne.s32.totalorder %s10910_s29, %s10274_s7  ;;  %p10278_p9 = scmp.lt.u32.totalorder %s10274_s7, %s10910_s29 }
  0x51   :  { %p10280_p10 = pnand %p10278_p9, %p10275_p8 }
  0x53   :  { %10283 = shalt.err (!%p10280_p10)
}
  0x54   :  { %s10284_s10 = scalar_lea.vmem %s127_s28, 16  ;;  %s10288_s11 = scalar_lea.vmem %s127_s28, 32 }
  0x55   :  { %p10285_p11 = scmp.ne.s32.totalorder %s127_s28, %s10284_s10  ;;  %p10289_p12 = scmp.lt.s32.totalorder %s127_s28, %s127_s28 }
  0x56   :  { %p10290_p13 = scmp.lt.s32.totalorder %s10288_s11, %s10284_s10 }
  0x58   :  { %p10291_p0 = por %p10290_p13, %p10289_p12 }
  0x5a   :  { %p10292_p1 = pnand %p10291_p0, %p10285_p11 }
  0x5c   :  { %10295 = shalt.err (!%p10292_p1)
}
  0x5d   :  { %129 = dma.hbm_to_vmem [thread:$0]  %s10910_s29, 16, %s127_s28, [#allocation9]  }
  0x5e   :  { %s10296_s21 = scalar_lea.hbm %s10920_s8, 49152 }
  0x5f   :  { %p10297_p2 = scmp.ne.s32.totalorder %s10920_s8, %s10296_s21  ;;  %p10300_p3 = scmp.lt.u32.totalorder %s10296_s21, %s10920_s8 }
  0x61   :  { %p10302_p4 = pnand %p10300_p3, %p10297_p2 }
  0x63   :  { %10305 = shalt.err (!%p10302_p4)
}
  0x64   :  { %s10306_s15 = scalar_lea.vmem %s148_s2, 49152  ;;  %p10311_p6 = scmp.lt.s32.totalorder %s148_s2, %s148_s2 }
  0x65   :  { %p10307_p5 = scmp.ne.s32.totalorder %s148_s2, %s10306_s15  ;;  %p10312_p7 = scmp.lt.s32.totalorder %s10306_s15, %s10306_s15 }
  0x67   :  { %p10313_p8 = por %p10312_p7, %p10311_p6 }
  0x69   :  { %p10314_p9 = pnand %p10313_p8, %p10307_p5 }
  0x6b   :  { %10317 = shalt.err (!%p10314_p9)
}
  0x6c   :  { %s10841_s16 = smov 256   ;;  %s10842_s0 = smov 16  }
  0x6d   :  { %153 = dma.hbm_to_vmem [thread:$0]  %s10920_s8, 49152, %s148_s2, [#allocation12], %s10841_s16, %s10841_s16, %s10842_s0  }
  0x6e   :  { %s10843_s29 = smov [#allocation14]   ;;  %s10318_s22 = scalar_lea.hbm %s10935_s24, 16 }
  0x6f   :  { %s174_s18 = sshll.u32 %s10843_s29, 4  ;;  %p10319_p10 = scmp.ne.s32.totalorder %s10935_s24, %s10318_s22  ;;  %s175_s18 = int_to_ptr.vmem [resolvable:$true] %s174_s18 }
  0x70   :  { %p10322_p11 = scmp.lt.u32.totalorder %s10318_s22, %s10935_s24 }
  0x72   :  { %p10324_p12 = pnand %p10322_p11, %p10319_p10 }
  0x74   :  { %10327 = shalt.err (!%p10324_p12)
}
  0x75   :  { %s10328_s26 = scalar_lea.vmem %s175_s18, 16  ;;  %s10332_s28 = scalar_lea.vmem %s175_s18, 32 }
  0x76   :  { %p10329_p13 = scmp.ne.s32.totalorder %s175_s18, %s10328_s26  ;;  %p10333_p0 = scmp.lt.s32.totalorder %s175_s18, %s175_s18 }
  0x77   :  { %p10334_p1 = scmp.lt.s32.totalorder %s10332_s28, %s10328_s26 }
  0x79   :  { %p10335_p2 = por %p10334_p1, %p10333_p0 }
  0x7b   :  { %p10336_p3 = pnand %p10335_p2, %p10329_p13 }
  0x7d   :  { %10339 = shalt.err (!%p10336_p3)
}
  0x7e   :  { %177 = dma.hbm_to_vmem [thread:$0]  %s10935_s24, 16, %s175_s18, [#allocation15]  }
  0x7f   :  { %s10844_s8 = smov [#allocation17]   ;;  %s10845_s2 = smov [#allocation20]  }
  0x80   :  { %s193_s1 = sshll.u32 %s10844_s8, 4  ;;  %s219_s7 = sshll.u32 %s10845_s2, 4  ;;  %s194_s1 = int_to_ptr.vmem [resolvable:$true] %s193_s1  ;;  %s11052_s7 = int_to_ptr.vmem [resolvable:$true] %s219_s7 }
  0x81   :  { %s10340_s10 = scalar_lea.hbm %s10945_s6, 384 }
  0x82   :  { %p10341_p4 = scmp.ne.s32.totalorder %s10945_s6, %s10340_s10  ;;  %p10344_p5 = scmp.lt.u32.totalorder %s10340_s10, %s10945_s6 }
  0x84   :  { %p10346_p6 = pnand %p10344_p5, %p10341_p4 }
  0x86   :  { %10349 = shalt.err (!%p10346_p6)
}
  0x87   :  { %s10350_s11 = scalar_lea.vmem %s194_s1, 384  ;;  %p10355_p8 = scmp.lt.s32.totalorder %s194_s1, %s194_s1 }
  0x88   :  { %p10351_p7 = scmp.ne.s32.totalorder %s194_s1, %s10350_s11  ;;  %p10356_p9 = scmp.lt.s32.totalorder %s10350_s11, %s10350_s11 }
  0x8a   :  { %p10357_p10 = por %p10356_p9, %p10355_p8 }
  0x8c   :  { %p10358_p11 = pnand %p10357_p10, %p10351_p7 }
  0x8e   :  { %10361 = shalt.err (!%p10358_p11)
}
  0x8f   :  { %s10846_s24 = smov 128   ;;  %s10847_s21 = smov 8  }
  0x90   :  { %199 = dma.hbm_to_vmem [thread:$0]  %s10945_s6, 384, %s194_s1, [#allocation18], %s10846_s24, %s10846_s24, %s10847_s21  }
  0x91   :  { %s10362_s15 = scalar_lea.hbm %s10960_s27, 512 }
  0x92   :  { %p10363_p12 = scmp.ne.s32.totalorder %s10960_s27, %s10362_s15  ;;  %p10366_p13 = scmp.lt.u32.totalorder %s10362_s15, %s10960_s27 }
  0x94   :  { %p10368_p0 = pnand %p10366_p13, %p10363_p12 }
  0x96   :  { %10371 = shalt.err (!%p10368_p0)
}
  0x97   :  { %s10372_s29 = scalar_lea.vmem %s11052_s7, 512  ;;  %p10377_p2 = scmp.lt.s32.totalorder %s11052_s7, %s11052_s7 }
  0x98   :  { %p10373_p1 = scmp.ne.s32.totalorder %s11052_s7, %s10372_s29  ;;  %p10378_p3 = scmp.lt.s32.totalorder %s10372_s29, %s10372_s29 }
  0x9a   :  { %p10379_p4 = por %p10378_p3, %p10377_p2 }
  0x9c   :  { %p10380_p5 = pnand %p10379_p4, %p10373_p1 }
  0x9e   :  { %10383 = shalt.err (!%p10380_p5)
}
  0x9f   :  { %225 = dma.hbm_to_vmem [thread:$0]  %s10960_s27, 512, %s11052_s7, [#allocation21], %s10846_s24, %s10846_s24, %s10847_s21  }
  0xa0   :  { %s10848_s6 = smov [#allocation23]   ;;  %s10849_s22 = smov [#allocation26]  }
  0xa1   :  { %s242_s18 = sshll.u32 %s10848_s6, 4  ;;  %s263_s26 = sshll.u32 %s10849_s22, 4  ;;  %s243_s18 = int_to_ptr.vmem [resolvable:$true] %s242_s18  ;;  %s11073_s26 = int_to_ptr.vmem [resolvable:$true] %s263_s26 }
  0xa2   :  { %s10384_s28 = scalar_lea.hbm %s10970_s14, 16 }
  0xa3   :  { %p10385_p6 = scmp.ne.s32.totalorder %s10970_s14, %s10384_s28  ;;  %p10388_p7 = scmp.lt.u32.totalorder %s10384_s28, %s10970_s14 }
  0xa5   :  { %p10390_p8 = pnand %p10388_p7, %p10385_p6 }
  0xa7   :  { %10393 = shalt.err (!%p10390_p8)
}
  0xa8   :  { %s10394_s8 = scalar_lea.vmem %s243_s18, 16  ;;  %s10398_s1 = scalar_lea.vmem %s243_s18, 32 }
  0xa9   :  { %p10395_p9 = scmp.ne.s32.totalorder %s243_s18, %s10394_s8  ;;  %p10399_p10 = scmp.lt.s32.totalorder %s243_s18, %s243_s18 }
  0xaa   :  { %p10400_p11 = scmp.lt.s32.totalorder %s10398_s1, %s10394_s8 }
  0xac   :  { %p10401_p12 = por %p10400_p11, %p10399_p10 }
  0xae   :  { %p10402_p13 = pnand %p10401_p12, %p10395_p9 }
  0xb0   :  { %10405 = shalt.err (!%p10402_p13)
}
  0xb1   :  { %245 = dma.hbm_to_vmem [thread:$0]  %s10970_s14, 16, %s243_s18, [#allocation24]  }
  0xb2   :  { %s10406_s27 = scalar_lea.hbm %s10980_s17, 12288 }
  0xb3   :  { %p10407_p0 = scmp.ne.s32.totalorder %s10980_s17, %s10406_s27  ;;  %p10410_p1 = scmp.lt.u32.totalorder %s10406_s27, %s10980_s17 }
  0xb5   :  { %p10412_p2 = pnand %p10410_p1, %p10407_p0 }
  0xb7   :  { %10415 = shalt.err (!%p10412_p2)
}
  0xb8   :  { %s10416_s2 = scalar_lea.vmem %s11073_s26, 12288  ;;  %p10421_p4 = scmp.lt.s32.totalorder %s11073_s26, %s11073_s26 }
  0xb9   :  { %p10417_p3 = scmp.ne.s32.totalorder %s11073_s26, %s10416_s2  ;;  %p10422_p5 = scmp.lt.s32.totalorder %s10416_s2, %s10416_s2 }
  0xbb   :  { %p10423_p6 = por %p10422_p5, %p10421_p4 }
  0xbd   :  { %p10424_p7 = pnand %p10423_p6, %p10417_p3 }
  0xbf   :  { %10427 = shalt.err (!%p10424_p7)
}
  0xc0   :  { %269 = dma.hbm_to_vmem [thread:$0]  %s10980_s17, 12288, %s11073_s26, [#allocation27], %s10846_s24, %s10846_s24, %s10847_s21  }
  0xc1   :  { %s10850_s14 = smov [#allocation29]   ;;  %s10851_s10 = smov [#allocation32]  }
  0xc2   :  { %s290_s7 = sshll.u32 %s10850_s14, 4  ;;  %s312_s11 = sshll.u32 %s10851_s10, 4  ;;  %s291_s7 = int_to_ptr.vmem [resolvable:$true] %s290_s7  ;;  %s313_s11 = int_to_ptr.vmem [resolvable:$true] %s312_s11 }
  0xc3   :  { %s10428_s15 = scalar_lea.hbm %s10995_s20, 16 }
  0xc4   :  { %p10429_p8 = scmp.ne.s32.totalorder %s10995_s20, %s10428_s15  ;;  %p10432_p9 = scmp.lt.u32.totalorder %s10428_s15, %s10995_s20 }
  0xc6   :  { %p10434_p10 = pnand %p10432_p9, %p10429_p8 }
  0xc8   :  { %10437 = shalt.err (!%p10434_p10)
}
  0xc9   :  { %s10438_s29 = scalar_lea.vmem %s291_s7, 16  ;;  %s10442_s6 = scalar_lea.vmem %s291_s7, 32 }
  0xca   :  { %p10439_p11 = scmp.ne.s32.totalorder %s291_s7, %s10438_s29  ;;  %p10443_p12 = scmp.lt.s32.totalorder %s291_s7, %s291_s7 }
  0xcb   :  { %p10444_p13 = scmp.lt.s32.totalorder %s10442_s6, %s10438_s29 }
  0xcd   :  { %p10445_p0 = por %p10444_p13, %p10443_p12 }
  0xcf   :  { %p10446_p1 = pnand %p10445_p0, %p10439_p11 }
  0xd1   :  { %10449 = shalt.err (!%p10446_p1)
}
  0xd2   :  { %293 = dma.hbm_to_vmem [thread:$0]  %s10995_s20, 16, %s291_s7, [#allocation30]  }
  0xd3   :  { %s10450_s17 = scalar_lea.hbm %s11010_s5, 16 }
  0xd4   :  { %p10451_p2 = scmp.ne.s32.totalorder %s11010_s5, %s10450_s17  ;;  %p10454_p3 = scmp.lt.u32.totalorder %s10450_s17, %s11010_s5 }
  0xd6   :  { %p10456_p4 = pnand %p10454_p3, %p10451_p2 }
  0xd8   :  { %10459 = shalt.err (!%p10456_p4)
}
  0xd9   :  { %s10460_s18 = scalar_lea.vmem %s313_s11, 16  ;;  %s10464_s22 = scalar_lea.vmem %s313_s11, 32 }
  0xda   :  { %p10461_p5 = scmp.ne.s32.totalorder %s313_s11, %s10460_s18  ;;  %p10465_p6 = scmp.lt.s32.totalorder %s313_s11, %s313_s11 }
  0xdb   :  { %p10466_p7 = scmp.lt.s32.totalorder %s10464_s22, %s10460_s18 }
  0xdd   :  { %p10467_p8 = por %p10466_p7, %p10465_p6 }
  0xdf   :  { %p10468_p9 = pnand %p10467_p8, %p10461_p5 }
  0xe1   :  { %10471 = shalt.err (!%p10468_p9)
}
  0xe2   :  { %315 = dma.hbm_to_vmem [thread:$0]  %s11010_s5, 16, %s313_s11, [#allocation33]  }
  0xe3   :  { %s10852_s26 = smov [#allocation2]   ;;  %s10853_s28 = smov [#allocation7]  }
  0xe4   :  { %s87_s20 = sshll.u32 %s10852_s26, 4  ;;  %s116_s8 = sshll.u32 %s10853_s28, 4  ;;  %s88_s20 = int_to_ptr.vmem [resolvable:$true] %s87_s20  ;;  %s117_s8 = int_to_ptr.vmem [resolvable:$true] %s116_s8 }
  0xe5   :  { %s10472_s1 = scalar_lea.hbm %s10885_s9, 1536 }
  0xe6   :  { %p10473_p10 = scmp.ne.s32.totalorder %s10885_s9, %s10472_s1  ;;  %p10476_p11 = scmp.lt.u32.totalorder %s10472_s1, %s10885_s9 }
  0xe8   :  { %p10478_p12 = pnand %p10476_p11, %p10473_p10 }
  0xea   :  { %10481 = shalt.err (!%p10478_p12)
}
  0xeb   :  { %s10482_s27 = scalar_lea.vmem %s88_s20, 1536  ;;  %p10487_p0 = scmp.lt.s32.totalorder %s88_s20, %s88_s20 }
  0xec   :  { %p10483_p13 = scmp.ne.s32.totalorder %s88_s20, %s10482_s27  ;;  %p10488_p1 = scmp.lt.s32.totalorder %s10482_s27, %s10482_s27 }
  0xee   :  { %p10489_p2 = por %p10488_p1, %p10487_p0 }
  0xf0   :  { %p10490_p3 = pnand %p10489_p2, %p10483_p13 }
  0xf2   :  { %10493 = shalt.err (!%p10490_p3)
}
  0xf3   :  { %93 = dma.hbm_to_vmem [thread:$0]  %s10885_s9, 1536, %s88_s20, [#allocation3], %s10846_s24, %s10846_s24, %s10847_s21  }
  0xf4   :  { %s10494_s5 = scalar_lea.hbm %s10905_s25, 16 }
  0xf5   :  { %p10495_p4 = scmp.ne.s32.totalorder %s10905_s25, %s10494_s5  ;;  %p10498_p5 = scmp.lt.u32.totalorder %s10494_s5, %s10905_s25 }
  0xf7   :  { %p10500_p6 = pnand %p10498_p5, %p10495_p4 }
  0xf9   :  { %10503 = shalt.err (!%p10500_p6)
}
  0xfa   :  { %s10504_s2 = scalar_lea.vmem %s117_s8, 16  ;;  %s10508_s14 = scalar_lea.vmem %s117_s8, 32 }
  0xfb   :  { %p10505_p7 = scmp.ne.s32.totalorder %s117_s8, %s10504_s2  ;;  %p10509_p8 = scmp.lt.s32.totalorder %s117_s8, %s117_s8 }
  0xfc   :  { %p10510_p9 = scmp.lt.s32.totalorder %s10508_s14, %s10504_s2 }
  0xfe   :  { %p10511_p10 = por %p10510_p9, %p10509_p8 }
 0x100   :  { %p10512_p11 = pnand %p10511_p10, %p10505_p7 }
 0x102   :  { %10515 = shalt.err (!%p10512_p11)
}
 0x103   :  { %119 = dma.hbm_to_vmem [thread:$0]  %s10905_s25, 16, %s117_s8, [#allocation6]  }
 0x104   :  { %s10854_s7 = smov [#allocation10]   ;;  %s10855_s10 = smov [#allocation13]  }
 0x105   :  { %s135_s9 = sshll.u32 %s10854_s7, 4  ;;  %s161_s11 = sshll.u32 %s10855_s10, 4  ;;  %s136_s9 = int_to_ptr.vmem [resolvable:$true] %s135_s9  ;;  %s11110_s11 = int_to_ptr.vmem [resolvable:$true] %s161_s11 }
 0x106   :  { %s10516_s15 = scalar_lea.hbm %s10915_s3, 768 }
 0x107   :  { %p10517_p12 = scmp.ne.s32.totalorder %s10915_s3, %s10516_s15  ;;  %p10520_p13 = scmp.lt.u32.totalorder %s10516_s15, %s10915_s3 }
 0x109   :  { %p10522_p0 = pnand %p10520_p13, %p10517_p12 }
 0x10b   :  { %10525 = shalt.err (!%p10522_p0)
}
 0x10c   :  { %s10526_s29 = scalar_lea.vmem %s136_s9, 768  ;;  %p10531_p2 = scmp.lt.s32.totalorder %s136_s9, %s136_s9 }
 0x10d   :  { %p10527_p1 = scmp.ne.s32.totalorder %s136_s9, %s10526_s29  ;;  %p10532_p3 = scmp.lt.s32.totalorder %s10526_s29, %s10526_s29 }
 0x10f   :  { %p10533_p4 = por %p10532_p3, %p10531_p2 }
 0x111   :  { %p10534_p5 = pnand %p10533_p4, %p10527_p1 }
 0x113   :  { %10537 = shalt.err (!%p10534_p5)
}
 0x114   :  { %141 = dma.hbm_to_vmem [thread:$0]  %s10915_s3, 768, %s136_s9, [#allocation9], %s10846_s24, %s10846_s24, %s10847_s21  }
 0x115   :  { %s10538_s25 = scalar_lea.hbm %s10930_s19, 1024 }
 0x116   :  { %p10539_p6 = scmp.ne.s32.totalorder %s10930_s19, %s10538_s25  ;;  %p10542_p7 = scmp.lt.u32.totalorder %s10538_s25, %s10930_s19 }
 0x118   :  { %p10544_p8 = pnand %p10542_p7, %p10539_p6 }
 0x11a   :  { %10547 = shalt.err (!%p10544_p8)
}
 0x11b   :  { %s10548_s6 = scalar_lea.vmem %s11110_s11, 1024  ;;  %p10553_p10 = scmp.lt.s32.totalorder %s11110_s11, %s11110_s11 }
 0x11c   :  { %p10549_p9 = scmp.ne.s32.totalorder %s11110_s11, %s10548_s6  ;;  %p10554_p11 = scmp.lt.s32.totalorder %s10548_s6, %s10548_s6 }
 0x11e   :  { %p10555_p12 = por %p10554_p11, %p10553_p10 }
 0x120   :  { %p10556_p13 = pnand %p10555_p12, %p10549_p9 }
 0x122   :  { %10559 = shalt.err (!%p10556_p13)
}
 0x123   :  { %s12518_s3 = sld [smem:[#allocation56_spill]]  ;;  %s10856_s17 = smov [#allocation16]  }
 0x124   :  { %167 = dma.hbm_to_vmem [thread:$0]  %s10930_s19, 1024, %s11110_s11, [#allocation12], %s10841_s16, %s10841_s16, %s10842_s0  }
 0x125   :  { %s184_s18 = sshll.u32 %s10856_s17, 4  ;;  %s10857_s22 = smov [#allocation19]   ;;  %s185_s18 = int_to_ptr.vmem [resolvable:$true] %s184_s18 }
 0x126   :  { %s205_s26 = sshll.u32 %s10857_s22, 4  ;;  %s11131_s26 = int_to_ptr.vmem [resolvable:$true] %s205_s26 }
 0x129   :  { %s10560_s20 = scalar_lea.hbm %s12518_s3, 16 }
 0x12a   :  { %p10561_p0 = scmp.ne.s32.totalorder %s12518_s3, %s10560_s20  ;;  %p10564_p1 = scmp.lt.u32.totalorder %s10560_s20, %s12518_s3 }
 0x12c   :  { %p10566_p2 = pnand %p10564_p1, %p10561_p0 }
 0x12e   :  { %10569 = shalt.err (!%p10566_p2)
}
 0x12f   :  { %s10570_s28 = scalar_lea.vmem %s185_s18, 16  ;;  %s10574_s8 = scalar_lea.vmem %s185_s18, 32 }
 0x130   :  { %p10571_p3 = scmp.ne.s32.totalorder %s185_s18, %s10570_s28  ;;  %p10575_p4 = scmp.lt.s32.totalorder %s185_s18, %s185_s18 }
 0x131   :  { %p10576_p5 = scmp.lt.s32.totalorder %s10574_s8, %s10570_s28 }
 0x133   :  { %p10577_p6 = por %p10576_p5, %p10575_p4 }
 0x135   :  { %p10578_p7 = pnand %p10577_p6, %p10571_p3 }
 0x137   :  { %10581 = shalt.err (!%p10578_p7)
}
 0x138   :  { %s12519_s19 = sld [smem:[#allocation57_spill]] }
 0x139   :  { %187 = dma.hbm_to_vmem [thread:$0]  %s12518_s3, 16, %s185_s18, [#allocation15]  }
 0x13e   :  { %s10582_s16 = scalar_lea.hbm %s12519_s19, 12288 }
 0x13f   :  { %p10583_p8 = scmp.ne.s32.totalorder %s12519_s19, %s10582_s16  ;;  %p10586_p9 = scmp.lt.u32.totalorder %s10582_s16, %s12519_s19 }
 0x141   :  { %p10588_p10 = pnand %p10586_p9, %p10583_p8 }
 0x143   :  { %10591 = shalt.err (!%p10588_p10)
}
 0x144   :  { %s10592_s1 = scalar_lea.vmem %s11131_s26, 12288  ;;  %p10597_p12 = scmp.lt.s32.totalorder %s11131_s26, %s11131_s26 }
 0x145   :  { %p10593_p11 = scmp.ne.s32.totalorder %s11131_s26, %s10592_s1  ;;  %p10598_p13 = scmp.lt.s32.totalorder %s10592_s1, %s10592_s1 }
 0x147   :  { %p10599_p0 = por %p10598_p13, %p10597_p12 }
 0x149   :  { %p10600_p1 = pnand %p10599_p0, %p10593_p11 }
 0x14b   :  { %10603 = shalt.err (!%p10600_p1)
}
 0x14c   :  { %s12520_s27 = sld [smem:[#allocation59_spill]]  ;;  %s10858_s5 = smov [#allocation22]  }
 0x14d   :  { %211 = dma.hbm_to_vmem [thread:$0]  %s12519_s19, 12288, %s11131_s26, [#allocation18], %s10846_s24, %s10846_s24, %s10847_s21  }
 0x14e   :  { %s232_s2 = sshll.u32 %s10858_s5, 4  ;;  %s10859_s14 = smov [#allocation25]   ;;  %s233_s2 = int_to_ptr.vmem [resolvable:$true] %s232_s2 }
 0x14f   :  { %s251_s7 = sshll.u32 %s10859_s14, 4  ;;  %s11149_s7 = int_to_ptr.vmem [resolvable:$true] %s251_s7 }
 0x152   :  { %s10604_s9 = scalar_lea.hbm %s12520_s27, 16 }
 0x153   :  { %p10605_p2 = scmp.ne.s32.totalorder %s12520_s27, %s10604_s9  ;;  %p10608_p3 = scmp.lt.u32.totalorder %s10604_s9, %s12520_s27 }
 0x155   :  { %p10610_p4 = pnand %p10608_p3, %p10605_p2 }
 0x157   :  { %10613 = shalt.err (!%p10610_p4)
}
 0x158   :  { %s10614_s10 = scalar_lea.vmem %s233_s2, 16  ;;  %s10618_s11 = scalar_lea.vmem %s233_s2, 32 }
 0x159   :  { %p10615_p5 = scmp.ne.s32.totalorder %s233_s2, %s10614_s10  ;;  %p10619_p6 = scmp.lt.s32.totalorder %s233_s2, %s233_s2 }
 0x15a   :  { %p10620_p7 = scmp.lt.s32.totalorder %s10618_s11, %s10614_s10 }
 0x15c   :  { %p10621_p8 = por %p10620_p7, %p10619_p6 }
 0x15e   :  { %p10622_p9 = pnand %p10621_p8, %p10615_p5 }
 0x160   :  { %10625 = shalt.err (!%p10622_p9)
}
 0x161   :  { %s12521_s15 = sld [smem:[#allocation60_spill]] }
 0x162   :  { %235 = dma.hbm_to_vmem [thread:$0]  %s12520_s27, 16, %s233_s2, [#allocation21]  }
 0x167   :  { %s10626_s29 = scalar_lea.hbm %s12521_s15, 192 }
 0x168   :  { %p10627_p10 = scmp.ne.s32.totalorder %s12521_s15, %s10626_s29  ;;  %p10630_p11 = scmp.lt.u32.totalorder %s10626_s29, %s12521_s15 }
 0x16a   :  { %p10632_p12 = pnand %p10630_p11, %p10627_p10 }
 0x16c   :  { %10635 = shalt.err (!%p10632_p12)
}
 0x16d   :  { %s10636_s25 = scalar_lea.vmem %s11149_s7, 192  ;;  %p10641_p0 = scmp.lt.s32.totalorder %s11149_s7, %s11149_s7 }
 0x16e   :  { %p10637_p13 = scmp.ne.s32.totalorder %s11149_s7, %s10636_s25  ;;  %p10642_p1 = scmp.lt.s32.totalorder %s10636_s25, %s10636_s25 }
 0x170   :  { %p10643_p2 = por %p10642_p1, %p10641_p0 }
 0x172   :  { %p10644_p3 = pnand %p10643_p2, %p10637_p13 }
 0x174   :  { %10647 = shalt.err (!%p10644_p3)
}
 0x175   :  { %s10860_s6 = smov 2   ;;  %s12522_s3 = sld [smem:[#allocation62_spill]] }
 0x176   :  { %257 = dma.hbm_to_vmem [thread:$0]  %s12521_s15, 192, %s11149_s7, [#allocation24], %s10838_s23, %s10838_s23, %s10860_s6  }
 0x177   :  { %s10861_s17 = smov [#allocation28]   ;;  %s10862_s22 = smov [#allocation31]  }
 0x178   :  { %s277_s18 = sshll.u32 %s10861_s17, 4  ;;  %s300_s26 = sshll.u32 %s10862_s22, 4  ;;  %s278_s18 = int_to_ptr.vmem [resolvable:$true] %s277_s18  ;;  %s301_s26 = int_to_ptr.vmem [resolvable:$true] %s300_s26 }
 0x17b   :  { %s10648_s20 = scalar_lea.hbm %s12522_s3, 512 }
 0x17c   :  { %p10649_p4 = scmp.ne.s32.totalorder %s12522_s3, %s10648_s20  ;;  %p10652_p5 = scmp.lt.u32.totalorder %s10648_s20, %s12522_s3 }
 0x17e   :  { %p10654_p6 = pnand %p10652_p5, %p10649_p4 }
 0x180   :  { %10657 = shalt.err (!%p10654_p6)
}
 0x181   :  { %s10658_s28 = scalar_lea.vmem %s278_s18, 512  ;;  %p10663_p8 = scmp.lt.s32.totalorder %s278_s18, %s278_s18 }
 0x182   :  { %p10659_p7 = scmp.ne.s32.totalorder %s278_s18, %s10658_s28  ;;  %p10664_p9 = scmp.lt.s32.totalorder %s10658_s28, %s10658_s28 }
 0x184   :  { %p10665_p10 = por %p10664_p9, %p10663_p8 }
 0x186   :  { %p10666_p11 = pnand %p10665_p10, %p10659_p7 }
 0x188   :  { %10669 = shalt.err (!%p10666_p11)
}
 0x189   :  { %s12523_s23 = sld [smem:[#allocation63_spill]] }
 0x18a   :  { %283 = dma.hbm_to_vmem [thread:$0]  %s12522_s3, 512, %s278_s18, [#allocation27], %s10846_s24, %s10846_s24, %s10847_s21  }
 0x18f   :  { %s10670_s8 = scalar_lea.hbm %s12523_s23, 16 }
 0x190   :  { %p10671_p12 = scmp.ne.s32.totalorder %s12523_s23, %s10670_s8  ;;  %p10674_p13 = scmp.lt.u32.totalorder %s10670_s8, %s12523_s23 }
 0x192   :  { %p10676_p0 = pnand %p10674_p13, %p10671_p12 }
 0x194   :  { %10679 = shalt.err (!%p10676_p0)
}
 0x195   :  { %s10680_s19 = scalar_lea.vmem %s301_s26, 16  ;;  %s10684_s16 = scalar_lea.vmem %s301_s26, 32 }
 0x196   :  { %p10681_p1 = scmp.ne.s32.totalorder %s301_s26, %s10680_s19  ;;  %p10685_p2 = scmp.lt.s32.totalorder %s301_s26, %s301_s26 }
 0x197   :  { %p10686_p3 = scmp.lt.s32.totalorder %s10684_s16, %s10680_s19 }
 0x199   :  { %p10687_p4 = por %p10686_p3, %p10685_p2 }
 0x19b   :  { %p10688_p5 = pnand %p10687_p4, %p10681_p1 }
 0x19d   :  { %10691 = shalt.err (!%p10688_p5)
}
 0x19e   :  { %303 = dma.hbm_to_vmem [thread:$0]  %s12523_s23, 16, %s301_s26, [#allocation30]  }
 0x19f   :  { %s10863_s24 = smov [#allocation34]   ;;  %s10692_s1 = scalar_lea.hbm %s11015_s12, 32 }
 0x1a0   :  { %s322_s21 = sshll.u32 %s10863_s24, 4  ;;  %p10693_p6 = scmp.ne.s32.totalorder %s11015_s12, %s10692_s1  ;;  %s323_s21 = int_to_ptr.vmem [resolvable:$true] %s322_s21 }
 0x1a1   :  { %p10696_p7 = scmp.lt.u32.totalorder %s10692_s1, %s11015_s12 }
 0x1a3   :  { %p10698_p8 = pnand %p10696_p7, %p10693_p6 }
 0x1a5   :  { %10701 = shalt.err (!%p10698_p8)
}
 0x1a6   :  { %s10702_s27 = scalar_lea.vmem %s323_s21, 32  ;;  %p10707_p10 = scmp.lt.s32.totalorder %s323_s21, %s323_s21 }
 0x1a7   :  { %p10703_p9 = scmp.ne.s32.totalorder %s323_s21, %s10702_s27  ;;  %p10708_p11 = scmp.lt.s32.totalorder %s10702_s27, %s10702_s27 }
 0x1a9   :  { %p10709_p12 = por %p10708_p11, %p10707_p10 }
 0x1ab   :  { %p10710_p13 = pnand %p10709_p12, %p10703_p9 }
 0x1ad   :  { %10713 = shalt.err (!%p10710_p13)
}
 0x1ae   :  { %325 = dma.hbm_to_vmem [thread:$0]  %s11015_s12, 32, %s323_s21, [#allocation33]  }
 0x1af   :  { %10780 = dma.done.wait [#allocation3], 1536  }
 0x1b0   :  { %10781 = vsyncadd [#allocation3], 4294965760 }
 0x1b1   :  { %10782 = dma.done.wait [#allocation6], 2064  }
 0x1b2   :  { %10783 = vsyncadd [#allocation6], 4294965232 }
 0x1b3   :  { %10784 = dma.done.wait [#allocation9], 784  }
 0x1b4   :  { %10785 = vsyncadd [#allocation9], 4294966512 }
 0x1b5   :  { %10786 = dma.done.wait [#allocation12], 50176  }
 0x1b6   :  { %10787 = vsyncadd [#allocation12], 4294917120 }
 0x1b7   :  { %10788 = dma.done.wait [#allocation15], 32  }
 0x1b8   :  { %10789 = vsyncadd [#allocation15], 4294967264 }
 0x1b9   :  { %10790 = dma.done.wait [#allocation18], 12672  }
 0x1ba   :  { %10791 = vsyncadd [#allocation18], 4294954624 }
 0x1bb   :  { %10792 = dma.done.wait [#allocation21], 528  }
 0x1bc   :  { %10793 = vsyncadd [#allocation21], 4294966768 }
 0x1bd   :  { %10794 = dma.done.wait [#allocation24], 208  }
 0x1be   :  { %10795 = vsyncadd [#allocation24], 4294967088 }
 0x1bf   :  { %10796 = dma.done.wait [#allocation27], 12800  }
 0x1c0   :  { %10797 = vsyncadd [#allocation27], 4294954496 }
 0x1c1   :  { %10798 = dma.done.wait [#allocation30], 32  }
 0x1c2   :  { %10799 = vsyncadd [#allocation30], 4294967264 }
 0x1c3   :  { %10800 = dma.done.wait [#allocation33], 48  }
 0x1c4   :  { %10801 = vsyncadd [#allocation33], 4294967248  ;;  %s12524_s12 = sld [smem:[#allocation52_spill]]  ;;  %vm401_vm0 = vcmask 523264   ;;  %v548_v8 = vld [vmem:[#allocation2 + $0x20] sm:$0xff]  ;;  %s12525_s5 = sld [smem:[#allocation53_spill]] }
 0x1c5   :  { %8249 = vmatprep.mubr.msk.f32.mxu1 %vm401_vm0, %v548_v8  ;;  %v397_v9 = vld [vmem:[#allocation2] sm:$0xff]  ;;  %v549_v26 = vld [vmem:[#allocation2 + $0x28] sm:$0xff]  ;;  %v550_v29 = vld [vmem:[#allocation2 + $0x30] sm:$0xff]  ;;  %vm698_vm1 = vcmask 785408   ;;  %s12526_s2 = sld [smem:[#allocation54_spill]]  ;;  %vm1516_vm2 = vcmask 261120  }
 0x1c6   :  { %8227 = vmatprep.mubr.msk.f32.mxu0 %vm401_vm0, %v397_v9  ;;  %v398_v30 = vld [vmem:[#allocation2 + $0x8] sm:$0xff]  ;;  %v399_v31 = vld [vmem:[#allocation2 + $0x10] sm:$0xff]  ;;  %v551_v42 = vld [vmem:[#allocation2 + $0x38] sm:$0xff]  ;;  %s12551_s14 = sld [smem:[#allocation55_spill]]  ;;  %s12552_s7 = sld [smem:[#allocation58_spill]] }
 0x1c7   :  { %v400_v45 = vld [vmem:[#allocation2 + $0x18] sm:$0xff]  ;;  %s12553_s9 = sld [smem:[#allocation61_spill]]  ;;  %s12554_s10 = sld [smem:[#allocation64_spill]] }
 0x1c8   :  { %s10869_s11 = smov [#allocation36]  }
 0x1c9   :  { %s7376_s15 = sshll.u32 %s10869_s11, 4  ;;  %s7377_s15 = int_to_ptr.vmem [resolvable:$true] %s7376_s15 }
 0x1ca   :  { %v389_v0 = vld [vmem:[%s12524_s12] sm:$0xff]  ;;  %v390_v1 = vld [vmem:[%s12524_s12 + $0x8] sm:$0xff]  ;;  %v391_v2 = vld [vmem:[%s12524_s12 + $0x10] sm:$0xff]  ;;  %s10714_s29 = scalar_lea.vmem %s7377_s15, 32  ;;  %p10719_p1 = scmp.lt.s32.totalorder %s7377_s15, %s7377_s15 }
 0x1cb   :  { %v11184_v3 = vpack.c.bf16 %v390_v1, %v389_v0  ;;  %v392_v4 = vld [vmem:[%s12524_s12 + $0x18] sm:$0xff]  ;;  %v393_v6 = vld [vmem:[%s12524_s12 + $0x20] sm:$0xff]  ;;  %v394_v7 = vld [vmem:[%s12524_s12 + $0x28] sm:$0xff]  ;;  %p10715_p0 = scmp.ne.s32.totalorder %s7377_s15, %s10714_s29  ;;  %p10720_p2 = scmp.lt.s32.totalorder %s10714_s29, %s10714_s29 }
 0x1cc   :  { %v11187_v5 = vpack.c.bf16 %v392_v4, %v391_v2  ;;  %v11196_v10 = vpack.c.bf16 %v394_v7, %v393_v6  ;;  %v395_v11 = vld [vmem:[%s12524_s12 + $0x30] sm:$0xff]  ;;  %v396_v12 = vld [vmem:[%s12524_s12 + $0x38] sm:$0xff]  ;;  %v7451_v16 = vld [vmem:[%s12525_s5 + $0x188] sm:$0xff] }
 0x1cd   :  { %8795 = vmatprep.subr.bf16.mxu1 %v11184_v3  ;;  %8779 = vmatprep.subr.bf16.mxu0 %v11184_v3  ;;  %v11205_v13 = vpack.c.bf16 %v396_v12, %v395_v11  ;;  %v7453_v14 = vld [vmem:[%s12525_s5 + $0x198] sm:$0xff]  ;;  %v7455_v17 = vld [vmem:[%s12525_s5 + $0x1a8] sm:$0xff]  ;;  %v7450_v20 = vld [vmem:[%s12525_s5 + $0x180] sm:$0xff]  ;;  %p10721_p3 = por %p10720_p2, %p10719_p1 }
 0x1ce   :  { %8797 = vmatpush3.bf16.msra.mxu1 %v11184_v3  ;;  %8781 = vmatpush3.bf16.msra.mxu0 %v11184_v3  ;;  %v7457_v15 = vld [vmem:[%s12525_s5 + $0x1b8] sm:$0xff]  ;;  %v8810_v19 = vpack.c.bf16 %v7455_v17, %v7451_v16  ;;  %v7454_v21 = vld [vmem:[%s12525_s5 + $0x1a0] sm:$0xff]  ;;  %v7452_v22 = vld [vmem:[%s12525_s5 + $0x190] sm:$0xff] }
 0x1cf   :  { %8799 = vmatprep.subr.bf16.mxu1 %v11187_v5  ;;  %8783 = vmatprep.subr.bf16.mxu0 %v11187_v5  ;;  %v8834_v18 = vpack.c.bf16 %v7457_v15, %v7453_v14  ;;  %v7456_v23 = vld [vmem:[%s12525_s5 + $0x1b0] sm:$0xff]  ;;  %v7459_v24 = vld [vmem:[%s12525_s5 + $0x1c8] sm:$0xff]  ;;  %v7461_v27 = vld [vmem:[%s12525_s5 + $0x1d8] sm:$0xff]  ;;  %v8812_v32 = vpack.c.bf16 %v7454_v21, %v7450_v20  ;;  %p10722_p4 = pnand %p10721_p3, %p10715_p0 }
 0x1d0   :  { %v7463_v25 = vld [vmem:[%s12525_s5 + $0x1e8] sm:$0xff]  ;;  %v7465_v28 = vld [vmem:[%s12525_s5 + $0x1f8] sm:$0xff]  ;;  %v8836_v33 = vpack.c.bf16 %v7456_v23, %v7452_v22  ;;  %v7458_v35 = vld [vmem:[%s12525_s5 + $0x1c0] sm:$0xff] }
 0x1d1   :  { %v8814_v34 = vpack.c.bf16 %v7463_v25, %v7459_v24  ;;  %v7462_v36 = vld [vmem:[%s12525_s5 + $0x1e0] sm:$0xff]  ;;  %v7460_v37 = vld [vmem:[%s12525_s5 + $0x1d0] sm:$0xff]  ;;  %v8838_v38 = vpack.c.bf16 %v7465_v28, %v7461_v27  ;;  %v7467_v40 = vld [vmem:[%s12525_s5 + $0x208] sm:$0xff] }
 0x1d2   :  { %8801 = vmatpush3.bf16.msra.mxu1 %v11187_v5  ;;  %8785 = vmatpush3.bf16.msra.mxu0 %v11187_v5  ;;  %v7464_v39 = vld [vmem:[%s12525_s5 + $0x1f0] sm:$0xff]  ;;  %v7471_v41 = vld [vmem:[%s12525_s5 + $0x228] sm:$0xff]  ;;  %v7469_v43 = vld [vmem:[%s12525_s5 + $0x218] sm:$0xff]  ;;  %v8816_v46 = vpack.c.bf16 %v7462_v36, %v7458_v35 }
 0x1d3   :  { %8803 = vmatprep.subr.bf16.mxu1 %v11196_v10  ;;  %8787 = vmatprep.subr.bf16.mxu0 %v11196_v10  ;;  %v7473_v44 = vld [vmem:[%s12525_s5 + $0x238] sm:$0xff]  ;;  %v8840_v47 = vpack.c.bf16 %v7464_v39, %v7460_v37  ;;  %v8818_v48 = vpack.c.bf16 %v7471_v41, %v7467_v40  ;;  %v7466_v49 = vld [vmem:[%s12525_s5 + $0x200] sm:$0xff]  ;;  %v7468_v51 = vld [vmem:[%s12525_s5 + $0x210] sm:$0xff] }
 0x1d4   :  { %v7470_v50 = vld [vmem:[%s12525_s5 + $0x220] sm:$0xff]  ;;  %v8842_v52 = vpack.c.bf16 %v7473_v44, %v7469_v43  ;;  %v7472_v53 = vld [vmem:[%s12525_s5 + $0x230] sm:$0xff]  ;;  %v7475_v54 = vld [vmem:[%s12525_s5 + $0x248] sm:$0xff] }
 0x1d5   :  { %v7479_v55 = vld [vmem:[%s12525_s5 + $0x268] sm:$0xff]  ;;  %v7477_v56 = vld [vmem:[%s12525_s5 + $0x258] sm:$0xff]  ;;  %v8820_v58 = vpack.c.bf16 %v7470_v50, %v7466_v49  ;;  %v8844_v59 = vpack.c.bf16 %v7472_v53, %v7468_v51  ;;  %v7474_v61 = vld [vmem:[%s12525_s5 + $0x240] sm:$0xff] }
 0x1d6   :  { %8805 = vmatpush3.bf16.msra.mxu1 %v11196_v10  ;;  %8789 = vmatpush3.bf16.msra.mxu0 %v11196_v10  ;;  %v7481_v57 = vld [vmem:[%s12525_s5 + $0x278] sm:$0xff]  ;;  %v8822_v60 = vpack.c.bf16 %v7479_v55, %v7475_v54  ;;  %v7478_v62 = vld [vmem:[%s12525_s5 + $0x260] sm:$0xff]  ;;  %v7476_v63 = vld [vmem:[%s12525_s5 + $0x250] sm:$0xff] }
 0x1d7   :  { %8807 = vmatprep.subr.bf16.mxu1 %v11205_v13  ;;  %8791 = vmatprep.subr.bf16.mxu0 %v11205_v13  ;;  %v8846_v0 = vpack.c.bf16 %v7481_v57, %v7477_v56  ;;  %v7480_v1 = vld [vmem:[%s12525_s5 + $0x270] sm:$0xff]  ;;  %v7483_v2 = vld [vmem:[%s12525_s5 + $0x288] sm:$0xff]  ;;  %v7485_v6 = vld [vmem:[%s12525_s5 + $0x298] sm:$0xff]  ;;  %v8824_v8 = vpack.c.bf16 %v7478_v62, %v7474_v61 }
 0x1d8   :  { %v7487_v4 = vld [vmem:[%s12525_s5 + $0x2a8] sm:$0xff]  ;;  %v7489_v7 = vld [vmem:[%s12525_s5 + $0x2b8] sm:$0xff]  ;;  %v8848_v9 = vpack.c.bf16 %v7480_v1, %v7476_v63  ;;  %v7482_v12 = vld [vmem:[%s12525_s5 + $0x280] sm:$0xff] }
 0x1d9   :  { %v8826_v11 = vpack.c.bf16 %v7487_v4, %v7483_v2  ;;  %v7486_v14 = vld [vmem:[%s12525_s5 + $0x2a0] sm:$0xff]  ;;  %v7484_v15 = vld [vmem:[%s12525_s5 + $0x290] sm:$0xff]  ;;  %v8850_v16 = vpack.c.bf16 %v7489_v7, %v7485_v6  ;;  %v7493_v20 = vld [vmem:[%s12525_s5 + $0x2d8] sm:$0xff] }
 0x1da   :  { %8809 = vmatpush3.bf16.msra.mxu1 %v11205_v13  ;;  %8793 = vmatpush3.bf16.msra.mxu0 %v11205_v13  ;;  %v7488_v17 = vld [vmem:[%s12525_s5 + $0x2b0] sm:$0xff]  ;;  %v7497_v21 = vld [vmem:[%s12525_s5 + $0x2f8] sm:$0xff]  ;;  %v8828_v22 = vpack.c.bf16 %v7486_v14, %v7482_v12  ;;  %v7490_v25 = vld [vmem:[%s12525_s5 + $0x2c0] sm:$0xff] }
 0x1db   :  { %8835 = vmatprep.subr.bf16.mxu1 %v8834_v18  ;;  %8811 = vmatprep.subr.bf16.mxu0 %v8810_v19  ;;  %v7491_v18 = vld [vmem:[%s12525_s5 + $0x2c8] sm:$0xff]  ;;  %v8852_v23 = vpack.c.bf16 %v7488_v17, %v7484_v15  ;;  %v8854_v27 = vpack.c.bf16 %v7497_v21, %v7493_v20  ;;  %v7492_v28 = vld [vmem:[%s12525_s5 + $0x2d0] sm:$0xff]  ;;  %v506_v36 = vld [vmem:[%s12525_s5 + $0x38] sm:$0xff] }
 0x1dc   :  { %v7495_v19 = vld [vmem:[%s12525_s5 + $0x2e8] sm:$0xff]  ;;  %v499_v39 = vld [vmem:[%s12525_s5] sm:$0xff]  ;;  %v501_v41 = vld [vmem:[%s12525_s5 + $0x10] sm:$0xff] }
 0x1dd   :  { %8250 = vmatmul.mubr.msk.f32.vlgmr.msra.gmra.mrb[0].mxu1 %vm401_vm0, %v549_v26  ;;  %8228 = vmatmul.mubr.msk.f32.vlgmr.msra.gmra.mrb[0].mxu0 %vm401_vm0, %v398_v30  ;;  %v8830_v24 = vpack.c.bf16 %v7495_v19, %v7491_v18  ;;  %v7494_v26 = vld [vmem:[%s12525_s5 + $0x2e0] sm:$0xff]  ;;  %v508_v43 = vld [vmem:[%s12525_s5 + $0x48] sm:$0xff]  ;;  %v513_v53 = vld [vmem:[%s12525_s5 + $0x70] sm:$0xff] }
 0x1de   :  { %8252 = vmatprep.mubr.msk.f32.mxu1 %vm401_vm0, %v550_v29  ;;  %8230 = vmatprep.mubr.msk.f32.mxu0 %vm401_vm0, %v399_v31  ;;  %v7496_v29 = vld [vmem:[%s12525_s5 + $0x2f0] sm:$0xff]  ;;  %v8832_v30 = vpack.c.bf16 %v7494_v26, %v7490_v25  ;;  %v503_v40 = vld [vmem:[%s12525_s5 + $0x20] sm:$0xff]  ;;  %v512_v44 = vld [vmem:[%s12525_s5 + $0x68] sm:$0xff] }
 0x1df   :  { %8813 = vmatpush1.bf16.msra.mxu0 %v8812_v32  ;;  %8837 = vmatpush1.bf16.msra.mxu1 %v8836_v33  ;;  %v8856_v31 = vpack.c.bf16 %v7496_v29, %v7492_v28  ;;  %v500_v32 = vld [vmem:[%s12525_s5 + $0x8] sm:$0xff]  ;;  %v507_v49 = vld [vmem:[%s12525_s5 + $0x40] sm:$0xff]  ;;  %v8862_v56 = vpack.c.bf16 %v512_v44, %v508_v43  ;;  %v526_v15 = vld [vmem:[%s12525_s5 + $0xd8] sm:$0xff] }
 0x1e0   :  { %8815 = vmatprep.subr.bf16.mxu0 %v8814_v34  ;;  %8839 = vmatprep.subr.bf16.mxu1 %v8838_v38  ;;  %v504_v33 = vld [vmem:[%s12525_s5 + $0x28] sm:$0xff]  ;;  %v502_v34 = vld [vmem:[%s12525_s5 + $0x18] sm:$0xff]  ;;  %v12489_v38 = vmov 0.0   ;;  %v511_v50 = vld [vmem:[%s12525_s5 + $0x60] sm:$0xff] }
 0x1e1   :  { %8253 = vmatmul.mubr.msk.f32.gmra.mrb[2].mxu1 %vm401_vm0, %v551_v42  ;;  %8231 = vmatmul.mubr.msk.f32.gmra.mrb[2].mxu0 %vm401_vm0, %v400_v45  ;;  %v8858_v35 = vpack.c.bf16 %v504_v33, %v500_v32  ;;  %v8882_v37 = vpack.c.bf16 %v506_v36, %v502_v34  ;;  %v505_v42 = vld [vmem:[%s12525_s5 + $0x30] sm:$0xff]  ;;  %v510_v45 = vld [vmem:[%s12525_s5 + $0x58] sm:$0xff]  ;;  %v516_v54 = vld [vmem:[%s12525_s5 + $0x88] sm:$0xff]  ;;  %v8864_v63 = vpack.c.bf16 %v511_v50, %v507_v49 }
 0x1e2   :  { %775 = vmatprep.mubr.f32.mxu0 %v12489_v38  ;;  %864 = vmatprep.mubr.f32.mxu1 %v12489_v38  ;;  %v515_v1 = vld [vmem:[%s12525_s5 + $0x80] sm:$0xff]  ;;  %v528_v14 = vld [vmem:[%s12525_s5 + $0xe8] sm:$0xff]  ;;  %v525_v25 = vld [vmem:[%s12525_s5 + $0xd0] sm:$0xff] }
 0x1e3   :  { %8817 = vmatpush1.bf16.msra.mxu0 %v8816_v46  ;;  %8841 = vmatpush1.bf16.msra.mxu1 %v8840_v47  ;;  %v514_v46 = vld [vmem:[%s12525_s5 + $0x78] sm:$0xff]  ;;  %v8860_v47 = vpack.c.bf16 %v503_v40, %v499_v39  ;;  %v519_v2 = vld [vmem:[%s12525_s5 + $0xa0] sm:$0xff]  ;;  %v529_v26 = vld [vmem:[%s12525_s5 + $0xf0] sm:$0xff] }
 0x1e4   :  { %8819 = vmatprep.subr.bf16.mxu0 %v8818_v48  ;;  %8843 = vmatprep.subr.bf16.mxu1 %v8842_v52  ;;  %v8884_v48 = vpack.c.bf16 %v505_v42, %v501_v41  ;;  %v509_v52 = vld [vmem:[%s12525_s5 + $0x50] sm:$0xff]  ;;  %v8886_v57 = vpack.c.bf16 %v514_v46, %v510_v45  ;;  %v8868_v19 = vpack.c.bf16 %v519_v2, %v515_v1  ;;  %v523_v21 = vld [vmem:[%s12525_s5 + $0xc0] sm:$0xff]  ;;  %v536_v28 = vld [vmem:[%s12525_s5 + $0x128] sm:$0xff] }
 0x1e5   :  { %v534_v29 = vld [vmem:[%s12525_s5 + $0x118] sm:$0xff]  ;;  %v8896_v32 = vpack.c.bf16 %v529_v26, %v525_v25  ;;  %v531_v33 = vld [vmem:[%s12525_s5 + $0x100] sm:$0xff]  ;;  %v537_v39 = vld [vmem:[%s12525_s5 + $0x130] sm:$0xff] }
 0x1e6   :  { %v535_v34 = vld [vmem:[%s12525_s5 + $0x120] sm:$0xff]  ;;  %v540_v40 = vld [vmem:[%s12525_s5 + $0x148] sm:$0xff]  ;;  %v542_v42 = vld [vmem:[%s12525_s5 + $0x158] sm:$0xff] }
 0x1e7   :  { %8821 = vmatpush1.bf16.msra.mxu0 %v8820_v58  ;;  %8845 = vmatpush1.bf16.msra.mxu1 %v8844_v59  ;;  %v520_v58 = vld [vmem:[%s12525_s5 + $0xa8] sm:$0xff]  ;;  %v518_v59 = vld [vmem:[%s12525_s5 + $0x98] sm:$0xff]  ;;  %v8876_v44 = vpack.c.bf16 %v535_v34, %v531_v33  ;;  %v539_v46 = vld [vmem:[%s12525_s5 + $0x140] sm:$0xff] }
 0x1e8   :  { %8823 = vmatprep.subr.bf16.mxu0 %v8822_v60  ;;  %8847 = vmatprep.subr.bf16.mxu1 %v8846_v0  ;;  %v522_v60 = vld [vmem:[%s12525_s5 + $0xb8] sm:$0xff]  ;;  %v8888_v0 = vpack.c.bf16 %v513_v53, %v509_v52  ;;  %v8866_v4 = vpack.c.bf16 %v520_v58, %v516_v54  ;;  %v544_v41 = vld [vmem:[%s12525_s5 + $0x168] sm:$0xff]  ;;  %v543_v49 = vld [vmem:[%s12525_s5 + $0x160] sm:$0xff] }
 0x1e9   :  { %v8890_v6 = vpack.c.bf16 %v522_v60, %v518_v59  ;;  %v546_v43 = vld [vmem:[%s12525_s5 + $0x178] sm:$0xff]  ;;  %v541_v50 = vld [vmem:[%s12525_s5 + $0x150] sm:$0xff]  ;;  %v8880_v54 = vpack.c.bf16 %v543_v49, %v539_v46  ;;  %v7519_v1 = vld [vmem:[%s12525_s5 + $0x308] sm:$0xff] }
 0x1ea   :  { %v7521_v52 = vld [vmem:[%s12525_s5 + $0x318] sm:$0xff]  ;;  %v7524_v58 = vld [vmem:[%s12525_s5 + $0x330] sm:$0xff]  ;;  %v7523_v2 = vld [vmem:[%s12525_s5 + $0x328] sm:$0xff] }
 0x1eb   :  { %8825 = vmatpush1.bf16.msra.mxu0 %v8824_v8  ;;  %8849 = vmatpush1.bf16.msra.mxu1 %v8848_v9  ;;  %v517_v8 = vld [vmem:[%s12525_s5 + $0x90] sm:$0xff]  ;;  %v7525_v53 = vld [vmem:[%s12525_s5 + $0x338] sm:$0xff] }
 0x1ec   :  { %8827 = vmatprep.subr.bf16.mxu0 %v8826_v11  ;;  %8851 = vmatprep.subr.bf16.mxu1 %v8850_v16  ;;  %v521_v9 = vld [vmem:[%s12525_s5 + $0xb0] sm:$0xff]  ;;  %v524_v11 = vld [vmem:[%s12525_s5 + $0xc8] sm:$0xff]  ;;  %v530_v16 = vld [vmem:[%s12525_s5 + $0xf8] sm:$0xff] }
 0x1ed   :  { %v8892_v20 = vpack.c.bf16 %v521_v9, %v517_v8  ;;  %v7529_v60 = vld [vmem:[%s12525_s5 + $0x358] sm:$0xff]  ;;  %v7552_v33 = vld [vmem:[%s12525_s5 + $0x410] sm:$0xff] }
 0x1ee   :  { %v7545_v8 = vld [vmem:[%s12525_s5 + $0x3d8] sm:$0xff]  ;;  %v7556_v34 = vld [vmem:[%s12525_s5 + $0x430] sm:$0xff] }
 0x1ef   :  { %8829 = vmatpush1.bf16.msra.mxu0 %v8828_v22  ;;  %8853 = vmatpush1.bf16.msra.mxu1 %v8852_v23  ;;  %v527_v22 = vld [vmem:[%s12525_s5 + $0xe0] sm:$0xff]  ;;  %v8870_v23 = vpack.c.bf16 %v528_v14, %v524_v11  ;;  %v7549_v9 = vld [vmem:[%s12525_s5 + $0x3f8] sm:$0xff] }
 0x1f0   :  { %8831 = vmatprep.subr.bf16.mxu0 %v8830_v24  ;;  %8855 = vmatprep.subr.bf16.mxu1 %v8854_v27  ;;  %v8894_v24 = vpack.c.bf16 %v530_v16, %v526_v15  ;;  %v532_v27 = vld [vmem:[%s12525_s5 + $0x108] sm:$0xff]  ;;  %v1080_v11 = vld [vmem:[#allocation2 + $0x40] sm:$0xff]  ;;  %v7553_v25 = vld [vmem:[%s12525_s5 + $0x418] sm:$0xff] }
 0x1f1   :  { %v7518_v14 = vld [vmem:[%s12525_s5 + $0x300] sm:$0xff]  ;;  %v7557_v26 = vld [vmem:[%s12525_s5 + $0x438] sm:$0xff] }
 0x1f2   :  { %v7522_v15 = vld [vmem:[%s12525_s5 + $0x320] sm:$0xff] }
 0x1f3   :  { %8833 = vmatpush1.bf16.msra.mxu0 %v8832_v30  ;;  %8857 = vmatpush1.bf16.msra.mxu1 %v8856_v31  ;;  %v538_v30 = vld [vmem:[%s12525_s5 + $0x138] sm:$0xff]  ;;  %v8872_v31 = vpack.c.bf16 %v527_v22, %v523_v21  ;;  %v7544_v21 = vld [vmem:[%s12525_s5 + $0x3d0] sm:$0xff] }
 0x1f4   :  { %8859 = vmatprep.subr.bf16.mxu0 %v8858_v35  ;;  %8883 = vmatprep.subr.bf16.mxu1 %v8882_v37  ;;  %v8874_v35 = vpack.c.bf16 %v536_v28, %v532_v27  ;;  %v8898_v36 = vpack.c.bf16 %v538_v30, %v534_v29  ;;  %v533_v37 = vld [vmem:[%s12525_s5 + $0x110] sm:$0xff]  ;;  %v7526_v29 = vld [vmem:[%s12525_s5 + $0x340] sm:$0xff]  ;;  %v7535_v30 = vld [vmem:[%s12525_s5 + $0x388] sm:$0xff] }
 0x1f5   :  { %v8900_v45 = vpack.c.bf16 %v537_v39, %v533_v37  ;;  %v7548_v22 = vld [vmem:[%s12525_s5 + $0x3f0] sm:$0xff]  ;;  %v7561_v37 = vld [vmem:[%s12525_s5 + $0x458] sm:$0xff] }
 0x1f6   :  { %v1082_v27 = vld [vmem:[#allocation2 + $0x50] sm:$0xff]  ;;  %v7565_v39 = vld [vmem:[%s12525_s5 + $0x478] sm:$0xff] }
 0x1f7   :  { %v8966_v46 = vpack.c.bf16 %v7565_v39, %v7561_v37  ;;  %v1463_v37 = vld [vmem:[%s12526_s2 + $0xd8] sm:$0xff] }
 0x2b0   :  { %v8251_v51 = vpop.f32.mrb[0].mxu1  ;;  %v11291_v61 = vpop.f32.mrb[0].mxu0 }
 0x2b1   :  { %v630_v55 = vpop.f32.mrb[1].mxu1  ;;  %v11295_v62 = vpop.f32.mrb[1].mxu0 }
 0x2b2   :  { %7498 = vmatmul.mubr.msk.f32.vlgmr.msra.gmra.mrb[4].mxu0 %vm698_vm1, %v630_v55  ;;  %7502 = vmatmul.mubr.msk.f32.vlgmr.msra.gmra.mrb[4].mxu1 %vm698_vm1, %v630_v55 }
 0x2b3   :  { %8861 = vmatpush1.bf16.msra.mxu0 %v8860_v47  ;;  %8885 = vmatpush1.bf16.msra.mxu1 %v8884_v48  ;;  %v8878_v47 = vpack.c.bf16 %v544_v41, %v540_v40  ;;  %v8902_v48 = vpack.c.bf16 %v546_v43, %v542_v42  ;;  %v7534_v41 = vld [vmem:[%s12525_s5 + $0x380] sm:$0xff]  ;;  %v7543_v43 = vld [vmem:[%s12525_s5 + $0x3c8] sm:$0xff] }
 0x2b4   :  { %781 = vmatprep.mubr.f32.mxu0 %v12489_v38  ;;  %870 = vmatprep.mubr.f32.mxu1 %v12489_v38  ;;  %v8254_v7 = vpop.f32.mrb[2].mxu1  ;;  %v11307_v17 = vpop.f32.mrb[2].mxu0  ;;  %v7538_v42 = vld [vmem:[%s12525_s5 + $0x3a0] sm:$0xff] }
 0x2b5   :  { %8863 = vmatprep.subr.bf16.mxu0 %v8862_v56  ;;  %8887 = vmatprep.subr.bf16.mxu1 %v8886_v57  ;;  %v640_v12 = vpop.f32.mrb[3].mxu1  ;;  %v11311_v18 = vpop.f32.mrb[3].mxu0  ;;  %v8946_v56 = vpack.c.bf16 %v7525_v53, %v7521_v52  ;;  %v7520_v57 = vld [vmem:[%s12525_s5 + $0x310] sm:$0xff]  ;;  %v8932_v49 = vpack.c.bf16 %v7538_v42, %v7534_v41  ;;  %v7546_v52 = vld [vmem:[%s12525_s5 + $0x3e0] sm:$0xff]  ;;  %v7551_v53 = vld [vmem:[%s12525_s5 + $0x408] sm:$0xff] }
 0x2b6   :  { %7499 = vmatmul.mubr.msk.f32.gmra.mrb[6].mxu0 %vm698_vm1, %v8251_v51  ;;  %7503 = vmatmul.mubr.msk.f32.gmra.mrb[6].mxu1 %vm698_vm1, %v8251_v51  ;;  %v545_v51 = vld [vmem:[%s12525_s5 + $0x170] sm:$0xff]  ;;  %v8948_v59 = vpack.c.bf16 %v7524_v58, %v7520_v57  ;;  %v7550_v58 = vld [vmem:[%s12525_s5 + $0x400] sm:$0xff]  ;;  %v1447_v42 = vld [vmem:[%s12526_s2 + $0x58] sm:$0xff] }
 0x2b7   :  { %8865 = vmatpush1.bf16.msra.mxu0 %v8864_v63  ;;  %8889 = vmatpush1.bf16.msra.mxu1 %v8888_v0  ;;  %v8904_v55 = vpack.c.bf16 %v545_v51, %v541_v50  ;;  %v7533_v63 = vld [vmem:[%s12525_s5 + $0x378] sm:$0xff]  ;;  %v7542_v51 = vld [vmem:[%s12525_s5 + $0x3c0] sm:$0xff]  ;;  %v1446_v41 = vld [vmem:[%s12526_s2 + $0x50] sm:$0xff] }
 0x2b8   :  { %8867 = vmatprep.subr.bf16.mxu0 %v8866_v4  ;;  %8891 = vmatprep.subr.bf16.mxu1 %v8890_v6  ;;  %v8950_v0 = vpack.c.bf16 %v7533_v63, %v7529_v60  ;;  %v7541_v6 = vld [vmem:[%s12525_s5 + $0x3b8] sm:$0xff]  ;;  %v7559_v60 = vld [vmem:[%s12525_s5 + $0x448] sm:$0xff] }
 0x2b9   :  { %787 = vmatprep.mubr.f32.mxu0 %v12489_v38  ;;  %876 = vmatprep.mubr.f32.mxu1 %v12489_v38  ;;  %v7563_v63 = vld [vmem:[%s12525_s5 + $0x468] sm:$0xff] }
 0x2ba   :  { %7500 = vmatmul.mubr.msk.f32.gmra.mrb[8].mxu0 %vm698_vm1, %v640_v12  ;;  %7504 = vmatmul.mubr.msk.f32.gmra.mrb[8].mxu1 %vm698_vm1, %v640_v12  ;;  %v8922_v12 = vpack.c.bf16 %v7523_v2, %v7519_v1  ;;  %v7562_v1 = vld [vmem:[%s12525_s5 + $0x460] sm:$0xff] }
 0x2bb   :  { %8869 = vmatpush1.bf16.msra.mxu0 %v8868_v19  ;;  %8893 = vmatpush1.bf16.msra.mxu1 %v8892_v20  ;;  %v7531_v19 = vld [vmem:[%s12525_s5 + $0x368] sm:$0xff]  ;;  %v8958_v20 = vpack.c.bf16 %v7549_v9, %v7545_v8  ;;  %v1436_v9 = vld [vmem:[%s12526_s2] sm:$0xff] }
 0x2bc   :  { %8871 = vmatprep.subr.bf16.mxu0 %v8870_v23  ;;  %8895 = vmatprep.subr.bf16.mxu1 %v8894_v24  ;;  %v1081_v23 = vld [vmem:[#allocation2 + $0x48] sm:$0xff]  ;;  %v8924_v24 = vpack.c.bf16 %v7522_v15, %v7518_v14  ;;  %v1454_v14 = vld [vmem:[%s12526_s2 + $0x90] sm:$0xff]  ;;  %v1455_v15 = vld [vmem:[%s12526_s2 + $0x98] sm:$0xff] }
 0x2bd   :  { %793 = vmatprep.mubr.f32.mxu0 %v12489_v38  ;;  %882 = vmatprep.mubr.f32.mxu1 %v12489_v38  ;;  %v1453_v8 = vld [vmem:[%s12526_s2 + $0x88] sm:$0xff] }
 0x2be   :  { %7501 = vmatmul.mubr.msk.f32.gmra.mrb[10].mxu0 %vm698_vm1, %v8254_v7  ;;  %7505 = vmatmul.mubr.msk.f32.gmra.mrb[10].mxu1 %vm698_vm1, %v8254_v7  ;;  %v7540_v7 = vld [vmem:[%s12525_s5 + $0x3b0] sm:$0xff] }
 0x2bf   :  { %8873 = vmatpush1.bf16.msra.mxu0 %v8872_v31  ;;  %8897 = vmatpush1.bf16.msra.mxu1 %v8896_v32  ;;  %v7539_v31 = vld [vmem:[%s12525_s5 + $0x3a8] sm:$0xff]  ;;  %v8962_v32 = vpack.c.bf16 %v7557_v26, %v7553_v25  ;;  %v1458_v26 = vld [vmem:[%s12526_s2 + $0xb0] sm:$0xff] }
 0x2c0   :  { %8875 = vmatprep.subr.bf16.mxu0 %v8874_v35  ;;  %8899 = vmatprep.subr.bf16.mxu1 %v8898_v36  ;;  %v1083_v35 = vld [vmem:[#allocation2 + $0x58] sm:$0xff]  ;;  %v8930_v40 = vpack.c.bf16 %v7539_v31, %v7535_v30  ;;  %v1441_v25 = vld [vmem:[%s12526_s2 + $0x28] sm:$0xff]  ;;  %v1460_v31 = vld [vmem:[%s12526_s2 + $0xc0] sm:$0xff] }
 0x2c1   :  { %965 = vmatprep.mubr.f32.mxu0 %v12489_v38  ;;  %1054 = vmatprep.mubr.f32.mxu1 %v12489_v38  ;;  %v1443_v30 = vld [vmem:[%s12526_s2 + $0x38] sm:$0xff] }
 0x2c3   :  { %8877 = vmatpush1.bf16.msra.mxu0 %v8876_v44  ;;  %8901 = vmatpush1.bf16.msra.mxu1 %v8900_v45  ;;  %v7547_v44 = vld [vmem:[%s12525_s5 + $0x3e8] sm:$0xff]  ;;  %v8964_v45 = vpack.c.bf16 %v7556_v34, %v7552_v33  ;;  %v1444_v34 = vld [vmem:[%s12526_s2 + $0x40] sm:$0xff] }
 0x2c4   :  { %8879 = vmatprep.subr.bf16.mxu0 %v8878_v47  ;;  %8903 = vmatprep.subr.bf16.mxu1 %v8902_v48  ;;  %v7560_v47 = vld [vmem:[%s12525_s5 + $0x450] sm:$0xff]  ;;  %v8934_v50 = vpack.c.bf16 %v7547_v44, %v7543_v43  ;;  %v1464_v43 = vld [vmem:[%s12526_s2 + $0xe0] sm:$0xff]  ;;  %v1465_v44 = vld [vmem:[%s12526_s2 + $0xe8] sm:$0xff] }
 0x2c5   :  { %v7564_v48 = vld [vmem:[%s12525_s5 + $0x470] sm:$0xff] }
 0x2c7   :  { %8881 = vmatpush1.bf16.msra.mxu0 %v8880_v54  ;;  %8905 = vmatpush1.bf16.msra.mxu1 %v8904_v55  ;;  %v7555_v54 = vld [vmem:[%s12525_s5 + $0x428] sm:$0xff]  ;;  %v8968_v55 = vpack.c.bf16 %v7564_v48, %v7560_v47  ;;  %v1448_v47 = vld [vmem:[%s12526_s2 + $0x60] sm:$0xff] }
 0x2c8   :  { %8907 = vmatprep.subr.bf16.mxu0 %v11184_v3  ;;  %8947 = vmatprep.subr.bf16.mxu1 %v8946_v56  ;;  %v8936_v56 = vpack.c.bf16 %v7546_v52, %v7542_v51  ;;  %v8938_v57 = vpack.c.bf16 %v7555_v54, %v7551_v53  ;;  %v1449_v48 = vld [vmem:[%s12526_s2 + $0x68] sm:$0xff] }
 0x2c9   :  { %v11510_v51 = vpack.c.bf16 %v1449_v48, %v1448_v47 }
 0x2ca   :  { %7506 = vmatmul.mubr.msk.f32.vlgmr.msra.gmra.mrb[4].mxu0 %vm698_vm1, %v11295_v62  ;;  %7510 = vmatmul.mubr.msk.f32.vlgmr.msra.gmra.mrb[4].mxu1 %vm698_vm1, %v11295_v62  ;;  %v7528_v62 = vld [vmem:[%s12525_s5 + $0x350] sm:$0xff] }
 0x2cb   :  { %8909 = vmatpush3.bf16.msra.mxu0 %v11184_v3  ;;  %971 = vmatprep.mubr.f32.mxu0 %v12489_v38  ;;  %v7532_v3 = vld [vmem:[%s12525_s5 + $0x370] sm:$0xff] }
 0x2cc   :  { %1060 = vmatprep.mubr.f32.mxu1 %v12489_v38  ;;  %8911 = vmatprep.subr.bf16.mxu0 %v11187_v5  ;;  %v8952_v4 = vpack.c.bf16 %v7532_v3, %v7528_v62  ;;  %v8942_v62 = vpack.c.bf16 %v7563_v63, %v7559_v60  ;;  %v7558_v3 = vld [vmem:[%s12525_s5 + $0x440] sm:$0xff] }
 0x2cd   :  { %8949 = vmatpush1.bf16.msra.mxu1 %v8948_v59  ;;  %v7554_v59 = vld [vmem:[%s12525_s5 + $0x420] sm:$0xff]  ;;  %v8944_v2 = vpack.c.bf16 %v7562_v1, %v7558_v3 }
 0x2ce   :  { %7507 = vmatmul.mubr.msk.f32.gmra.mrb[6].mxu0 %vm698_vm1, %v11291_v61  ;;  %7511 = vmatmul.mubr.msk.f32.gmra.mrb[6].mxu1 %vm698_vm1, %v11291_v61  ;;  %v7537_v61 = vld [vmem:[%s12525_s5 + $0x398] sm:$0xff] }
 0x2cf   :  { %8913 = vmatpush3.bf16.msra.mxu0 %v11187_v5  ;;  %977 = vmatprep.mubr.f32.mxu0 %v12489_v38  ;;  %v7536_v5 = vld [vmem:[%s12525_s5 + $0x390] sm:$0xff]  ;;  %v8954_v16 = vpack.c.bf16 %v7541_v6, %v7537_v61 }
 0x2d0   :  { %1066 = vmatprep.mubr.f32.mxu1 %v12489_v38  ;;  %8915 = vmatprep.subr.bf16.mxu0 %v11196_v10 }
 0x2d1   :  { %8951 = vmatprep.subr.bf16.mxu1 %v8950_v0  ;;  %v8940_v0 = vpack.c.bf16 %v7554_v59, %v7550_v58 }
 0x2d2   :  { %7508 = vmatmul.mubr.msk.f32.gmra.mrb[8].mxu0 %vm698_vm1, %v11311_v18  ;;  %7512 = vmatmul.mubr.msk.f32.gmra.mrb[8].mxu1 %vm698_vm1, %v11311_v18  ;;  %v7527_v18 = vld [vmem:[%s12525_s5 + $0x348] sm:$0xff] }
 0x2d3   :  { %8917 = vmatpush3.bf16.msra.mxu0 %v11196_v10  ;;  %983 = vmatprep.mubr.f32.mxu0 %v12489_v38  ;;  %v8956_v10 = vpack.c.bf16 %v7540_v7, %v7536_v5  ;;  %v8926_v28 = vpack.c.bf16 %v7531_v19, %v7527_v18  ;;  %v1452_v7 = vld [vmem:[%s12526_s2 + $0x80] sm:$0xff]  ;;  %v11452_v18 = vpack.c.bf16 %v1455_v15, %v1454_v14  ;;  %v1438_v19 = vld [vmem:[%s12526_s2 + $0x10] sm:$0xff] }
 0x2d4   :  { %1072 = vmatprep.mubr.f32.mxu1 %v12489_v38  ;;  %8919 = vmatprep.subr.bf16.mxu0 %v11205_v13 }
 0x2d5   :  { %8953 = vmatpush1.bf16.msra.mxu1 %v8952_v4 }
 0x2d6   :  { %7509 = vmatmul.mubr.msk.f32.gmra.mrb[10].mxu0 %vm698_vm1, %v11307_v17  ;;  %7513 = vmatmul.mubr.msk.f32.gmra.mrb[10].mxu1 %vm698_vm1, %v11307_v17  ;;  %v7530_v17 = vld [vmem:[%s12525_s5 + $0x360] sm:$0xff] }
 0x2d7   :  { %8921 = vmatpush3.bf16.msra.mxu0 %v11205_v13  ;;  %8271 = vmatprep.mubr.msk.f32.mxu0 %vm401_vm0, %v1080_v11  ;;  %v8960_v13 = vpack.c.bf16 %v7548_v22, %v7544_v21  ;;  %v8928_v36 = vpack.c.bf16 %v7530_v17, %v7526_v29  ;;  %v11445_v11 = vpack.c.bf16 %v1453_v8, %v1452_v7  ;;  %v1457_v21 = vld [vmem:[%s12526_s2 + $0xa8] sm:$0xff]  ;;  %v1442_v17 = vld [vmem:[%s12526_s2 + $0x30] sm:$0xff] }
 0x2d8   :  { %8923 = vmatprep.subr.bf16.mxu0 %v8922_v12  ;;  %8955 = vmatprep.subr.bf16.mxu1 %v8954_v16  ;;  %v1437_v12 = vld [vmem:[%s12526_s2 + $0x8] sm:$0xff] }
 0x2d9   :  { %8957 = vmatpush1.bf16.msra.mxu1 %v8956_v10  ;;  %1395 = vmatprep.mubr.f32.mxu1 %v12489_v38  ;;  %v11450_v16 = vpack.c.bf16 %v1437_v12, %v1436_v9  ;;  %v1439_v10 = vld [vmem:[%s12526_s2 + $0x18] sm:$0xff] }
 0x2da   :  { %8272 = vmatmul.mubr.msk.f32.vlgmr.msra.gmra.mrb[12].mxu0 %vm401_vm0, %v1081_v23  ;;  %8959 = vmatprep.subr.bf16.mxu1 %v8958_v20  ;;  %v1456_v20 = vld [vmem:[%s12526_s2 + $0xa0] sm:$0xff]  ;;  %v11460_v22 = vpack.c.bf16 %v1439_v10, %v1438_v19  ;;  %v1485_v10 = vld [vmem:[%s12526_s2 + $0x188] sm:$0xff] }
 0x2db   :  { %8274 = vmatprep.mubr.msk.f32.mxu0 %vm401_vm0, %v1082_v27  ;;  %8925 = vmatpush1.bf16.msra.mxu0 %v8924_v24  ;;  %v11463_v23 = vpack.c.bf16 %v1457_v21, %v1456_v20  ;;  %v1440_v24 = vld [vmem:[%s12526_s2 + $0x20] sm:$0xff]  ;;  %v1459_v27 = vld [vmem:[%s12526_s2 + $0xb8] sm:$0xff]  ;;  %v12487_v20 = vmov 1.0  }
 0x2dc   :  { %8927 = vmatprep.subr.bf16.mxu0 %v8926_v28  ;;  %v11470_v28 = vpack.c.bf16 %v1441_v25, %v1440_v24  ;;  %v11473_v29 = vpack.c.bf16 %v1459_v27, %v1458_v26  ;;  %v1484_v19 = vld [vmem:[%s12526_s2 + $0x180] sm:$0xff]  ;;  %v1469_v25 = vld [vmem:[%s12526_s2 + $0x108] sm:$0xff]  ;;  %v1486_v26 = vld [vmem:[%s12526_s2 + $0x190] sm:$0xff] }
 0x2dd   :  { %8961 = vmatpush1.bf16.msra.mxu1 %v8960_v13  ;;  %v1461_v13 = vld [vmem:[%s12526_s2 + $0xc8] sm:$0xff]  ;;  %v11570_v21 = vpack.c.bf16 %v1485_v10, %v1484_v19  ;;  %v1468_v24 = vld [vmem:[%s12526_s2 + $0x100] sm:$0xff]  ;;  %v1487_v27 = vld [vmem:[%s12526_s2 + $0x198] sm:$0xff] }
 0x2de   :  { %8275 = vmatmul.mubr.msk.f32.gmra.mrb[14].mxu0 %vm401_vm0, %v1083_v35  ;;  %8963 = vmatprep.subr.bf16.mxu1 %v8962_v32  ;;  %v11480_v32 = vpack.c.bf16 %v1443_v30, %v1442_v17  ;;  %v11483_v33 = vpack.c.bf16 %v1461_v13, %v1460_v31  ;;  %v1445_v35 = vld [vmem:[%s12526_s2 + $0x48] sm:$0xff]  ;;  %v11576_v17 = vpack.c.bf16 %v1469_v25, %v1468_v24  ;;  %v1470_v31 = vld [vmem:[%s12526_s2 + $0x110] sm:$0xff]  ;;  %v1471_v13 = vld [vmem:[%s12526_s2 + $0x118] sm:$0xff] }
 0x2df   :  { %8929 = vmatpush1.bf16.msra.mxu0 %v8928_v36  ;;  %1306 = vmatprep.mubr.f32.mxu0 %v12489_v38  ;;  %v1462_v36 = vld [vmem:[%s12526_s2 + $0xd0] sm:$0xff]  ;;  %v11490_v39 = vpack.c.bf16 %v1445_v35, %v1444_v34  ;;  %v11579_v30 = vpack.c.bf16 %v1487_v27, %v1486_v26  ;;  %v1488_v34 = vld [vmem:[%s12526_s2 + $0x1a0] sm:$0xff]  ;;  %v1489_v35 = vld [vmem:[%s12526_s2 + $0x1a8] sm:$0xff] }
 0x2e0   :  { %8931 = vmatprep.subr.bf16.mxu0 %v8930_v40  ;;  %v11493_v40 = vpack.c.bf16 %v1463_v37, %v1462_v36  ;;  %v11588_v36 = vpack.c.bf16 %v1471_v13, %v1470_v31  ;;  %v11591_v37 = vpack.c.bf16 %v1489_v35, %v1488_v34  ;;  %v1450_v24 = vld [vmem:[%s12526_s2 + $0x70] sm:$0xff]  ;;  %v1451_v25 = vld [vmem:[%s12526_s2 + $0x78] sm:$0xff]  ;;  %v1496_v34 = vld [vmem:[%s12526_s2 + $0x1e0] sm:$0xff] }
 0x2e1   :  { %8965 = vmatpush1.bf16.msra.mxu1 %v8964_v45  ;;  %v11500_v45 = vpack.c.bf16 %v1447_v42, %v1446_v41  ;;  %v1472_v41 = vld [vmem:[%s12526_s2 + $0x120] sm:$0xff]  ;;  %v1473_v42 = vld [vmem:[%s12526_s2 + $0x128] sm:$0xff]  ;;  %v1478_v26 = vld [vmem:[%s12526_s2 + $0x150] sm:$0xff]  ;;  %v11628_v27 = vpack.c.bf16 %v1451_v25, %v1450_v24 }
 0x2e2   :  { %8967 = vmatprep.subr.bf16.mxu1 %v8966_v46  ;;  %v11503_v46 = vpack.c.bf16 %v1465_v44, %v1464_v43  ;;  %v1490_v43 = vld [vmem:[%s12526_s2 + $0x1b0] sm:$0xff]  ;;  %v1491_v44 = vld [vmem:[%s12526_s2 + $0x1b8] sm:$0xff]  ;;  %v11598_v47 = vpack.c.bf16 %v1473_v42, %v1472_v41  ;;  %v1497_v35 = vld [vmem:[%s12526_s2 + $0x1e8] sm:$0xff] }
 0x2e3   :  { %8933 = vmatpush1.bf16.msra.mxu0 %v8932_v49  ;;  %v1466_v49 = vld [vmem:[%s12526_s2 + $0xf0] sm:$0xff]  ;;  %v11601_v48 = vpack.c.bf16 %v1491_v44, %v1490_v43  ;;  %v1479_v31 = vld [vmem:[%s12526_s2 + $0x158] sm:$0xff]  ;;  %v11637_v41 = vpack.c.bf16 %v1497_v35, %v1496_v34  ;;  %v1480_v42 = vld [vmem:[%s12526_s2 + $0x160] sm:$0xff] }
 0x2e4   :  { %8935 = vmatprep.subr.bf16.mxu0 %v8934_v50  ;;  %v1467_v50 = vld [vmem:[%s12526_s2 + $0xf8] sm:$0xff]  ;;  %v11631_v13 = vpack.c.bf16 %v1479_v31, %v1478_v26  ;;  %v1481_v43 = vld [vmem:[%s12526_s2 + $0x168] sm:$0xff]  ;;  %v1500_v35 = vld [vmem:[#allocation5] sm:$0xff] }
 0x2e5   :  { %8969 = vmatpush1.bf16.msra.mxu1 %v8968_v55  ;;  %v11513_v52 = vpack.c.bf16 %v1467_v50, %v1466_v49  ;;  %v1474_v49 = vld [vmem:[%s12526_s2 + $0x130] sm:$0xff]  ;;  %v1475_v50 = vld [vmem:[%s12526_s2 + $0x138] sm:$0xff]  ;;  %v11641_v44 = vpack.c.bf16 %v1481_v43, %v1480_v42  ;;  %v1501_v26 = vld [vmem:[#allocation5 + $0x8] sm:$0xff] }
 0x2e6   :  { %v1505_v31 = vld [vmem:[#allocation5 + $0x28] sm:$0xff]  ;;  %v1504_v42 = vld [vmem:[#allocation5 + $0x20] sm:$0xff] }
 0x2e7   :  { %8937 = vmatpush1.bf16.msra.mxu0 %v8936_v56  ;;  %v11657_v34 = vpack.c.bf16 %v1505_v31, %v1501_v26  ;;  %v11660_v43 = vpack.c.bf16 %v1504_v42, %v1500_v35 }
 0x2e8   :  { %8939 = vmatprep.subr.bf16.mxu0 %v8938_v57 }
 0x2e9   :  { %12529 = vst [vmem:[#allocation67_spill] sm:$0xff] %v11660_v43 }
 0x2eb   :  { %8941 = vmatpush1.bf16.msra.mxu0 %v8940_v0 }
 0x2ec   :  { %8943 = vmatprep.subr.bf16.mxu0 %v8942_v62 }
 0x2ef   :  { %8945 = vmatpush1.bf16.msra.mxu0 %v8944_v2 }
 0x2f0   :  { %8987 = vmatprep.subr.bf16.mxu0 %v11445_v11 }
 0x3ad   :  { %v8273_v4 = vpop.f32.mrb[12].mxu0 }
 0x3ae   :  { %v1162_v61 = vpop.f32.mrb[13].mxu0 }
 0x3af   :  { %7566 = vmatmul.mubr.msk.f32.vlgmr.msra.gmra.mrb[4].mxu0 %vm698_vm1, %v1162_v61  ;;  %7570 = vmatmul.mubr.msk.f32.vlgmr.msra.gmra.mrb[4].mxu1 %vm698_vm1, %v1162_v61 }
 0x3b0   :  { %1312 = vmatprep.mubr.f32.mxu0 %v12489_v38  ;;  %1401 = vmatprep.mubr.f32.mxu1 %v12489_v38 }
 0x3b1   :  { %v8276_v6 = vpop.f32.mrb[14].mxu0  ;;  %8989 = vmatpush3.bf16.msra.mxu0 %v11450_v16 }
 0x3b2   :  { %v1172_v5 = vpop.f32.mrb[15].mxu0  ;;  %8991 = vmatprep.subr.bf16.mxu0 %v11452_v18 }
 0x3b3   :  { %7567 = vmatmul.mubr.msk.f32.gmra.mrb[6].mxu0 %vm698_vm1, %v8273_v4  ;;  %7571 = vmatmul.mubr.msk.f32.gmra.mrb[6].mxu1 %vm698_vm1, %v8273_v4 }
 0x3b4   :  { %1318 = vmatprep.mubr.f32.mxu0 %v12489_v38  ;;  %1407 = vmatprep.mubr.f32.mxu1 %v12489_v38 }
 0x3b5   :  { %8993 = vmatpush3.bf16.msra.mxu0 %v11460_v22 }
 0x3b6   :  { %8995 = vmatprep.subr.bf16.mxu0 %v11463_v23 }
 0x3b7   :  { %7568 = vmatmul.mubr.msk.f32.gmra.mrb[8].mxu0 %vm698_vm1, %v1172_v5  ;;  %7572 = vmatmul.mubr.msk.f32.gmra.mrb[8].mxu1 %vm698_vm1, %v1172_v5 }
 0x3b8   :  { %1324 = vmatprep.mubr.f32.mxu0 %v12489_v38  ;;  %1413 = vmatprep.mubr.f32.mxu1 %v12489_v38 }
 0x3b9   :  { %8997 = vmatpush3.bf16.msra.mxu0 %v11470_v28 }
 0x3ba   :  { %8999 = vmatprep.subr.bf16.mxu0 %v11473_v29 }
 0x3bb   :  { %7569 = vmatmul.mubr.msk.f32.gmra.mrb[10].mxu0 %vm698_vm1, %v8276_v6  ;;  %7573 = vmatmul.mubr.msk.f32.gmra.mrb[10].mxu1 %vm698_vm1, %v8276_v6 }
 0x3bc   :  { %1584 = vmatprep.mubr.f32.mxu1 %v12489_v38 }
 0x3bd   :  { %9001 = vmatpush3.bf16.msra.mxu0 %v11480_v32 }
 0x3be   :  { %9003 = vmatprep.subr.bf16.mxu0 %v11483_v33 }
 0x3c1   :  { %9005 = vmatpush3.bf16.msra.mxu0 %v11490_v39 }
 0x3c2   :  { %9007 = vmatprep.subr.bf16.mxu0 %v11493_v40 }
 0x3c5   :  { %9009 = vmatpush3.bf16.msra.mxu0 %v11500_v45 }
 0x3c6   :  { %9011 = vmatprep.subr.bf16.mxu0 %v11503_v46 }
 0x3c9   :  { %9013 = vmatpush3.bf16.msra.mxu0 %v11510_v51 }
 0x3ca   :  { %9015 = vmatprep.subr.bf16.mxu0 %v11513_v52 }
 0x3cd   :  { %9017 = vmatpush3.bf16.msra.mxu0 %v11628_v27 }
 0x3ce   :  { %9051 = vmatprep.subr.bf16.mxu0 %v11657_v34 }
 0x482   :  { %v11517_v53 = vpop.f32.mrb[4].mxu0  ;;  %v11519_v54 = vpop.f32.mrb[4].mxu1 }
 0x483   :  { %v11521_v55 = vpop.f32.mrb[5].mxu0  ;;  %v11523_v56 = vpop.f32.mrb[5].mxu1 }
 0x486   :  { %v11525_v57 = vpop.f32.mrb[6].mxu0  ;;  %v11527_v58 = vpop.f32.mrb[6].mxu1 }
 0x487   :  { %v8972_v59 = vpack.c.bf16 %v11525_v57, %v11517_v53  ;;  %v8980_v60 = vpack.c.bf16 %v11527_v58, %v11519_v54  ;;  %v11533_v63 = vpop.f32.mrb[7].mxu0  ;;  %v11535_v0 = vpop.f32.mrb[7].mxu1 }
 0x488   :  { %v8970_v62 = vpack.c.bf16 %v11533_v63, %v11521_v55  ;;  %v8978_v3 = vpack.c.bf16 %v11535_v0, %v11523_v56 }
 0x48a   :  { %v11541_v1 = vpop.f32.mrb[8].mxu0  ;;  %v11543_v2 = vpop.f32.mrb[8].mxu1  ;;  %8971 = vmatprep.subr.bf16.mxu1 %v8970_v62  ;;  %v11608_v62 = vpack.c.bf16 %v1475_v50, %v1474_v49  ;;  %v1498_v49 = vld [vmem:[%s12526_s2 + $0x1f0] sm:$0xff]  ;;  %v1499_v50 = vld [vmem:[%s12526_s2 + $0x1f8] sm:$0xff] }
 0x48b   :  { %v11545_v4 = vpop.f32.mrb[9].mxu0  ;;  %v11547_v61 = vpop.f32.mrb[9].mxu1  ;;  %8973 = vmatpush1.bf16.msra.mxu1 %v8972_v59  ;;  %v1492_v59 = vld [vmem:[%s12526_s2 + $0x1c0] sm:$0xff] }
 0x48e   :  { %v11549_v6 = vpop.f32.mrb[10].mxu0  ;;  %v11551_v5 = vpop.f32.mrb[10].mxu1 }
 0x48f   :  { %v8976_v7 = vpack.c.bf16 %v11549_v6, %v11541_v1  ;;  %v8984_v8 = vpack.c.bf16 %v11551_v5, %v11543_v2  ;;  %v11557_v9 = vpop.f32.mrb[11].mxu0  ;;  %v11559_v12 = vpop.f32.mrb[11].mxu1 }
 0x490   :  { %v8974_v14 = vpack.c.bf16 %v11557_v9, %v11545_v4  ;;  %v8982_v15 = vpack.c.bf16 %v11559_v12, %v11547_v61 }
 0x492   :  { %8975 = vmatprep.subr.bf16.mxu1 %v8974_v14  ;;  %v1494_v14 = vld [vmem:[%s12526_s2 + $0x1d0] sm:$0xff] }
 0x493   :  { %8977 = vmatpush1.bf16.msra.mxu1 %v8976_v7  ;;  %v1476_v7 = vld [vmem:[%s12526_s2 + $0x140] sm:$0xff] }
 0x494   :  { %8979 = vmatprep.subr.bf16.mxu1 %v8978_v3 }
 0x496   :  { %7574 = vmatmul.mubr.msk.f32.vlgmr.msra.gmra.mrb[12].mxu1 %vm1516_vm2, %v12487_v20 }
 0x497   :  { %8981 = vmatpush1.bf16.msra.mxu1 %v8980_v60  ;;  %1655 = vmatprep.mubr.f32.mxu1 %v12489_v38  ;;  %v1493_v60 = vld [vmem:[%s12526_s2 + $0x1c8] sm:$0xff] }
 0x498   :  { %8983 = vmatprep.subr.bf16.mxu1 %v8982_v15  ;;  %v11611_v3 = vpack.c.bf16 %v1493_v60, %v1492_v59  ;;  %v1495_v15 = vld [vmem:[%s12526_s2 + $0x1d8] sm:$0xff]  ;;  %v11646_v59 = vpack.c.bf16 %v1499_v50, %v1498_v49  ;;  %v1482_v60 = vld [vmem:[%s12526_s2 + $0x170] sm:$0xff]  ;;  %v1509_v49 = vld [vmem:[#allocation5 + $0x48] sm:$0xff] }
 0x499   :  { %v11621_v10 = vpack.c.bf16 %v1495_v15, %v1494_v14  ;;  %v1513_v50 = vld [vmem:[#allocation5 + $0x68] sm:$0xff] }
 0x49a   :  { %12527 = vst [vmem:[#allocation65_spill] sm:$0xff] %v11646_v59 }
 0x49b   :  { %8985 = vmatpush1.bf16.msra.mxu1 %v8984_v8  ;;  %v1477_v8 = vld [vmem:[%s12526_s2 + $0x148] sm:$0xff] }
 0x49c   :  { %9019 = vmatprep.subr.bf16.mxu1 %v11570_v21  ;;  %v11618_v19 = vpack.c.bf16 %v1477_v8, %v1476_v7  ;;  %v1483_v7 = vld [vmem:[%s12526_s2 + $0x178] sm:$0xff] }
 0x49d   :  { %v11652_v8 = vpack.c.bf16 %v1483_v7, %v1482_v60  ;;  %v11663_v60 = vpack.c.bf16 %v1513_v50, %v1509_v49  ;;  %v1508_v7 = vld [vmem:[#allocation5 + $0x40] sm:$0xff] }
 0x49e   :  { %7575 = vmatmul.mubr.msk.f32.vlgmr.msra.gmra.mrb[14].mxu1 %vm1516_vm2, %v12487_v20 }
 0x49f   :  { %9021 = vmatpush3.bf16.msra.mxu1 %v11576_v17  ;;  %12528 = vst [vmem:[#allocation66_spill] sm:$0xff] %v11652_v8  ;;  %12530 = vst [vmem:[#allocation68_spill] sm:$0xff] %v11663_v60 }
 0x4a0   :  { %9023 = vmatprep.subr.bf16.mxu1 %v11579_v30 }
 0x4a3   :  { %9025 = vmatpush3.bf16.msra.mxu1 %v11588_v36 }
 0x4a4   :  { %9027 = vmatprep.subr.bf16.mxu1 %v11591_v37 }
 0x4a7   :  { %9029 = vmatpush3.bf16.msra.mxu1 %v11598_v47 }
 0x4a8   :  { %9031 = vmatprep.subr.bf16.mxu1 %v11601_v48 }
 0x4ab   :  { %9033 = vmatpush3.bf16.msra.mxu1 %v11608_v62 }
 0x4ac   :  { %9035 = vmatprep.subr.bf16.mxu1 %v11611_v3 }
 0x4af   :  { %9037 = vmatpush3.bf16.msra.mxu1 %v11618_v19 }
 0x4b0   :  { %9039 = vmatprep.subr.bf16.mxu1 %v11621_v10 }
 0x4b3   :  { %9041 = vmatpush3.bf16.msra.mxu1 %v11631_v13 }
 0x4b4   :  { %9043 = vmatprep.subr.bf16.mxu1 %v11637_v41 }
 0x4b7   :  { %9045 = vmatpush3.bf16.msra.mxu1 %v11641_v44 }
 0x4b8   :  { %9047 = vmatprep.subr.bf16.mxu1 %v11646_v59 }
 0x4bb   :  { %9049 = vmatpush3.bf16.msra.mxu1 %v11652_v8 }
 0x569   :  { %v1586_v14 = vpop.f32.mrb[12].mxu1 }
 0x56a   :  { %v1588_v15 = vpop.f32.mrb[13].mxu1 }
 0x56b   :  { %1726 = vmatprep.mubr.f32.mxu0 %v1588_v15 }
 0x56c   :  { %1727 = vmatmul.mubr.f32.vlgmr.msra.gmra.mrb[16].mxu0 %v1586_v14  ;;  %v1512_v14 = vld [vmem:[#allocation5 + $0x60] sm:$0xff] }
 0x56d   :  { %1870 = vmatprep.mubr.f32.mxu0 %v12489_v38  ;;  %9053 = vmatpush1.bf16.msra.mxu0 %v11660_v43  ;;  %v11665_v15 = vpack.c.bf16 %v1512_v14, %v1508_v7  ;;  %v1506_v43 = vld [vmem:[#allocation5 + $0x30] sm:$0xff]  ;;  %v1511_v7 = vld [vmem:[#allocation5 + $0x58] sm:$0xff] }
 0x56e   :  { %9055 = vmatprep.subr.bf16.mxu0 %v11663_v60  ;;  %v1515_v14 = vld [vmem:[#allocation5 + $0x78] sm:$0xff] }
 0x56f   :  { %12531 = vst [vmem:[#allocation69_spill] sm:$0xff] %v11665_v15  ;;  %v11674_v59 = vpack.c.bf16 %v1515_v14, %v1511_v7 }
 0x571   :  { %v1657_v24 = vpop.f32.mrb[14].mxu1  ;;  %9057 = vmatpush1.bf16.msra.mxu0 %v11665_v15 }
 0x572   :  { %v1659_v25 = vpop.f32.mrb[15].mxu1 }
 0x573   :  { %1796 = vmatprep.mubr.f32.mxu1 %v1659_v25  ;;  %v1507_v25 = vld [vmem:[#allocation5 + $0x38] sm:$0xff] }
 0x574   :  { %1797 = vmatmul.mubr.f32.vlgmr.msra.gmra.mrb[16].mxu1 %v1657_v24  ;;  %v1503_v24 = vld [vmem:[#allocation5 + $0x18] sm:$0xff] }
 0x575   :  { %2060 = vmatprep.mubr.f32.mxu1 %v12489_v38  ;;  %v11669_v26 = vpack.c.bf16 %v1507_v25, %v1503_v24  ;;  %v1502_v38 = vld [vmem:[#allocation5 + $0x10] sm:$0xff] }
 0x576   :  { %v11672_v60 = vpack.c.bf16 %v1506_v43, %v1502_v38  ;;  %v1510_v24 = vld [vmem:[#allocation5 + $0x50] sm:$0xff]  ;;  %v1948_v38 = vlaneseq }
 0x577   :  { %9059 = vmatprep.subr.bf16.mxu0 %v11669_v26  ;;  %v1514_v25 = vld [vmem:[#allocation5 + $0x70] sm:$0xff] }
 0x63f   :  { %v7691_v31 = vpop.f32.mrb[16].mxu0 }
 0x640   :  { %v7692_v35 = vpop.f32.mrb[17].mxu0 }
 0x641   :  { %v7693_v42 = vadd.f32 %v7692_v35, %v7691_v31  ;;  %v11678_v31 = vpack.c.bf16 %v1514_v25, %v1510_v24  ;;  %v12532_v35 = vmov 0.0  }
 0x647   :  { %v7726_v20 = vpop.f32.mrb[16].mxu1 }
 0x648   :  { %v7727_v49 = vpop.f32.mrb[17].mxu1 }
 0x649   :  { %v7728_v50 = vadd.f32 %v7727_v49, %v7726_v20  ;;  %v1949_v20 = vshrl.u32 %v1948_v38, 7 }
 0x64b   :  { %v1799_v8 = vadd.f32 %v7728_v50, %v7693_v42 }
 0x64d   :  { %v1802_v15 = vmul.f32 0.001953125, %v1799_v8  ;;  %v11685_v8 = vsub.s32 0, %v1949_v20 }
 0x64f   :  { %7576 = vmatmul.mubr.msk.f32.vlgmr.msra.gmra.mrb[18].mxu0 %vm1516_vm2, %v1802_v15 }
 0x650   :  { %9061 = vmatpush1.bf16.msra.mxu0 %v11672_v60  ;;  %1941 = vmatprep.mubr.f32.mxu0 %v12532_v35 }
 0x651   :  { %9063 = vmatprep.subr.bf16.mxu0 %v11674_v59 }
 0x654   :  { %9065 = vmatpush1.bf16.msra.mxu0 %v11678_v31 }
 0x657   :  { %7577 = vmatmul.mubr.msk.f32.vlgmr.msra.gmra.mrb[20].mxu0 %vm1516_vm2, %v1802_v15 }
 0x658   :  { %2131 = vmatprep.mubr.f32.mxu0 %v12532_v35 }
 0x722   :  { %v1872_v43 = vpop.f32.mrb[18].mxu0 }
 0x723   :  { %v1951_v42 = vrot.slane %v1872_v43, %v11685_v8  ;;  %v1874_v49 = vpop.f32.mrb[19].mxu0 }
 0x724   :  { %v1955_v50 = vrot.slane %v1874_v49, %v11685_v8 }
 0x725   :  { %v11690_v7 = vsub.f32 %v11517_v53, %v1951_v42  ;;  %v11693_v14 = vsub.f32 %v11525_v57, %v1951_v42  ;;  %v11696_v15 = vsub.f32 %v11541_v1, %v1951_v42  ;;  %v11699_v24 = vsub.f32 %v11549_v6, %v1951_v42 }
 0x726   :  { %v11702_v25 = vsub.f32 %v11521_v55, %v1955_v50  ;;  %v11705_v38 = vsub.f32 %v11533_v63, %v1955_v50  ;;  %v11708_v20 = vsub.f32 %v11545_v4, %v1955_v50  ;;  %v11711_v53 = vsub.f32 %v11557_v9, %v1955_v50 }
 0x727   :  { %12533 = vst [vmem:[#allocation70_spill] sm:$0xff] %v11690_v7  ;;  %12534 = vst [vmem:[#allocation71_spill] sm:$0xff] %v11693_v14  ;;  %v1980_v57 = vmul.f32 %v11690_v7, %v11690_v7  ;;  %v1984_v1 = vmul.f32 %v11693_v14, %v11693_v14  ;;  %v1988_v14 = vmul.f32 %v11696_v15, %v11696_v15 }
 0x728   :  { %12535 = vst [vmem:[#allocation72_spill] sm:$0xff] %v11702_v25  ;;  %12536 = vst [vmem:[#allocation73_spill] sm:$0xff] %v11705_v38  ;;  %v1981_v6 = vmul.f32 %v11702_v25, %v11702_v25  ;;  %v1985_v55 = vmul.f32 %v11705_v38, %v11705_v38  ;;  %v1989_v63 = vmul.f32 %v11708_v20, %v11708_v20 }
 0x729   :  { %12537 = vst [vmem:[#allocation74_spill] sm:$0xff] %v11708_v20  ;;  %12538 = vst [vmem:[#allocation75_spill] sm:$0xff] %v11711_v53  ;;  %v1993_v4 = vmul.f32 %v11711_v53, %v11711_v53  ;;  %v9068_v50 = vpack.c.bf16 %v1984_v1, %v1980_v57  ;;  %v1992_v25 = vmul.f32 %v11699_v24, %v11699_v24 }
 0x72a   :  { %v1943_v9 = vpop.f32.mrb[20].mxu0  ;;  %v9066_v43 = vpack.c.bf16 %v1985_v55, %v1981_v6 }
 0x72b   :  { %v1959_v42 = vrot.slane %v1943_v9, %v11685_v8  ;;  %v1945_v49 = vpop.f32.mrb[21].mxu0  ;;  %v9070_v7 = vpack.c.bf16 %v1993_v4, %v1989_v63  ;;  %v9072_v63 = vpack.c.bf16 %v1992_v25, %v1988_v14  ;;  %v12539_v9 = vmov 1.0  }
 0x72c   :  { %v1963_v38 = vrot.slane %v1945_v49, %v11685_v8  ;;  %9067 = vmatprep.subr.bf16.mxu1 %v9066_v43 }
 0x72d   :  { %v11732_v20 = vsub.f32 %v11519_v54, %v1959_v42  ;;  %v11735_v53 = vsub.f32 %v11527_v58, %v1959_v42  ;;  %v11738_v6 = vsub.f32 %v11543_v2, %v1959_v42  ;;  %v11741_v57 = vsub.f32 %v11551_v5, %v1959_v42  ;;  %9069 = vmatpush1.bf16.msra.mxu1 %v9068_v50 }
 0x72e   :  { %9071 = vmatprep.subr.bf16.mxu1 %v9070_v7  ;;  %v11744_v1 = vsub.f32 %v11523_v56, %v1963_v38  ;;  %v11747_v55 = vsub.f32 %v11535_v0, %v1963_v38  ;;  %v11750_v54 = vsub.f32 %v11547_v61, %v1963_v38  ;;  %v11753_v58 = vsub.f32 %v11559_v12, %v1963_v38 }
 0x72f   :  { %v1982_v2 = vmul.f32 %v11732_v20, %v11732_v20  ;;  %v1986_v5 = vmul.f32 %v11735_v53, %v11735_v53  ;;  %v1990_v25 = vmul.f32 %v11738_v6, %v11738_v6  ;;  %v1994_v38 = vmul.f32 %v11741_v57, %v11741_v57 }
 0x730   :  { %v1983_v56 = vmul.f32 %v11744_v1, %v11744_v1  ;;  %v1987_v0 = vmul.f32 %v11747_v55, %v11747_v55  ;;  %v1991_v61 = vmul.f32 %v11750_v54, %v11750_v54  ;;  %v1995_v12 = vmul.f32 %v11753_v58, %v11753_v58 }
 0x731   :  { %9073 = vmatpush1.bf16.msra.mxu1 %v9072_v63  ;;  %v9076_v14 = vpack.c.bf16 %v1986_v5, %v1982_v2  ;;  %v9080_v43 = vpack.c.bf16 %v1994_v38, %v1990_v25  ;;  %v12547_v5 = vld [vmem:[#allocation72_spill] sm:$0xff] }
 0x732   :  { %v9074_v7 = vpack.c.bf16 %v1987_v0, %v1983_v56  ;;  %9083 = vmatprep.subr.bf16.mxu1 %v11445_v11  ;;  %v9078_v4 = vpack.c.bf16 %v1995_v12, %v1991_v61  ;;  %v12540_v11 = vld [vmem:[#allocation65_spill] sm:$0xff]  ;;  %v12549_v12 = vld [vmem:[#allocation74_spill] sm:$0xff] }
 0x733   :  { %v12548_v0 = vld [vmem:[#allocation73_spill] sm:$0xff] }
 0x734   :  { %9075 = vmatprep.subr.bf16.mxu0 %v9074_v7  ;;  %7578 = vmatmul.mubr.msk.f32.vlgmr.msra.gmra.mrb[18].mxu1 %vm1516_vm2, %v12539_v9 }
 0x735   :  { %9077 = vmatpush1.bf16.msra.mxu0 %v9076_v14  ;;  %9085 = vmatpush3.bf16.msra.mxu1 %v11450_v16  ;;  %v12541_v16 = vld [vmem:[#allocation66_spill] sm:$0xff]  ;;  %v12550_v14 = vld [vmem:[#allocation75_spill] sm:$0xff] }
 0x736   :  { %9079 = vmatprep.subr.bf16.mxu0 %v9078_v4  ;;  %9087 = vmatprep.subr.bf16.mxu1 %v11452_v18 }
 0x739   :  { %9081 = vmatpush1.bf16.msra.mxu0 %v9080_v43  ;;  %9089 = vmatpush3.bf16.msra.mxu1 %v11460_v22 }
 0x73a   :  { %9115 = vmatprep.subr.bf16.mxu0 %v11570_v21  ;;  %9091 = vmatprep.subr.bf16.mxu1 %v11463_v23  ;;  %v12542_v23 = vld [vmem:[#allocation67_spill] sm:$0xff] }
 0x73c   :  { %7579 = vmatmul.mubr.msk.f32.vlgmr.msra.gmra.mrb[22].mxu0 %vm1516_vm2, %v12539_v9 }
 0x73d   :  { %9117 = vmatpush3.bf16.msra.mxu0 %v11576_v17  ;;  %9093 = vmatpush3.bf16.msra.mxu1 %v11470_v28  ;;  %v12543_v28 = vld [vmem:[#allocation68_spill] sm:$0xff] }
 0x73e   :  { %9119 = vmatprep.subr.bf16.mxu0 %v11579_v30  ;;  %9095 = vmatprep.subr.bf16.mxu1 %v11473_v29 }
 0x741   :  { %9121 = vmatpush3.bf16.msra.mxu0 %v11588_v36  ;;  %9097 = vmatpush3.bf16.msra.mxu1 %v11480_v32  ;;  %v12544_v32 = vld [vmem:[#allocation69_spill] sm:$0xff]  ;;  %v2279_v36 = vld [vmem:[#allocation7] sm:$0x1] }
 0x742   :  { %9123 = vmatprep.subr.bf16.mxu0 %v11591_v37  ;;  %9099 = vmatprep.subr.bf16.mxu1 %v11483_v33 }
 0x745   :  { %9125 = vmatpush3.bf16.msra.mxu0 %v11598_v47  ;;  %9101 = vmatpush3.bf16.msra.mxu1 %v11490_v39 }
 0x746   :  { %9127 = vmatprep.subr.bf16.mxu0 %v11601_v48  ;;  %9103 = vmatprep.subr.bf16.mxu1 %v11493_v40  ;;  %v2428_v48 = vld [vmem:[#allocation8] sm:$0x1] }
 0x749   :  { %9129 = vmatpush3.bf16.msra.mxu0 %v11608_v62  ;;  %9105 = vmatpush3.bf16.msra.mxu1 %v11500_v45 }
 0x74a   :  { %9131 = vmatprep.subr.bf16.mxu0 %v11611_v3  ;;  %9107 = vmatprep.subr.bf16.mxu1 %v11503_v46 }
 0x74d   :  { %9133 = vmatpush3.bf16.msra.mxu0 %v11618_v19  ;;  %9109 = vmatpush3.bf16.msra.mxu1 %v11510_v51 }
 0x74e   :  { %9135 = vmatprep.subr.bf16.mxu0 %v11621_v10  ;;  %9111 = vmatprep.subr.bf16.mxu1 %v11513_v52 }
 0x751   :  { %9137 = vmatpush3.bf16.msra.mxu0 %v11631_v13  ;;  %9113 = vmatpush3.bf16.msra.mxu1 %v11628_v27 }
 0x752   :  { %9139 = vmatprep.subr.bf16.mxu0 %v11637_v41  ;;  %9147 = vmatprep.subr.bf16.mxu1 %v11657_v34 }
 0x755   :  { %9141 = vmatpush3.bf16.msra.mxu0 %v11641_v44 }
 0x756   :  { %9143 = vmatprep.subr.bf16.mxu0 %v12540_v11 }
 0x759   :  { %9145 = vmatpush3.bf16.msra.mxu0 %v12541_v16 }
 0x75a   :  { %9155 = vmatprep.subr.bf16.mxu0 %v11669_v26 }
 0x807   :  { %v2062_v18 = vpop.f32.mrb[18].mxu1 }
 0x808   :  { %v2064_v22 = vpop.f32.mrb[19].mxu1 }
 0x809   :  { %2202 = vmatprep.mubr.f32.mxu1 %v2064_v22 }
 0x80a   :  { %2203 = vmatmul.mubr.f32.vlgmr.msra.gmra.mrb[20].mxu1 %v2062_v18 }
 0x80b   :  { %9149 = vmatpush1.bf16.msra.mxu1 %v12542_v23  ;;  %2350 = vmatprep.mubr.f32.mxu1 %v12532_v35 }
 0x80c   :  { %9151 = vmatprep.subr.bf16.mxu1 %v12543_v28 }
 0x80f   :  { %v2133_v29 = vpop.f32.mrb[22].mxu0  ;;  %9153 = vmatpush1.bf16.msra.mxu1 %v12544_v32 }
 0x810   :  { %v2135_v33 = vpop.f32.mrb[23].mxu0  ;;  %9163 = vmatprep.subr.bf16.mxu1 %v11657_v34 }
 0x811   :  { %2272 = vmatprep.mubr.f32.mxu0 %v2135_v33 }
 0x812   :  { %2273 = vmatmul.mubr.f32.vlgmr.msra.gmra.mrb[24].mxu0 %v2133_v29 }
 0x813   :  { %9157 = vmatpush1.bf16.msra.mxu0 %v11672_v60  ;;  %2421 = vmatprep.mubr.f32.mxu0 %v12532_v35 }
 0x814   :  { %9159 = vmatprep.subr.bf16.mxu0 %v11674_v59 }
 0x817   :  { %9161 = vmatpush1.bf16.msra.mxu0 %v11678_v31 }
 0x818   :  { %9171 = vmatprep.subr.bf16.mxu0 %v11669_v26 }
 0x8dd   :  { %v7761_v39 = vpop.f32.mrb[20].mxu1 }
 0x8de   :  { %v7762_v40 = vpop.f32.mrb[21].mxu1 }
 0x8df   :  { %v7763_v45 = vadd.f32 %v7762_v40, %v7761_v39 }
 0x8e5   :  { %v7796_v46 = vpop.f32.mrb[24].mxu0 }
 0x8e6   :  { %v7797_v51 = vpop.f32.mrb[25].mxu0 }
 0x8e7   :  { %v7798_v52 = vadd.f32 %v7797_v51, %v7796_v46 }
 0x8e9   :  { %v2275_v21 = vadd.f32 %v7798_v52, %v7763_v45 }
 0x8eb   :  { %v2278_v17 = vmul.f32 0.001953125, %v2275_v21 }
 0x8ed   :  { %v2280_v30 = vadd.f32 1e-05, %v2278_v17 }
 0x8ef   :  { %10242 = vrsqrt.f32 %v2280_v30 }
 0x8f9   :  { %v10243_v37 = vpop.eup %10242 }
 0x8fa   :  { %v2282_v47 = vmul.f32 %v10243_v37, %v2279_v36 }
 0x8fc   :  { %7580 = vmatmul.mubr.msk.f32.vlgmr.msra.gmra.mrb[22].mxu1 %vm1516_vm2, %v2282_v47  ;;  %7581 = vmatmul.mubr.msk.f32.vlgmr.msra.gmra.mrb[26].mxu0 %vm1516_vm2, %v2282_v47 }
 0x8fd   :  { %9165 = vmatpush1.bf16.msra.mxu1 %v12542_v23  ;;  %9173 = vmatpush1.bf16.msra.mxu0 %v11672_v60  ;;  %v12546_v60 = vld [vmem:[#allocation71_spill] sm:$0xff] }
 0x8fe   :  { %9167 = vmatprep.subr.bf16.mxu1 %v12543_v28  ;;  %9175 = vmatprep.subr.bf16.mxu0 %v11674_v59  ;;  %v12545_v59 = vld [vmem:[#allocation70_spill] sm:$0xff] }
 0x8ff   :  { %2496 = vmatprep.mubr.f32.mxu1 %v12532_v35  ;;  %2567 = vmatprep.mubr.f32.mxu0 %v12532_v35 }
 0x901   :  { %9169 = vmatpush1.bf16.msra.mxu1 %v12544_v32  ;;  %9177 = vmatpush1.bf16.msra.mxu0 %v11678_v31 }
 0x904   :  { %7582 = vmatmul.mubr.msk.f32.vlgmr.msra.gmra.mrb[24].mxu1 %vm1516_vm2, %v2428_v48  ;;  %7583 = vmatmul.mubr.msk.f32.vlgmr.msra.gmra.mrb[28].mxu0 %vm1516_vm2, %v2428_v48 }
 0x905   :  { %2758 = vmatprep.mubr.f32.mxu1 %v12532_v35  ;;  %2835 = vmatprep.mubr.f32.mxu0 %v12532_v35 }
 0x9cf   :  { %v2352_v62 = vpop.f32.mrb[22].mxu1  ;;  %v2423_v3 = vpop.f32.mrb[26].mxu0 }
 0x9d0   :  { %v2354_v19 = vpop.f32.mrb[23].mxu1  ;;  %v2425_v10 = vpop.f32.mrb[27].mxu0  ;;  %v2577_v27 = vrot.slane %v2352_v62, %v11685_v8  ;;  %v2585_v13 = vrot.slane %v2423_v3, %v11685_v8 }
 0x9d1   :  { %v2581_v41 = vrot.slane %v2354_v19, %v11685_v8  ;;  %v2589_v44 = vrot.slane %v2425_v10, %v11685_v8 }
 0x9d2   :  { %v2590_v34 = vmul.f32 %v2577_v27, %v12545_v59  ;;  %v2594_v26 = vmul.f32 %v2577_v27, %v12546_v60  ;;  %v2598_v31 = vmul.f32 %v2577_v27, %v11696_v15  ;;  %v2602_v42 = vmul.f32 %v2577_v27, %v11699_v24 }
 0x9d3   :  { %v2592_v49 = vmul.f32 %v2585_v13, %v11732_v20  ;;  %v2596_v50 = vmul.f32 %v2585_v13, %v11735_v53  ;;  %v2600_v63 = vmul.f32 %v2585_v13, %v11738_v6  ;;  %v2604_v2 = vmul.f32 %v2585_v13, %v11741_v57 }
 0x9d4   :  { %v2591_v56 = vmul.f32 %v2581_v41, %v12547_v5  ;;  %v2595_v61 = vmul.f32 %v2581_v41, %v12548_v0  ;;  %v2599_v7 = vmul.f32 %v2581_v41, %v12549_v12  ;;  %v2603_v25 = vmul.f32 %v2581_v41, %v12550_v14 }
 0x9d5   :  { %v2593_v24 = vmul.f32 %v2589_v44, %v11744_v1  ;;  %v2597_v20 = vmul.f32 %v2589_v44, %v11747_v55  ;;  %v2601_v43 = vmul.f32 %v2589_v44, %v11750_v54  ;;  %v2605_v11 = vmul.f32 %v2589_v44, %v11753_v58 }
 0x9d7   :  { %v2498_v38 = vpop.f32.mrb[24].mxu1  ;;  %v2569_v15 = vpop.f32.mrb[28].mxu0 }
 0x9d8   :  { %v2609_v53 = vrot.slane %v2498_v38, %v11685_v8  ;;  %v2617_v6 = vrot.slane %v2569_v15, %v11685_v8  ;;  %v2500_v4 = vpop.f32.mrb[25].mxu1  ;;  %v2571_v57 = vpop.f32.mrb[29].mxu0 }
 0x9d9   :  { %v2613_v16 = vrot.slane %v2500_v4, %v11685_v8  ;;  %v2621_v18 = vrot.slane %v2571_v57, %v11685_v8  ;;  %v2686_v57 = vld [vmem:[#allocation10] sm:$0xff] }
 0x9da   :  { %v2622_v22 = vadd.f32 %v2609_v53, %v2590_v34  ;;  %v2626_v23 = vadd.f32 %v2609_v53, %v2594_v26  ;;  %v11857_v28 = vadd.f32 %v2609_v53, %v2598_v31  ;;  %v11859_v1 = vadd.f32 %v2609_v53, %v2602_v42 }
 0x9db   :  { %v2624_v55 = vadd.f32 %v2617_v6, %v2592_v49  ;;  %v2628_v29 = vadd.f32 %v2617_v6, %v2596_v50  ;;  %v11861_v32 = vadd.f32 %v2617_v6, %v2600_v63  ;;  %v11863_v33 = vadd.f32 %v2617_v6, %v2604_v2 }
 0x9dc   :  { %v2623_v39 = vadd.f32 %v2613_v16, %v2591_v56  ;;  %v2627_v54 = vadd.f32 %v2613_v16, %v2595_v61  ;;  %v2631_v40 = vadd.f32 %v2613_v16, %v2599_v7  ;;  %v2635_v58 = vadd.f32 %v2613_v16, %v2603_v25  ;;  %v2687_v16 = vld [vmem:[#allocation10 + $0x8] sm:$0xff] }
 0x9dd   :  { %v2625_v45 = vadd.f32 %v2621_v18, %v2593_v24  ;;  %v2629_v46 = vadd.f32 %v2621_v18, %v2597_v20  ;;  %v2633_v51 = vadd.f32 %v2621_v18, %v2601_v43  ;;  %v2637_v52 = vadd.f32 %v2621_v18, %v2605_v11  ;;  %v3141_v43 = vld [vmem:[#allocation11 + $0x408] sm:$0xff]  ;;  %v3143_v11 = vld [vmem:[#allocation11 + $0x418] sm:$0xff] }
 0x9de   :  { %vm2639_vm3 = vcmp.gt.f32.partialorder %v2623_v39, 0.0  ;;  %vm2643_vm4 = vcmp.gt.f32.partialorder %v2627_v54, 0.0  ;;  %v2655_v21 = vmul.f32 0.01, %v2623_v39  ;;  %v2659_v17 = vmul.f32 0.01, %v2627_v54 }
 0x9df   :  { %vm2641_vm5 = vcmp.gt.f32.partialorder %v2625_v45, 0.0  ;;  %vm2645_vm6 = vcmp.gt.f32.partialorder %v2629_v46, 0.0  ;;  %v2657_v30 = vmul.f32 0.01, %v2625_v45  ;;  %v2661_v36 = vmul.f32 0.01, %v2629_v46 }
 0x9e0   :  { %v2671_v37 = vsel %vm2639_vm3, %v2623_v39, %v2655_v21  ;;  %v2675_v47 = vsel %vm2643_vm4, %v2627_v54, %v2659_v17  ;;  %vm2638_vm7 = vcmp.gt.f32.partialorder %v2622_v22, 0.0  ;;  %vm2642_vm8 = vcmp.gt.f32.partialorder %v2626_v23, 0.0  ;;  %v3146_v39 = vld [vmem:[#allocation11 + $0x430] sm:$0xff]  ;;  %v3149_v54 = vld [vmem:[#allocation11 + $0x448] sm:$0xff]  ;;  %v3155_v17 = vld [vmem:[#allocation11 + $0x478] sm:$0xff] }
 0x9e1   :  { %v11865_v48 = vpack.c.bf16 %v2675_v47, %v2671_v37  ;;  %v2673_v62 = vsel %vm2641_vm5, %v2625_v45, %v2657_v30  ;;  %v2677_v3 = vsel %vm2645_vm6, %v2629_v46, %v2661_v36  ;;  %v2654_v19 = vmul.f32 0.01, %v2622_v22  ;;  %v3148_v46 = vld [vmem:[#allocation11 + $0x440] sm:$0xff]  ;;  %v3153_v21 = vld [vmem:[#allocation11 + $0x468] sm:$0xff]  ;;  %v3154_v47 = vld [vmem:[#allocation11 + $0x470] sm:$0xff] }
 0x9e2   :  { %v11867_v10 = vpack.c.bf16 %v2677_v3, %v2673_v62  ;;  %v2658_v27 = vmul.f32 0.01, %v2626_v23  ;;  %vm2640_vm9 = vcmp.gt.f32.partialorder %v2624_v55, 0.0  ;;  %vm2644_vm10 = vcmp.gt.f32.partialorder %v2628_v29, 0.0  ;;  %v3152_v37 = vld [vmem:[#allocation11 + $0x460] sm:$0xff]  ;;  %v3157_v62 = vld [vmem:[#allocation11 + $0x488] sm:$0xff] }
 0x9e3   :  { %9179 = vmatprep.subr.bf16.mxu1 %v11865_v48  ;;  %v2670_v13 = vsel %vm2638_vm7, %v2622_v22, %v2654_v19  ;;  %v2656_v41 = vmul.f32 0.01, %v2624_v55  ;;  %v2660_v44 = vmul.f32 0.01, %v2628_v29  ;;  %vm2647_vm11 = vcmp.gt.f32.partialorder %v2631_v40, 0.0  ;;  %v3140_v22 = vld [vmem:[#allocation11 + $0x400] sm:$0xff] }
 0x9e4   :  { %9187 = vmatprep.subr.bf16.mxu0 %v11867_v10  ;;  %v2674_v59 = vsel %vm2642_vm8, %v2626_v23, %v2658_v27  ;;  %vm2651_vm12 = vcmp.gt.f32.partialorder %v2635_v58, 0.0  ;;  %v2663_v34 = vmul.f32 0.01, %v2631_v40  ;;  %v2667_v60 = vmul.f32 0.01, %v2635_v58  ;;  %v3142_v23 = vld [vmem:[#allocation11 + $0x410] sm:$0xff] }
 0x9e5   :  { %v11871_v26 = vpack.c.bf16 %v2674_v59, %v2670_v13  ;;  %v2672_v31 = vsel %vm2640_vm9, %v2624_v55, %v2656_v41  ;;  %v2676_v42 = vsel %vm2644_vm10, %v2628_v29, %v2660_v44  ;;  %vm2649_vm13 = vcmp.gt.f32.partialorder %v2633_v51, 0.0  ;;  %v2977_v55 = vld [vmem:[#allocation10 + $0x10] sm:$0xff]  ;;  %v3159_v3 = vld [vmem:[#allocation11 + $0x498] sm:$0xff]  ;;  %v3158_v41 = vld [vmem:[#allocation11 + $0x490] sm:$0xff] }
 0x9e6   :  { %v11873_v49 = vpack.c.bf16 %v2676_v42, %v2672_v31  ;;  %v2679_v50 = vsel %vm2647_vm11, %v2631_v40, %v2663_v34  ;;  %v2683_v63 = vsel %vm2651_vm12, %v2635_v58, %v2667_v60  ;;  %vm2653_vm14 = vcmp.gt.f32.partialorder %v2637_v52, 0.0  ;;  %v3151_v40 = vld [vmem:[#allocation11 + $0x458] sm:$0xff]  ;;  %v3156_v13 = vld [vmem:[#allocation11 + $0x480] sm:$0xff]  ;;  %v3161_v44 = vld [vmem:[#allocation11 + $0x4a8] sm:$0xff] }
 0x9e7   :  { %9181 = vmatpush1.bf16.msra.mxu1 %v11871_v26  ;;  %v11876_v2 = vpack.c.bf16 %v2683_v63, %v2679_v50  ;;  %v2665_v5 = vmul.f32 0.01, %v2633_v51  ;;  %v2669_v56 = vmul.f32 0.01, %v2637_v52  ;;  %vm2646_vm15 = vcmp.gt.f32.partialorder %v11857_v28, 0.0  ;;  %v3163_v59 = vld [vmem:[#allocation11 + $0x4b8] sm:$0xff] }
 0x9e8   :  { %9189 = vmatpush1.bf16.msra.mxu0 %v11873_v49  ;;  %vm2650_vm0 = vcmp.gt.f32.partialorder %v11859_v1, 0.0  ;;  %v2662_v0 = vmul.f32 0.01, %v11857_v28  ;;  %v2666_v61 = vmul.f32 0.01, %v11859_v1  ;;  %vm2648_vm1 = vcmp.gt.f32.partialorder %v11861_v32, 0.0 }
 0x9e9   :  { %9183 = vmatprep.subr.bf16.mxu1 %v11876_v2  ;;  %v2681_v12 = vsel %vm2649_vm13, %v2633_v51, %v2665_v5  ;;  %v2685_v7 = vsel %vm2653_vm14, %v2637_v52, %v2669_v56  ;;  %vm2652_vm3 = vcmp.gt.f32.partialorder %v11863_v33, 0.0  ;;  %v2664_v14 = vmul.f32 0.01, %v11861_v32  ;;  %v3150_v51 = vld [vmem:[#allocation11 + $0x450] sm:$0xff]  ;;  %v2978_v52 = vld [vmem:[#allocation10 + $0x18] sm:$0xff]  ;;  %v3160_v60 = vld [vmem:[#allocation11 + $0x4a0] sm:$0xff] }
 0x9ea   :  { %v11888_v25 = vpack.c.bf16 %v2685_v7, %v2681_v12  ;;  %v2678_v38 = vsel %vm2646_vm15, %v11857_v28, %v2662_v0  ;;  %v2682_v15 = vsel %vm2650_vm0, %v11859_v1, %v2666_v61  ;;  %v2668_v24 = vmul.f32 0.01, %v11863_v33  ;;  %v3145_v28 = vld [vmem:[#allocation11 + $0x428] sm:$0xff]  ;;  %v3147_v1 = vld [vmem:[#allocation11 + $0x438] sm:$0xff]  ;;  %v3164_v63 = vld [vmem:[#allocation11 + $0x4c0] sm:$0xff] }
 0x9eb   :  { %v11893_v20 = vpack.c.bf16 %v2682_v15, %v2678_v38  ;;  %v2680_v53 = vsel %vm2648_vm1, %v11861_v32, %v2664_v14  ;;  %v9210_v18 = vpack.c.bf16 %v3143_v11, %v3141_v43  ;;  %v9212_v29 = vpack.c.bf16 %v3142_v23, %v3140_v22  ;;  %v3165_v31 = vld [vmem:[#allocation11 + $0x4c8] sm:$0xff]  ;;  %v3167_v42 = vld [vmem:[#allocation11 + $0x4d8] sm:$0xff]  ;;  %v3168_v12 = vld [vmem:[#allocation11 + $0x4e0] sm:$0xff] }
 0x9ec   :  { %9191 = vmatprep.subr.bf16.mxu0 %v11888_v25  ;;  %v2684_v6 = vsel %vm2652_vm3, %v11863_v33, %v2668_v24  ;;  %v9214_v32 = vpack.c.bf16 %v3147_v1, %v3145_v28  ;;  %v3144_v33 = vld [vmem:[#allocation11 + $0x420] sm:$0xff]  ;;  %v9218_v45 = vpack.c.bf16 %v3151_v40, %v3149_v54  ;;  %v9220_v30 = vpack.c.bf16 %v3150_v51, %v3148_v46  ;;  %v3169_v5 = vld [vmem:[#allocation11 + $0x4e8] sm:$0xff]  ;;  %v3171_v56 = vld [vmem:[#allocation11 + $0x4f8] sm:$0xff] }
 0x9ed   :  { %9185 = vmatpush1.bf16.msra.mxu1 %v11893_v20  ;;  %v11899_v4 = vpack.c.bf16 %v2684_v6, %v2680_v53  ;;  %v9216_v58 = vpack.c.bf16 %v3146_v39, %v3144_v33  ;;  %v9222_v36 = vpack.c.bf16 %v3155_v17, %v3153_v21  ;;  %v9224_v19 = vpack.c.bf16 %v3154_v47, %v3152_v37  ;;  %v3170_v7 = vld [vmem:[#allocation11 + $0x4f0] sm:$0xff]  ;;  %v3173_v14 = vld [vmem:[#allocation11 + $0x508] sm:$0xff]  ;;  %v3172_v24 = vld [vmem:[#allocation11 + $0x500] sm:$0xff] }
 0x9ee   :  { %9195 = vmatprep.subr.bf16.mxu1 %v11865_v48  ;;  %v9226_v27 = vpack.c.bf16 %v3159_v3, %v3157_v62  ;;  %v9228_v34 = vpack.c.bf16 %v3158_v41, %v3156_v13  ;;  %v9238_v61 = vpack.c.bf16 %v3171_v56, %v3169_v5  ;;  %v9240_v38 = vpack.c.bf16 %v3170_v7, %v3168_v12  ;;  %v3177_v53 = vld [vmem:[#allocation11 + $0x528] sm:$0xff]  ;;  %v3179_v6 = vld [vmem:[#allocation11 + $0x538] sm:$0xff]  ;;  %v3176_v43 = vld [vmem:[#allocation11 + $0x520] sm:$0xff] }
 0x9ef   :  { %9193 = vmatpush1.bf16.msra.mxu0 %v11899_v4  ;;  %v3178_v11 = vld [vmem:[#allocation11 + $0x530] sm:$0xff]  ;;  %v3180_v28 = vld [vmem:[#allocation11 + $0x540] sm:$0xff]  ;;  %v3189_v40 = vld [vmem:[#allocation11 + $0x588] sm:$0xff]  ;;  %vm4066_vm4 = vcmask 130048   ;;  %vm10866_vm9 = vmmov 0   ;;  %vm5188_vm10 = vcmask 64512  }
 0x9f0   :  { %9203 = vmatprep.subr.bf16.mxu0 %v11867_v10  ;;  %7584 = vmatmul.mubr.msk.f32.vlgmr.msra.gmra.mrb[26].mxu1 %vm1516_vm2, %v2686_v57  ;;  %v9248_v22 = vpack.c.bf16 %v3178_v11, %v3176_v43  ;;  %v3182_v1 = vld [vmem:[#allocation11 + $0x550] sm:$0xff]  ;;  %v3184_v39 = vld [vmem:[#allocation11 + $0x560] sm:$0xff]  ;;  %v3193_v21 = vld [vmem:[#allocation11 + $0x5a8] sm:$0xff]  ;;  %vm6713_vm12 = vcmask 1041408   ;;  %vm6710_vm13 = vcmask 15360   ;;  %vm7352_vm14 = vcmask 123904  }
 0x9f1   :  { %9197 = vmatpush1.bf16.msra.mxu1 %v11871_v26  ;;  %2764 = vmatprep.mubr.f32.mxu1 %v12532_v35  ;;  %v3186_v54 = vld [vmem:[#allocation11 + $0x570] sm:$0xff]  ;;  %v3188_v51 = vld [vmem:[#allocation11 + $0x580] sm:$0xff]  ;;  %v3195_v17 = vld [vmem:[#allocation11 + $0x5b8] sm:$0xff] }
 0x9f2   :  { %7586 = vmatmul.mubr.msk.f32.vlgmr.msra.gmra.mrb[30].mxu0 %vm1516_vm2, %v2686_v57  ;;  %9199 = vmatprep.subr.bf16.mxu1 %v11876_v2  ;;  %v9246_v57 = vpack.c.bf16 %v3179_v6, %v3177_v53  ;;  %v3192_v37 = vld [vmem:[#allocation11 + $0x5a0] sm:$0xff]  ;;  %v3194_v47 = vld [vmem:[#allocation11 + $0x5b0] sm:$0xff]  ;;  %v3197_v3 = vld [vmem:[#allocation11 + $0x5c8] sm:$0xff] }
 0x9f3   :  { %9205 = vmatpush1.bf16.msra.mxu0 %v11873_v49  ;;  %2841 = vmatprep.mubr.f32.mxu0 %v12532_v35  ;;  %v9264_v62 = vpack.c.bf16 %v3194_v47, %v3192_v37  ;;  %v3198_v41 = vld [vmem:[#allocation11 + $0x5d0] sm:$0xff]  ;;  %v3204_v7 = vld [vmem:[#allocation11 + $0x600] sm:$0xff]  ;;  %v3213_v43 = vld [vmem:[#allocation11 + $0x648] sm:$0xff] }
 0x9f4   :  { %9207 = vmatprep.subr.bf16.mxu0 %v11888_v25  ;;  %7585 = vmatmul.mubr.msk.f32.gmra.mrb[28].mxu1 %vm1516_vm2, %v2687_v16  ;;  %v3215_v11 = vld [vmem:[#allocation11 + $0x658] sm:$0xff]  ;;  %v3225_v37 = vld [vmem:[#allocation11 + $0x6a8] sm:$0xff] }
 0x9f5   :  { %9201 = vmatpush1.bf16.msra.mxu1 %v11893_v20  ;;  %3049 = vmatprep.mubr.f32.mxu1 %v12532_v35  ;;  %v3227_v47 = vld [vmem:[#allocation11 + $0x6b8] sm:$0xff] }
 0x9f6   :  { %7587 = vmatmul.mubr.msk.f32.gmra.mrb[32].mxu0 %vm1516_vm2, %v2687_v16  ;;  %9211 = vmatprep.subr.bf16.mxu1 %v9210_v18  ;;  %v3181_v16 = vld [vmem:[#allocation11 + $0x548] sm:$0xff]  ;;  %v3183_v18 = vld [vmem:[#allocation11 + $0x558] sm:$0xff] }
 0x9f7   :  { %9209 = vmatpush1.bf16.msra.mxu0 %v11899_v4  ;;  %3126 = vmatprep.mubr.f32.mxu0 %v12532_v35  ;;  %v9250_v23 = vpack.c.bf16 %v3183_v18, %v3181_v16 }
 0x9f8   :  { %9467 = vmatprep.subr.bf16.mxu0 %v11865_v48  ;;  %7588 = vmatmul.mubr.msk.f32.vlgmr.msra.gmra.mrb[30].mxu1 %vm1516_vm2, %v2977_v55  ;;  %v11929_v48 = vld [vmem:[#allocation10 + $0x20] sm:$0xff] }
 0x9f9   :  { %3055 = vmatprep.mubr.f32.mxu1 %v12532_v35  ;;  %9213 = vmatpush1.bf16.msra.mxu1 %v9212_v29  ;;  %v3187_v29 = vld [vmem:[#allocation11 + $0x578] sm:$0xff] }
 0x9fa   :  { %7590 = vmatmul.mubr.msk.f32.vlgmr.msra.gmra.mrb[34].mxu0 %vm1516_vm2, %v2977_v55  ;;  %9215 = vmatprep.subr.bf16.mxu1 %v9214_v32  ;;  %v3185_v55 = vld [vmem:[#allocation11 + $0x568] sm:$0xff]  ;;  %v9252_v32 = vpack.c.bf16 %v3182_v1, %v3180_v28  ;;  %v9282_v28 = vpack.c.bf16 %v3215_v11, %v3213_v43  ;;  %v3212_v1 = vld [vmem:[#allocation11 + $0x640] sm:$0xff]  ;;  %v3242_v43 = vld [vmem:[#allocation11 + $0x730] sm:$0xff] }
 0x9fb   :  { %9469 = vmatpush1.bf16.msra.mxu0 %v11871_v26  ;;  %3132 = vmatprep.mubr.f32.mxu0 %v12532_v35  ;;  %v3162_v26 = vld [vmem:[#allocation11 + $0x4b0] sm:$0xff]  ;;  %v9254_v33 = vpack.c.bf16 %v3187_v29, %v3185_v55  ;;  %v3245_v11 = vld [vmem:[#allocation11 + $0x748] sm:$0xff] }
 0x9fc   :  { %9471 = vmatprep.subr.bf16.mxu0 %v11876_v2  ;;  %7589 = vmatmul.mubr.msk.f32.gmra.mrb[32].mxu1 %vm1516_vm2, %v2978_v52  ;;  %v9232_v50 = vpack.c.bf16 %v3162_v26, %v3160_v60  ;;  %v3166_v2 = vld [vmem:[#allocation11 + $0x4d0] sm:$0xff] }
 0x9fd   :  { %9217 = vmatpush1.bf16.msra.mxu1 %v9216_v58  ;;  %v9236_v0 = vpack.c.bf16 %v3166_v2, %v3164_v63  ;;  %v3191_v58 = vld [vmem:[#allocation11 + $0x598] sm:$0xff]  ;;  %v3202_v26 = vld [vmem:[#allocation11 + $0x5f0] sm:$0xff] }
 0x9fe   :  { %7591 = vmatmul.mubr.msk.f32.gmra.mrb[36].mxu0 %vm1516_vm2, %v2978_v52  ;;  %9219 = vmatprep.subr.bf16.mxu1 %v9218_v45  ;;  %v9256_v45 = vpack.c.bf16 %v3186_v54, %v3184_v39  ;;  %v9258_v46 = vpack.c.bf16 %v3191_v58, %v3189_v40  ;;  %v3190_v52 = vld [vmem:[#allocation11 + $0x590] sm:$0xff]  ;;  %v3578_v63 = vld [vmem:[#allocation10 + $0x28] sm:$0xff] }
 0x9ff   :  { %9473 = vmatpush1.bf16.msra.mxu0 %v11893_v20  ;;  %3649 = vmatprep.mubr.f32.mxu0 %v12532_v35  ;;  %v3174_v20 = vld [vmem:[#allocation11 + $0x510] sm:$0xff] }
 0xa00   :  { %9475 = vmatprep.subr.bf16.mxu0 %v11867_v10  ;;  %v9230_v10 = vpack.c.bf16 %v3163_v59, %v3161_v44  ;;  %v3201_v59 = vld [vmem:[#allocation11 + $0x5e8] sm:$0xff]  ;;  %v3214_v55 = vld [vmem:[#allocation11 + $0x650] sm:$0xff] }
 0xa01   :  { %9221 = vmatpush1.bf16.msra.mxu1 %v9220_v30  ;;  %v9260_v30 = vpack.c.bf16 %v3190_v52, %v3188_v51  ;;  %v9284_v40 = vpack.c.bf16 %v3214_v55, %v3212_v1  ;;  %v3221_v51 = vld [vmem:[#allocation11 + $0x688] sm:$0xff]  ;;  %v3223_v52 = vld [vmem:[#allocation11 + $0x698] sm:$0xff]  ;;  %v3246_v1 = vld [vmem:[#allocation11 + $0x750] sm:$0xff] }
 0xa02   :  { %7592 = vmatmul.mubr.msk.f32.vlgmr.msra.gmra.mrb[38].mxu0 %vm1516_vm2, %v11929_v48  ;;  %9223 = vmatprep.subr.bf16.mxu1 %v9222_v36  ;;  %v9262_v36 = vpack.c.bf16 %v3195_v17, %v3193_v21  ;;  %v9290_v17 = vpack.c.bf16 %v3223_v52, %v3221_v51  ;;  %v3249_v55 = vld [vmem:[#allocation11 + $0x768] sm:$0xff] }
 0xa03   :  { %9477 = vmatpush1.bf16.msra.mxu0 %v11873_v49  ;;  %3655 = vmatprep.mubr.f32.mxu0 %v12532_v35  ;;  %v9234_v49 = vpack.c.bf16 %v3167_v42, %v3165_v31  ;;  %v3205_v42 = vld [vmem:[#allocation11 + $0x608] sm:$0xff] }
 0xa04   :  { %9479 = vmatprep.subr.bf16.mxu0 %v11888_v25  ;;  %v3175_v25 = vld [vmem:[#allocation11 + $0x518] sm:$0xff] }
 0xa05   :  { %9225 = vmatpush1.bf16.msra.mxu1 %v9224_v19  ;;  %v9242_v15 = vpack.c.bf16 %v3175_v25, %v3173_v14  ;;  %v3199_v19 = vld [vmem:[#allocation11 + $0x5d8] sm:$0xff]  ;;  %v3209_v14 = vld [vmem:[#allocation11 + $0x628] sm:$0xff] }
 0xa06   :  { %9227 = vmatprep.subr.bf16.mxu1 %v9226_v27  ;;  %v3196_v27 = vld [vmem:[#allocation11 + $0x5c0] sm:$0xff]  ;;  %v9266_v13 = vpack.c.bf16 %v3199_v19, %v3197_v3  ;;  %7593 = vmatmul.mubr.msk.f32.gmra.mrb[40].mxu0 %vm1516_vm2, %v3578_v63  ;;  %v3211_v25 = vld [vmem:[#allocation11 + $0x638] sm:$0xff]  ;;  %v9294_v3 = vpack.c.bf16 %v3227_v47, %v3225_v37 }
 0xa07   :  { %9481 = vmatpush1.bf16.msra.mxu0 %v11899_v4  ;;  %v9244_v4 = vpack.c.bf16 %v3174_v20, %v3172_v24  ;;  %v9268_v44 = vpack.c.bf16 %v3198_v41, %v3196_v27  ;;  %3726 = vmatprep.mubr.f32.mxu0 %v12532_v35  ;;  %v9278_v6 = vpack.c.bf16 %v3211_v25, %v3209_v14  ;;  %v3224_v19 = vld [vmem:[#allocation11 + $0x6a0] sm:$0xff]  ;;  %v3226_v27 = vld [vmem:[#allocation11 + $0x6b0] sm:$0xff]  ;;  %v3231_v41 = vld [vmem:[#allocation11 + $0x6d8] sm:$0xff] }
 0xa08   :  { %v3236_v25 = vld [vmem:[#allocation11 + $0x700] sm:$0xff] }
 0xa09   :  { %9229 = vmatpush1.bf16.msra.mxu1 %v9228_v34  ;;  %v3203_v34 = vld [vmem:[#allocation11 + $0x5f8] sm:$0xff] }
 0xa0a   :  { %9231 = vmatprep.subr.bf16.mxu1 %v9230_v10  ;;  %v3200_v10 = vld [vmem:[#allocation11 + $0x5e0] sm:$0xff]  ;;  %v9270_v60 = vpack.c.bf16 %v3203_v34, %v3201_v59  ;;  %7594 = vmatmul.mubr.msk.f32.vlgmr.msra.gmra.mrb[42].mxu0 %vm1516_vm2, %v11929_v48  ;;  %v3206_v48 = vld [vmem:[#allocation11 + $0x610] sm:$0xff] }
 0xa0b   :  { %v9272_v31 = vpack.c.bf16 %v3202_v26, %v3200_v10  ;;  %3732 = vmatprep.mubr.f32.mxu0 %v12532_v35  ;;  %v9276_v20 = vpack.c.bf16 %v3206_v48, %v3204_v7  ;;  %v3228_v34 = vld [vmem:[#allocation11 + $0x6c0] sm:$0xff]  ;;  %v3230_v10 = vld [vmem:[#allocation11 + $0x6d0] sm:$0xff]  ;;  %v3235_v26 = vld [vmem:[#allocation11 + $0x6f8] sm:$0xff] }
 0xa0c   :  { %v3239_v7 = vld [vmem:[#allocation11 + $0x718] sm:$0xff] }
 0xa0d   :  { %9233 = vmatpush1.bf16.msra.mxu1 %v9232_v50  ;;  %v3207_v50 = vld [vmem:[#allocation11 + $0x618] sm:$0xff] }
 0xa0e   :  { %9235 = vmatprep.subr.bf16.mxu1 %v9234_v49  ;;  %v9274_v49 = vpack.c.bf16 %v3207_v50, %v3205_v42  ;;  %7595 = vmatmul.mubr.msk.f32.gmra.mrb[44].mxu0 %vm1516_vm2, %v3578_v63  ;;  %v3232_v50 = vld [vmem:[#allocation11 + $0x6e0] sm:$0xff]  ;;  %v3237_v63 = vld [vmem:[#allocation11 + $0x708] sm:$0xff] }
 0xa0f   :  { %4133 = vmatprep.mubr.f32.mxu0 %v12532_v35  ;;  %v9306_v14 = vpack.c.bf16 %v3239_v7, %v3237_v63 }
 0xa11   :  { %9237 = vmatpush1.bf16.msra.mxu1 %v9236_v0 }
 0xa12   :  { %9239 = vmatprep.subr.bf16.mxu1 %v9238_v61 }
 0xa15   :  { %9241 = vmatpush1.bf16.msra.mxu1 %v9240_v38 }
 0xa16   :  { %9243 = vmatprep.subr.bf16.mxu1 %v9242_v15 }
 0xa19   :  { %9245 = vmatpush1.bf16.msra.mxu1 %v9244_v4  ;;  %v3208_v4 = vld [vmem:[#allocation11 + $0x620] sm:$0xff] }
 0xa1a   :  { %9247 = vmatprep.subr.bf16.mxu1 %v9246_v57  ;;  %v3210_v57 = vld [vmem:[#allocation11 + $0x630] sm:$0xff] }
 0xa1d   :  { %9249 = vmatpush1.bf16.msra.mxu1 %v9248_v22  ;;  %v9280_v22 = vpack.c.bf16 %v3210_v57, %v3208_v4  ;;  %v3240_v57 = vld [vmem:[#allocation11 + $0x720] sm:$0xff] }
 0xa1e   :  { %9251 = vmatprep.subr.bf16.mxu1 %v9250_v23 }
 0xa21   :  { %9253 = vmatpush1.bf16.msra.mxu1 %v9252_v32  ;;  %v3217_v32 = vld [vmem:[#allocation11 + $0x668] sm:$0xff] }
 0xa22   :  { %9255 = vmatprep.subr.bf16.mxu1 %v9254_v33  ;;  %v3219_v33 = vld [vmem:[#allocation11 + $0x678] sm:$0xff] }
 0xa23   :  { %v9286_v58 = vpack.c.bf16 %v3219_v33, %v3217_v32 }
 0xa25   :  { %9257 = vmatpush1.bf16.msra.mxu1 %v9256_v45  ;;  %v3216_v45 = vld [vmem:[#allocation11 + $0x660] sm:$0xff] }
 0xa26   :  { %9259 = vmatprep.subr.bf16.mxu1 %v9258_v46  ;;  %v3218_v46 = vld [vmem:[#allocation11 + $0x670] sm:$0xff] }
 0xa27   :  { %v9288_v21 = vpack.c.bf16 %v3218_v46, %v3216_v45  ;;  %v3253_v45 = vld [vmem:[#allocation11 + $0x788] sm:$0xff]  ;;  %v3255_v46 = vld [vmem:[#allocation11 + $0x798] sm:$0xff] }
 0xa28   :  { %v9322_v52 = vpack.c.bf16 %v3255_v46, %v3253_v45  ;;  %v2864_v45 = vld [vmem:[#allocation11 + $0x80] sm:$0xff]  ;;  %v2866_v46 = vld [vmem:[#allocation11 + $0x90] sm:$0xff] }
 0xa29   :  { %9261 = vmatpush1.bf16.msra.mxu1 %v9260_v30  ;;  %v3220_v30 = vld [vmem:[#allocation11 + $0x680] sm:$0xff] }
 0xa2a   :  { %9263 = vmatprep.subr.bf16.mxu1 %v9262_v36  ;;  %v3222_v36 = vld [vmem:[#allocation11 + $0x690] sm:$0xff] }
 0xa2d   :  { %9265 = vmatpush1.bf16.msra.mxu1 %v9264_v62  ;;  %v9292_v62 = vpack.c.bf16 %v3222_v36, %v3220_v30  ;;  %v3257_v30 = vld [vmem:[#allocation11 + $0x7a8] sm:$0xff]  ;;  %v3259_v36 = vld [vmem:[#allocation11 + $0x7b8] sm:$0xff] }
 0xa2e   :  { %9267 = vmatprep.subr.bf16.mxu1 %v9266_v13  ;;  %v3229_v13 = vld [vmem:[#allocation11 + $0x6c8] sm:$0xff]  ;;  %v9326_v47 = vpack.c.bf16 %v3259_v36, %v3257_v30  ;;  %v2875_v36 = vld [vmem:[#allocation11 + $0xd8] sm:$0xff] }
 0xa2f   :  { %v9298_v59 = vpack.c.bf16 %v3231_v41, %v3229_v13  ;;  %v2873_v30 = vld [vmem:[#allocation11 + $0xc8] sm:$0xff] }
 0xa31   :  { %9269 = vmatpush1.bf16.msra.mxu1 %v9268_v44  ;;  %v9296_v44 = vpack.c.bf16 %v3226_v27, %v3224_v19  ;;  %v3261_v19 = vld [vmem:[#allocation11 + $0x7c8] sm:$0xff]  ;;  %v3263_v27 = vld [vmem:[#allocation11 + $0x7d8] sm:$0xff] }
 0xa32   :  { %9271 = vmatprep.subr.bf16.mxu1 %v9270_v60  ;;  %v3233_v60 = vld [vmem:[#allocation11 + $0x6e8] sm:$0xff]  ;;  %v9330_v41 = vpack.c.bf16 %v3263_v27, %v3261_v19  ;;  %v2879_v27 = vld [vmem:[#allocation11 + $0xf8] sm:$0xff] }
 0xa33   :  { %v9302_v42 = vpack.c.bf16 %v3235_v26, %v3233_v60  ;;  %v2877_v19 = vld [vmem:[#allocation11 + $0xe8] sm:$0xff] }
 0xa35   :  { %9273 = vmatpush1.bf16.msra.mxu1 %v9272_v31  ;;  %v9300_v31 = vpack.c.bf16 %v3230_v10, %v3228_v34  ;;  %v3265_v34 = vld [vmem:[#allocation11 + $0x7e8] sm:$0xff]  ;;  %v3267_v10 = vld [vmem:[#allocation11 + $0x7f8] sm:$0xff] }
 0xa36   :  { %9275 = vmatprep.subr.bf16.mxu1 %v9274_v49  ;;  %v3234_v49 = vld [vmem:[#allocation11 + $0x6f0] sm:$0xff]  ;;  %v9334_v26 = vpack.c.bf16 %v3267_v10, %v3265_v34  ;;  %v2881_v34 = vld [vmem:[#allocation11 + $0x108] sm:$0xff]  ;;  %v2883_v10 = vld [vmem:[#allocation11 + $0x118] sm:$0xff] }
 0xa37   :  { %v9304_v48 = vpack.c.bf16 %v3234_v49, %v3232_v50  ;;  %v2849_v50 = vld [vmem:[#allocation11 + $0x8] sm:$0xff]  ;;  %v2851_v49 = vld [vmem:[#allocation11 + $0x18] sm:$0xff] }
 0xa38   :  { %v9338_v7 = vpack.c.bf16 %v2851_v49, %v2849_v50  ;;  %v2885_v50 = vld [vmem:[#allocation11 + $0x128] sm:$0xff]  ;;  %v2887_v49 = vld [vmem:[#allocation11 + $0x138] sm:$0xff] }
 0xac3   :  { %v11945_v2 = vpop.f32.mrb[26].mxu1 }
 0xac4   :  { %v11947_v5 = vpop.f32.mrb[27].mxu1 }
 0xac5   :  { %v11949_v56 = vpop.f32.mrb[30].mxu0 }
 0xac6   :  { %v11951_v0 = vpop.f32.mrb[31].mxu0 }
 0xac7   :  { %v11953_v61 = vpop.f32.mrb[28].mxu1 }
 0xac8   :  { %v11955_v12 = vpop.f32.mrb[29].mxu1 }
 0xac9   :  { %v11957_v38 = vpop.f32.mrb[32].mxu0 }
 0xaca   :  { %v11959_v15 = vpop.f32.mrb[33].mxu0 }
 0xacb   :  { %v3051_v24 = vpop.f32.mrb[30].mxu1 }
 0xacc   :  { %v3053_v53 = vpop.f32.mrb[31].mxu1 }
 0xacd   :  { %3332 = vmatprep.mubr.f32.mxu1 %v3053_v53  ;;  %v11961_v16 = vpop.f32.mrb[34].mxu0  ;;  %v3243_v53 = vld [vmem:[#allocation11 + $0x738] sm:$0xff] }
 0xace   :  { %3333 = vmatmul.mubr.f32.vlgmr.msra.gmra.mrb[34].mxu1 %v3051_v24  ;;  %v3130_v18 = vpop.f32.mrb[35].mxu0  ;;  %v3238_v24 = vld [vmem:[#allocation11 + $0x710] sm:$0xff] }
 0xacf   :  { %9277 = vmatpush1.bf16.msra.mxu1 %v9276_v20  ;;  %v3057_v23 = vpop.f32.mrb[32].mxu1  ;;  %v3241_v20 = vld [vmem:[#allocation11 + $0x728] sm:$0xff] }
 0xad0   :  { %9279 = vmatprep.subr.bf16.mxu1 %v9278_v6  ;;  %v3059_v29 = vpop.f32.mrb[33].mxu1  ;;  %v9308_v6 = vpack.c.bf16 %v3238_v24, %v3236_v25  ;;  %v9310_v4 = vpack.c.bf16 %v3243_v53, %v3241_v20  ;;  %v2853_v25 = vld [vmem:[#allocation11 + $0x28] sm:$0xff]  ;;  %v2855_v24 = vld [vmem:[#allocation11 + $0x38] sm:$0xff] }
 0xad1   :  { %3338 = vmatprep.mubr.f32.mxu1 %v3059_v29  ;;  %v11963_v39 = vpop.f32.mrb[36].mxu0  ;;  %v3251_v29 = vld [vmem:[#allocation11 + $0x778] sm:$0xff]  ;;  %v9342_v53 = vpack.c.bf16 %v2855_v24, %v2853_v25  ;;  %v2889_v25 = vld [vmem:[#allocation11 + $0x148] sm:$0xff] }
 0xad2   :  { %3339 = vmatmul.mubr.f32.gmra.mrb[36].mxu1 %v3057_v23  ;;  %v11965_v54 = vpop.f32.mrb[37].mxu0  ;;  %v9318_v33 = vpack.c.bf16 %v3251_v29, %v3249_v55  ;;  %v2891_v24 = vld [vmem:[#allocation11 + $0x158] sm:$0xff] }
 0xad3   :  { %9281 = vmatpush1.bf16.msra.mxu1 %v9280_v22  ;;  %3409 = vmatprep.mubr.f32.mxu1 %v3130_v18  ;;  %v3247_v18 = vld [vmem:[#allocation11 + $0x758] sm:$0xff]  ;;  %v9312_v22 = vpack.c.bf16 %v3242_v43, %v3240_v57  ;;  %v2857_v57 = vld [vmem:[#allocation11 + $0x48] sm:$0xff] }
 0xad4   :  { %9283 = vmatprep.subr.bf16.mxu1 %v9282_v28  ;;  %v9314_v23 = vpack.c.bf16 %v3247_v18, %v3245_v11  ;;  %v3244_v28 = vld [vmem:[#allocation11 + $0x740] sm:$0xff]  ;;  %v2859_v43 = vld [vmem:[#allocation11 + $0x58] sm:$0xff] }
 0xad5   :  { %v9316_v32 = vpack.c.bf16 %v3246_v1, %v3244_v28  ;;  %v9346_v18 = vpack.c.bf16 %v2859_v43, %v2857_v57  ;;  %v2861_v28 = vld [vmem:[#allocation11 + $0x68] sm:$0xff]  ;;  %v2863_v1 = vld [vmem:[#allocation11 + $0x78] sm:$0xff] }
 0xad6   :  { %v9350_v29 = vpack.c.bf16 %v2863_v1, %v2861_v28  ;;  %v2893_v57 = vld [vmem:[#allocation11 + $0x168] sm:$0xff]  ;;  %v2895_v43 = vld [vmem:[#allocation11 + $0x178] sm:$0xff] }
 0xad7   :  { %9285 = vmatpush1.bf16.msra.mxu1 %v9284_v40  ;;  %v3248_v40 = vld [vmem:[#allocation11 + $0x760] sm:$0xff]  ;;  %v2897_v28 = vld [vmem:[#allocation11 + $0x188] sm:$0xff]  ;;  %v2899_v1 = vld [vmem:[#allocation11 + $0x198] sm:$0xff] }
 0xad8   :  { %9287 = vmatprep.subr.bf16.mxu1 %v9286_v58  ;;  %v3250_v58 = vld [vmem:[#allocation11 + $0x770] sm:$0xff] }
 0xad9   :  { %v9320_v51 = vpack.c.bf16 %v3250_v58, %v3248_v40  ;;  %v2867_v40 = vld [vmem:[#allocation11 + $0x98] sm:$0xff] }
 0xadb   :  { %9289 = vmatpush1.bf16.msra.mxu1 %v9288_v21  ;;  %v3252_v21 = vld [vmem:[#allocation11 + $0x780] sm:$0xff] }
 0xadc   :  { %9291 = vmatprep.subr.bf16.mxu1 %v9290_v17  ;;  %v3254_v17 = vld [vmem:[#allocation11 + $0x790] sm:$0xff] }
 0xadd   :  { %v9324_v37 = vpack.c.bf16 %v3254_v17, %v3252_v21  ;;  %v2870_v17 = vld [vmem:[#allocation11 + $0xb0] sm:$0xff] }
 0xadf   :  { %9293 = vmatpush1.bf16.msra.mxu1 %v9292_v62  ;;  %v3256_v62 = vld [vmem:[#allocation11 + $0x7a0] sm:$0xff] }
 0xae0   :  { %9295 = vmatprep.subr.bf16.mxu1 %v9294_v3  ;;  %v3258_v3 = vld [vmem:[#allocation11 + $0x7b0] sm:$0xff] }
 0xae1   :  { %v9328_v13 = vpack.c.bf16 %v3258_v3, %v3256_v62  ;;  %v2872_v62 = vld [vmem:[#allocation11 + $0xc0] sm:$0xff]  ;;  %v2874_v3 = vld [vmem:[#allocation11 + $0xd0] sm:$0xff] }
 0xae3   :  { %9297 = vmatpush1.bf16.msra.mxu1 %v9296_v44  ;;  %v3260_v44 = vld [vmem:[#allocation11 + $0x7c0] sm:$0xff] }
 0xae4   :  { %9299 = vmatprep.subr.bf16.mxu1 %v9298_v59  ;;  %v3262_v59 = vld [vmem:[#allocation11 + $0x7d0] sm:$0xff] }
 0xae5   :  { %v9332_v60 = vpack.c.bf16 %v3262_v59, %v3260_v44  ;;  %v2876_v44 = vld [vmem:[#allocation11 + $0xe0] sm:$0xff]  ;;  %v2878_v59 = vld [vmem:[#allocation11 + $0xf0] sm:$0xff] }
 0xae7   :  { %9301 = vmatpush1.bf16.msra.mxu1 %v9300_v31  ;;  %v3264_v31 = vld [vmem:[#allocation11 + $0x7e0] sm:$0xff] }
 0xae8   :  { %9303 = vmatprep.subr.bf16.mxu1 %v9302_v42  ;;  %v3266_v42 = vld [vmem:[#allocation11 + $0x7f0] sm:$0xff] }
 0xae9   :  { %v9336_v63 = vpack.c.bf16 %v3266_v42, %v3264_v31  ;;  %v2880_v31 = vld [vmem:[#allocation11 + $0x100] sm:$0xff]  ;;  %v2882_v42 = vld [vmem:[#allocation11 + $0x110] sm:$0xff] }
 0xaeb   :  { %9305 = vmatpush1.bf16.msra.mxu1 %v9304_v48  ;;  %v2848_v48 = vld [vmem:[#allocation11] sm:$0xff] }
 0xaec   :  { %9307 = vmatprep.subr.bf16.mxu1 %v9306_v14  ;;  %v2850_v14 = vld [vmem:[#allocation11 + $0x10] sm:$0xff] }
 0xaed   :  { %v9340_v20 = vpack.c.bf16 %v2850_v14, %v2848_v48  ;;  %v2884_v48 = vld [vmem:[#allocation11 + $0x120] sm:$0xff]  ;;  %v2886_v14 = vld [vmem:[#allocation11 + $0x130] sm:$0xff] }
 0xaef   :  { %9309 = vmatpush1.bf16.msra.mxu1 %v9308_v6  ;;  %v2852_v6 = vld [vmem:[#allocation11 + $0x20] sm:$0xff] }
 0xaf0   :  { %9311 = vmatprep.subr.bf16.mxu1 %v9310_v4  ;;  %v2854_v4 = vld [vmem:[#allocation11 + $0x30] sm:$0xff] }
 0xaf1   :  { %v9344_v11 = vpack.c.bf16 %v2854_v4, %v2852_v6  ;;  %v2888_v6 = vld [vmem:[#allocation11 + $0x140] sm:$0xff]  ;;  %v2890_v4 = vld [vmem:[#allocation11 + $0x150] sm:$0xff] }
 0xaf3   :  { %9313 = vmatpush1.bf16.msra.mxu1 %v9312_v22  ;;  %v2856_v22 = vld [vmem:[#allocation11 + $0x40] sm:$0xff] }
 0xaf4   :  { %9315 = vmatprep.subr.bf16.mxu1 %v9314_v23  ;;  %v2858_v23 = vld [vmem:[#allocation11 + $0x50] sm:$0xff] }
 0xaf5   :  { %v9348_v55 = vpack.c.bf16 %v2858_v23, %v2856_v22  ;;  %v2892_v22 = vld [vmem:[#allocation11 + $0x160] sm:$0xff]  ;;  %v2894_v23 = vld [vmem:[#allocation11 + $0x170] sm:$0xff] }
 0xaf7   :  { %9317 = vmatpush1.bf16.msra.mxu1 %v9316_v32  ;;  %v2860_v32 = vld [vmem:[#allocation11 + $0x60] sm:$0xff] }
 0xaf8   :  { %9319 = vmatprep.subr.bf16.mxu1 %v9318_v33  ;;  %v2865_v33 = vld [vmem:[#allocation11 + $0x88] sm:$0xff] }
 0xaf9   :  { %v9354_v58 = vpack.c.bf16 %v2867_v40, %v2865_v33  ;;  %v2901_v33 = vld [vmem:[#allocation11 + $0x1a8] sm:$0xff]  ;;  %v2903_v40 = vld [vmem:[#allocation11 + $0x1b8] sm:$0xff] }
 0xafb   :  { %9321 = vmatpush1.bf16.msra.mxu1 %v9320_v51  ;;  %v2869_v51 = vld [vmem:[#allocation11 + $0xa8] sm:$0xff] }
 0xafc   :  { %9323 = vmatprep.subr.bf16.mxu1 %v9322_v52  ;;  %v2871_v52 = vld [vmem:[#allocation11 + $0xb8] sm:$0xff] }
 0xafd   :  { %v9358_v21 = vpack.c.bf16 %v2871_v52, %v2869_v51  ;;  %v2905_v51 = vld [vmem:[#allocation11 + $0x1c8] sm:$0xff]  ;;  %v2907_v52 = vld [vmem:[#allocation11 + $0x1d8] sm:$0xff] }
 0xaff   :  { %9325 = vmatpush1.bf16.msra.mxu1 %v9324_v37 }
 0xb00   :  { %9327 = vmatprep.subr.bf16.mxu1 %v9326_v47  ;;  %v9362_v47 = vpack.c.bf16 %v2875_v36, %v2873_v30  ;;  %v2909_v30 = vld [vmem:[#allocation11 + $0x1e8] sm:$0xff]  ;;  %v2911_v36 = vld [vmem:[#allocation11 + $0x1f8] sm:$0xff] }
 0xb03   :  { %9329 = vmatpush1.bf16.msra.mxu1 %v9328_v13  ;;  %v9364_v13 = vpack.c.bf16 %v2874_v3, %v2872_v62  ;;  %v2908_v62 = vld [vmem:[#allocation11 + $0x1e0] sm:$0xff]  ;;  %v2910_v3 = vld [vmem:[#allocation11 + $0x1f0] sm:$0xff] }
 0xb04   :  { %9331 = vmatprep.subr.bf16.mxu1 %v9330_v41  ;;  %v9366_v41 = vpack.c.bf16 %v2879_v27, %v2877_v19  ;;  %v2913_v19 = vld [vmem:[#allocation11 + $0x208] sm:$0xff]  ;;  %v2915_v27 = vld [vmem:[#allocation11 + $0x218] sm:$0xff] }
 0xb07   :  { %9333 = vmatpush1.bf16.msra.mxu1 %v9332_v60  ;;  %v9368_v60 = vpack.c.bf16 %v2878_v59, %v2876_v44  ;;  %v2912_v44 = vld [vmem:[#allocation11 + $0x200] sm:$0xff]  ;;  %v2914_v59 = vld [vmem:[#allocation11 + $0x210] sm:$0xff] }
 0xb08   :  { %9335 = vmatprep.subr.bf16.mxu1 %v9334_v26  ;;  %v9370_v26 = vpack.c.bf16 %v2883_v10, %v2881_v34  ;;  %v11971_v34 = vpop.f32.mrb[38].mxu0  ;;  %v2917_v10 = vld [vmem:[#allocation11 + $0x228] sm:$0xff] }
 0xb0b   :  { %9337 = vmatpush1.bf16.msra.mxu1 %v9336_v63  ;;  %v9372_v63 = vpack.c.bf16 %v2882_v42, %v2880_v31  ;;  %v11973_v31 = vpop.f32.mrb[39].mxu0 }
 0xb0c   :  { %9339 = vmatprep.subr.bf16.mxu1 %v9338_v7  ;;  %v9374_v7 = vpack.c.bf16 %v2887_v49, %v2885_v50  ;;  %v2916_v50 = vld [vmem:[#allocation11 + $0x220] sm:$0xff]  ;;  %v2918_v49 = vld [vmem:[#allocation11 + $0x230] sm:$0xff] }
 0xb0e   :  { %3410 = vmatmul.mubr.f32.vlgmr.msra.gmra.mrb[34].mxu1 %v11961_v16  ;;  %v2862_v16 = vld [vmem:[#allocation11 + $0x70] sm:$0xff] }
 0xb0f   :  { %9341 = vmatpush1.bf16.msra.mxu1 %v9340_v20  ;;  %3415 = vmatprep.mubr.f32.mxu1 %v11965_v54  ;;  %v9352_v54 = vpack.c.bf16 %v2862_v16, %v2860_v32  ;;  %v9376_v20 = vpack.c.bf16 %v2886_v14, %v2884_v48  ;;  %v2896_v32 = vld [vmem:[#allocation11 + $0x180] sm:$0xff]  ;;  %v2898_v16 = vld [vmem:[#allocation11 + $0x190] sm:$0xff]  ;;  %v9408_v48 = vpack.c.bf16 %v2918_v49, %v2916_v50  ;;  %v2957_v50 = vld [vmem:[#allocation11 + $0x368] sm:$0xff] }
 0xb10   :  { %9343 = vmatprep.subr.bf16.mxu1 %v9342_v53  ;;  %v9378_v53 = vpack.c.bf16 %v2891_v24, %v2889_v25  ;;  %v2920_v25 = vld [vmem:[#allocation11 + $0x240] sm:$0xff]  ;;  %v2922_v24 = vld [vmem:[#allocation11 + $0x250] sm:$0xff]  ;;  %v2959_v49 = vld [vmem:[#allocation11 + $0x378] sm:$0xff] }
 0xb12   :  { %3416 = vmatmul.mubr.f32.gmra.mrb[36].mxu1 %v11963_v39  ;;  %v9356_v39 = vpack.c.bf16 %v2866_v46, %v2864_v45  ;;  %v2900_v45 = vld [vmem:[#allocation11 + $0x1a0] sm:$0xff]  ;;  %v2902_v46 = vld [vmem:[#allocation11 + $0x1b0] sm:$0xff] }
 0xb13   :  { %9345 = vmatpush1.bf16.msra.mxu1 %v9344_v11  ;;  %3486 = vmatprep.mubr.f32.mxu1 %v11947_v5  ;;  %v2868_v5 = vld [vmem:[#allocation11 + $0xa0] sm:$0xff]  ;;  %v9380_v11 = vpack.c.bf16 %v2890_v4, %v2888_v6  ;;  %v9412_v6 = vpack.c.bf16 %v2922_v24, %v2920_v25  ;;  %v2961_v25 = vld [vmem:[#allocation11 + $0x388] sm:$0xff]  ;;  %v2963_v24 = vld [vmem:[#allocation11 + $0x398] sm:$0xff] }
 0xb14   :  { %9347 = vmatprep.subr.bf16.mxu1 %v9346_v18  ;;  %v9360_v37 = vpack.c.bf16 %v2870_v17, %v2868_v5  ;;  %v9382_v18 = vpack.c.bf16 %v2895_v43, %v2893_v57  ;;  %v2904_v5 = vld [vmem:[#allocation11 + $0x1c0] sm:$0xff]  ;;  %v2906_v17 = vld [vmem:[#allocation11 + $0x1d0] sm:$0xff]  ;;  %v2929_v43 = vld [vmem:[#allocation11 + $0x288] sm:$0xff] }
 0xb15   :  { %v2924_v57 = vld [vmem:[#allocation11 + $0x260] sm:$0xff] }
 0xb17   :  { %9349 = vmatpush1.bf16.msra.mxu1 %v9348_v55  ;;  %v9384_v55 = vpack.c.bf16 %v2894_v23, %v2892_v22  ;;  %v2928_v22 = vld [vmem:[#allocation11 + $0x280] sm:$0xff]  ;;  %v2930_v23 = vld [vmem:[#allocation11 + $0x290] sm:$0xff] }
 0xb18   :  { %9351 = vmatprep.subr.bf16.mxu1 %v9350_v29  ;;  %v9386_v29 = vpack.c.bf16 %v2899_v1, %v2897_v28  ;;  %v2933_v28 = vld [vmem:[#allocation11 + $0x2a8] sm:$0xff]  ;;  %v2935_v1 = vld [vmem:[#allocation11 + $0x2b8] sm:$0xff] }
 0xb1b   :  { %9353 = vmatpush1.bf16.msra.mxu1 %v9352_v54  ;;  %v9388_v54 = vpack.c.bf16 %v2898_v16, %v2896_v32  ;;  %v2937_v32 = vld [vmem:[#allocation11 + $0x2c8] sm:$0xff]  ;;  %v2939_v16 = vld [vmem:[#allocation11 + $0x2d8] sm:$0xff] }
 0xb1c   :  { %9355 = vmatprep.subr.bf16.mxu1 %v9354_v58  ;;  %v9390_v58 = vpack.c.bf16 %v2903_v40, %v2901_v33  ;;  %v9426_v40 = vpack.c.bf16 %v2939_v16, %v2937_v32 }
 0xb1f   :  { %9357 = vmatpush1.bf16.msra.mxu1 %v9356_v39  ;;  %v9392_v39 = vpack.c.bf16 %v2902_v46, %v2900_v45  ;;  %v2941_v45 = vld [vmem:[#allocation11 + $0x2e8] sm:$0xff]  ;;  %v2943_v46 = vld [vmem:[#allocation11 + $0x2f8] sm:$0xff] }
 0xb20   :  { %9359 = vmatprep.subr.bf16.mxu1 %v9358_v21  ;;  %v9394_v21 = vpack.c.bf16 %v2907_v52, %v2905_v51  ;;  %v9430_v52 = vpack.c.bf16 %v2943_v46, %v2941_v45  ;;  %v3743_v45 = vld [vmem:[#allocation11 + $0x818] sm:$0xff] }
 0xb23   :  { %9361 = vmatpush1.bf16.msra.mxu1 %v9360_v37  ;;  %v9396_v37 = vpack.c.bf16 %v2906_v17, %v2904_v5  ;;  %v2945_v5 = vld [vmem:[#allocation11 + $0x308] sm:$0xff]  ;;  %v2947_v17 = vld [vmem:[#allocation11 + $0x318] sm:$0xff] }
 0xb24   :  { %9363 = vmatprep.subr.bf16.mxu1 %v9362_v47  ;;  %v9398_v47 = vpack.c.bf16 %v2911_v36, %v2909_v30  ;;  %v9434_v36 = vpack.c.bf16 %v2947_v17, %v2945_v5  ;;  %v3745_v17 = vld [vmem:[#allocation11 + $0x828] sm:$0xff] }
 0xb27   :  { %9365 = vmatpush1.bf16.msra.mxu1 %v9364_v13  ;;  %v9400_v13 = vpack.c.bf16 %v2910_v3, %v2908_v62  ;;  %v2949_v62 = vld [vmem:[#allocation11 + $0x328] sm:$0xff]  ;;  %v2951_v3 = vld [vmem:[#allocation11 + $0x338] sm:$0xff] }
 0xb28   :  { %9367 = vmatprep.subr.bf16.mxu1 %v9366_v41  ;;  %v9402_v41 = vpack.c.bf16 %v2915_v27, %v2913_v19  ;;  %v9438_v27 = vpack.c.bf16 %v2951_v3, %v2949_v62  ;;  %v3744_v62 = vld [vmem:[#allocation11 + $0x820] sm:$0xff]  ;;  %v3746_v3 = vld [vmem:[#allocation11 + $0x830] sm:$0xff] }
 0xb2b   :  { %9369 = vmatpush1.bf16.msra.mxu1 %v9368_v60  ;;  %v2919_v60 = vld [vmem:[#allocation11 + $0x238] sm:$0xff] }
 0xb2c   :  { %9371 = vmatprep.subr.bf16.mxu1 %v9370_v26  ;;  %v9404_v26 = vpack.c.bf16 %v2914_v59, %v2912_v44  ;;  %v9406_v42 = vpack.c.bf16 %v2919_v60, %v2917_v10  ;;  %v2953_v44 = vld [vmem:[#allocation11 + $0x348] sm:$0xff]  ;;  %v2955_v59 = vld [vmem:[#allocation11 + $0x358] sm:$0xff] }
 0xb2d   :  { %v9442_v60 = vpack.c.bf16 %v2955_v59, %v2953_v44  ;;  %v9488_v44 = vpack.c.bf16 %v3746_v3, %v3744_v62  ;;  %v3780_v62 = vld [vmem:[#allocation11 + $0x940] sm:$0xff]  ;;  %v3782_v3 = vld [vmem:[#allocation11 + $0x950] sm:$0xff] }
 0xb2f   :  { %9373 = vmatpush1.bf16.msra.mxu1 %v9372_v63  ;;  %v2921_v63 = vld [vmem:[#allocation11 + $0x248] sm:$0xff] }
 0xb30   :  { %9375 = vmatprep.subr.bf16.mxu1 %v9374_v7  ;;  %v2923_v7 = vld [vmem:[#allocation11 + $0x258] sm:$0xff] }
 0xb31   :  { %v9410_v14 = vpack.c.bf16 %v2923_v7, %v2921_v63  ;;  %v9446_v7 = vpack.c.bf16 %v2959_v49, %v2957_v50  ;;  %v3752_v49 = vld [vmem:[#allocation11 + $0x860] sm:$0xff] }
 0xb33   :  { %9377 = vmatpush1.bf16.msra.mxu1 %v9376_v20  ;;  %v2925_v20 = vld [vmem:[#allocation11 + $0x268] sm:$0xff] }
 0xb34   :  { %9379 = vmatprep.subr.bf16.mxu1 %v9378_v53  ;;  %v2927_v53 = vld [vmem:[#allocation11 + $0x278] sm:$0xff] }
 0xb35   :  { %v9414_v4 = vpack.c.bf16 %v2927_v53, %v2925_v20  ;;  %v9450_v53 = vpack.c.bf16 %v2963_v24, %v2961_v25  ;;  %v3756_v25 = vld [vmem:[#allocation11 + $0x880] sm:$0xff]  ;;  %v3758_v24 = vld [vmem:[#allocation11 + $0x890] sm:$0xff] }
 0xb37   :  { %9381 = vmatpush1.bf16.msra.mxu1 %v9380_v11 }
 0xb38   :  { %9383 = vmatprep.subr.bf16.mxu1 %v9382_v18 }
 0xb3b   :  { %9385 = vmatpush1.bf16.msra.mxu1 %v9384_v55  ;;  %v9422_v55 = vpack.c.bf16 %v2935_v1, %v2933_v28 }
 0xb3c   :  { %9387 = vmatprep.subr.bf16.mxu1 %v9386_v29  ;;  %v2934_v29 = vld [vmem:[#allocation11 + $0x2b0] sm:$0xff] }
 0xb3f   :  { %9389 = vmatpush1.bf16.msra.mxu1 %v9388_v54  ;;  %v2936_v54 = vld [vmem:[#allocation11 + $0x2c0] sm:$0xff] }
 0xb40   :  { %9391 = vmatprep.subr.bf16.mxu1 %v9390_v58  ;;  %v2938_v58 = vld [vmem:[#allocation11 + $0x2d0] sm:$0xff] }
 0xb41   :  { %v9428_v51 = vpack.c.bf16 %v2938_v58, %v2936_v54  ;;  %v11979_v54 = vpop.f32.mrb[40].mxu0  ;;  %v3741_v58 = vld [vmem:[#allocation11 + $0x808] sm:$0xff] }
 0xb42   :  { %v11981_v46 = vpop.f32.mrb[41].mxu0 }
 0xb43   :  { %9393 = vmatpush1.bf16.msra.mxu1 %v9392_v39  ;;  %v2940_v39 = vld [vmem:[#allocation11 + $0x2e0] sm:$0xff]  ;;  %v11983_v5 = vpop.f32.mrb[42].mxu0 }
 0xb44   :  { %9395 = vmatprep.subr.bf16.mxu1 %v9394_v21  ;;  %v2942_v21 = vld [vmem:[#allocation11 + $0x2f0] sm:$0xff] }
 0xb45   :  { %v9432_v30 = vpack.c.bf16 %v2942_v21, %v2940_v39  ;;  %v3740_v39 = vld [vmem:[#allocation11 + $0x800] sm:$0xff]  ;;  %v3742_v21 = vld [vmem:[#allocation11 + $0x810] sm:$0xff] }
 0xb47   :  { %9397 = vmatpush1.bf16.msra.mxu1 %v9396_v37  ;;  %v2944_v37 = vld [vmem:[#allocation11 + $0x300] sm:$0xff] }
 0xb48   :  { %9399 = vmatprep.subr.bf16.mxu1 %v9398_v47  ;;  %v2946_v47 = vld [vmem:[#allocation11 + $0x310] sm:$0xff] }
 0xb49   :  { %v9436_v19 = vpack.c.bf16 %v2946_v47, %v2944_v37  ;;  %v9484_v37 = vpack.c.bf16 %v3742_v21, %v3740_v39  ;;  %v3776_v39 = vld [vmem:[#allocation11 + $0x920] sm:$0xff]  ;;  %v3778_v21 = vld [vmem:[#allocation11 + $0x930] sm:$0xff] }
 0xb4b   :  { %9401 = vmatpush1.bf16.msra.mxu1 %v9400_v13  ;;  %v2948_v13 = vld [vmem:[#allocation11 + $0x320] sm:$0xff] }
 0xb4c   :  { %9403 = vmatprep.subr.bf16.mxu1 %v9402_v41  ;;  %v2950_v41 = vld [vmem:[#allocation11 + $0x330] sm:$0xff] }
 0xb4d   :  { %v9440_v10 = vpack.c.bf16 %v2950_v41, %v2948_v13  ;;  %v3751_v13 = vld [vmem:[#allocation11 + $0x858] sm:$0xff] }
 0xb4e   :  { %3487 = vmatmul.mubr.f32.vlgmr.msra.gmra.mrb[34].mxu1 %v11945_v2  ;;  %v2926_v2 = vld [vmem:[#allocation11 + $0x270] sm:$0xff] }
 0xb4f   :  { %3492 = vmatprep.mubr.f32.mxu1 %v11955_v12  ;;  %9405 = vmatpush1.bf16.msra.mxu1 %v9404_v26  ;;  %v2931_v12 = vld [vmem:[#allocation11 + $0x298] sm:$0xff]  ;;  %v9416_v11 = vpack.c.bf16 %v2926_v2, %v2924_v57  ;;  %v2952_v26 = vld [vmem:[#allocation11 + $0x340] sm:$0xff]  ;;  %v2965_v57 = vld [vmem:[#allocation11 + $0x3a8] sm:$0xff] }
 0xb50   :  { %9407 = vmatprep.subr.bf16.mxu1 %v9406_v42  ;;  %v9418_v18 = vpack.c.bf16 %v2931_v12, %v2929_v43  ;;  %v2954_v42 = vld [vmem:[#allocation11 + $0x350] sm:$0xff]  ;;  %v2967_v2 = vld [vmem:[#allocation11 + $0x3b8] sm:$0xff] }
 0xb51   :  { %v9444_v63 = vpack.c.bf16 %v2954_v42, %v2952_v26  ;;  %v9454_v12 = vpack.c.bf16 %v2967_v2, %v2965_v57  ;;  %v3753_v26 = vld [vmem:[#allocation11 + $0x868] sm:$0xff]  ;;  %v3755_v42 = vld [vmem:[#allocation11 + $0x878] sm:$0xff] }
 0xb52   :  { %3493 = vmatmul.mubr.f32.gmra.mrb[36].mxu1 %v11953_v61  ;;  %v9420_v61 = vpack.c.bf16 %v2930_v23, %v2928_v22  ;;  %v2969_v22 = vld [vmem:[#allocation11 + $0x3c8] sm:$0xff]  ;;  %v2971_v23 = vld [vmem:[#allocation11 + $0x3d8] sm:$0xff] }
 0xb53   :  { %9409 = vmatpush1.bf16.msra.mxu1 %v9408_v48  ;;  %3563 = vmatprep.mubr.f32.mxu1 %v11951_v0  ;;  %v2932_v0 = vld [vmem:[#allocation11 + $0x2a0] sm:$0xff]  ;;  %v9458_v1 = vpack.c.bf16 %v2971_v23, %v2969_v22  ;;  %v3765_v57 = vld [vmem:[#allocation11 + $0x8c8] sm:$0xff]  ;;  %v3767_v2 = vld [vmem:[#allocation11 + $0x8d8] sm:$0xff] }
 0xb54   :  { %9411 = vmatprep.subr.bf16.mxu1 %v9410_v14  ;;  %v9424_v33 = vpack.c.bf16 %v2934_v29, %v2932_v0  ;;  %v2956_v48 = vld [vmem:[#allocation11 + $0x360] sm:$0xff]  ;;  %v2958_v14 = vld [vmem:[#allocation11 + $0x370] sm:$0xff]  ;;  %v2973_v0 = vld [vmem:[#allocation11 + $0x3e8] sm:$0xff] }
 0xb55   :  { %v9448_v20 = vpack.c.bf16 %v2958_v14, %v2956_v48  ;;  %v2975_v29 = vld [vmem:[#allocation11 + $0x3f8] sm:$0xff]  ;;  %v3769_v22 = vld [vmem:[#allocation11 + $0x8e8] sm:$0xff] }
 0xb56   :  { %v9462_v16 = vpack.c.bf16 %v2975_v29, %v2973_v0  ;;  %v3771_v23 = vld [vmem:[#allocation11 + $0x8f8] sm:$0xff]  ;;  %v3773_v0 = vld [vmem:[#allocation11 + $0x908] sm:$0xff] }
 0xb57   :  { %9413 = vmatpush1.bf16.msra.mxu1 %v9412_v6  ;;  %v2960_v6 = vld [vmem:[#allocation11 + $0x380] sm:$0xff]  ;;  %v3775_v29 = vld [vmem:[#allocation11 + $0x918] sm:$0xff] }
 0xb58   :  { %9415 = vmatprep.subr.bf16.mxu1 %v9414_v4  ;;  %v2962_v4 = vld [vmem:[#allocation11 + $0x390] sm:$0xff] }
 0xb59   :  { %v9452_v43 = vpack.c.bf16 %v2962_v4, %v2960_v6  ;;  %v3760_v4 = vld [vmem:[#allocation11 + $0x8a0] sm:$0xff] }
 0xb5b   :  { %9417 = vmatpush1.bf16.msra.mxu1 %v9416_v11  ;;  %v2964_v11 = vld [vmem:[#allocation11 + $0x3a0] sm:$0xff] }
 0xb5c   :  { %9419 = vmatprep.subr.bf16.mxu1 %v9418_v18  ;;  %v2966_v18 = vld [vmem:[#allocation11 + $0x3b0] sm:$0xff] }
 0xb5d   :  { %v9456_v28 = vpack.c.bf16 %v2966_v18, %v2964_v11  ;;  %v3764_v11 = vld [vmem:[#allocation11 + $0x8c0] sm:$0xff]  ;;  %v3766_v18 = vld [vmem:[#allocation11 + $0x8d0] sm:$0xff] }
 0xb5f   :  { %9421 = vmatpush1.bf16.msra.mxu1 %v9420_v61  ;;  %v2968_v61 = vld [vmem:[#allocation11 + $0x3c0] sm:$0xff] }
 0xb60   :  { %9423 = vmatprep.subr.bf16.mxu1 %v9422_v55  ;;  %v2970_v55 = vld [vmem:[#allocation11 + $0x3d0] sm:$0xff] }
 0xb61   :  { %v9460_v32 = vpack.c.bf16 %v2970_v55, %v2968_v61  ;;  %v3768_v61 = vld [vmem:[#allocation11 + $0x8e0] sm:$0xff]  ;;  %v3770_v55 = vld [vmem:[#allocation11 + $0x8f0] sm:$0xff] }
 0xb63   :  { %9425 = vmatpush1.bf16.msra.mxu1 %v9424_v33  ;;  %v2972_v33 = vld [vmem:[#allocation11 + $0x3e0] sm:$0xff] }
 0xb64   :  { %9427 = vmatprep.subr.bf16.mxu1 %v9426_v40  ;;  %v2974_v40 = vld [vmem:[#allocation11 + $0x3f0] sm:$0xff] }
 0xb67   :  { %9429 = vmatpush1.bf16.msra.mxu1 %v9428_v51  ;;  %v9464_v51 = vpack.c.bf16 %v2974_v40, %v2972_v33  ;;  %v3772_v33 = vld [vmem:[#allocation11 + $0x900] sm:$0xff]  ;;  %v3774_v40 = vld [vmem:[#allocation11 + $0x910] sm:$0xff] }
 0xb68   :  { %9431 = vmatprep.subr.bf16.mxu1 %v9430_v52  ;;  %v9482_v52 = vpack.c.bf16 %v3743_v45, %v3741_v58  ;;  %v3777_v58 = vld [vmem:[#allocation11 + $0x928] sm:$0xff]  ;;  %v3779_v45 = vld [vmem:[#allocation11 + $0x938] sm:$0xff] }
 0xb6b   :  { %9433 = vmatpush1.bf16.msra.mxu1 %v9432_v30  ;;  %v3747_v30 = vld [vmem:[#allocation11 + $0x838] sm:$0xff] }
 0xb6c   :  { %9435 = vmatprep.subr.bf16.mxu1 %v9434_v36  ;;  %v11985_v36 = vpop.f32.mrb[43].mxu0  ;;  %v9486_v47 = vpack.c.bf16 %v3747_v30, %v3745_v17  ;;  %v3781_v17 = vld [vmem:[#allocation11 + $0x948] sm:$0xff]  ;;  %v3783_v30 = vld [vmem:[#allocation11 + $0x958] sm:$0xff] }
 0xb6f   :  { %9437 = vmatpush1.bf16.msra.mxu1 %v9436_v19  ;;  %v11987_v19 = vpop.f32.mrb[44].mxu0 }
 0xb70   :  { %9439 = vmatprep.subr.bf16.mxu1 %v9438_v27  ;;  %v3749_v27 = vld [vmem:[#allocation11 + $0x848] sm:$0xff]  ;;  %v11990_v41 = vpop.f32.mrb[45].mxu0 }
 0xb71   :  { %v9490_v59 = vpack.c.bf16 %v3751_v13, %v3749_v27  ;;  %v3785_v27 = vld [vmem:[#allocation11 + $0x968] sm:$0xff]  ;;  %v3787_v13 = vld [vmem:[#allocation11 + $0x978] sm:$0xff] }
 0xb73   :  { %9441 = vmatpush1.bf16.msra.mxu1 %v9440_v10  ;;  %v3748_v10 = vld [vmem:[#allocation11 + $0x840] sm:$0xff] }
 0xb74   :  { %9443 = vmatprep.subr.bf16.mxu1 %v9442_v60  ;;  %v3750_v60 = vld [vmem:[#allocation11 + $0x850] sm:$0xff] }
 0xb75   :  { %v9492_v50 = vpack.c.bf16 %v3750_v60, %v3748_v10  ;;  %v3784_v10 = vld [vmem:[#allocation11 + $0x960] sm:$0xff]  ;;  %v3786_v60 = vld [vmem:[#allocation11 + $0x970] sm:$0xff] }
 0xb77   :  { %9445 = vmatpush1.bf16.msra.mxu1 %v9444_v63  ;;  %v3754_v63 = vld [vmem:[#allocation11 + $0x870] sm:$0xff] }
 0xb78   :  { %9447 = vmatprep.subr.bf16.mxu1 %v9446_v7  ;;  %v3757_v7 = vld [vmem:[#allocation11 + $0x888] sm:$0xff]  ;;  %v9496_v48 = vpack.c.bf16 %v3754_v63, %v3752_v49  ;;  %v3788_v49 = vld [vmem:[#allocation11 + $0x980] sm:$0xff]  ;;  %v3790_v63 = vld [vmem:[#allocation11 + $0x990] sm:$0xff] }
 0xb7b   :  { %9449 = vmatpush1.bf16.msra.mxu1 %v9448_v20  ;;  %v3761_v20 = vld [vmem:[#allocation11 + $0x8a8] sm:$0xff] }
 0xb7c   :  { %9451 = vmatprep.subr.bf16.mxu1 %v9450_v53  ;;  %v3763_v53 = vld [vmem:[#allocation11 + $0x8b8] sm:$0xff] }
 0xb7d   :  { %v9502_v6 = vpack.c.bf16 %v3763_v53, %v3761_v20  ;;  %v3797_v20 = vld [vmem:[#allocation11 + $0x9c8] sm:$0xff]  ;;  %v3799_v53 = vld [vmem:[#allocation11 + $0x9d8] sm:$0xff] }
 0xb7f   :  { %9453 = vmatpush1.bf16.msra.mxu1 %v9452_v43 }
 0xb80   :  { %9455 = vmatprep.subr.bf16.mxu1 %v9454_v12  ;;  %v9506_v12 = vpack.c.bf16 %v3767_v2, %v3765_v57  ;;  %v3801_v57 = vld [vmem:[#allocation11 + $0x9e8] sm:$0xff]  ;;  %v3803_v2 = vld [vmem:[#allocation11 + $0x9f8] sm:$0xff] }
 0xb83   :  { %9457 = vmatpush1.bf16.msra.mxu1 %v9456_v28  ;;  %v9508_v28 = vpack.c.bf16 %v3766_v18, %v3764_v11  ;;  %v3800_v11 = vld [vmem:[#allocation11 + $0x9e0] sm:$0xff]  ;;  %v3802_v18 = vld [vmem:[#allocation11 + $0x9f0] sm:$0xff] }
 0xb84   :  { %9459 = vmatprep.subr.bf16.mxu1 %v9458_v1  ;;  %v9510_v1 = vpack.c.bf16 %v3771_v23, %v3769_v22  ;;  %v3805_v22 = vld [vmem:[#allocation11 + $0xa08] sm:$0xff]  ;;  %v3807_v23 = vld [vmem:[#allocation11 + $0xa18] sm:$0xff] }
 0xb87   :  { %9461 = vmatpush1.bf16.msra.mxu1 %v9460_v32  ;;  %v9512_v32 = vpack.c.bf16 %v3770_v55, %v3768_v61  ;;  %v3804_v61 = vld [vmem:[#allocation11 + $0xa00] sm:$0xff]  ;;  %v3806_v55 = vld [vmem:[#allocation11 + $0xa10] sm:$0xff] }
 0xb88   :  { %9463 = vmatprep.subr.bf16.mxu1 %v9462_v16  ;;  %v9514_v16 = vpack.c.bf16 %v3775_v29, %v3773_v0  ;;  %v3809_v0 = vld [vmem:[#allocation11 + $0xa28] sm:$0xff]  ;;  %v3811_v29 = vld [vmem:[#allocation11 + $0xa38] sm:$0xff] }
 0xb8b   :  { %9465 = vmatpush1.bf16.msra.mxu1 %v9464_v51  ;;  %v9516_v51 = vpack.c.bf16 %v3774_v40, %v3772_v33  ;;  %v3808_v33 = vld [vmem:[#allocation11 + $0xa20] sm:$0xff]  ;;  %v3810_v40 = vld [vmem:[#allocation11 + $0xa30] sm:$0xff] }
 0xb8c   :  { %9483 = vmatprep.subr.bf16.mxu1 %v9482_v52  ;;  %v9518_v52 = vpack.c.bf16 %v3779_v45, %v3777_v58  ;;  %v3813_v58 = vld [vmem:[#allocation11 + $0xa48] sm:$0xff]  ;;  %v3815_v45 = vld [vmem:[#allocation11 + $0xa58] sm:$0xff] }
 0xb8e   :  { %3564 = vmatmul.mubr.f32.vlgmr.msra.gmra.mrb[34].mxu1 %v11949_v56  ;;  %v9494_v56 = vpack.c.bf16 %v3755_v42, %v3753_v26  ;;  %v3789_v26 = vld [vmem:[#allocation11 + $0x988] sm:$0xff]  ;;  %v3791_v42 = vld [vmem:[#allocation11 + $0x998] sm:$0xff] }
 0xb8f   :  { %3569 = vmatprep.mubr.f32.mxu1 %v11959_v15  ;;  %9485 = vmatpush1.bf16.msra.mxu1 %v9484_v37  ;;  %v3759_v15 = vld [vmem:[#allocation11 + $0x898] sm:$0xff]  ;;  %v9520_v37 = vpack.c.bf16 %v3778_v21, %v3776_v39  ;;  %v3812_v39 = vld [vmem:[#allocation11 + $0xa40] sm:$0xff]  ;;  %v3814_v21 = vld [vmem:[#allocation11 + $0xa50] sm:$0xff] }
 0xb90   :  { %9487 = vmatprep.subr.bf16.mxu1 %v9486_v47  ;;  %v9498_v14 = vpack.c.bf16 %v3759_v15, %v3757_v7  ;;  %v9522_v47 = vpack.c.bf16 %v3783_v30, %v3781_v17  ;;  %v3793_v7 = vld [vmem:[#allocation11 + $0x9a8] sm:$0xff]  ;;  %v3795_v15 = vld [vmem:[#allocation11 + $0x9b8] sm:$0xff] }
 0xb91   :  { %v3817_v17 = vld [vmem:[#allocation11 + $0xa68] sm:$0xff]  ;;  %v3819_v30 = vld [vmem:[#allocation11 + $0xa78] sm:$0xff] }
 0xb92   :  { %3570 = vmatmul.mubr.f32.gmra.mrb[36].mxu1 %v11957_v38  ;;  %v9500_v38 = vpack.c.bf16 %v3758_v24, %v3756_v25  ;;  %v3792_v25 = vld [vmem:[#allocation11 + $0x9a0] sm:$0xff]  ;;  %v3794_v24 = vld [vmem:[#allocation11 + $0x9b0] sm:$0xff] }
 0xb93   :  { %9489 = vmatpush1.bf16.msra.mxu1 %v9488_v44  ;;  %3932 = vmatprep.mubr.f32.mxu1 %v11973_v31  ;;  %v3762_v31 = vld [vmem:[#allocation11 + $0x8b0] sm:$0xff]  ;;  %v9524_v44 = vpack.c.bf16 %v3782_v3, %v3780_v62  ;;  %v3816_v62 = vld [vmem:[#allocation11 + $0xa60] sm:$0xff]  ;;  %v3821_v3 = vld [vmem:[#allocation11 + $0xa88] sm:$0xff] }
 0xb94   :  { %9491 = vmatprep.subr.bf16.mxu1 %v9490_v59  ;;  %v9504_v43 = vpack.c.bf16 %v3762_v31, %v3760_v4  ;;  %v9526_v59 = vpack.c.bf16 %v3787_v13, %v3785_v27  ;;  %v3796_v4 = vld [vmem:[#allocation11 + $0x9c0] sm:$0xff]  ;;  %v3798_v31 = vld [vmem:[#allocation11 + $0x9d0] sm:$0xff]  ;;  %v3823_v27 = vld [vmem:[#allocation11 + $0xa98] sm:$0xff] }
 0xb95   :  { %v9562_v13 = vpack.c.bf16 %v3823_v27, %v3821_v3  ;;  %v3856_v3 = vld [vmem:[#allocation11 + $0xba0] sm:$0xff]  ;;  %v3858_v27 = vld [vmem:[#allocation11 + $0xbb0] sm:$0xff] }
 0xb97   :  { %9493 = vmatpush1.bf16.msra.mxu1 %v9492_v50  ;;  %v9528_v50 = vpack.c.bf16 %v3786_v60, %v3784_v10  ;;  %v3825_v10 = vld [vmem:[#allocation11 + $0xaa8] sm:$0xff]  ;;  %v3827_v60 = vld [vmem:[#allocation11 + $0xab8] sm:$0xff] }
 0xb98   :  { %9495 = vmatprep.subr.bf16.mxu1 %v9494_v56  ;;  %v9530_v56 = vpack.c.bf16 %v3791_v42, %v3789_v26  ;;  %v9566_v26 = vpack.c.bf16 %v3827_v60, %v3825_v10  ;;  %v3824_v42 = vld [vmem:[#allocation11 + $0xaa0] sm:$0xff]  ;;  %v3862_v60 = vld [vmem:[#allocation11 + $0xbd0] sm:$0xff] }
 0xb99   :  { %v3860_v10 = vld [vmem:[#allocation11 + $0xbc0] sm:$0xff] }
 0xb9b   :  { %9497 = vmatpush1.bf16.msra.mxu1 %v9496_v48  ;;  %v9532_v48 = vpack.c.bf16 %v3790_v63, %v3788_v49 }
 0xb9c   :  { %9499 = vmatprep.subr.bf16.mxu1 %v9498_v14  ;;  %v9534_v14 = vpack.c.bf16 %v3795_v15, %v3793_v7  ;;  %v3828_v7 = vld [vmem:[#allocation11 + $0xac0] sm:$0xff]  ;;  %v3830_v15 = vld [vmem:[#allocation11 + $0xad0] sm:$0xff] }
 0xb9f   :  { %9501 = vmatpush1.bf16.msra.mxu1 %v9500_v38  ;;  %v9536_v38 = vpack.c.bf16 %v3794_v24, %v3792_v25  ;;  %v9572_v25 = vpack.c.bf16 %v3830_v15, %v3828_v7  ;;  %v4042_v15 = vld [vmem:[%s12551_s14 + $0x80] sm:$0xff] }
 0xba0   :  { %9503 = vmatprep.subr.bf16.mxu1 %v9502_v6  ;;  %v9538_v6 = vpack.c.bf16 %v3799_v53, %v3797_v20  ;;  %v3832_v20 = vld [vmem:[#allocation11 + $0xae0] sm:$0xff]  ;;  %v3834_v53 = vld [vmem:[#allocation11 + $0xaf0] sm:$0xff] }
 0xba3   :  { %9505 = vmatpush1.bf16.msra.mxu1 %v9504_v43  ;;  %v9540_v43 = vpack.c.bf16 %v3798_v31, %v3796_v4  ;;  %v9576_v4 = vpack.c.bf16 %v3834_v53, %v3832_v20  ;;  %v4027_v20 = vld [vmem:[%s12551_s14 + $0x8] sm:$0xff]  ;;  %v4044_v53 = vld [vmem:[%s12551_s14 + $0x90] sm:$0xff] }
 0xba4   :  { %9507 = vmatprep.subr.bf16.mxu1 %v9506_v12  ;;  %v9542_v12 = vpack.c.bf16 %v3803_v2, %v3801_v57  ;;  %v3836_v57 = vld [vmem:[#allocation11 + $0xb00] sm:$0xff]  ;;  %v3838_v2 = vld [vmem:[#allocation11 + $0xb10] sm:$0xff] }
 0xba7   :  { %9509 = vmatpush1.bf16.msra.mxu1 %v9508_v28  ;;  %v9544_v28 = vpack.c.bf16 %v3802_v18, %v3800_v11  ;;  %v9580_v11 = vpack.c.bf16 %v3838_v2, %v3836_v57  ;;  %v4029_v57 = vld [vmem:[%s12551_s14 + $0x18] sm:$0xff]  ;;  %v4046_v2 = vld [vmem:[%s12551_s14 + $0xa0] sm:$0xff] }
 0xba8   :  { %9511 = vmatprep.subr.bf16.mxu1 %v9510_v1  ;;  %v9546_v1 = vpack.c.bf16 %v3807_v23, %v3805_v22  ;;  %v3840_v22 = vld [vmem:[#allocation11 + $0xb20] sm:$0xff]  ;;  %v3842_v23 = vld [vmem:[#allocation11 + $0xb30] sm:$0xff] }
 0xbab   :  { %9513 = vmatpush1.bf16.msra.mxu1 %v9512_v32  ;;  %v9548_v32 = vpack.c.bf16 %v3806_v55, %v3804_v61  ;;  %v9584_v61 = vpack.c.bf16 %v3842_v23, %v3840_v22  ;;  %v4031_v22 = vld [vmem:[%s12551_s14 + $0x28] sm:$0xff]  ;;  %v4048_v23 = vld [vmem:[%s12551_s14 + $0xb0] sm:$0xff] }
 0xbac   :  { %9515 = vmatprep.subr.bf16.mxu1 %v9514_v16  ;;  %v9550_v16 = vpack.c.bf16 %v3811_v29, %v3809_v0  ;;  %v3844_v0 = vld [vmem:[#allocation11 + $0xb40] sm:$0xff]  ;;  %v3846_v29 = vld [vmem:[#allocation11 + $0xb50] sm:$0xff] }
 0xbaf   :  { %9517 = vmatpush1.bf16.msra.mxu1 %v9516_v51  ;;  %v9552_v51 = vpack.c.bf16 %v3810_v40, %v3808_v33  ;;  %v9588_v33 = vpack.c.bf16 %v3846_v29, %v3844_v0  ;;  %v4033_v0 = vld [vmem:[%s12551_s14 + $0x38] sm:$0xff]  ;;  %v4050_v29 = vld [vmem:[%s12551_s14 + $0xc0] sm:$0xff] }
 0xbb0   :  { %9519 = vmatprep.subr.bf16.mxu1 %v9518_v52  ;;  %v9554_v52 = vpack.c.bf16 %v3815_v45, %v3813_v58  ;;  %v3848_v58 = vld [vmem:[#allocation11 + $0xb60] sm:$0xff]  ;;  %v3850_v45 = vld [vmem:[#allocation11 + $0xb70] sm:$0xff] }
 0xbb3   :  { %9521 = vmatpush1.bf16.msra.mxu1 %v9520_v37  ;;  %v9556_v37 = vpack.c.bf16 %v3814_v21, %v3812_v39  ;;  %v9592_v39 = vpack.c.bf16 %v3850_v45, %v3848_v58  ;;  %v4035_v58 = vld [vmem:[%s12551_s14 + $0x48] sm:$0xff]  ;;  %v4052_v45 = vld [vmem:[%s12551_s14 + $0xd0] sm:$0xff] }
 0xbb4   :  { %9523 = vmatprep.subr.bf16.mxu1 %v9522_v47  ;;  %v9558_v47 = vpack.c.bf16 %v3819_v30, %v3817_v17  ;;  %v3852_v17 = vld [vmem:[#allocation11 + $0xb80] sm:$0xff]  ;;  %v3854_v30 = vld [vmem:[#allocation11 + $0xb90] sm:$0xff] }
 0xbb7   :  { %9525 = vmatpush1.bf16.msra.mxu1 %v9524_v44  ;;  %v3820_v44 = vld [vmem:[#allocation11 + $0xa80] sm:$0xff] }
 0xbb8   :  { %9527 = vmatprep.subr.bf16.mxu1 %v9526_v59  ;;  %v3822_v59 = vld [vmem:[#allocation11 + $0xa90] sm:$0xff] }
 0xbbb   :  { %9529 = vmatpush1.bf16.msra.mxu1 %v9528_v50  ;;  %v3829_v50 = vld [vmem:[#allocation11 + $0xac8] sm:$0xff] }
 0xbbc   :  { %9531 = vmatprep.subr.bf16.mxu1 %v9530_v56  ;;  %v3831_v56 = vld [vmem:[#allocation11 + $0xad8] sm:$0xff] }
 0xbbd   :  { %v9570_v63 = vpack.c.bf16 %v3831_v56, %v3829_v50  ;;  %v3864_v50 = vld [vmem:[#allocation11 + $0xbe0] sm:$0xff]  ;;  %v3866_v56 = vld [vmem:[#allocation11 + $0xbf0] sm:$0xff] }
 0xbbf   :  { %9533 = vmatpush1.bf16.msra.mxu1 %v9532_v48  ;;  %v3833_v48 = vld [vmem:[#allocation11 + $0xae8] sm:$0xff] }
 0xbc0   :  { %9535 = vmatprep.subr.bf16.mxu1 %v9534_v14  ;;  %v3835_v14 = vld [vmem:[#allocation11 + $0xaf8] sm:$0xff] }
 0xbc1   :  { %v9574_v24 = vpack.c.bf16 %v3835_v14, %v3833_v48  ;;  %v4043_v48 = vld [vmem:[%s12551_s14 + $0x88] sm:$0xff] }
 0xbc3   :  { %9537 = vmatpush1.bf16.msra.mxu1 %v9536_v38  ;;  %v3837_v38 = vld [vmem:[#allocation11 + $0xb08] sm:$0xff] }
 0xbc4   :  { %9539 = vmatprep.subr.bf16.mxu1 %v9538_v6  ;;  %v3839_v6 = vld [vmem:[#allocation11 + $0xb18] sm:$0xff] }
 0xbc5   :  { %v9578_v31 = vpack.c.bf16 %v3839_v6, %v3837_v38  ;;  %v4045_v38 = vld [vmem:[%s12551_s14 + $0x98] sm:$0xff] }
 0xbc7   :  { %9541 = vmatpush1.bf16.msra.mxu1 %v9540_v43  ;;  %v3841_v43 = vld [vmem:[#allocation11 + $0xb28] sm:$0xff] }
 0xbc8   :  { %9543 = vmatprep.subr.bf16.mxu1 %v9542_v12  ;;  %v3843_v12 = vld [vmem:[#allocation11 + $0xb38] sm:$0xff] }
 0xbc9   :  { %v9582_v18 = vpack.c.bf16 %v3843_v12, %v3841_v43  ;;  %v4047_v43 = vld [vmem:[%s12551_s14 + $0xa8] sm:$0xff] }
 0xbcb   :  { %9545 = vmatpush1.bf16.msra.mxu1 %v9544_v28  ;;  %v3845_v28 = vld [vmem:[#allocation11 + $0xb48] sm:$0xff] }
 0xbcc   :  { %9547 = vmatprep.subr.bf16.mxu1 %v9546_v1  ;;  %v3847_v1 = vld [vmem:[#allocation11 + $0xb58] sm:$0xff] }
 0xbcd   :  { %v9586_v55 = vpack.c.bf16 %v3847_v1, %v3845_v28  ;;  %v4049_v28 = vld [vmem:[%s12551_s14 + $0xb8] sm:$0xff] }
 0xbce   :  { %3933 = vmatmul.mubr.f32.vlgmr.msra.gmra.mrb[34].mxu1 %v11971_v34  ;;  %v3818_v34 = vld [vmem:[#allocation11 + $0xa70] sm:$0xff] }
 0xbcf   :  { %9549 = vmatpush1.bf16.msra.mxu1 %v9548_v32  ;;  %3938 = vmatprep.mubr.f32.mxu1 %v11981_v46  ;;  %v9560_v46 = vpack.c.bf16 %v3818_v34, %v3816_v62  ;;  %v3849_v32 = vld [vmem:[#allocation11 + $0xb68] sm:$0xff]  ;;  %v9596_v62 = vpack.c.bf16 %v3854_v30, %v3852_v17 }
 0xbd0   :  { %9551 = vmatprep.subr.bf16.mxu1 %v9550_v16  ;;  %v3851_v16 = vld [vmem:[#allocation11 + $0xb78] sm:$0xff]  ;;  %v4037_v17 = vld [vmem:[%s12551_s14 + $0x58] sm:$0xff]  ;;  %v4054_v30 = vld [vmem:[%s12551_s14 + $0xe0] sm:$0xff] }
 0xbd1   :  { %v9590_v40 = vpack.c.bf16 %v3851_v16, %v3849_v32  ;;  %v4051_v32 = vld [vmem:[%s12551_s14 + $0xc8] sm:$0xff] }
 0xbd2   :  { %3939 = vmatmul.mubr.f32.gmra.mrb[36].mxu1 %v11979_v54  ;;  %v9564_v54 = vpack.c.bf16 %v3822_v59, %v3820_v44  ;;  %v9600_v44 = vpack.c.bf16 %v3858_v27, %v3856_v3  ;;  %v4039_v3 = vld [vmem:[%s12551_s14 + $0x68] sm:$0xff]  ;;  %v4056_v27 = vld [vmem:[%s12551_s14 + $0xf0] sm:$0xff] }
 0xbd3   :  { %9553 = vmatpush1.bf16.msra.mxu1 %v9552_v51  ;;  %4009 = vmatprep.mubr.f32.mxu1 %v11985_v36  ;;  %v3826_v36 = vld [vmem:[#allocation11 + $0xab0] sm:$0xff]  ;;  %v3853_v51 = vld [vmem:[#allocation11 + $0xb88] sm:$0xff] }
 0xbd4   :  { %9555 = vmatprep.subr.bf16.mxu1 %v9554_v52  ;;  %v9568_v49 = vpack.c.bf16 %v3826_v36, %v3824_v42  ;;  %v3855_v52 = vld [vmem:[#allocation11 + $0xb98] sm:$0xff]  ;;  %v9604_v42 = vpack.c.bf16 %v3862_v60, %v3860_v10  ;;  %v4041_v10 = vld [vmem:[%s12551_s14 + $0x78] sm:$0xff] }
 0xbd5   :  { %v9594_v21 = vpack.c.bf16 %v3855_v52, %v3853_v51  ;;  %v4053_v51 = vld [vmem:[%s12551_s14 + $0xd8] sm:$0xff] }
 0xbd7   :  { %9557 = vmatpush1.bf16.msra.mxu1 %v9556_v37  ;;  %v3857_v37 = vld [vmem:[#allocation11 + $0xba8] sm:$0xff] }
 0xbd8   :  { %9559 = vmatprep.subr.bf16.mxu1 %v9558_v47  ;;  %v3859_v47 = vld [vmem:[#allocation11 + $0xbb8] sm:$0xff] }
 0xbd9   :  { %v9598_v34 = vpack.c.bf16 %v3859_v47, %v3857_v37  ;;  %v4055_v37 = vld [vmem:[%s12551_s14 + $0xe8] sm:$0xff] }
 0xbdb   :  { %9561 = vmatpush1.bf16.msra.mxu1 %v9560_v46  ;;  %v3861_v46 = vld [vmem:[#allocation11 + $0xbc8] sm:$0xff] }
 0xbdc   :  { %9563 = vmatprep.subr.bf16.mxu1 %v9562_v13  ;;  %v3863_v13 = vld [vmem:[#allocation11 + $0xbd8] sm:$0xff] }
 0xbdd   :  { %v9602_v59 = vpack.c.bf16 %v3863_v13, %v3861_v46  ;;  %v4057_v46 = vld [vmem:[%s12551_s14 + $0xf8] sm:$0xff] }
 0xbdf   :  { %9565 = vmatpush1.bf16.msra.mxu1 %v9564_v54  ;;  %v3865_v54 = vld [vmem:[#allocation11 + $0xbe8] sm:$0xff] }
 0xbe0   :  { %9567 = vmatprep.subr.bf16.mxu1 %v9566_v26  ;;  %v3867_v26 = vld [vmem:[#allocation11 + $0xbf8] sm:$0xff] }
 0xbe1   :  { %v9606_v36 = vpack.c.bf16 %v3867_v26, %v3865_v54  ;;  %v4059_v54 = vld [vmem:[#allocation13 + $0x8] sm:$0xff]  ;;  %v4061_v26 = vld [vmem:[#allocation13 + $0x18] sm:$0xff] }
 0xbe3   :  { %9569 = vmatpush1.bf16.msra.mxu1 %v9568_v49  ;;  %v9608_v49 = vpack.c.bf16 %v3866_v56, %v3864_v50  ;;  %v4060_v50 = vld [vmem:[#allocation13 + $0x10] sm:$0xff] }
 0xbe4   :  { %9571 = vmatprep.subr.bf16.mxu1 %v9570_v63 }
 0xbe7   :  { %9573 = vmatpush1.bf16.msra.mxu1 %v9572_v25 }
 0xbe8   :  { %9575 = vmatprep.subr.bf16.mxu1 %v9574_v24 }
 0xbeb   :  { %9577 = vmatpush1.bf16.msra.mxu1 %v9576_v4  ;;  %v12026_v4 = vpack.c.bf16 %v4045_v38, %v4044_v53 }
 0xbec   :  { %9579 = vmatprep.subr.bf16.mxu1 %v9578_v31  ;;  %v4028_v31 = vld [vmem:[%s12551_s14 + $0x10] sm:$0xff] }
 0xbed   :  { %v12035_v12 = vpack.c.bf16 %v4029_v57, %v4028_v31 }
 0xbef   :  { %9581 = vmatpush1.bf16.msra.mxu1 %v9580_v11  ;;  %v12038_v11 = vpack.c.bf16 %v4047_v43, %v4046_v2 }
 0xbf0   :  { %9583 = vmatprep.subr.bf16.mxu1 %v9582_v18  ;;  %v4030_v18 = vld [vmem:[%s12551_s14 + $0x20] sm:$0xff] }
 0xbf1   :  { %v12045_v1 = vpack.c.bf16 %v4031_v22, %v4030_v18 }
 0xbf3   :  { %9585 = vmatpush1.bf16.msra.mxu1 %v9584_v61  ;;  %v12048_v61 = vpack.c.bf16 %v4049_v28, %v4048_v23 }
 0xbf4   :  { %9587 = vmatprep.subr.bf16.mxu1 %v9586_v55  ;;  %v4032_v55 = vld [vmem:[%s12551_s14 + $0x30] sm:$0xff] }
 0xbf5   :  { %v12055_v16 = vpack.c.bf16 %v4033_v0, %v4032_v55 }
 0xbf7   :  { %9589 = vmatpush1.bf16.msra.mxu1 %v9588_v33  ;;  %v12058_v33 = vpack.c.bf16 %v4051_v32, %v4050_v29 }
 0xbf8   :  { %9591 = vmatprep.subr.bf16.mxu1 %v9590_v40  ;;  %v4034_v40 = vld [vmem:[%s12551_s14 + $0x40] sm:$0xff] }
 0xbf9   :  { %v12065_v52 = vpack.c.bf16 %v4035_v58, %v4034_v40 }
 0xbfb   :  { %9593 = vmatpush1.bf16.msra.mxu1 %v9592_v39  ;;  %v12068_v39 = vpack.c.bf16 %v4053_v51, %v4052_v45 }
 0xbfc   :  { %9595 = vmatprep.subr.bf16.mxu1 %v9594_v21  ;;  %v4036_v21 = vld [vmem:[%s12551_s14 + $0x50] sm:$0xff] }
 0xbfd   :  { %v12075_v47 = vpack.c.bf16 %v4037_v17, %v4036_v21 }
 0xbff   :  { %9597 = vmatpush1.bf16.msra.mxu1 %v9596_v62  ;;  %v12078_v62 = vpack.c.bf16 %v4055_v37, %v4054_v30 }
 0xc00   :  { %9599 = vmatprep.subr.bf16.mxu1 %v9598_v34  ;;  %v4038_v34 = vld [vmem:[%s12551_s14 + $0x60] sm:$0xff] }
 0xc01   :  { %v12085_v13 = vpack.c.bf16 %v4039_v3, %v4038_v34 }
 0xc03   :  { %9601 = vmatpush1.bf16.msra.mxu1 %v9600_v44  ;;  %v12088_v44 = vpack.c.bf16 %v4057_v46, %v4056_v27 }
 0xc04   :  { %9603 = vmatprep.subr.bf16.mxu1 %v9602_v59  ;;  %v4040_v59 = vld [vmem:[%s12551_s14 + $0x70] sm:$0xff] }
 0xc05   :  { %v9644_v60 = vpack.c.bf16 %v4041_v10, %v4040_v59 }
 0xc07   :  { %9605 = vmatpush1.bf16.msra.mxu1 %v9604_v42  ;;  %v12094_v42 = vpack.c.bf16 %v4061_v26, %v4059_v54 }
 0xc08   :  { %9607 = vmatprep.subr.bf16.mxu1 %v9606_v36  ;;  %v4058_v36 = vld [vmem:[#allocation13] sm:$0xff] }
 0xc0b   :  { %9609 = vmatpush1.bf16.msra.mxu1 %v9608_v49  ;;  %v12097_v49 = vpack.c.bf16 %v4060_v50, %v4058_v36 }
 0xc0c   :  { %8470 = vmatprep.subr.mxu1 %v12532_v35 }
 0xc0e   :  { %4010 = vmatmul.mubr.f32.vlgmr.msra.gmra.mrb[34].mxu1 %v11983_v5 }
 0xc0f   :  { %4015 = vmatprep.mubr.f32.mxu1 %v11990_v41  ;;  %v4026_v41 = vld [vmem:[%s12551_s14] sm:$0xff] }
 0xc10   :  { %v12023_v6 = vpack.c.bf16 %v4027_v20, %v4026_v41  ;;  %v4064_v20 = vld [vmem:[#allocation13 + $0x30] sm:$0xff] }
 0xc12   :  { %4016 = vmatmul.mubr.f32.gmra.mrb[36].mxu1 %v11987_v19  ;;  %v12017_v19 = vpack.c.bf16 %v4043_v48, %v4042_v15  ;;  %v4063_v48 = vld [vmem:[#allocation13 + $0x28] sm:$0xff] }
 0xc13   :  { %8472 = vmatprep.mubr.msk.f32.mxu1 %vm10866_vm9, %v12532_v35 }
 0xce1   :  { %v12003_v63 = vpop.f32.mrb[34].mxu1 }
 0xce2   :  { %v12005_v7 = vpop.f32.mrb[35].mxu1 }
 0xce5   :  { %v12009_v14 = vpop.f32.mrb[36].mxu1 }
 0xce6   :  { %v9612_v25 = vpack.c.bf16 %v12009_v14, %v12003_v63  ;;  %v12013_v24 = vpop.f32.mrb[37].mxu1 }
 0xce7   :  { %v9610_v5 = vpack.c.bf16 %v12013_v24, %v12005_v7 }
 0xce9   :  { %9611 = vmatprep.subr.bf16.mxu0 %v9610_v5  ;;  %v4062_v5 = vld [vmem:[#allocation13 + $0x20] sm:$0xff] }
 0xcea   :  { %9613 = vmatpush1.bf16.msra.mxu0 %v9612_v25  ;;  %v4065_v25 = vld [vmem:[#allocation13 + $0x38] sm:$0xff]  ;;  %v12103_v53 = vpack.c.bf16 %v4064_v20, %v4062_v5  ;;  %v4632_v5 = vld [vmem:[#allocation17] sm:$0xff] }
 0xceb   :  { %9615 = vmatprep.subr.bf16.mxu0 %v12017_v19  ;;  %v12101_v41 = vpack.c.bf16 %v4065_v25, %v4063_v48  ;;  %v4832_v48 = vld [vmem:[#allocation19 + $0x180] sm:$0xff]  ;;  %v4833_v25 = vld [vmem:[#allocation19 + $0x188] sm:$0xff] }
 0xcec   :  { %v4816_v20 = vld [vmem:[#allocation19 + $0x100] sm:$0xff] }
 0xced   :  { %7596 = vmatmul.mubr.msk.f32.vlgmr.msra.gmra.mrb[46].mxu0 %vm4066_vm4, %v12539_v9 }
 0xcee   :  { %9617 = vmatpush3.bf16.msra.mxu0 %v12023_v6 }
 0xcef   :  { %9619 = vmatprep.subr.bf16.mxu0 %v12026_v4 }
 0xcf2   :  { %9621 = vmatpush3.bf16.msra.mxu0 %v12035_v12 }
 0xcf3   :  { %9623 = vmatprep.subr.bf16.mxu0 %v12038_v11 }
 0xcf6   :  { %9625 = vmatpush3.bf16.msra.mxu0 %v12045_v1 }
 0xcf7   :  { %9627 = vmatprep.subr.bf16.mxu0 %v12048_v61 }
 0xcfa   :  { %9629 = vmatpush3.bf16.msra.mxu0 %v12055_v16 }
 0xcfb   :  { %9631 = vmatprep.subr.bf16.mxu0 %v12058_v33 }
 0xcfe   :  { %9633 = vmatpush3.bf16.msra.mxu0 %v12065_v52 }
 0xcff   :  { %9635 = vmatprep.subr.bf16.mxu0 %v12068_v39 }
 0xd02   :  { %9637 = vmatpush3.bf16.msra.mxu0 %v12075_v47 }
 0xd03   :  { %9639 = vmatprep.subr.bf16.mxu0 %v12078_v62 }
 0xd06   :  { %9641 = vmatpush3.bf16.msra.mxu0 %v12085_v13 }
 0xd07   :  { %9643 = vmatprep.subr.bf16.mxu0 %v12088_v44 }
 0xd0a   :  { %9645 = vmatpush3.bf16.msra.mxu0 %v9644_v60 }
 0xd0b   :  { %9647 = vmatprep.subr.bf16.mxu0 %v12094_v42 }
 0xdc0   :  { %v4135_v56 = vpop.f32.mrb[46].mxu0 }
 0xdc1   :  { %v4137_v15 = vpop.f32.mrb[47].mxu0 }
 0xdc2   :  { %4204 = vmatprep.mubr.f32.mxu0 %v4137_v15 }
 0xdc3   :  { %4205 = vmatmul.mubr.f32.vlgmr.msra.gmra.mrb[48].mxu0 %v4135_v56 }
 0xdc4   :  { %9649 = vmatpush1.bf16.msra.mxu0 %v12097_v49  ;;  %4278 = vmatprep.mubr.f32.mxu0 %v12532_v35 }
 0xdc5   :  { %9651 = vmatprep.subr.bf16.mxu0 %v12101_v41 }
 0xdc8   :  { %9653 = vmatpush1.bf16.msra.mxu0 %v12103_v53 }
 0xe96   :  { %v7831_v38 = vpop.f32.mrb[48].mxu0 }
 0xe97   :  { %v7832_v31 = vpop.f32.mrb[49].mxu0 }
 0xe98   :  { %v7833_v57 = vadd.f32 %v7832_v31, %v7831_v38  ;;  %v4834_v38 = vld [vmem:[#allocation19 + $0x190] sm:$0xff]  ;;  %v4835_v31 = vld [vmem:[#allocation19 + $0x198] sm:$0xff] }
 0xe9a   :  { %v4210_v2 = vmul.f32 0.0078125, %v7833_v57  ;;  %v4740_v57 = vld [vmem:[#allocation17 + $0x8] sm:$0xff] }
 0xe9c   :  { %7597 = vmatmul.mubr.msk.f32.vlgmr.msra.gmra.mrb[50].mxu0 %vm1516_vm2, %v4210_v2 }
 0xe9d   :  { %4365 = vmatprep.mubr.f32.mxu0 %v12532_v35 }
 0xf6f   :  { %v4280_v43 = vpop.f32.mrb[50].mxu0 }
 0xf70   :  { %v4288_v18 = vrot.slane %v4280_v43, %v11685_v8  ;;  %v4282_v22 = vpop.f32.mrb[51].mxu0  ;;  %v9718_v43 = vpack.c.bf16 %v4835_v31, %v4834_v38  ;;  %v4727_v38 = vld [vmem:[#allocation19 + $0xa0] sm:$0xff]  ;;  %v4728_v31 = vld [vmem:[#allocation19 + $0xa8] sm:$0xff] }
 0xf71   :  { %v4292_v23 = vrot.slane %v4282_v22, %v11685_v8  ;;  %v4819_v22 = vld [vmem:[#allocation19 + $0x118] sm:$0xff] }
 0xf72   :  { %v4293_v28 = vsub.f32 %v12003_v63, %v4288_v18  ;;  %v4295_v55 = vsub.f32 %v12009_v14, %v4288_v18  ;;  %v4818_v18 = vld [vmem:[#allocation19 + $0x110] sm:$0xff] }
 0xf73   :  { %v12114_v0 = vsub.f32 %v12005_v7, %v4292_v23  ;;  %v12117_v29 = vsub.f32 %v12013_v24, %v4292_v23  ;;  %v4836_v23 = vld [vmem:[#allocation19 + $0x1a0] sm:$0xff] }
 0xf74   :  { %v4297_v32 = vmul.f32 %v4293_v28, %v4293_v28  ;;  %v4299_v40 = vmul.f32 %v4295_v55, %v4295_v55 }
 0xf75   :  { %v4298_v58 = vmul.f32 %v12114_v0, %v12114_v0  ;;  %v4300_v45 = vmul.f32 %v12117_v29, %v12117_v29 }
 0xf76   :  { %v9656_v21 = vpack.c.bf16 %v4299_v40, %v4297_v32  ;;  %v4821_v32 = vld [vmem:[#allocation19 + $0x128] sm:$0xff]  ;;  %v4838_v40 = vld [vmem:[#allocation19 + $0x1b0] sm:$0xff] }
 0xf77   :  { %v9654_v51 = vpack.c.bf16 %v4300_v45, %v4298_v58  ;;  %v4839_v58 = vld [vmem:[#allocation19 + $0x1b8] sm:$0xff] }
 0xf79   :  { %9655 = vmatprep.subr.bf16.mxu0 %v9654_v51  ;;  %v9726_v51 = vpack.c.bf16 %v4839_v58, %v4838_v40  ;;  %v4732_v40 = vld [vmem:[#allocation19 + $0xc8] sm:$0xff] }
 0xf7a   :  { %9657 = vmatpush1.bf16.msra.mxu0 %v9656_v21  ;;  %v4822_v21 = vld [vmem:[#allocation19 + $0x130] sm:$0xff] }
 0xf7b   :  { %9659 = vmatprep.subr.bf16.mxu0 %v12017_v19 }
 0xf7d   :  { %7598 = vmatmul.mubr.msk.f32.vlgmr.msra.gmra.mrb[52].mxu0 %vm4066_vm4, %v12539_v9 }
 0xf7e   :  { %9661 = vmatpush3.bf16.msra.mxu0 %v12023_v6 }
 0xf7f   :  { %9663 = vmatprep.subr.bf16.mxu0 %v12026_v4 }
 0xf82   :  { %9665 = vmatpush3.bf16.msra.mxu0 %v12035_v12  ;;  %v4443_v12 = vld [vmem:[#allocation14] sm:$0x1] }
 0xf83   :  { %9667 = vmatprep.subr.bf16.mxu0 %v12038_v11 }
 0xf86   :  { %9669 = vmatpush3.bf16.msra.mxu0 %v12045_v1 }
 0xf87   :  { %9671 = vmatprep.subr.bf16.mxu0 %v12048_v61  ;;  %v4521_v61 = vld [vmem:[#allocation16] sm:$0x1] }
 0xf8a   :  { %9673 = vmatpush3.bf16.msra.mxu0 %v12055_v16 }
 0xf8b   :  { %9675 = vmatprep.subr.bf16.mxu0 %v12058_v33 }
 0xf8e   :  { %9677 = vmatpush3.bf16.msra.mxu0 %v12065_v52 }
 0xf8f   :  { %9679 = vmatprep.subr.bf16.mxu0 %v12068_v39 }
 0xf92   :  { %9681 = vmatpush3.bf16.msra.mxu0 %v12075_v47 }
 0xf93   :  { %9683 = vmatprep.subr.bf16.mxu0 %v12078_v62 }
 0xf96   :  { %9685 = vmatpush3.bf16.msra.mxu0 %v12085_v13 }
 0xf97   :  { %9687 = vmatprep.subr.bf16.mxu0 %v12088_v44 }
 0xf9a   :  { %9689 = vmatpush3.bf16.msra.mxu0 %v9644_v60 }
 0xf9b   :  { %9691 = vmatprep.subr.bf16.mxu0 %v12094_v42 }
0x1050   :  { %v4367_v63 = vpop.f32.mrb[52].mxu0 }
0x1051   :  { %v4369_v7 = vpop.f32.mrb[53].mxu0 }
0x1052   :  { %4436 = vmatprep.mubr.f32.mxu0 %v4369_v7  ;;  %v4840_v7 = vld [vmem:[#allocation19 + $0x1c0] sm:$0xff] }
0x1053   :  { %4437 = vmatmul.mubr.f32.vlgmr.msra.gmra.mrb[54].mxu0 %v4367_v63  ;;  %v4823_v63 = vld [vmem:[#allocation19 + $0x138] sm:$0xff] }
0x1054   :  { %9693 = vmatpush1.bf16.msra.mxu0 %v12097_v49  ;;  %4514 = vmatprep.mubr.f32.mxu0 %v12532_v35 }
0x1055   :  { %9695 = vmatprep.subr.bf16.mxu0 %v12101_v41 }
0x1058   :  { %9697 = vmatpush1.bf16.msra.mxu0 %v12103_v53 }
0x1059   :  { %9699 = vmatprep.subr.bf16.mxu0 %v12094_v42 }
0x1126   :  { %v7866_v14 = vpop.f32.mrb[54].mxu0 }
0x1127   :  { %v7867_v24 = vpop.f32.mrb[55].mxu0 }
0x1128   :  { %v7868_v19 = vadd.f32 %v7867_v24, %v7866_v14  ;;  %v4841_v14 = vld [vmem:[#allocation19 + $0x1c8] sm:$0xff]  ;;  %v9728_v24 = vpack.c.bf16 %v4823_v63, %v4822_v21  ;;  %v4733_v63 = vld [vmem:[#allocation19 + $0xd0] sm:$0xff] }
0x1129   :  { %v4716_v21 = vld [vmem:[#allocation19 + $0x48] sm:$0xff] }
0x112a   :  { %v4442_v6 = vmul.f32 0.0078125, %v7868_v19  ;;  %v9730_v19 = vpack.c.bf16 %v4841_v14, %v4840_v7  ;;  %v4734_v7 = vld [vmem:[#allocation19 + $0xd8] sm:$0xff] }
0x112c   :  { %v4444_v4 = vadd.f32 1e-05, %v4442_v6  ;;  %v4824_v6 = vld [vmem:[#allocation19 + $0x140] sm:$0xff] }
0x112e   :  { %10244 = vrsqrt.f32 %v4444_v4  ;;  %v4825_v4 = vld [vmem:[#allocation19 + $0x148] sm:$0xff] }
0x1138   :  { %v10245_v11 = vpop.eup %10244 }
0x1139   :  { %v4446_v1 = vmul.f32 %v10245_v11, %v4443_v12  ;;  %v4842_v12 = vld [vmem:[#allocation19 + $0x1d0] sm:$0xff]  ;;  %v4843_v11 = vld [vmem:[#allocation19 + $0x1d8] sm:$0xff] }
0x113b   :  { %7599 = vmatmul.mubr.msk.f32.vlgmr.msra.gmra.mrb[56].mxu0 %vm1516_vm2, %v4446_v1  ;;  %v9732_v1 = vpack.c.bf16 %v4825_v4, %v4824_v6  ;;  %v4718_v6 = vld [vmem:[#allocation19 + $0x58] sm:$0xff]  ;;  %v4735_v4 = vld [vmem:[#allocation19 + $0xe0] sm:$0xff] }
0x113c   :  { %9701 = vmatpush1.bf16.msra.mxu0 %v12097_v49  ;;  %4589 = vmatprep.mubr.f32.mxu0 %v12532_v35 }
0x113d   :  { %9703 = vmatprep.subr.bf16.mxu0 %v12101_v41  ;;  %v9714_v41 = vpack.c.bf16 %v4833_v25, %v4832_v48 }
0x1140   :  { %9705 = vmatpush1.bf16.msra.mxu0 %v12103_v53  ;;  %v4817_v53 = vld [vmem:[#allocation19 + $0x108] sm:$0xff] }
0x1141   :  { %v9716_v2 = vpack.c.bf16 %v4817_v53, %v4816_v20  ;;  %v4709_v20 = vld [vmem:[#allocation19 + $0x10] sm:$0xff]  ;;  %v4710_v53 = vld [vmem:[#allocation19 + $0x18] sm:$0xff] }
0x1143   :  { %7600 = vmatmul.mubr.msk.f32.vlgmr.msra.gmra.mrb[58].mxu0 %vm1516_vm2, %v4521_v61  ;;  %v9734_v61 = vpack.c.bf16 %v4843_v11, %v4842_v12  ;;  %v4736_v12 = vld [vmem:[#allocation19 + $0xe8] sm:$0xff] }
0x1144   :  { %4700 = vmatprep.mubr.f32.mxu0 %v12532_v35 }
0x120e   :  { %v4516_v16 = vpop.f32.mrb[56].mxu0 }
0x120f   :  { %v4518_v33 = vpop.f32.mrb[57].mxu0  ;;  %v4599_v52 = vrot.slane %v4516_v16, %v11685_v8  ;;  %v4826_v16 = vld [vmem:[#allocation19 + $0x150] sm:$0xff] }
0x1210   :  { %v4603_v39 = vrot.slane %v4518_v33, %v11685_v8  ;;  %v4827_v33 = vld [vmem:[#allocation19 + $0x158] sm:$0xff] }
0x1211   :  { %v4604_v30 = vmul.f32 %v4599_v52, %v4293_v28  ;;  %v4606_v37 = vmul.f32 %v4599_v52, %v4295_v55  ;;  %v4837_v28 = vld [vmem:[#allocation19 + $0x1a8] sm:$0xff]  ;;  %v9720_v55 = vpack.c.bf16 %v4819_v22, %v4818_v18  ;;  %v4844_v52 = vld [vmem:[#allocation19 + $0x1e0] sm:$0xff]  ;;  %v4729_v22 = vld [vmem:[#allocation19 + $0xb0] sm:$0xff] }
0x1212   :  { %v4605_v34 = vmul.f32 %v4603_v39, %v12114_v0  ;;  %v4607_v3 = vmul.f32 %v4603_v39, %v12117_v29  ;;  %v9722_v0 = vpack.c.bf16 %v4837_v28, %v4836_v23  ;;  %v4820_v29 = vld [vmem:[#allocation19 + $0x120] sm:$0xff]  ;;  %v4845_v39 = vld [vmem:[#allocation19 + $0x1e8] sm:$0xff]  ;;  %v4730_v23 = vld [vmem:[#allocation19 + $0xb8] sm:$0xff] }
0x1213   :  { %v9724_v45 = vpack.c.bf16 %v4821_v32, %v4820_v29  ;;  %v4712_v18 = vld [vmem:[#allocation19 + $0x28] sm:$0xff]  ;;  %v4714_v29 = vld [vmem:[#allocation19 + $0x38] sm:$0xff]  ;;  %v4731_v32 = vld [vmem:[#allocation19 + $0xc0] sm:$0xff] }
0x1216   :  { %v4591_v17 = vpop.f32.mrb[58].mxu0 }
0x1217   :  { %v4611_v47 = vrot.slane %v4591_v17, %v11685_v8  ;;  %v4593_v62 = vpop.f32.mrb[59].mxu0  ;;  %v9736_v17 = vpack.c.bf16 %v4827_v33, %v4826_v16  ;;  %v4720_v16 = vld [vmem:[#allocation19 + $0x68] sm:$0xff]  ;;  %v4737_v33 = vld [vmem:[#allocation19 + $0xf0] sm:$0xff] }
0x1218   :  { %v4615_v27 = vrot.slane %v4593_v62, %v11685_v8 }
0x1219   :  { %v4616_v46 = vadd.f32 %v4611_v47, %v4604_v30  ;;  %v4618_v13 = vadd.f32 %v4611_v47, %v4606_v37  ;;  %v9738_v30 = vpack.c.bf16 %v4845_v39, %v4844_v52  ;;  %v4828_v37 = vld [vmem:[#allocation19 + $0x160] sm:$0xff]  ;;  %v4829_v47 = vld [vmem:[#allocation19 + $0x168] sm:$0xff]  ;;  %v4738_v52 = vld [vmem:[#allocation19 + $0xf8] sm:$0xff] }
0x121a   :  { %v4617_v44 = vadd.f32 %v4615_v27, %v4605_v34  ;;  %v4619_v59 = vadd.f32 %v4615_v27, %v4607_v3  ;;  %v9740_v62 = vpack.c.bf16 %v4829_v47, %v4828_v37  ;;  %v4846_v34 = vld [vmem:[#allocation19 + $0x1f0] sm:$0xff]  ;;  %v4847_v3 = vld [vmem:[#allocation19 + $0x1f8] sm:$0xff] }
0x121b   :  { %vm4620_vm5 = vcmp.gt.f32.partialorder %v4616_v46, 0.0  ;;  %vm4622_vm6 = vcmp.gt.f32.partialorder %v4618_v13, 0.0  ;;  %v4624_v10 = vmul.f32 0.01, %v4616_v46  ;;  %v4626_v60 = vmul.f32 0.01, %v4618_v13 }
0x121c   :  { %vm4621_vm7 = vcmp.gt.f32.partialorder %v4617_v44, 0.0  ;;  %vm4623_vm8 = vcmp.gt.f32.partialorder %v4619_v59, 0.0  ;;  %v4625_v54 = vmul.f32 0.01, %v4617_v44  ;;  %v4627_v26 = vmul.f32 0.01, %v4619_v59 }
0x121d   :  { %v4628_v42 = vsel %vm4620_vm5, %v4616_v46, %v4624_v10  ;;  %v4630_v36 = vsel %vm4622_vm6, %v4618_v13, %v4626_v60  ;;  %v4830_v27 = vld [vmem:[#allocation19 + $0x170] sm:$0xff]  ;;  %v9742_v46 = vpack.c.bf16 %v4847_v3, %v4846_v34  ;;  %v4831_v13 = vld [vmem:[#allocation19 + $0x178] sm:$0xff]  ;;  %v4724_v10 = vld [vmem:[#allocation19 + $0x88] sm:$0xff] }
0x121e   :  { %v4629_v50 = vsel %vm4621_vm7, %v4617_v44, %v4625_v54  ;;  %v4631_v56 = vsel %vm4623_vm8, %v4619_v59, %v4627_v26  ;;  %v12159_v49 = vpack.c.bf16 %v4630_v36, %v4628_v42  ;;  %v9744_v44 = vpack.c.bf16 %v4831_v13, %v4830_v27  ;;  %v4723_v59 = vld [vmem:[#allocation19 + $0x80] sm:$0xff]  ;;  %v4708_v36 = vld [vmem:[#allocation19 + $0x8] sm:$0xff]  ;;  %v4722_v37 = vld [vmem:[#allocation19 + $0x78] sm:$0xff] }
0x121f   :  { %v12161_v15 = vpack.c.bf16 %v4631_v56, %v4629_v50  ;;  %v9746_v60 = vpack.c.bf16 %v4724_v10, %v4723_v59  ;;  %v4707_v42 = vld [vmem:[#allocation19] sm:$0xff]  ;;  %v4725_v50 = vld [vmem:[#allocation19 + $0x90] sm:$0xff]  ;;  %v4726_v56 = vld [vmem:[#allocation19 + $0x98] sm:$0xff] }
0x1220   :  { %v9748_v25 = vpack.c.bf16 %v4708_v36, %v4707_v42  ;;  %v5081_v34 = vld [vmem:[#allocation19 + $0x280] sm:$0xff]  ;;  %v5082_v3 = vld [vmem:[#allocation19 + $0x288] sm:$0xff]  ;;  %v5084_v59 = vld [vmem:[#allocation19 + $0x298] sm:$0xff] }
0x1221   :  { %9707 = vmatprep.subr.bf16.mxu0 %v12161_v15  ;;  %v5065_v27 = vld [vmem:[#allocation19 + $0x200] sm:$0xff]  ;;  %v5066_v13 = vld [vmem:[#allocation19 + $0x208] sm:$0xff] }
0x1222   :  { %9709 = vmatpush1.bf16.msra.mxu0 %v12159_v49  ;;  %v9784_v10 = vpack.c.bf16 %v5066_v13, %v5065_v27  ;;  %v5085_v42 = vld [vmem:[#allocation19 + $0x2a0] sm:$0xff]  ;;  %v5171_v13 = vld [vmem:[%s12552_s7 + $0x18] sm:$0xff] }
0x1223   :  { %9711 = vmatprep.subr.bf16.mxu0 %v12161_v15 }
0x1225   :  { %7601 = vmatmul.mubr.msk.f32.vlgmr.msra.gmra.mrb[60].mxu0 %vm4066_vm4, %v4632_v5 }
0x1226   :  { %9713 = vmatpush1.bf16.msra.mxu0 %v12159_v49  ;;  %4808 = vmatprep.mubr.f32.mxu0 %v12532_v35 }
0x1227   :  { %9715 = vmatprep.subr.bf16.mxu0 %v9714_v41  ;;  %v9750_v41 = vpack.c.bf16 %v4726_v56, %v4725_v50  ;;  %v5069_v50 = vld [vmem:[#allocation19 + $0x220] sm:$0xff]  ;;  %v5070_v56 = vld [vmem:[#allocation19 + $0x228] sm:$0xff] }
0x1229   :  { %7602 = vmatmul.mubr.msk.f32.vlgmr.msra.gmra.mrb[62].mxu0 %vm4066_vm4, %v4740_v57  ;;  %v9752_v57 = vpack.c.bf16 %v4710_v53, %v4709_v20  ;;  %v5071_v20 = vld [vmem:[#allocation19 + $0x230] sm:$0xff]  ;;  %v5072_v53 = vld [vmem:[#allocation19 + $0x238] sm:$0xff] }
0x122a   :  { %9717 = vmatpush3.bf16.msra.mxu0 %v9716_v2  ;;  %v9754_v2 = vpack.c.bf16 %v4728_v31, %v4727_v38  ;;  %v5089_v38 = vld [vmem:[#allocation19 + $0x2c0] sm:$0xff]  ;;  %v5090_v31 = vld [vmem:[#allocation19 + $0x2c8] sm:$0xff] }
0x122b   :  { %9719 = vmatprep.subr.bf16.mxu0 %v9718_v43  ;;  %v4711_v43 = vld [vmem:[#allocation19 + $0x20] sm:$0xff] }
0x122c   :  { %v9756_v28 = vpack.c.bf16 %v4712_v18, %v4711_v43  ;;  %v5073_v43 = vld [vmem:[#allocation19 + $0x240] sm:$0xff]  ;;  %v5074_v18 = vld [vmem:[#allocation19 + $0x248] sm:$0xff] }
0x122e   :  { %9721 = vmatpush3.bf16.msra.mxu0 %v9720_v55  ;;  %v9758_v55 = vpack.c.bf16 %v4730_v23, %v4729_v22  ;;  %v5091_v22 = vld [vmem:[#allocation19 + $0x2d0] sm:$0xff]  ;;  %v5092_v23 = vld [vmem:[#allocation19 + $0x2d8] sm:$0xff] }
0x122f   :  { %9723 = vmatprep.subr.bf16.mxu0 %v9722_v0  ;;  %v4713_v0 = vld [vmem:[#allocation19 + $0x30] sm:$0xff] }
0x1230   :  { %v9760_v58 = vpack.c.bf16 %v4714_v29, %v4713_v0  ;;  %v5075_v0 = vld [vmem:[#allocation19 + $0x250] sm:$0xff]  ;;  %v5076_v29 = vld [vmem:[#allocation19 + $0x258] sm:$0xff] }
0x1232   :  { %9725 = vmatpush3.bf16.msra.mxu0 %v9724_v45  ;;  %v9762_v45 = vpack.c.bf16 %v4732_v40, %v4731_v32  ;;  %v5093_v32 = vld [vmem:[#allocation19 + $0x2e0] sm:$0xff]  ;;  %v5094_v40 = vld [vmem:[#allocation19 + $0x2e8] sm:$0xff] }
0x1233   :  { %9727 = vmatprep.subr.bf16.mxu0 %v9726_v51  ;;  %v4715_v51 = vld [vmem:[#allocation19 + $0x40] sm:$0xff] }
0x1234   :  { %v9764_v14 = vpack.c.bf16 %v4716_v21, %v4715_v51  ;;  %v5077_v51 = vld [vmem:[#allocation19 + $0x260] sm:$0xff]  ;;  %v5078_v21 = vld [vmem:[#allocation19 + $0x268] sm:$0xff] }
0x1236   :  { %9729 = vmatpush3.bf16.msra.mxu0 %v9728_v24  ;;  %v9766_v24 = vpack.c.bf16 %v4734_v7, %v4733_v63  ;;  %v9808_v63 = vpack.c.bf16 %v5078_v21, %v5077_v51  ;;  %v5095_v7 = vld [vmem:[#allocation19 + $0x2f0] sm:$0xff] }
0x1237   :  { %9731 = vmatprep.subr.bf16.mxu0 %v9730_v19  ;;  %v4717_v19 = vld [vmem:[#allocation19 + $0x50] sm:$0xff] }
0x1238   :  { %v9768_v11 = vpack.c.bf16 %v4718_v6, %v4717_v19  ;;  %v5080_v6 = vld [vmem:[#allocation19 + $0x278] sm:$0xff] }
0x123a   :  { %9733 = vmatpush3.bf16.msra.mxu0 %v9732_v1  ;;  %v9770_v1 = vpack.c.bf16 %v4736_v12, %v4735_v4 }
0x123b   :  { %9735 = vmatprep.subr.bf16.mxu0 %v9734_v61  ;;  %v4719_v61 = vld [vmem:[#allocation19 + $0x60] sm:$0xff] }
0x123c   :  { %v9772_v39 = vpack.c.bf16 %v4720_v16, %v4719_v61 }
0x123e   :  { %9737 = vmatpush3.bf16.msra.mxu0 %v9736_v17  ;;  %v9774_v17 = vpack.c.bf16 %v4738_v52, %v4737_v33 }
0x123f   :  { %9739 = vmatprep.subr.bf16.mxu0 %v9738_v30  ;;  %v4721_v30 = vld [vmem:[#allocation19 + $0x70] sm:$0xff] }
0x1240   :  { %v9776_v47 = vpack.c.bf16 %v4722_v37, %v4721_v30 }
0x1242   :  { %9741 = vmatpush3.bf16.msra.mxu0 %v9740_v62  ;;  %v4989_v62 = vld [vmem:[#allocation17 + $0x10] sm:$0xff] }
0x1243   :  { %9743 = vmatprep.subr.bf16.mxu0 %v9742_v46  ;;  %v9782_v46 = vpack.c.bf16 %v5082_v3, %v5081_v34 }
0x1246   :  { %9745 = vmatpush3.bf16.msra.mxu0 %v9744_v44  ;;  %v5083_v44 = vld [vmem:[#allocation19 + $0x290] sm:$0xff] }
0x1247   :  { %9747 = vmatprep.subr.bf16.mxu0 %v9746_v60  ;;  %v9786_v60 = vpack.c.bf16 %v5084_v59, %v5083_v44  ;;  %v10867_v44 = vmov 0.0|0.0  }
0x12f8   :  { %v12170_v54 = vpop.f32.mrb[60].mxu0 }
0x12f9   :  { %v4704_v26 = vpop.f32.mrb[61].mxu0 }
0x12fc   :  { %v4810_v48 = vpop.f32.mrb[62].mxu0 }
0x12fd   :  { %v4812_v5 = vpop.f32.mrb[63].mxu0 }
0x12fe   :  { %4912 = vmatprep.mubr.f32.mxu0 %v4812_v5  ;;  %v9792_v5 = vpack.c.bf16 %v5070_v56, %v5069_v50  ;;  %v5178_v56 = vld [vmem:[%s12552_s7 + $0x50] sm:$0xff] }
0x12ff   :  { %4913 = vmatmul.mubr.f32.vlgmr.msra.gmra.mrb[64].mxu0 %v4810_v48  ;;  %v5087_v48 = vld [vmem:[#allocation19 + $0x2b0] sm:$0xff] }
0x1300   :  { %9749 = vmatpush3.bf16.msra.mxu0 %v9748_v25  ;;  %4982 = vmatprep.mubr.f32.mxu0 %v4704_v26  ;;  %v5067_v26 = vld [vmem:[#allocation19 + $0x210] sm:$0xff]  ;;  %v5088_v25 = vld [vmem:[#allocation19 + $0x2b8] sm:$0xff] }
0x1301   :  { %9751 = vmatprep.subr.bf16.mxu0 %v9750_v41  ;;  %v9794_v41 = vpack.c.bf16 %v5088_v25, %v5087_v48  ;;  %v5179_v48 = vld [vmem:[%s12552_s7 + $0x58] sm:$0xff] }
0x1302   :  { %v9830_v25 = vpack.c.bf16 %v5179_v48, %v5178_v56  ;;  %v5888_v56 = vld [vmem:[#allocation26 + $0xb0] sm:$0xff]  ;;  %v5889_v48 = vld [vmem:[#allocation26 + $0xb8] sm:$0xff] }
0x1304   :  { %9753 = vmatpush3.bf16.msra.mxu0 %v9752_v57  ;;  %v9796_v57 = vpack.c.bf16 %v5072_v53, %v5071_v20  ;;  %v5182_v53 = vld [vmem:[%s12552_s7 + $0x70] sm:$0xff] }
0x1305   :  { %9755 = vmatprep.subr.bf16.mxu0 %v9754_v2  ;;  %v9798_v2 = vpack.c.bf16 %v5090_v31, %v5089_v38  ;;  %v5183_v38 = vld [vmem:[%s12552_s7 + $0x78] sm:$0xff] }
0x1306   :  { %v9836_v31 = vpack.c.bf16 %v5183_v38, %v5182_v53  ;;  %v5892_v53 = vld [vmem:[#allocation26 + $0xd0] sm:$0xff]  ;;  %v5893_v38 = vld [vmem:[#allocation26 + $0xd8] sm:$0xff] }
0x1308   :  { %9757 = vmatpush3.bf16.msra.mxu0 %v9756_v28  ;;  %v9800_v28 = vpack.c.bf16 %v5074_v18, %v5073_v43 }
0x1309   :  { %9759 = vmatprep.subr.bf16.mxu0 %v9758_v55  ;;  %v9802_v55 = vpack.c.bf16 %v5092_v23, %v5091_v22  ;;  %v5186_v23 = vld [vmem:[#allocation20 + $0x10] sm:$0xff] }
0x130c   :  { %9761 = vmatpush3.bf16.msra.mxu0 %v9760_v58  ;;  %v9804_v58 = vpack.c.bf16 %v5076_v29, %v5075_v0 }
0x130d   :  { %9763 = vmatprep.subr.bf16.mxu0 %v9762_v45  ;;  %v9806_v45 = vpack.c.bf16 %v5094_v40, %v5093_v32 }
0x1310   :  { %9765 = vmatpush3.bf16.msra.mxu0 %v9764_v14  ;;  %v5096_v14 = vld [vmem:[#allocation19 + $0x2f8] sm:$0xff] }
0x1311   :  { %9767 = vmatprep.subr.bf16.mxu0 %v9766_v24  ;;  %v5079_v24 = vld [vmem:[#allocation19 + $0x270] sm:$0xff]  ;;  %v9810_v19 = vpack.c.bf16 %v5096_v14, %v5095_v7 }
0x1312   :  { %v9812_v4 = vpack.c.bf16 %v5080_v6, %v5079_v24 }
0x1314   :  { %9769 = vmatpush3.bf16.msra.mxu0 %v9768_v11 }
0x1315   :  { %9771 = vmatprep.subr.bf16.mxu0 %v9770_v1 }
0x1318   :  { %9773 = vmatpush3.bf16.msra.mxu0 %v9772_v39 }
0x1319   :  { %9775 = vmatprep.subr.bf16.mxu0 %v9774_v17 }
0x131c   :  { %9777 = vmatpush3.bf16.msra.mxu0 %v9776_v47  ;;  %v5168_v47 = vld [vmem:[%s12552_s7] sm:$0xff] }
0x131d   :  { %9779 = vmatprep.subr.bf16.mxu0 %v12161_v15  ;;  %v5068_v15 = vld [vmem:[#allocation19 + $0x218] sm:$0xff] }
0x131f   :  { %4983 = vmatmul.mubr.f32.vlgmr.msra.gmra.mrb[66].mxu0 %v12170_v54  ;;  %v5086_v54 = vld [vmem:[#allocation19 + $0x2a8] sm:$0xff] }
0x1320   :  { %9781 = vmatpush1.bf16.msra.mxu0 %v12159_v49  ;;  %5057 = vmatprep.mubr.f32.mxu0 %v12532_v35  ;;  %v9788_v49 = vpack.c.bf16 %v5068_v15, %v5067_v26  ;;  %v9790_v36 = vpack.c.bf16 %v5086_v54, %v5085_v42  ;;  %v5174_v15 = vld [vmem:[%s12552_s7 + $0x30] sm:$0xff]  ;;  %v5175_v42 = vld [vmem:[%s12552_s7 + $0x38] sm:$0xff] }
0x1321   :  { %9783 = vmatprep.subr.bf16.mxu0 %v9782_v46  ;;  %v5170_v46 = vld [vmem:[%s12552_s7 + $0x10] sm:$0xff]  ;;  %v9824_v54 = vpack.c.bf16 %v5175_v42, %v5174_v15  ;;  %v6365_v15 = vld [vmem:[#allocation25 + $0x8] sm:$0x3] }
0x1322   :  { %v12195_v59 = vpack.c.bf16 %v5171_v13, %v5170_v46  ;;  %v5883_v46 = vld [vmem:[#allocation26 + $0x88] sm:$0xff]  ;;  %v5807_v13 = vld [vmem:[#allocation25 + $0x2] sm:$0x3] }
0x1323   :  { %7603 = vmatmul.mubr.msk.f32.vlgmr.msra.gmra.mrb[68].mxu0 %vm4066_vm4, %v4989_v62  ;;  %v5169_v62 = vld [vmem:[%s12552_s7 + $0x8] sm:$0xff] }
0x1324   :  { %9785 = vmatpush3.bf16.msra.mxu0 %v9784_v10  ;;  %v12186_v27 = vpack.c.bf16 %v5169_v62, %v5168_v47  ;;  %v5172_v10 = vld [vmem:[%s12552_s7 + $0x20] sm:$0xff]  ;;  %v5716_v62 = vld [vmem:[#allocation25] sm:$0x3] }
0x1325   :  { %9787 = vmatprep.subr.bf16.mxu0 %v9786_v60  ;;  %v5173_v60 = vld [vmem:[%s12552_s7 + $0x28] sm:$0xff] }
0x1326   :  { %v9821_v26 = vpack.c.bf16 %v5173_v60, %v5172_v10  ;;  %v5884_v60 = vld [vmem:[#allocation26 + $0x90] sm:$0xff] }
0x1328   :  { %9789 = vmatpush3.bf16.msra.mxu0 %v9788_v49  ;;  %v5176_v49 = vld [vmem:[%s12552_s7 + $0x40] sm:$0xff] }
0x1329   :  { %9791 = vmatprep.subr.bf16.mxu0 %v9790_v36  ;;  %v5177_v36 = vld [vmem:[%s12552_s7 + $0x48] sm:$0xff] }
0x132a   :  { %v9827_v50 = vpack.c.bf16 %v5177_v36, %v5176_v49  ;;  %v5887_v49 = vld [vmem:[#allocation26 + $0xa8] sm:$0xff]  ;;  %v6528_v36 = vld [vmem:[#allocation25 + $0xa] sm:$0x3] }
0x132c   :  { %9793 = vmatpush3.bf16.msra.mxu0 %v9792_v5  ;;  %v5180_v5 = vld [vmem:[%s12552_s7 + $0x60] sm:$0xff] }
0x132d   :  { %9795 = vmatprep.subr.bf16.mxu0 %v9794_v41  ;;  %v5181_v41 = vld [vmem:[%s12552_s7 + $0x68] sm:$0xff] }
0x132e   :  { %v9833_v20 = vpack.c.bf16 %v5181_v41, %v5180_v5  ;;  %v5890_v5 = vld [vmem:[#allocation26 + $0xc0] sm:$0xff]  ;;  %v5891_v41 = vld [vmem:[#allocation26 + $0xc8] sm:$0xff] }
0x1330   :  { %9797 = vmatpush3.bf16.msra.mxu0 %v9796_v57  ;;  %v5184_v57 = vld [vmem:[#allocation20] sm:$0xff] }
0x1331   :  { %9799 = vmatprep.subr.bf16.mxu0 %v9798_v2  ;;  %v5185_v2 = vld [vmem:[#allocation20 + $0x8] sm:$0xff] }
0x1332   :  { %v9839_v43 = vpack.c.bf16 %v5185_v2, %v5184_v57  ;;  %v5894_v57 = vld [vmem:[#allocation26 + $0xe0] sm:$0xff]  ;;  %v5895_v2 = vld [vmem:[#allocation26 + $0xe8] sm:$0xff] }
0x1334   :  { %9801 = vmatpush3.bf16.msra.mxu0 %v9800_v28  ;;  %v5187_v28 = vld [vmem:[#allocation20 + $0x18] sm:$0xff] }
0x1335   :  { %9803 = vmatprep.subr.bf16.mxu0 %v9802_v55  ;;  %v9842_v55 = vpack.c.bf16 %v5187_v28, %v5186_v23  ;;  %v5790_v28 = vld [vmem:[#allocation26] sm:$0xff] }
0x1338   :  { %9805 = vmatpush3.bf16.msra.mxu0 %v9804_v58 }
0x1339   :  { %9807 = vmatprep.subr.bf16.mxu0 %v9806_v45 }
0x133c   :  { %9809 = vmatpush3.bf16.msra.mxu0 %v9808_v63 }
0x133d   :  { %9811 = vmatprep.subr.bf16.mxu0 %v9810_v19 }
0x1340   :  { %9813 = vmatpush3.bf16.msra.mxu0 %v9812_v4  ;;  %v5552_v4 = vld [vmem:[#allocation22] sm:$0x1] }
0x1341   :  { %8277 = vmatprep.subr.mxu0 %v12532_v35 }
0x13d2   :  { %v7901_v12 = vpop.f32.mrb[64].mxu0 }
0x13d3   :  { %v7902_v11 = vpop.f32.mrb[65].mxu0 }
0x13d4   :  { %v7903_v1 = vadd.f32 %v7902_v11, %v7901_v12 }
0x13f2   :  { %v7936_v61 = vpop.f32.mrb[66].mxu0 }
0x13f3   :  { %v7937_v16 = vpop.f32.mrb[67].mxu0 }
0x13f4   :  { %v7938_v33 = vadd.f32 %v7937_v16, %v7936_v61 }
0x13f6   :  { %v4985_v52 = vadd.f32 %v7938_v33, %v7903_v1  ;;  %v5059_v39 = vpop.f32.mrb[68].mxu0  ;;  %v5629_v1 = vld [vmem:[#allocation23] sm:$0x1] }
0x13f7   :  { %v5061_v17 = vpop.f32.mrb[69].mxu0 }
0x13f8   :  { %5161 = vmatprep.mubr.f32.mxu0 %v5061_v17 }
0x13f9   :  { %5162 = vmatmul.mubr.f32.vlgmr.msra.gmra.mrb[70].mxu0 %v5059_v39 }
0x13fa   :  { %8279 = vmatprep.mubr.msk.f32.mxu0 %vm10866_vm9, %v12532_v35 }
0x14cc   :  { %v7971_v30 = vpop.f32.mrb[70].mxu0 }
0x14cd   :  { %v7972_v37 = vpop.f32.mrb[71].mxu0 }
0x14ce   :  { %v7973_v34 = vadd.f32 %v7972_v37, %v7971_v30 }
0x14d0   :  { %v12184_v3 = vadd.f32 %v7973_v34, %v4985_v52 }
0x14d2   :  { %8278 = vmatpush3.msra.mxu0 %v12184_v3 }
0x14d3   :  { %8280 = vmatmul.mubr.msk.f32.vlgmr.msra.gmra.mrb[72].mxu0 %vm5188_vm10, %v12539_v9  ;;  %9814 = vmatprep.subr.bf16.mxu0 %v10867_v44 }
0x14d4   :  { %9816 = vmatpush3.bf16.msra.mxu0 %v12186_v27  ;;  %8314 = vmatprep.mubr.msk.f32.mxu0 %vm10866_vm9, %v12532_v35 }
0x14d5   :  { %9817 = vmatprep.subr.bf16.mxu0 %v10867_v44 }
0x14d8   :  { %9819 = vmatpush3.bf16.msra.mxu0 %v12195_v59 }
0x14d9   :  { %9820 = vmatprep.subr.bf16.mxu0 %v10867_v44 }
0x14dc   :  { %9822 = vmatpush3.bf16.msra.mxu0 %v9821_v26 }
0x14dd   :  { %9823 = vmatprep.subr.bf16.mxu0 %v10867_v44 }
0x14e0   :  { %9825 = vmatpush3.bf16.msra.mxu0 %v9824_v54 }
0x14e1   :  { %9826 = vmatprep.subr.bf16.mxu0 %v10867_v44 }
0x14e4   :  { %9828 = vmatpush3.bf16.msra.mxu0 %v9827_v50 }
0x14e5   :  { %9829 = vmatprep.subr.bf16.mxu0 %v10867_v44 }
0x14e8   :  { %9831 = vmatpush3.bf16.msra.mxu0 %v9830_v25 }
0x14e9   :  { %9832 = vmatprep.subr.bf16.mxu0 %v10867_v44 }
0x14ec   :  { %9834 = vmatpush3.bf16.msra.mxu0 %v9833_v20 }
0x14ed   :  { %9835 = vmatprep.subr.bf16.mxu0 %v10867_v44 }
0x14f0   :  { %9837 = vmatpush3.bf16.msra.mxu0 %v9836_v31 }
0x14f1   :  { %9838 = vmatprep.subr.bf16.mxu0 %v10867_v44 }
0x15a6   :  { %v5257_v18 = vpop.f32.mrb[72].mxu0 }
0x15a7   :  { %8315 = vmatmul.mubr.f32.vlgmr.msra.gmra.mrb[74].mxu0 %v5257_v18  ;;  %v8281_v22 = vpop.f32.mrb[73].mxu0  ;;  %v5896_v18 = vld [vmem:[#allocation26 + $0xf0] sm:$0xff] }
0x15a8   :  { %9840 = vmatpush3.bf16.msra.mxu0 %v9839_v43  ;;  %8325 = vmatprep.mubr.msk.f32.mxu0 %vm10866_vm9, %v12532_v35  ;;  %v5897_v22 = vld [vmem:[#allocation26 + $0xf8] sm:$0xff] }
0x15a9   :  { %9841 = vmatprep.subr.bf16.mxu0 %v10867_v44  ;;  %v9902_v23 = vpack.c.bf16 %v5897_v22, %v5896_v18  ;;  %v6128_v18 = vld [vmem:[#allocation26 + $0x170] sm:$0xff]  ;;  %v6129_v22 = vld [vmem:[#allocation26 + $0x178] sm:$0xff] }
0x15ac   :  { %9843 = vmatpush3.bf16.msra.mxu0 %v9842_v55 }
0x15ad   :  { %8328 = vmatprep.subr.mxu0 %v12532_v35 }
0x167a   :  { %v5327_v0 = vpop.f32.mrb[74].mxu0 }
0x167b   :  { %v5331_v29 = vmul.f32 0.03125, %v5327_v0  ;;  %v8316_v32 = vpop.f32.mrb[75].mxu0 }
0x167d   :  { %8326 = vmatmul.mubr.msk.f32.vlgmr.msra.gmra.mrb[76].mxu0 %vm1516_vm2, %v5331_v29 }
0x167e   :  { %8330 = vmatprep.mubr.msk.f32.mxu0 %vm10866_vm9, %v12532_v35 }
0x1750   :  { %v5401_v40 = vpop.f32.mrb[76].mxu0 }
0x1751   :  { %v5408_v58 = vrot.slane %v5401_v40, %v11685_v8  ;;  %v8327_v45 = vpop.f32.mrb[77].mxu0 }
0x1752   :  { %v5792_v45 = vld [vmem:[#allocation26 + $0x10] sm:$0xff] }
0x1753   :  { %v5409_v51 = vsub.f32 %v12184_v3, %v5408_v58  ;;  %v6039_v3 = vld [vmem:[#allocation25 + $0x4] sm:$0x3] }
0x1755   :  { %v5410_v21 = vmul.f32 %v5409_v51, %v5409_v51 }
0x1757   :  { %8329 = vmatpush3.msra.mxu0 %v5410_v21 }
0x1758   :  { %8331 = vmatmul.mubr.msk.f32.vlgmr.msra.gmra.mrb[78].mxu0 %vm5188_vm10, %v12539_v9  ;;  %9844 = vmatprep.subr.bf16.mxu0 %v10867_v44 }
0x1759   :  { %9846 = vmatpush3.bf16.msra.mxu0 %v12186_v27  ;;  %8365 = vmatprep.mubr.msk.f32.mxu0 %vm10866_vm9, %v12532_v35  ;;  %v5882_v27 = vld [vmem:[#allocation26 + $0x80] sm:$0xff] }
0x175a   :  { %9847 = vmatprep.subr.bf16.mxu0 %v10867_v44  ;;  %v9881_v10 = vpack.c.bf16 %v5883_v46, %v5882_v27  ;;  %v5805_v27 = vld [vmem:[#allocation26 + $0x78] sm:$0xff] }
0x175d   :  { %9849 = vmatpush3.bf16.msra.mxu0 %v12195_v59  ;;  %v6202_v59 = vld [vmem:[#allocation25 + $0x6] sm:$0x3] }
0x175e   :  { %9850 = vmatprep.subr.bf16.mxu0 %v10867_v44 }
0x1761   :  { %9852 = vmatpush3.bf16.msra.mxu0 %v9821_v26  ;;  %v5885_v26 = vld [vmem:[#allocation26 + $0x98] sm:$0xff] }
0x1762   :  { %9853 = vmatprep.subr.bf16.mxu0 %v10867_v44  ;;  %v9884_v42 = vpack.c.bf16 %v5885_v26, %v5884_v60  ;;  %v6116_v26 = vld [vmem:[#allocation26 + $0x110] sm:$0xff] }
0x1765   :  { %9855 = vmatpush3.bf16.msra.mxu0 %v9824_v54  ;;  %v5886_v54 = vld [vmem:[#allocation26 + $0xa0] sm:$0xff] }
0x1766   :  { %9856 = vmatprep.subr.bf16.mxu0 %v10867_v44 }
0x1769   :  { %9858 = vmatpush3.bf16.msra.mxu0 %v9827_v50  ;;  %v9887_v50 = vpack.c.bf16 %v5887_v49, %v5886_v54  ;;  %v6118_v49 = vld [vmem:[#allocation26 + $0x120] sm:$0xff] }
0x176a   :  { %9859 = vmatprep.subr.bf16.mxu0 %v10867_v44 }
0x176d   :  { %9861 = vmatpush3.bf16.msra.mxu0 %v9830_v25  ;;  %v9890_v25 = vpack.c.bf16 %v5889_v48, %v5888_v56  ;;  %v6120_v56 = vld [vmem:[#allocation26 + $0x130] sm:$0xff]  ;;  %v6121_v48 = vld [vmem:[#allocation26 + $0x138] sm:$0xff] }
0x176e   :  { %9862 = vmatprep.subr.bf16.mxu0 %v10867_v44 }
0x1771   :  { %9864 = vmatpush3.bf16.msra.mxu0 %v9833_v20  ;;  %v9893_v20 = vpack.c.bf16 %v5891_v41, %v5890_v5  ;;  %v6122_v5 = vld [vmem:[#allocation26 + $0x140] sm:$0xff]  ;;  %v6123_v41 = vld [vmem:[#allocation26 + $0x148] sm:$0xff] }
0x1772   :  { %9865 = vmatprep.subr.bf16.mxu0 %v10867_v44 }
0x1775   :  { %9867 = vmatpush3.bf16.msra.mxu0 %v9836_v31  ;;  %v9896_v31 = vpack.c.bf16 %v5893_v38, %v5892_v53  ;;  %v6124_v53 = vld [vmem:[#allocation26 + $0x150] sm:$0xff]  ;;  %v6125_v38 = vld [vmem:[#allocation26 + $0x158] sm:$0xff] }
0x1776   :  { %9868 = vmatprep.subr.bf16.mxu0 %v10867_v44 }
0x182b   :  { %v5477_v63 = vpop.f32.mrb[78].mxu0 }
0x182c   :  { %8366 = vmatmul.mubr.f32.vlgmr.msra.gmra.mrb[80].mxu0 %v5477_v63  ;;  %v8332_v7 = vpop.f32.mrb[79].mxu0 }
0x182d   :  { %9870 = vmatpush3.bf16.msra.mxu0 %v9839_v43  ;;  %8376 = vmatprep.mubr.msk.f32.mxu0 %vm10866_vm9, %v12532_v35 }
0x182e   :  { %9871 = vmatprep.subr.bf16.mxu0 %v10867_v44 }
0x1831   :  { %9873 = vmatpush3.bf16.msra.mxu0 %v9842_v55 }
0x1832   :  { %9874 = vmatprep.subr.bf16.mxu0 %v10867_v44 }
0x18ff   :  { %v5547_v14 = vpop.f32.mrb[80].mxu0 }
0x1900   :  { %v5551_v24 = vmul.f32 0.03125, %v5547_v14  ;;  %v8367_v19 = vpop.f32.mrb[81].mxu0 }
0x1901   :  { %v5794_v19 = vld [vmem:[#allocation26 + $0x20] sm:$0xff] }
0x1902   :  { %v5553_v6 = vadd.f32 1e-05, %v5551_v24 }
0x1904   :  { %10246 = vrsqrt.f32 %v5553_v6  ;;  %v5795_v6 = vld [vmem:[#allocation26 + $0x28] sm:$0xff] }
0x190e   :  { %v10247_v12 = vpop.eup %10246 }
0x190f   :  { %v5555_v11 = vmul.f32 %v10247_v12, %v5552_v4  ;;  %v9911_v12 = vpack.c.bf16 %v5795_v6, %v5794_v19  ;;  %v6286_v19 = vld [vmem:[#allocation26 + $0x1c8] sm:$0xff] }
0x1911   :  { %8377 = vmatmul.mubr.msk.f32.vlgmr.msra.gmra.mrb[82].mxu0 %vm1516_vm2, %v5555_v11 }
0x1912   :  { %9876 = vmatpush3.bf16.msra.mxu0 %v9839_v43  ;;  %8387 = vmatprep.mubr.msk.f32.mxu0 %vm10866_vm9, %v12532_v35  ;;  %v9899_v43 = vpack.c.bf16 %v5895_v2, %v5894_v57  ;;  %v6126_v57 = vld [vmem:[#allocation26 + $0x160] sm:$0xff]  ;;  %v6127_v2 = vld [vmem:[#allocation26 + $0x168] sm:$0xff] }
0x1913   :  { %9877 = vmatprep.subr.bf16.mxu0 %v10867_v44 }
0x1916   :  { %9879 = vmatpush3.bf16.msra.mxu0 %v9842_v55  ;;  %v5791_v55 = vld [vmem:[#allocation26 + $0x8] sm:$0xff] }
0x1917   :  { %8390 = vmatprep.subr.mxu0 %v12532_v35  ;;  %v9905_v40 = vpack.c.bf16 %v5791_v55, %v5790_v28  ;;  %v6277_v28 = vld [vmem:[#allocation26 + $0x180] sm:$0xff]  ;;  %v6278_v55 = vld [vmem:[#allocation26 + $0x188] sm:$0xff] }
0x1919   :  { %8388 = vmatmul.mubr.msk.f32.vlgmr.msra.gmra.mrb[84].mxu0 %vm1516_vm2, %v5629_v1  ;;  %v5796_v1 = vld [vmem:[#allocation26 + $0x30] sm:$0xff] }
0x191a   :  { %8392 = vmatprep.mubr.msk.f32.mxu0 %vm10866_vm9, %v12532_v35 }
0x19e4   :  { %v5625_v61 = vpop.f32.mrb[82].mxu0 }
0x19e5   :  { %v8378_v16 = vpop.f32.mrb[83].mxu0  ;;  %v5706_v33 = vrot.slane %v5625_v61, %v11685_v8  ;;  %v5797_v61 = vld [vmem:[#allocation26 + $0x38] sm:$0xff] }
0x19e6   :  { %v9914_v16 = vpack.c.bf16 %v5797_v61, %v5796_v1  ;;  %v6289_v61 = vld [vmem:[#allocation26 + $0x1e0] sm:$0xff] }
0x19e7   :  { %v5707_v39 = vmul.f32 %v5706_v33, %v5409_v51  ;;  %v5793_v51 = vld [vmem:[#allocation26 + $0x18] sm:$0xff]  ;;  %v5798_v33 = vld [vmem:[#allocation26 + $0x40] sm:$0xff] }
0x19e8   :  { %v9908_v14 = vpack.c.bf16 %v5793_v51, %v5792_v45  ;;  %v6281_v45 = vld [vmem:[#allocation26 + $0x1a0] sm:$0xff]  ;;  %v6282_v51 = vld [vmem:[#allocation26 + $0x1a8] sm:$0xff] }
0x19ec   :  { %v5699_v52 = vpop.f32.mrb[84].mxu0 }
0x19ed   :  { %v5711_v17 = vrot.slane %v5699_v52, %v11685_v8  ;;  %v8389_v30 = vpop.f32.mrb[85].mxu0  ;;  %v5799_v52 = vld [vmem:[#allocation26 + $0x48] sm:$0xff] }
0x19ee   :  { %v5801_v30 = vld [vmem:[#allocation26 + $0x58] sm:$0xff] }
0x19ef   :  { %v5712_v37 = vadd.f32 %v5711_v17, %v5707_v39  ;;  %v9917_v39 = vpack.c.bf16 %v5799_v52, %v5798_v33  ;;  %v5800_v17 = vld [vmem:[#allocation26 + $0x50] sm:$0xff] }
0x19f0   :  { %v6291_v52 = vld [vmem:[#allocation26 + $0x1f0] sm:$0xff] }
0x19f1   :  { %vm5713_vm11 = vcmp.gt.f32.partialorder %v5712_v37, 0.0  ;;  %v5714_v47 = vmul.f32 0.01, %v5712_v37 }
0x19f3   :  { %v5715_v34 = vsel %vm5713_vm11, %v5712_v37, %v5714_v47  ;;  %v9920_v37 = vpack.c.bf16 %v5801_v30, %v5800_v17  ;;  %v5802_v47 = vld [vmem:[#allocation26 + $0x60] sm:$0xff] }
0x19f4   :  { %8391 = vmatpush3.msra.mxu0 %v5715_v34  ;;  %8471 = vmatpush3.msra.mxu1 %v5715_v34  ;;  %v6440_v30 = vld [vmem:[#allocation26 + $0x200] sm:$0xff] }
0x19f5   :  { %8393 = vmatmul.mubr.msk.f32.vlgmr.msra.gmra.mrb[86].mxu0 %vm5188_vm10, %v5716_v62  ;;  %8395 = vmatprep.subr.mxu0 %v12532_v35  ;;  %v5803_v62 = vld [vmem:[#allocation26 + $0x68] sm:$0xff] }
0x19f6   :  { %8473 = vmatmul.mubr.msk.f32.vlgmr.msra.gmra.mrb[38].mxu1 %vm5188_vm10, %v6039_v3  ;;  %8510 = vmatprep.subr.mxu1 %v12532_v35  ;;  %v5804_v3 = vld [vmem:[#allocation26 + $0x70] sm:$0xff] }
0x19f7   :  { %8396 = vmatpush3.msra.mxu0 %v5715_v34  ;;  %8511 = vmatpush3.msra.mxu1 %v5715_v34  ;;  %v9926_v46 = vpack.c.bf16 %v5805_v27, %v5804_v3  ;;  %v6444_v27 = vld [vmem:[#allocation26 + $0x220] sm:$0xff] }
0x19f8   :  { %8397 = vmatprep.mubr.msk.f32.mxu0 %vm10866_vm9, %v12532_v35  ;;  %8512 = vmatprep.mubr.msk.f32.mxu1 %vm10866_vm9, %v12532_v35 }
0x19f9   :  { %8550 = vmatprep.subr.mxu1 %v12532_v35  ;;  %8398 = vmatmul.mubr.msk.f32.vlgmr.msra.gmra.mrb[88].mxu0 %vm5188_vm10, %v5807_v13  ;;  %v6114_v13 = vld [vmem:[#allocation26 + $0x100] sm:$0xff] }
0x19fa   :  { %8513 = vmatmul.mubr.msk.f32.vlgmr.msra.gmra.mrb[40].mxu1 %vm5188_vm10, %v6202_v59  ;;  %9880 = vmatprep.subr.bf16.mxu0 %v10867_v44  ;;  %v6115_v59 = vld [vmem:[#allocation26 + $0x108] sm:$0xff] }
0x19fb   :  { %8551 = vmatpush3.msra.mxu1 %v5715_v34  ;;  %8552 = vmatprep.mubr.msk.f32.mxu1 %vm10866_vm9, %v12532_v35 }
0x19fc   :  { %8590 = vmatprep.subr.mxu1 %v12532_v35  ;;  %9882 = vmatpush3.bf16.msra.mxu0 %v9881_v10  ;;  %v9929_v10 = vpack.c.bf16 %v6115_v59, %v6114_v13  ;;  %v6446_v59 = vld [vmem:[#allocation26 + $0x230] sm:$0xff] }
0x19fd   :  { %9883 = vmatprep.subr.bf16.mxu0 %v10867_v44  ;;  %8432 = vmatprep.mubr.msk.f32.mxu0 %vm10866_vm9, %v12532_v35 }
0x19fe   :  { %8553 = vmatmul.mubr.msk.f32.vlgmr.msra.gmra.mrb[42].mxu1 %vm5188_vm10, %v6365_v15  ;;  %v6117_v15 = vld [vmem:[#allocation26 + $0x118] sm:$0xff] }
0x19ff   :  { %8591 = vmatpush3.msra.mxu1 %v5715_v34  ;;  %8592 = vmatprep.mubr.msk.f32.mxu1 %vm10866_vm9, %v12532_v35  ;;  %v9923_v34 = vpack.c.bf16 %v5803_v62, %v5802_v47  ;;  %v9932_v54 = vpack.c.bf16 %v6117_v15, %v6116_v26  ;;  %v6442_v62 = vld [vmem:[#allocation26 + $0x210] sm:$0xff]  ;;  %v6449_v15 = vld [vmem:[#allocation26 + $0x248] sm:$0xff] }
0x1a00   :  { %9885 = vmatpush3.bf16.msra.mxu0 %v9884_v42  ;;  %8630 = vmatprep.subr.mxu1 %v12532_v35 }
0x1a01   :  { %9886 = vmatprep.subr.bf16.mxu0 %v10867_v44 }
0x1a02   :  { %8593 = vmatmul.mubr.msk.f32.vlgmr.msra.gmra.mrb[44].mxu1 %vm5188_vm10, %v6528_v36  ;;  %v6119_v36 = vld [vmem:[#allocation26 + $0x128] sm:$0xff] }
0x1a03   :  { %8632 = vmatprep.mubr.msk.f32.mxu1 %vm10866_vm9, %v12532_v35 }
0x1a04   :  { %9888 = vmatpush3.bf16.msra.mxu0 %v9887_v50  ;;  %v9935_v50 = vpack.c.bf16 %v6119_v36, %v6118_v49  ;;  %v6451_v49 = vld [vmem:[#allocation26 + $0x258] sm:$0xff] }
0x1a05   :  { %9889 = vmatprep.subr.bf16.mxu0 %v10867_v44 }
0x1a08   :  { %9891 = vmatpush3.bf16.msra.mxu0 %v9890_v25  ;;  %v9938_v25 = vpack.c.bf16 %v6121_v48, %v6120_v56  ;;  %v6453_v56 = vld [vmem:[#allocation26 + $0x268] sm:$0xff] }
0x1a09   :  { %9892 = vmatprep.subr.bf16.mxu0 %v10867_v44 }
0x1a0c   :  { %9894 = vmatpush3.bf16.msra.mxu0 %v9893_v20  ;;  %v9941_v20 = vpack.c.bf16 %v6123_v41, %v6122_v5  ;;  %v6455_v5 = vld [vmem:[#allocation26 + $0x278] sm:$0xff] }
0x1a0d   :  { %9895 = vmatprep.subr.bf16.mxu0 %v10867_v44 }
0x1a10   :  { %9897 = vmatpush3.bf16.msra.mxu0 %v9896_v31  ;;  %v9944_v31 = vpack.c.bf16 %v6125_v38, %v6124_v53  ;;  %v6604_v53 = vld [vmem:[#allocation26 + $0x288] sm:$0xff] }
0x1a11   :  { %9898 = vmatprep.subr.bf16.mxu0 %v10867_v44 }
0x1a14   :  { %9900 = vmatpush3.bf16.msra.mxu0 %v9899_v43  ;;  %v9947_v43 = vpack.c.bf16 %v6127_v2, %v6126_v57  ;;  %v6606_v57 = vld [vmem:[#allocation26 + $0x298] sm:$0xff] }
0x1a15   :  { %9901 = vmatprep.subr.bf16.mxu0 %v10867_v44 }
0x1a18   :  { %9903 = vmatpush3.bf16.msra.mxu0 %v9902_v23  ;;  %v9950_v23 = vpack.c.bf16 %v6129_v22, %v6128_v18  ;;  %v6608_v18 = vld [vmem:[#allocation26 + $0x2a8] sm:$0xff] }
0x1a19   :  { %9904 = vmatprep.subr.bf16.mxu0 %v10867_v44 }
0x1ac8   :  { %v5786_v0 = vpop.f32.mrb[86].mxu0 }
0x1ac9   :  { %v8394_v29 = vpop.f32.mrb[87].mxu0  ;;  %v12290_v32 = vpop.f32.mrb[38].mxu1 }
0x1aca   :  { %v8474_v58 = vpop.f32.mrb[39].mxu1  ;;  %v6279_v29 = vld [vmem:[#allocation26 + $0x190] sm:$0xff] }
0x1acc   :  { %v5877_v21 = vpop.f32.mrb[88].mxu0 }
0x1acd   :  { %8433 = vmatmul.mubr.f32.vlgmr.msra.gmra.mrb[90].mxu0 %v5877_v21  ;;  %v8399_v63 = vpop.f32.mrb[89].mxu0  ;;  %v12292_v7 = vpop.f32.mrb[40].mxu1  ;;  %v9959_v21 = vpack.c.bf16 %v6282_v51, %v6281_v45  ;;  %v6615_v51 = vld [vmem:[#allocation26 + $0x2e0] sm:$0xff] }
0x1ace   :  { %9906 = vmatpush3.bf16.msra.mxu0 %v9905_v40  ;;  %8467 = vmatprep.mubr.msk.f32.mxu0 %vm10866_vm9, %v12532_v35  ;;  %v8514_v24 = vpop.f32.mrb[41].mxu1  ;;  %v6280_v40 = vld [vmem:[#allocation26 + $0x198] sm:$0xff]  ;;  %v6283_v63 = vld [vmem:[#allocation26 + $0x1b0] sm:$0xff] }
0x1acf   :  { %9907 = vmatprep.subr.bf16.mxu0 %v10867_v44  ;;  %v9956_v58 = vpack.c.bf16 %v6280_v40, %v6279_v29  ;;  %v6613_v40 = vld [vmem:[#allocation26 + $0x2d0] sm:$0xff] }
0x1ad1   :  { %v12297_v4 = vpop.f32.mrb[42].mxu1 }
0x1ad2   :  { %9909 = vmatpush3.bf16.msra.mxu0 %v9908_v14  ;;  %v8554_v11 = vpop.f32.mrb[43].mxu1  ;;  %v6284_v14 = vld [vmem:[#allocation26 + $0x1b8] sm:$0xff] }
0x1ad3   :  { %9910 = vmatprep.subr.bf16.mxu0 %v10867_v44  ;;  %v9962_v24 = vpack.c.bf16 %v6284_v14, %v6283_v63  ;;  %v6288_v11 = vld [vmem:[#allocation26 + $0x1d8] sm:$0xff]  ;;  %v6617_v14 = vld [vmem:[#allocation26 + $0x2f0] sm:$0xff] }
0x1ad5   :  { %v12305_v60 = vpop.f32.mrb[44].mxu1 }
0x1ad6   :  { %9912 = vmatpush3.bf16.msra.mxu0 %v9911_v12  ;;  %v8594_v42 = vpop.f32.mrb[45].mxu1  ;;  %v6287_v12 = vld [vmem:[#allocation26 + $0x1d0] sm:$0xff] }
0x1ad7   :  { %9913 = vmatprep.subr.bf16.mxu0 %v10867_v44  ;;  %v9968_v1 = vpack.c.bf16 %v6288_v11, %v6287_v12 }
0x1ada   :  { %9915 = vmatpush3.bf16.msra.mxu0 %v9914_v16  ;;  %v6290_v16 = vld [vmem:[#allocation26 + $0x1e8] sm:$0xff] }
0x1adb   :  { %9916 = vmatprep.subr.bf16.mxu0 %v10867_v44  ;;  %v9971_v33 = vpack.c.bf16 %v6290_v16, %v6289_v61  ;;  %v6693_v61 = vld [vmem:[%s12553_s9 + $0x18] sm:$0xff] }
0x1ade   :  { %9918 = vmatpush3.bf16.msra.mxu0 %v9917_v39  ;;  %v6292_v39 = vld [vmem:[#allocation26 + $0x1f8] sm:$0xff] }
0x1adf   :  { %9919 = vmatprep.subr.bf16.mxu0 %v10867_v44  ;;  %v9974_v17 = vpack.c.bf16 %v6292_v39, %v6291_v52  ;;  %v6695_v52 = vld [vmem:[%s12553_s9 + $0x28] sm:$0xff] }
0x1ae2   :  { %9921 = vmatpush3.bf16.msra.mxu0 %v9920_v37  ;;  %v6441_v37 = vld [vmem:[#allocation26 + $0x208] sm:$0xff] }
0x1ae3   :  { %9922 = vmatprep.subr.bf16.mxu0 %v10867_v44  ;;  %v9977_v47 = vpack.c.bf16 %v6441_v37, %v6440_v30  ;;  %v6697_v30 = vld [vmem:[%s12553_s9 + $0x38] sm:$0xff] }
0x1ae6   :  { %9924 = vmatpush3.bf16.msra.mxu0 %v9923_v34  ;;  %v6443_v34 = vld [vmem:[#allocation26 + $0x218] sm:$0xff] }
0x1ae7   :  { %9925 = vmatprep.subr.bf16.mxu0 %v10867_v44  ;;  %v9980_v3 = vpack.c.bf16 %v6443_v34, %v6442_v62  ;;  %v6699_v62 = vld [vmem:[%s12553_s9 + $0x48] sm:$0xff] }
0x1aea   :  { %9927 = vmatpush3.bf16.msra.mxu0 %v9926_v46  ;;  %v6445_v46 = vld [vmem:[#allocation26 + $0x228] sm:$0xff] }
0x1aeb   :  { %9928 = vmatprep.subr.bf16.mxu0 %v10867_v44  ;;  %v9983_v13 = vpack.c.bf16 %v6445_v46, %v6444_v27  ;;  %v6701_v27 = vld [vmem:[%s12553_s9 + $0x58] sm:$0xff] }
0x1aed   :  { %8468 = vmatmul.mubr.f32.vlgmr.msra.gmra.mrb[90].mxu0 %v5786_v0  ;;  %v9953_v0 = vpack.c.bf16 %v6278_v55, %v6277_v28  ;;  %v6610_v28 = vld [vmem:[#allocation26 + $0x2b8] sm:$0xff] }
0x1aee   :  { %9930 = vmatpush3.bf16.msra.mxu0 %v9929_v10  ;;  %8507 = vmatprep.mubr.msk.f32.mxu0 %vm10866_vm9, %v12532_v35  ;;  %v6447_v10 = vld [vmem:[#allocation26 + $0x238] sm:$0xff] }
0x1aef   :  { %9931 = vmatprep.subr.bf16.mxu0 %v10867_v44  ;;  %v9986_v26 = vpack.c.bf16 %v6447_v10, %v6446_v59  ;;  %v6703_v59 = vld [vmem:[%s12553_s9 + $0x68] sm:$0xff] }
0x1af2   :  { %9933 = vmatpush3.bf16.msra.mxu0 %v9932_v54  ;;  %v6450_v54 = vld [vmem:[#allocation26 + $0x250] sm:$0xff] }
0x1af3   :  { %9934 = vmatprep.subr.bf16.mxu0 %v10867_v44  ;;  %v9992_v36 = vpack.c.bf16 %v6451_v49, %v6450_v54  ;;  %v6707_v54 = vld [vmem:[#allocation28 + $0x8] sm:$0xff] }
0x1af6   :  { %9936 = vmatpush3.bf16.msra.mxu0 %v9935_v50  ;;  %v6452_v50 = vld [vmem:[#allocation26 + $0x260] sm:$0xff] }
0x1af7   :  { %9937 = vmatprep.subr.bf16.mxu0 %v10867_v44  ;;  %v9995_v48 = vpack.c.bf16 %v6453_v56, %v6452_v50  ;;  %v6708_v56 = vld [vmem:[#allocation28 + $0x10] sm:$0xff] }
0x1afa   :  { %9939 = vmatpush3.bf16.msra.mxu0 %v9938_v25  ;;  %v6454_v25 = vld [vmem:[#allocation26 + $0x270] sm:$0xff] }
0x1afb   :  { %9940 = vmatprep.subr.bf16.mxu0 %v10867_v44  ;;  %v9998_v41 = vpack.c.bf16 %v6455_v5, %v6454_v25 }
0x1afe   :  { %9942 = vmatpush3.bf16.msra.mxu0 %v9941_v20  ;;  %v6603_v20 = vld [vmem:[#allocation26 + $0x280] sm:$0xff] }
0x1aff   :  { %9943 = vmatprep.subr.bf16.mxu0 %v10867_v44  ;;  %v10001_v38 = vpack.c.bf16 %v6604_v53, %v6603_v20 }
0x1b02   :  { %9945 = vmatpush3.bf16.msra.mxu0 %v9944_v31  ;;  %v6605_v31 = vld [vmem:[#allocation26 + $0x290] sm:$0xff] }
0x1b03   :  { %9946 = vmatprep.subr.bf16.mxu0 %v10867_v44  ;;  %v10004_v2 = vpack.c.bf16 %v6606_v57, %v6605_v31 }
0x1b06   :  { %9948 = vmatpush3.bf16.msra.mxu0 %v9947_v43  ;;  %v6607_v43 = vld [vmem:[#allocation26 + $0x2a0] sm:$0xff] }
0x1b07   :  { %9949 = vmatprep.subr.bf16.mxu0 %v10867_v44  ;;  %v10007_v22 = vpack.c.bf16 %v6608_v18, %v6607_v43 }
0x1b0a   :  { %9951 = vmatpush3.bf16.msra.mxu0 %v9950_v23  ;;  %v6609_v23 = vld [vmem:[#allocation26 + $0x2b0] sm:$0xff] }
0x1b0b   :  { %9952 = vmatprep.subr.bf16.mxu0 %v10867_v44  ;;  %v10010_v55 = vpack.c.bf16 %v6610_v28, %v6609_v23 }
0x1b0d   :  { %8508 = vmatmul.mubr.f32.vlgmr.msra.gmra.mrb[90].mxu0 %v12290_v32  ;;  %v6285_v32 = vld [vmem:[#allocation26 + $0x1c0] sm:$0xff] }
0x1b0e   :  { %9954 = vmatpush3.bf16.msra.mxu0 %v9953_v0  ;;  %8547 = vmatprep.mubr.msk.f32.mxu0 %vm10866_vm9, %v12532_v35  ;;  %v9965_v6 = vpack.c.bf16 %v6286_v19, %v6285_v32  ;;  %v6612_v0 = vld [vmem:[#allocation26 + $0x2c8] sm:$0xff]  ;;  %v6690_v19 = vld [vmem:[%s12553_s9] sm:$0xff] }
0x1b0f   :  { %9955 = vmatprep.subr.bf16.mxu0 %v10867_v44 }
0x1b12   :  { %9957 = vmatpush3.bf16.msra.mxu0 %v9956_v58  ;;  %v6614_v58 = vld [vmem:[#allocation26 + $0x2d8] sm:$0xff] }
0x1b13   :  { %9958 = vmatprep.subr.bf16.mxu0 %v10867_v44  ;;  %v10016_v45 = vpack.c.bf16 %v6614_v58, %v6613_v40  ;;  %v7246_v40 = vld [vmem:[%s12554_s10 + $0x8] sm:$0xff]  ;;  %v7158_v58 = vld [vmem:[#allocation31] sm:$0x1] }
0x1b16   :  { %9960 = vmatpush3.bf16.msra.mxu0 %v9959_v21  ;;  %v6616_v21 = vld [vmem:[#allocation26 + $0x2e8] sm:$0xff] }
0x1b17   :  { %9961 = vmatprep.subr.bf16.mxu0 %v10867_v44  ;;  %v10019_v63 = vpack.c.bf16 %v6616_v21, %v6615_v51  ;;  %v7247_v51 = vld [vmem:[%s12554_s10 + $0x10] sm:$0xff]  ;;  %v7248_v21 = vld [vmem:[%s12554_s10 + $0x18] sm:$0xff] }
0x1b1a   :  { %9963 = vmatpush3.bf16.msra.mxu0 %v9962_v24  ;;  %v6618_v24 = vld [vmem:[#allocation26 + $0x2f8] sm:$0xff] }
0x1b1b   :  { %9964 = vmatprep.subr.bf16.mxu0 %v10867_v44  ;;  %v10022_v32 = vpack.c.bf16 %v6618_v24, %v6617_v14  ;;  %v7249_v14 = vld [vmem:[%s12554_s10 + $0x20] sm:$0xff]  ;;  %v7250_v24 = vld [vmem:[%s12554_s10 + $0x28] sm:$0xff] }
0x1b1e   :  { %9966 = vmatpush3.bf16.msra.mxu0 %v9965_v6  ;;  %v6691_v6 = vld [vmem:[%s12553_s9 + $0x8] sm:$0xff] }
0x1b1f   :  { %9967 = vmatprep.subr.bf16.mxu0 %v10867_v44  ;;  %v12353_v12 = vpack.c.bf16 %v6691_v6, %v6690_v19  ;;  %v7251_v19 = vld [vmem:[%s12554_s10 + $0x30] sm:$0xff]  ;;  %v7252_v6 = vld [vmem:[%s12554_s10 + $0x38] sm:$0xff] }
0x1b22   :  { %9969 = vmatpush3.bf16.msra.mxu0 %v9968_v1  ;;  %v6692_v1 = vld [vmem:[%s12553_s9 + $0x10] sm:$0xff] }
0x1b23   :  { %9970 = vmatprep.subr.bf16.mxu0 %v10867_v44 }
0x1b26   :  { %9972 = vmatpush3.bf16.msra.mxu0 %v9971_v33  ;;  %v6694_v33 = vld [vmem:[%s12553_s9 + $0x20] sm:$0xff] }
0x1b27   :  { %9973 = vmatprep.subr.bf16.mxu0 %v10867_v44  ;;  %v10031_v39 = vpack.c.bf16 %v6695_v52, %v6694_v33  ;;  %v7257_v33 = vld [vmem:[%s12554_s10 + $0x60] sm:$0xff]  ;;  %v7258_v52 = vld [vmem:[%s12554_s10 + $0x68] sm:$0xff] }
0x1b2a   :  { %9975 = vmatpush3.bf16.msra.mxu0 %v9974_v17  ;;  %v6696_v17 = vld [vmem:[%s12553_s9 + $0x30] sm:$0xff] }
0x1b2b   :  { %9976 = vmatprep.subr.bf16.mxu0 %v10867_v44  ;;  %v10034_v37 = vpack.c.bf16 %v6697_v30, %v6696_v17  ;;  %v7259_v17 = vld [vmem:[%s12554_s10 + $0x70] sm:$0xff]  ;;  %v7260_v30 = vld [vmem:[%s12554_s10 + $0x78] sm:$0xff] }
0x1b2d   :  { %8548 = vmatmul.mubr.f32.vlgmr.msra.gmra.mrb[90].mxu0 %v12292_v7  ;;  %v6448_v7 = vld [vmem:[#allocation26 + $0x240] sm:$0xff] }
0x1b2e   :  { %9978 = vmatpush3.bf16.msra.mxu0 %v9977_v47  ;;  %8587 = vmatprep.mubr.msk.f32.mxu0 %vm10866_vm9, %v12532_v35  ;;  %v9989_v42 = vpack.c.bf16 %v6449_v15, %v6448_v7  ;;  %v6698_v47 = vld [vmem:[%s12553_s9 + $0x40] sm:$0xff]  ;;  %v6705_v7 = vld [vmem:[%s12553_s9 + $0x78] sm:$0xff] }
0x1b2f   :  { %9979 = vmatprep.subr.bf16.mxu0 %v10867_v44  ;;  %v10037_v34 = vpack.c.bf16 %v6699_v62, %v6698_v47  ;;  %v7341_v47 = vld [vmem:[#allocation34] sm:$0x3] }
0x1b30   :  { %7343 = vrot.lane.b32.xlu0 %v7341_v47, %s10842_s0  ;;  %s10868_s0 = smov 112  }
0x1b32   :  { %9981 = vmatpush3.bf16.msra.mxu0 %v9980_v3  ;;  %v6700_v3 = vld [vmem:[%s12553_s9 + $0x50] sm:$0xff] }
0x1b33   :  { %9982 = vmatprep.subr.bf16.mxu0 %v10867_v44  ;;  %v10040_v46 = vpack.c.bf16 %v6701_v27, %v6700_v3 }
0x1b36   :  { %9984 = vmatpush3.bf16.msra.mxu0 %v9983_v13  ;;  %v6702_v13 = vld [vmem:[%s12553_s9 + $0x60] sm:$0xff] }
0x1b37   :  { %9985 = vmatprep.subr.bf16.mxu0 %v10867_v44  ;;  %v10043_v10 = vpack.c.bf16 %v6703_v59, %v6702_v13 }
0x1b3a   :  { %9987 = vmatpush3.bf16.msra.mxu0 %v9986_v26  ;;  %v6704_v26 = vld [vmem:[%s12553_s9 + $0x70] sm:$0xff] }
0x1b3b   :  { %9988 = vmatprep.subr.bf16.mxu0 %v10867_v44  ;;  %v10046_v15 = vpack.c.bf16 %v6705_v7, %v6704_v26  ;;  %v7622_v7 = vld [vmem:[#allocation32] ss:$0 sm:$0xff] }
0x1b3e   :  { %9990 = vmatpush3.bf16.msra.mxu0 %v9989_v42  ;;  %v6706_v42 = vld [vmem:[#allocation28] sm:$0xff] }
0x1b3f   :  { %9991 = vmatprep.subr.bf16.mxu0 %v10867_v44  ;;  %v10049_v49 = vpack.c.bf16 %v6707_v54, %v6706_v42 }
0x1b42   :  { %9993 = vmatpush3.bf16.msra.mxu0 %v9992_v36 }
0x1b43   :  { %9994 = vmatprep.subr.bf16.mxu0 %v10867_v44 }
0x1b46   :  { %9996 = vmatpush3.bf16.msra.mxu0 %v9995_v48  ;;  %v6709_v48 = vld [vmem:[#allocation28 + $0x18] sm:$0xff] }
0x1b47   :  { %9997 = vmatprep.subr.bf16.mxu0 %v10867_v44  ;;  %v10052_v25 = vpack.c.bf16 %v6709_v48, %v6708_v56 }
0x1b4a   :  { %9999 = vmatpush3.bf16.msra.mxu0 %v9998_v41 }
0x1b4b   :  { %10000 = vmatprep.subr.bf16.mxu0 %v10867_v44 }
0x1b4d   :  { %8588 = vmatmul.mubr.f32.vlgmr.msra.gmra.mrb[90].mxu0 %v12297_v4  ;;  %v6611_v4 = vld [vmem:[#allocation26 + $0x2c0] sm:$0xff] }
0x1b4e   :  { %10002 = vmatpush3.bf16.msra.mxu0 %v10001_v38  ;;  %8627 = vmatprep.mubr.msk.f32.mxu0 %vm10866_vm9, %v12532_v35  ;;  %v10013_v29 = vpack.c.bf16 %v6612_v0, %v6611_v4 }
0x1b4f   :  { %10003 = vmatprep.subr.bf16.mxu0 %v10867_v44 }
0x1b52   :  { %10005 = vmatpush3.bf16.msra.mxu0 %v10004_v2 }
0x1b53   :  { %10006 = vmatprep.subr.bf16.mxu0 %v10867_v44 }
0x1b56   :  { %10008 = vmatpush3.bf16.msra.mxu0 %v10007_v22 }
0x1b57   :  { %10009 = vmatprep.subr.bf16.mxu0 %v10867_v44 }
0x1b5a   :  { %10011 = vmatpush3.bf16.msra.mxu0 %v10010_v55  ;;  %v7081_v55 = vld [vmem:[#allocation29] sm:$0x1] }
0x1b5b   :  { %10012 = vmatprep.subr.bf16.mxu0 %v10867_v44 }
0x1b5e   :  { %10014 = vmatpush3.bf16.msra.mxu0 %v10013_v29  ;;  %v7245_v29 = vld [vmem:[%s12554_s10] sm:$0xff] }
0x1b5f   :  { %10015 = vmatprep.subr.bf16.mxu0 %v10867_v44 }
0x1b62   :  { %10017 = vmatpush3.bf16.msra.mxu0 %v10016_v45  ;;  %v10091_v45 = vpack.c.bf16 %v7246_v40, %v7245_v29 }
0x1b63   :  { %10018 = vmatprep.subr.bf16.mxu0 %v10867_v44 }
0x1b66   :  { %10020 = vmatpush3.bf16.msra.mxu0 %v10019_v63  ;;  %v10094_v63 = vpack.c.bf16 %v7248_v21, %v7247_v51 }
0x1b67   :  { %10021 = vmatprep.subr.bf16.mxu0 %v10867_v44 }
0x1b6a   :  { %10023 = vmatpush3.bf16.msra.mxu0 %v10022_v32  ;;  %v10097_v32 = vpack.c.bf16 %v7250_v24, %v7249_v14 }
0x1b6d   :  { %8628 = vmatmul.mubr.f32.vlgmr.msra.gmra.mrb[90].mxu0 %v12305_v60  ;;  %v12365_v60 = vpack.c.bf16 %v6693_v61, %v6692_v1  ;;  %v7255_v61 = vld [vmem:[%s12554_s10 + $0x50] sm:$0xff] }
0x1c40   :  { %v12355_v11 = vpop.f32.mrb[90].mxu0 }
0x1c41   :  { %v8629_v16 = vpop.f32.mrb[91].mxu0  ;;  %8631 = vmatpush3.msk.msra.mxu1 %vm6713_vm12, %v12355_v11 }
0x1c42   :  { %8633 = vmatmul.mubr.msk.f32.vlgmr.msra.gmra.mrb[46].mxu1 %vm6710_vm13, %v12539_v9  ;;  %10024 = vmatprep.subr.bf16.mxu1 %v10867_v44  ;;  %v7256_v16 = vld [vmem:[%s12554_s10 + $0x58] sm:$0xff] }
0x1c43   :  { %10026 = vmatpush3.bf16.msra.mxu1 %v12353_v12  ;;  %8667 = vmatprep.mubr.msk.f32.mxu1 %vm10866_vm9, %v12532_v35 }
0x1c44   :  { %10027 = vmatprep.subr.bf16.mxu1 %v10867_v44 }
0x1c47   :  { %10029 = vmatpush3.bf16.msra.mxu1 %v12365_v60 }
0x1c48   :  { %10030 = vmatprep.subr.bf16.mxu1 %v10867_v44 }
0x1c4b   :  { %10032 = vmatpush3.bf16.msra.mxu1 %v10031_v39 }
0x1c4c   :  { %10033 = vmatprep.subr.bf16.mxu1 %v10867_v44 }
0x1c4f   :  { %10035 = vmatpush3.bf16.msra.mxu1 %v10034_v37 }
0x1c50   :  { %10036 = vmatprep.subr.bf16.mxu1 %v10867_v44 }
0x1c53   :  { %10038 = vmatpush3.bf16.msra.mxu1 %v10037_v34 }
0x1c54   :  { %10039 = vmatprep.subr.bf16.mxu1 %v10867_v44 }
0x1c57   :  { %10041 = vmatpush3.bf16.msra.mxu1 %v10040_v46 }
0x1c58   :  { %10042 = vmatprep.subr.bf16.mxu1 %v10867_v44 }
0x1c5b   :  { %10044 = vmatpush3.bf16.msra.mxu1 %v10043_v10 }
0x1c5c   :  { %10045 = vmatprep.subr.bf16.mxu1 %v10867_v44 }
0x1c5f   :  { %10047 = vmatpush3.bf16.msra.mxu1 %v10046_v15 }
0x1c60   :  { %10048 = vmatprep.subr.bf16.mxu1 %v10867_v44 }
0x1d15   :  { %v6783_v36 = vpop.f32.mrb[46].mxu1 }
0x1d16   :  { %8668 = vmatmul.mubr.f32.vlgmr.msra.gmra.mrb[48].mxu1 %v6783_v36  ;;  %v8634_v50 = vpop.f32.mrb[47].mxu1 }
0x1d17   :  { %10050 = vmatpush3.bf16.msra.mxu1 %v10049_v49  ;;  %8678 = vmatprep.mubr.msk.f32.mxu1 %vm10866_vm9, %v12532_v35 }
0x1d18   :  { %10051 = vmatprep.subr.bf16.mxu1 %v10867_v44 }
0x1d1b   :  { %10053 = vmatpush3.bf16.msra.mxu1 %v10052_v25 }
0x1d1c   :  { %8681 = vmatprep.subr.mxu1 %v12532_v35 }
0x1de9   :  { %v6853_v5 = vpop.f32.mrb[48].mxu1 }
0x1dea   :  { %v6857_v41 = vmul.f32 0.125, %v6853_v5  ;;  %v8669_v20 = vpop.f32.mrb[49].mxu1 }
0x1dec   :  { %8679 = vmatmul.mubr.msk.f32.vlgmr.msra.gmra.mrb[50].mxu1 %vm1516_vm2, %v6857_v41 }
0x1ded   :  { %8683 = vmatprep.mubr.msk.f32.mxu1 %vm10866_vm9, %v12532_v35 }
0x1ebf   :  { %v6927_v53 = vpop.f32.mrb[50].mxu1 }
0x1ec0   :  { %v6934_v38 = vrot.slane %v6927_v53, %v11685_v8  ;;  %v8680_v31 = vpop.f32.mrb[51].mxu1 }
0x1ec2   :  { %v12399_v57 = vsub.f32 %v12355_v11, %v6934_v38  ;;  %v7254_v11 = vld [vmem:[%s12554_s10 + $0x48] sm:$0xff] }
0x1ec4   :  { %v6936_v2 = vmul.f32 %v12399_v57, %v12399_v57 }
0x1ec6   :  { %8682 = vmatpush3.msk.msra.mxu1 %vm6713_vm12, %v6936_v2 }
0x1ec7   :  { %8684 = vmatmul.mubr.msk.f32.vlgmr.msra.gmra.mrb[52].mxu1 %vm6710_vm13, %v12539_v9  ;;  %10054 = vmatprep.subr.bf16.mxu1 %v10867_v44 }
0x1ec8   :  { %10056 = vmatpush3.bf16.msra.mxu1 %v12353_v12  ;;  %8718 = vmatprep.mubr.msk.f32.mxu1 %vm10866_vm9, %v12532_v35  ;;  %v10100_v12 = vpack.c.bf16 %v7252_v6, %v7251_v19 }
0x1ec9   :  { %10057 = vmatprep.subr.bf16.mxu1 %v10867_v44 }
0x1ecc   :  { %10059 = vmatpush3.bf16.msra.mxu1 %v12365_v60  ;;  %v10106_v60 = vpack.c.bf16 %v7256_v16, %v7255_v61 }
0x1ecd   :  { %10060 = vmatprep.subr.bf16.mxu1 %v10867_v44 }
0x1ed0   :  { %10062 = vmatpush3.bf16.msra.mxu1 %v10031_v39  ;;  %v10109_v39 = vpack.c.bf16 %v7258_v52, %v7257_v33 }
0x1ed1   :  { %10063 = vmatprep.subr.bf16.mxu1 %v10867_v44 }
0x1ed4   :  { %10065 = vmatpush3.bf16.msra.mxu1 %v10034_v37  ;;  %v10112_v37 = vpack.c.bf16 %v7260_v30, %v7259_v17 }
0x1ed5   :  { %10066 = vmatprep.subr.bf16.mxu1 %v10867_v44 }
0x1ed8   :  { %10068 = vmatpush3.bf16.msra.mxu1 %v10037_v34 }
0x1ed9   :  { %10069 = vmatprep.subr.bf16.mxu1 %v10867_v44 }
0x1edc   :  { %10071 = vmatpush3.bf16.msra.mxu1 %v10040_v46 }
0x1edd   :  { %10072 = vmatprep.subr.bf16.mxu1 %v10867_v44 }
0x1ee0   :  { %10074 = vmatpush3.bf16.msra.mxu1 %v10043_v10 }
0x1ee1   :  { %10075 = vmatprep.subr.bf16.mxu1 %v10867_v44 }
0x1ee4   :  { %10077 = vmatpush3.bf16.msra.mxu1 %v10046_v15 }
0x1ee5   :  { %10078 = vmatprep.subr.bf16.mxu1 %v10867_v44 }
0x1f9a   :  { %v7006_v9 = vpop.f32.mrb[52].mxu1 }
0x1f9b   :  { %8719 = vmatmul.mubr.f32.vlgmr.msra.gmra.mrb[54].mxu1 %v7006_v9  ;;  %v8685_v43 = vpop.f32.mrb[53].mxu1 }
0x1f9c   :  { %10080 = vmatpush3.bf16.msra.mxu1 %v10049_v49  ;;  %8729 = vmatprep.mubr.msk.f32.mxu1 %vm10866_vm9, %v12532_v35 }
0x1f9d   :  { %10081 = vmatprep.subr.bf16.mxu1 %v10867_v44 }
0x1fa0   :  { %10083 = vmatpush3.bf16.msra.mxu1 %v10052_v25 }
0x1fa1   :  { %10084 = vmatprep.subr.bf16.mxu1 %v10867_v44 }
0x206e   :  { %v7076_v18 = vpop.f32.mrb[54].mxu1 }
0x206f   :  { %v7080_v22 = vmul.f32 0.125, %v7076_v18  ;;  %v8720_v23 = vpop.f32.mrb[55].mxu1 }
0x2071   :  { %v7082_v28 = vadd.f32 1e-05, %v7080_v22 }
0x2073   :  { %10248 = vrsqrt.f32 %v7082_v28 }
0x207d   :  { %v10249_v4 = vpop.eup %10248 }
0x207e   :  { %v7084_v0 = vmul.f32 %v10249_v4, %v7081_v55 }
0x2080   :  { %8730 = vmatmul.mubr.msk.f32.vlgmr.msra.gmra.mrb[56].mxu1 %vm1516_vm2, %v7084_v0 }
0x2081   :  { %10086 = vmatpush3.bf16.msra.mxu1 %v10049_v49  ;;  %8740 = vmatprep.mubr.msk.f32.mxu1 %vm10866_vm9, %v12532_v35 }
0x2082   :  { %10087 = vmatprep.subr.bf16.mxu1 %v10867_v44 }
0x2085   :  { %10089 = vmatpush3.bf16.msra.mxu1 %v10052_v25 }
0x2086   :  { %10090 = vmatprep.subr.bf16.mxu1 %v10867_v44 }
0x2088   :  { %8741 = vmatmul.mubr.msk.f32.vlgmr.msra.gmra.mrb[58].mxu1 %vm1516_vm2, %v7158_v58 }
0x2089   :  { %10092 = vmatpush3.bf16.msra.mxu1 %v10091_v45  ;;  %8775 = vmatprep.mubr.msk.f32.mxu1 %vm10866_vm9, %v12532_v35  ;;  %v7253_v35 = vld [vmem:[%s12554_s10 + $0x40] sm:$0xff] }
0x208a   :  { %10093 = vmatprep.subr.bf16.mxu1 %v10867_v44  ;;  %v10103_v1 = vpack.c.bf16 %v7254_v11, %v7253_v35 }
0x208d   :  { %10095 = vmatpush3.bf16.msra.mxu1 %v10094_v63 }
0x208e   :  { %10096 = vmatprep.subr.bf16.mxu1 %v10867_v44 }
0x2091   :  { %10098 = vmatpush3.bf16.msra.mxu1 %v10097_v32 }
0x2092   :  { %10099 = vmatprep.subr.bf16.mxu1 %v10867_v44 }
0x2095   :  { %10101 = vmatpush3.bf16.msra.mxu1 %v10100_v12 }
0x2096   :  { %10102 = vmatprep.subr.bf16.mxu1 %v10867_v44 }
0x2099   :  { %10104 = vmatpush3.bf16.msra.mxu1 %v10103_v1 }
0x209a   :  { %10105 = vmatprep.subr.bf16.mxu1 %v10867_v44 }
0x209d   :  { %10107 = vmatpush3.bf16.msra.mxu1 %v10106_v60 }
0x209e   :  { %10108 = vmatprep.subr.bf16.mxu1 %v10867_v44 }
0x20a1   :  { %10110 = vmatpush3.bf16.msra.mxu1 %v10109_v39 }
0x20a2   :  { %10111 = vmatprep.subr.bf16.mxu1 %v10867_v44 }
0x20a5   :  { %10113 = vmatpush3.bf16.msra.mxu1 %v10112_v37 }
0x2153   :  { %v7154_v62 = vpop.f32.mrb[56].mxu1 }
0x2154   :  { %v8731_v34 = vpop.f32.mrb[57].mxu1  ;;  %v7235_v3 = vrot.slane %v7154_v62, %v11685_v8 }
0x2156   :  { %v7236_v46 = vmul.f32 %v7235_v3, %v12399_v57 }
0x215b   :  { %v7228_v27 = vpop.f32.mrb[58].mxu1 }
0x215c   :  { %v7240_v13 = vrot.slane %v7228_v27, %v11685_v8  ;;  %v8742_v59 = vpop.f32.mrb[59].mxu1 }
0x215e   :  { %v7241_v10 = vadd.f32 %v7240_v13, %v7236_v46 }
0x2160   :  { %v7243_v26 = vmul.f32 0.01, %v7241_v10  ;;  %vm7242_vm2 = vcmp.gt.f32.partialorder %v7241_v10, 0.0 }
0x2162   :  { %v7244_v44 = vsel %vm7242_vm2, %v7241_v10, %v7243_v26 }
0x2163   :  { %8776 = vmatmul.mubr.f32.vlgmr.msra.gmra.mrb[60].mxu1 %v7244_v44 }
0x2236   :  { %v7334_v15 = vpop.f32.mrb[60].mxu1 }
0x2237   :  { %v7335_v42 = vadd.f32 %v7622_v7, %v7334_v15  ;;  %v8777_v54 = vpop.f32.mrb[61].mxu1 }
0x2239   :  { %v7338_v49 = vmul.f32 0.5, %v7335_v42  ;;  %7356 = vrot.lane.b32.xlu1 %v7335_v42, %s10868_s0  ;;  %7354 = vst.msk [vmem:[#allocation36] sm:$0x3] %vm7352_vm14, %v7335_v42 }
0x223b   :  { %v7339_v36 = vmul.f32 1.442695, %v7338_v49 }
0x223d   :  { %10250 = vpow2.f32 %v7339_v36 }
0x223e   :  { %10725 = shalt.err (!%p10722_p4)
}
0x223f   :  { %s10726_s25 = scalar_lea.hbm %s11025_s13, 32 }
0x2240   :  { %p10727_p5 = scmp.ne.s32.totalorder %s11025_s13, %s10726_s25  ;;  %p10730_p6 = scmp.lt.u32.totalorder %s10726_s25, %s11025_s13 }
0x2242   :  { %p10732_p7 = pnand %p10730_p6, %p10727_p5 }
0x2244   :  { %10735 = shalt.err (!%p10732_p7)
}
0x2245   :  { %7379 = dma.vmem_to_hbm [thread:$0]  %s7377_s15, 32, %s11025_s13, [#allocation37]   ;;  %v7344_v8 = vpop.permute.xlu0 %7343 }
0x2246   :  { %s10870_s6 = smov [#allocation38]  }
0x2247   :  { %v10251_v50 = vpop.eup %10250  ;;  %s7386_s3 = sshll.u32 %s10870_s6, 4  ;;  %s7387_s3 = int_to_ptr.vmem [resolvable:$true] %s7386_s3 }
0x2248   :  { %v7346_v56 = vmul.f32 %v10251_v50, %v7344_v8  ;;  %s10736_s17 = scalar_lea.vmem %s7387_s3, 32  ;;  %p10741_p9 = scmp.lt.s32.totalorder %s7387_s3, %s7387_s3 }
0x2249   :  { %p10737_p8 = scmp.ne.s32.totalorder %s7387_s3, %s10736_s17  ;;  %p10742_p10 = scmp.lt.s32.totalorder %s10736_s17, %s10736_s17 }
0x224a   :  { %7348 = vrot.lane.b32.xlu0 %v7346_v56, %s10868_s0 }
0x224b   :  { %p10743_p11 = por %p10742_p10, %p10741_p9 }
0x224d   :  { %p10744_p12 = pnand %p10743_p11, %p10737_p8 }
0x22ab   :  { %v7357_v48 = vpop.permute.xlu1 %7356 }
0x22ac   :  { %7359 = vst.msk [vmem:[#allocation38] sm:$0x3] %vm7352_vm14, %v7357_v48 }
0x22ad   :  { %10747 = shalt.err (!%p10744_p12)
}
0x22ae   :  { %s10748_s13 = scalar_lea.hbm %s11030_s30, 32 }
0x22af   :  { %p10749_p13 = scmp.ne.s32.totalorder %s11030_s30, %s10748_s13  ;;  %p10752_p0 = scmp.lt.u32.totalorder %s10748_s13, %s11030_s30 }
0x22b1   :  { %p10754_p1 = pnand %p10752_p0, %p10749_p13 }
0x22b3   :  { %10757 = shalt.err (!%p10754_p1)
}
0x22b4   :  { %7389 = dma.vmem_to_hbm [thread:$0]  %s7387_s3, 32, %s11030_s30, [#allocation37]  }
0x22b5   :  { %s10871_s18 = smov [#allocation35]  }
0x22b6   :  { %s7366_s22 = sshll.u32 %s10871_s18, 4  ;;  %s7367_s22 = int_to_ptr.vmem [resolvable:$true] %s7366_s22 }
0x22b7   :  { %s10758_s26 = scalar_lea.vmem %s7367_s22, 32  ;;  %p10763_p3 = scmp.lt.s32.totalorder %s7367_s22, %s7367_s22 }
0x22b8   :  { %p10759_p2 = scmp.ne.s32.totalorder %s7367_s22, %s10758_s26  ;;  %p10764_p4 = scmp.lt.s32.totalorder %s10758_s26, %s10758_s26 }
0x22ba   :  { %p10765_p5 = por %p10764_p4, %p10763_p3 }
0x22bc   :  { %v7349_v25 = vpop.permute.xlu0 %7348  ;;  %p10766_p6 = pnand %p10765_p5, %p10759_p2 }
0x22bd   :  { %v7351_v5 = vadd.f32 %v7349_v25, %v7335_v42 }
0x22bf   :  { %7353 = vst.msk [vmem:[#allocation35] sm:$0x3] %vm7352_vm14, %v7351_v5 }
0x22c0   :  { %10769 = shalt.err (!%p10766_p6)
}
0x22c1   :  { %s10770_s20 = scalar_lea.hbm %s11020_s4, 32 }
0x22c2   :  { %p10771_p7 = scmp.ne.s32.totalorder %s11020_s4, %s10770_s20  ;;  %p10774_p8 = scmp.lt.u32.totalorder %s10770_s20, %s11020_s4 }
0x22c4   :  { %p10776_p9 = pnand %p10774_p8, %p10771_p7 }
0x22c6   :  { %10779 = shalt.err (!%p10776_p9)
}
0x22c7   :  { %7369 = dma.vmem_to_hbm [thread:$0]  %s7367_s22, 32, %s11020_s4, [#allocation4]  }
0x22c8   :  { %10802 = dma.done.wait [#allocation4], 32  }
0x22c9   :  { %10803 = vsyncadd [#allocation4], 4294967264 }
0x22ca   :  { %10804 = dma.done.wait [#allocation37], 64  }
0x22cb   :  { %10805 = vsyncadd [#allocation37], 4294967232 }
0x22cc   :  { %7399 = vsyncpa [#allocation3], 1 }
0x22cd   :  { %7400 = vsyncpa [#allocation6], 1 }
0x22ce   :  { %7401 = vsyncpa [#allocation9], 1 }
0x22cf   :  { %7402 = vsyncpa [#allocation12], 1 }
0x22d0   :  { %7403 = vsyncpa [#allocation15], 1 }
0x22d1   :  { %7404 = vsyncpa [#allocation18], 1 }
0x22d2   :  { %7405 = vsyncpa [#allocation21], 1 }
0x22d3   :  { %7406 = vsyncpa [#allocation24], 1 }
0x22d4   :  { %7407 = vsyncpa [#allocation27], 1 }
0x22d5   :  { %7408 = vsyncpa [#allocation30], 1 }
0x22d6   :  { %7409 = vsyncpa [#allocation33], 1 }
0x22d7   :  { %7410 = vsyncpa [#allocation4], 1 }
0x22d8   :  { %7411 = vsyncpa [#allocation37], 1 }

</bundles_post_ra>
